<compile_context>
chip_gen: v6e
topology: v6e:2x2x1
jax: 0.10.0
libtpu: 0.0.40
codegen_flags: <defaults>
</compile_context>

<pallas_src>
import jax
import jax.numpy as jnp
from jax.experimental import pallas as pl
from jax.experimental.pallas import tpu as pltpu


# ----------------------------- static helpers ------------------------------

def _round_up(x, m):
    return ((x + m - 1) // m) * m


def _pick_tm(m):
    if m >= 512:
        return 256
    if m >= 128:
        return 128
    return _round_up(m, 16)          # 16-aligned (bf16 sublane packing)


def _pick_tk(kp):
    best, t = 128, 128
    while t <= min(512, kp):
        if kp % t == 0:
            best = t
        t += 128
    return best


def _ew_rows(mp, cap=512):
    best, d = 16, 16
    while d <= min(mp, cap):
        if mp % d == 0:
            best = d
        d += 16
    return best


def _pad_row(v, np_):
    return jnp.pad(v.astype(jnp.float32), (0, np_ - v.shape[0])).reshape(1, np_)


# ---------------- Pallas kernel 1: MXU matmul + BN-stats epilogue -----------

def _conv_matmul_kernel(a_ref, b_ref, o_ref, sum_ref, ssq_ref, acc_ref):
    @pl.when(pl.program_id(2) == 0)
    def _():
        acc_ref[...] = jnp.zeros_like(acc_ref)

    acc_ref[...] += jnp.dot(a_ref[...], b_ref[...],
                            preferred_element_type=jnp.float32)

    @pl.when(pl.program_id(2) == pl.num_programs(2) - 1)
    def _():
        acc = acc_ref[...]
        o_ref[...] = acc.astype(o_ref.dtype)
        # partial BatchNorm statistics (zero-padded rows contribute exactly 0)
        cs = jnp.sum(acc, axis=0, keepdims=True)
        cq = jnp.sum(acc * acc, axis=0, keepdims=True)
        sum_ref[...] = jnp.broadcast_to(cs, sum_ref.shape)
        ssq_ref[...] = jnp.broadcast_to(cq, ssq_ref.shape)


def conv_matmul_stats(a, b, out_dtype=jnp.bfloat16):
    """(M,K)@(K,N) -> (padded (Mp,Np) product, per-column sum, per-column sum-of-sq)."""
    m, k = a.shape
    k2, n = b.shape
    assert k == k2
    tm = _pick_tm(m)
    mp = _round_up(m, tm)
    np_ = _round_up(n, 128)
    tn = 256 if (np_ >= 256 and np_ % 256 == 0) else 128
    kp = _round_up(k, 128)
    tk = _pick_tk(kp)

    a_p = jnp.pad(a.astype(jnp.bfloat16), ((0, mp - m), (0, kp - k)))
    b_p = jnp.pad(b.astype(jnp.bfloat16), ((0, kp - k), (0, np_ - n)))

    n_i, n_j, n_k = mp // tm, np_ // tn, kp // tk
    o_pad, sums, ssqs = pl.pallas_call(
        _conv_matmul_kernel,
        out_shape=(jax.ShapeDtypeStruct((mp, np_), out_dtype),
                   jax.ShapeDtypeStruct((8 * n_i, np_), jnp.float32),
                   jax.ShapeDtypeStruct((8 * n_i, np_), jnp.float32)),
        grid_spec=pltpu.PrefetchScalarGridSpec(
            num_scalar_prefetch=0,
            grid=(n_i, n_j, n_k),
            in_specs=[pl.BlockSpec((tm, tk), lambda i, j, kk: (i, kk)),
                      pl.BlockSpec((tk, tn), lambda i, j, kk: (kk, j))],
            out_specs=(pl.BlockSpec((tm, tn), lambda i, j, kk: (i, j)),
                       pl.BlockSpec((8, tn), lambda i, j, kk: (i, j)),
                       pl.BlockSpec((8, tn), lambda i, j, kk: (i, j))),
            scratch_shapes=[pltpu.VMEM((tm, tn), jnp.float32)]),
        compiler_params=pltpu.CompilerParams(
            dimension_semantics=("parallel", "parallel", "arbitrary")),
    )(a_p, b_p)
    col_sum = sums[0::8].sum(axis=0)
    col_ssq = ssqs[0::8].sum(axis=0)
    return o_pad, col_sum, col_ssq


# --------- Pallas kernels 2/3: fused BN-affine (+residual) + ReLU -----------

def _bn_relu_kernel(z_ref, s_ref, t_ref, o_ref):
    y = z_ref[...].astype(jnp.float32) * s_ref[...] + t_ref[...]
    o_ref[...] = jnp.maximum(y, 0.0).astype(o_ref.dtype)


def _bn_add_relu_kernel(z_ref, s_ref, t_ref, r_ref, sr_ref, tr_ref, o_ref):
    main = jnp.maximum(
        z_ref[...].astype(jnp.float32) * s_ref[...] + t_ref[...], 0.0)
    ident = r_ref[...].astype(jnp.float32) * sr_ref[...] + tr_ref[...]
    o_ref[...] = jnp.maximum(main + ident, 0.0).astype(o_ref.dtype)


def bn_relu(z_pad, scale, shift, out_dtype=jnp.bfloat16):
    mp, np_ = z_pad.shape
    bm = _ew_rows(mp)
    return pl.pallas_call(
        _bn_relu_kernel,
        out_shape=jax.ShapeDtypeStruct((mp, np_), out_dtype),
        grid=(mp // bm,),
        in_specs=[pl.BlockSpec((bm, np_), lambda i: (i, 0)),
                  pl.BlockSpec((1, np_), lambda i: (0, 0)),
                  pl.BlockSpec((1, np_), lambda i: (0, 0))],
        out_specs=pl.BlockSpec((bm, np_), lambda i: (i, 0)),
        compiler_params=pltpu.CompilerParams(dimension_semantics=("parallel",)),
    )(z_pad, _pad_row(scale, np_), _pad_row(shift, np_))


def bn_add_relu(z_pad, scale, shift, r_pad, scale_r, shift_r,
                out_dtype=jnp.bfloat16):
    assert z_pad.shape == r_pad.shape
    mp, np_ = z_pad.shape
    bm = _ew_rows(mp)
    return pl.pallas_call(
        _bn_add_relu_kernel,
        out_shape=jax.ShapeDtypeStruct((mp, np_), out_dtype),
        grid=(mp // bm,),
        in_specs=[pl.BlockSpec((bm, np_), lambda i: (i, 0)),
                  pl.BlockSpec((1, np_), lambda i: (0, 0)),
                  pl.BlockSpec((1, np_), lambda i: (0, 0)),
                  pl.BlockSpec((bm, np_), lambda i: (i, 0)),
                  pl.BlockSpec((1, np_), lambda i: (0, 0)),
                  pl.BlockSpec((1, np_), lambda i: (0, 0))],
        out_specs=pl.BlockSpec((bm, np_), lambda i: (i, 0)),
        compiler_params=pltpu.CompilerParams(dimension_semantics=("parallel",)),
    )(z_pad, _pad_row(scale, np_), _pad_row(shift, np_),
      r_pad, _pad_row(scale_r, np_), _pad_row(shift_r, np_))


# ------------------------------- glue (JAX) ---------------------------------

def im2col(x, kh, kw, stride, pad):
    """NHWC (bf16) -> (N*OH*OW, kh*kw*C); column order (ki, kj, c)."""
    n, h, w, c = x.shape
    if pad:
        x = jnp.pad(x, ((0, 0), (pad, pad), (pad, pad), (0, 0)))
    hp, wp = h + 2 * pad, w + 2 * pad
    oh = (hp - kh) // stride + 1
    ow = (wp - kw) // stride + 1
    if kh == 1 and kw == 1:
        patches = x[:, ::stride, ::stride, :][:, :oh, :ow, :]
    else:
        cols = [x[:, i:i + stride * oh:stride, j:j + stride * ow:stride, :]
                for i in range(kh) for j in range(kw)]
        patches = jnp.concatenate(cols, axis=-1)
    # TODO(synk): replace materialized im2col with implicit im2col inside the matmul
    # kernel (strided BlockSpec windows over NHWC) to avoid the 9x patch materialization.
    return patches.reshape(n * oh * ow, kh * kw * c), n, oh, ow


def conv_bn_stats(x, w, bn_g, bn_be, stride, pad, eps=1e-5):
    """Conv (bias omitted: exactly cancelled by batch-stat BN) + BN batch statistics.
    Returns (padded conv output, per-channel scale, per-channel shift, NHWC shape)."""
    cout, cin, kh, kw = w.shape
    patches, n, oh, ow = im2col(x, kh, kw, stride, pad)
    wmat = jnp.transpose(w, (2, 3, 1, 0)).reshape(kh * kw * cin, cout)
    z_pad, col_sum, col_ssq = conv_matmul_stats(patches, wmat)
    m = n * oh * ow
    mean = col_sum[:cout] / m
    var = jnp.maximum(col_ssq[:cout] / m - mean * mean, 0.0)  # biased, as PyTorch BN
    scale = bn_g * jax.lax.rsqrt(var + eps)
    shift = bn_be - mean * scale
    return z_pad, scale, shift, (n, oh, ow, cout)


def to_nhwc(y_pad, shape_nhwc):
    n, oh, ow, c = shape_nhwc
    return y_pad[:n * oh * ow, :c].reshape(n, oh, ow, c)


def maxpool(x, k=3, s=2):
    # tiny strided-max; left in XLA (negligible vs conv traffic)
    n, h, w, c = x.shape
    oh = (h - k) // s + 1
    ow = (w - k) // s + 1
    out = None
    for i in range(k):
        for j in range(k):
            patch = x[:, i:i + s * oh:s, j:j + s * ow:s, :][:, :oh, :ow, :]
            out = patch if out is None else jnp.maximum(out, patch)
    return out


def resblock(x, p, stride):
    # conv1 -> BN1 -> ReLU (BN affine + ReLU fused into one elementwise pass)
    z1, s1, t1, shp1 = conv_bn_stats(x, p['conv1']['w'],
                                     p['bn1']['g'], p['bn1']['be'], stride, 1)
    out1 = to_nhwc(bn_relu(z1, s1, t1), shp1)
    # conv2 -> BN2 ; downsample conv -> BNd (always taken, see note at top)
    z2, s2, t2, shp2 = conv_bn_stats(out1, p['conv2']['w'],
                                     p['bn2']['g'], p['bn2']['be'], 1, 1)
    zd, sd, td, shpd = conv_bn_stats(x, p['convd']['w'],
                                     p['bnd']['g'], p['bnd']['be'], stride, 0)
    assert shp2 == shpd and z2.shape == zd.shape
    # relu(BN2(conv2)) + BNd(convd)  -> relu, all fused into one pass
    y = bn_add_relu(z2, s2, t2, zd, sd, td)
    return to_nhwc(y, shp2)


BLOCK_CFG = ([(64, 64, 1)] * 3 +
             [(64, 128, 2)] + [(128, 128, 1)] * 3 +
             [(128, 256, 2)] + [(256, 256, 1)] * 5 +
             [(256, 512, 2)] + [(512, 512, 1)] * 2)


def forward(params, x_nchw):
    # NCHW -> NHWC; activations in bf16 between layers (fp32 MXU accumulation,
    # fp32 BN statistics / affine parameters).
    x = jnp.transpose(x_nchw, (0, 2, 3, 1)).astype(jnp.bfloat16)
    # stem: Conv2d(3, 64, 7, stride=2, padding=0) -> BN -> ReLU -> MaxPool(3, 2)
    z, s, t, shp = conv_bn_stats(x, params['stem_conv']['w'],
                                 params['stem_bn']['g'], params['stem_bn']['be'],
                                 stride=2, pad=0)
    x = to_nhwc(bn_relu(z, s, t), shp)
    x = maxpool(x, 3, 2)
    for p, (_, _, stride) in zip(params['blocks'], BLOCK_CFG):
        x = resblock(x, p, stride)
    x = x.astype(jnp.float32).mean(axis=(1, 2))   # AdaptiveAvgPool2d((1,1)) + Flatten
    # FC head: tiny matmuls -> plain XLA dots (per perf review).
    x = jnp.dot(x, params['fc']['w'].T) + params['fc']['b']
    x = jnp.dot(x, params['fc2']['w'].T) + params['fc2']['b']
    return jax.nn.sigmoid(x)


# ------------------------------ parameters ---------------------------------

def init_params(key):
    keys = iter(jax.random.split(key, 256))

    def nrm(shape, scale):
        return scale * jax.random.normal(next(keys), shape, dtype=jnp.float32)

    def conv_p(cin, cout, k):
        # conv biases are kept for parity with the torch module but are a no-op
        # for conv layers followed by batch-statistics BatchNorm (exact cancellation).
        return {'w': nrm((cout, cin, k, k), 0.05), 'b': nrm((cout,), 0.01)}

    def bn_p(c):
        return {'g': 1.0 + nrm((c,), 0.1), 'be': nrm((c,), 0.1)}

    params = {
        'stem_conv': conv_p(3, 64, 7),
        'stem_bn': bn_p(64),
        'blocks': [],
        'fc': {'w': nrm((64, 512), 0.05), 'b': nrm((64,), 0.01)},
        'fc2': {'w': nrm((2, 64), 0.05), 'b': nrm((2,), 0.01)},
    }
    for cin, cout, _ in BLOCK_CFG:
        params['blocks'].append({
            'conv1': conv_p(cin, cout, 3), 'bn1': bn_p(cout),
            'conv2': conv_p(cout, cout, 3), 'bn2': bn_p(cout),
            'convd': conv_p(cin, cout, 1), 'bnd': bn_p(cout),
        })
    return params


# --------------------------------- main -------------------------------------

if __name__ == "__main__":
    key = jax.random.PRNGKey(0)
    pkey, xkey = jax.random.split(key)
    params = init_params(pkey)
    x = jax.random.normal(xkey, (2, 3, 16, 16), dtype=jnp.float32)  # NCHW

    fwd = jax.jit(forward)
    out = fwd(params, x)
    out = jax.block_until_ready(out)

    assert out.shape == (2, 2), out.shape
    assert bool(jnp.all(jnp.isfinite(out)))
    assert bool(jnp.all((out >= 0.0) & (out <= 1.0)))  # post-sigmoid
    print("KERNEL_OK")
</pallas_src>

<mosaic_0001>
module attributes {stable_mosaic.version = 11 : i64} {
  func.func @_conv_matmul_kernel(%arg0: i32, %arg1: i32, %arg2: i32, %arg3: memref<64x256xbf16, #tpu.memory_space<vmem>>, %arg4: memref<256x128xbf16, #tpu.memory_space<vmem>>, %arg5: memref<64x128xbf16, #tpu.memory_space<vmem>>, %arg6: memref<8x128xf32, #tpu.memory_space<vmem>>, %arg7: memref<8x128xf32, #tpu.memory_space<vmem>>, %arg8: memref<64x128xf32, #tpu.memory_space<vmem>>) attributes {dimension_semantics = [#tpu.dimension_semantics<parallel>, #tpu.dimension_semantics<parallel>, #tpu.dimension_semantics<arbitrary>], iteration_bounds = array<i64: 1, 1, 1>, scalar_prefetch = 0 : i64, scratch_operands = 1 : i64, tpu.core_type = #tpu.core_type<tc>, window_params = [{transform_indices = @transform_0, window_bounds = array<i64: 64, 256>}, {transform_indices = @transform_1, window_bounds = array<i64: 256, 128>}, {transform_indices = @transform_2, window_bounds = array<i64: 64, 128>}, {transform_indices = @transform_3, window_bounds = array<i64: 8, 128>}, {transform_indices = @transform_4, window_bounds = array<i64: 8, 128>}]} {
    %c0_i32 = arith.constant 0 : i32
    %0 = arith.cmpi eq, %arg2, %c0_i32 : i32
    %1 = arith.extui %0 : i1 to i32
    %c0_i32_0 = arith.constant 0 : i32
    %2 = arith.cmpi ne, %1, %c0_i32_0 : i32
    scf.if %2 {
      %cst_10 = arith.constant 0.000000e+00 : f32
      %12 = vector.broadcast %cst_10 : f32 to vector<64x128xf32>
      %c0_11 = arith.constant 0 : index
      %c0_12 = arith.constant 0 : index
      %13 = vector.load %arg8[%c0_11, %c0_12] : memref<64x128xf32, #tpu.memory_space<vmem>>, vector<64x128xf32>
      tpu.vector_store %arg8[%c0_11, %c0_12], %12 {strides = array<i32>} : memref<64x128xf32, #tpu.memory_space<vmem>>, vector<64x128xf32>,
    } else {
    }
    %c0 = arith.constant 0 : index
    %c0_1 = arith.constant 0 : index
    %3 = vector.load %arg8[%c0, %c0_1] : memref<64x128xf32, #tpu.memory_space<vmem>>, vector<64x128xf32>
    %c0_2 = arith.constant 0 : index
    %c0_3 = arith.constant 0 : index
    %4 = vector.load %arg3[%c0_2, %c0_3] : memref<64x256xbf16, #tpu.memory_space<vmem>>, vector<64x256xbf16>
    %c0_4 = arith.constant 0 : index
    %c0_5 = arith.constant 0 : index
    %5 = vector.load %arg4[%c0_4, %c0_5] : memref<256x128xbf16, #tpu.memory_space<vmem>>, vector<256x128xbf16>
    %cst = arith.constant dense<0.000000e+00> : vector<64x128xf32>
    %6 = tpu.matmul %4, %5, %cst {dimension_numbers = #tpu.dot_dimension_numbers<[1], [0], [0], [1], [0, 0, 1, 1], [], []>} : vector<64x256xbf16>, vector<256x128xbf16>, vector<64x128xf32> -> vector<64x128xf32>
    %7 = arith.addf %3, %6 : vector<64x128xf32>
    %c0_6 = arith.constant 0 : index
    %c0_7 = arith.constant 0 : index
    %8 = vector.load %arg8[%c0_6, %c0_7] : memref<64x128xf32, #tpu.memory_space<vmem>>, vector<64x128xf32>
    tpu.vector_store %arg8[%c0_6, %c0_7], %7 {strides = array<i32>} : memref<64x128xf32, #tpu.memory_space<vmem>>, vector<64x128xf32>,
    %c0_i32_8 = arith.constant 0 : i32
    %9 = arith.cmpi eq, %arg2, %c0_i32_8 : i32
    %10 = arith.extui %9 : i1 to i32
    %c0_i32_9 = arith.constant 0 : i32
    %11 = arith.cmpi ne, %10, %c0_i32_9 : i32
    scf.if %11 {
      %c0_10 = arith.constant 0 : index
      %c0_11 = arith.constant 0 : index
      %12 = vector.load %arg8[%c0_10, %c0_11] : memref<64x128xf32, #tpu.memory_space<vmem>>, vector<64x128xf32>
      %13 = arith.truncf %12 : vector<64x128xf32> to vector<64x128xbf16>
      %c0_12 = arith.constant 0 : index
      %c0_13 = arith.constant 0 : index
      %14 = vector.load %arg5[%c0_12, %c0_13] : memref<64x128xbf16, #tpu.memory_space<vmem>>, vector<64x128xbf16>
      tpu.vector_store %arg5[%c0_12, %c0_13], %13 {strides = array<i32>} : memref<64x128xbf16, #tpu.memory_space<vmem>>, vector<64x128xbf16>,
      %cst_14 = arith.constant dense<0.000000e+00> : vector<128xf32>
      %15 = vector.multi_reduction <add>, %12, %cst_14 [0] : vector<64x128xf32> to vector<128xf32>
      %16 = vector.shape_cast %15 : vector<128xf32> to vector<1x128xf32>
      %17 = arith.mulf %12, %12 : vector<64x128xf32>
      %cst_15 = arith.constant dense<0.000000e+00> : vector<128xf32>
      %18 = vector.multi_reduction <add>, %17, %cst_15 [0] : vector<64x128xf32> to vector<128xf32>
      %19 = vector.shape_cast %18 : vector<128xf32> to vector<1x128xf32>
      %20 = vector.shape_cast %16 : vector<1x128xf32> to vector<1x128xf32>
      %21 = vector.broadcast %20 : vector<1x128xf32> to vector<8x128xf32>
      %c0_16 = arith.constant 0 : index
      %c0_17 = arith.constant 0 : index
      %22 = vector.load %arg6[%c0_16, %c0_17] : memref<8x128xf32, #tpu.memory_space<vmem>>, vector<8x128xf32>
      tpu.vector_store %arg6[%c0_16, %c0_17], %21 {strides = array<i32>} : memref<8x128xf32, #tpu.memory_space<vmem>>, vector<8x128xf32>,
      %23 = vector.shape_cast %19 : vector<1x128xf32> to vector<1x128xf32>
      %24 = vector.broadcast %23 : vector<1x128xf32> to vector<8x128xf32>
      %c0_18 = arith.constant 0 : index
      %c0_19 = arith.constant 0 : index
      %25 = vector.load %arg7[%c0_18, %c0_19] : memref<8x128xf32, #tpu.memory_space<vmem>>, vector<8x128xf32>
      tpu.vector_store %arg7[%c0_18, %c0_19], %24 {strides = array<i32>} : memref<8x128xf32, #tpu.memory_space<vmem>>, vector<8x128xf32>,
    } else {
    }
    return
  }
  func.func @transform_0(%arg0: i32, %arg1: i32, %arg2: i32) -> (i32, i32) {
    %c0_i32 = arith.constant 0 : i32
    return %arg0, %arg2 : i32, i32
  }
  func.func @transform_1(%arg0: i32, %arg1: i32, %arg2: i32) -> (i32, i32) {
    %c0_i32 = arith.constant 0 : i32
    return %arg2, %arg1 : i32, i32
  }
  func.func @transform_2(%arg0: i32, %arg1: i32, %arg2: i32) -> (i32, i32) {
    %c0_i32 = arith.constant 0 : i32
    return %arg0, %arg1 : i32, i32
  }
  func.func @transform_3(%arg0: i32, %arg1: i32, %arg2: i32) -> (i32, i32) {
    %c0_i32 = arith.constant 0 : i32
    return %arg0, %arg1 : i32, i32
  }
  func.func @transform_4(%arg0: i32, %arg1: i32, %arg2: i32) -> (i32, i32) {
    %c0_i32 = arith.constant 0 : i32
    return %arg0, %arg1 : i32, i32
  }
}

module attributes {stable_mosaic.version = 11 : i64} {
  func.func @_bn_relu_kernel(%arg0: i32, %arg1: memref<64x128xbf16, #tpu.memory_space<vmem>>, %arg2: memref<1x128xf32, #tpu.memory_space<vmem>>, %arg3: memref<1x128xf32, #tpu.memory_space<vmem>>, %arg4: memref<64x128xbf16, #tpu.memory_space<vmem>>) attributes {dimension_semantics = [#tpu.dimension_semantics<parallel>], iteration_bounds = array<i64: 1>, scalar_prefetch = 0 : i64, scratch_operands = 0 : i64, tpu.core_type = #tpu.core_type<tc>, window_params = [{transform_indices = @transform_0, window_bounds = array<i64: 64, 128>}, {pipeline_mode = #tpu.pipeline_mode<synchronous>, transform_indices = @transform_1, window_bounds = array<i64: 1, 128>}, {pipeline_mode = #tpu.pipeline_mode<synchronous>, transform_indices = @transform_2, window_bounds = array<i64: 1, 128>}, {transform_indices = @transform_3, window_bounds = array<i64: 64, 128>}]} {
    %c0 = arith.constant 0 : index
    %c0_0 = arith.constant 0 : index
    %0 = vector.load %arg1[%c0, %c0_0] : memref<64x128xbf16, #tpu.memory_space<vmem>>, vector<64x128xbf16>
    %1 = arith.extf %0 : vector<64x128xbf16> to vector<64x128xf32>
    %c0_1 = arith.constant 0 : index
    %c0_2 = arith.constant 0 : index
    %2 = vector.load %arg2[%c0_1, %c0_2] : memref<1x128xf32, #tpu.memory_space<vmem>>, vector<1x128xf32>
    %3 = vector.broadcast %2 : vector<1x128xf32> to vector<64x128xf32>
    %4 = arith.mulf %1, %3 : vector<64x128xf32>
    %c0_3 = arith.constant 0 : index
    %c0_4 = arith.constant 0 : index
    %5 = vector.load %arg3[%c0_3, %c0_4] : memref<1x128xf32, #tpu.memory_space<vmem>>, vector<1x128xf32>
    %6 = vector.broadcast %5 : vector<1x128xf32> to vector<64x128xf32>
    %7 = arith.addf %4, %6 : vector<64x128xf32>
    %cst = arith.constant 0.000000e+00 : f32
    %8 = vector.broadcast %cst : f32 to vector<64x128xf32>
    %9 = arith.maximumf %7, %8 : vector<64x128xf32>
    %10 = arith.truncf %9 : vector<64x128xf32> to vector<64x128xbf16>
    %c0_5 = arith.constant 0 : index
    %c0_6 = arith.constant 0 : index
    %11 = vector.load %arg4[%c0_5, %c0_6] : memref<64x128xbf16, #tpu.memory_space<vmem>>, vector<64x128xbf16>
    tpu.vector_store %arg4[%c0_5, %c0_6], %10 {strides = array<i32>} : memref<64x128xbf16, #tpu.memory_space<vmem>>, vector<64x128xbf16>,
    return
  }
  func.func @transform_0(%arg0: i32) -> (i32, i32) {
    %c0_i32 = arith.constant 0 : i32
    %c0_i32_0 = arith.constant 0 : i32
    return %arg0, %c0_i32 : i32, i32
  }
  func.func @transform_1(%arg0: i32) -> (i32, i32) {
    %c0_i32 = arith.constant 0 : i32
    %c0_i32_0 = arith.constant 0 : i32
    %c0_i32_1 = arith.constant 0 : i32
    return %c0_i32, %c0_i32_0 : i32, i32
  }
  func.func @transform_2(%arg0: i32) -> (i32, i32) {
    %c0_i32 = arith.constant 0 : i32
    %c0_i32_0 = arith.constant 0 : i32
    %c0_i32_1 = arith.constant 0 : i32
    return %c0_i32, %c0_i32_0 : i32, i32
  }
  func.func @transform_3(%arg0: i32) -> (i32, i32) {
    %c0_i32 = arith.constant 0 : i32
    %c0_i32_0 = arith.constant 0 : i32
    return %arg0, %c0_i32 : i32, i32
  }
}

module attributes {stable_mosaic.version = 11 : i64} {
  func.func @_conv_matmul_kernel(%arg0: i32, %arg1: i32, %arg2: i32, %arg3: memref<16x128xbf16, #tpu.memory_space<vmem>>, %arg4: memref<128x128xbf16, #tpu.memory_space<vmem>>, %arg5: memref<16x128xbf16, #tpu.memory_space<vmem>>, %arg6: memref<8x128xf32, #tpu.memory_space<vmem>>, %arg7: memref<8x128xf32, #tpu.memory_space<vmem>>, %arg8: memref<16x128xf32, #tpu.memory_space<vmem>>) attributes {dimension_semantics = [#tpu.dimension_semantics<parallel>, #tpu.dimension_semantics<parallel>, #tpu.dimension_semantics<arbitrary>], iteration_bounds = array<i64: 1, 1, 1>, scalar_prefetch = 0 : i64, scratch_operands = 1 : i64, tpu.core_type = #tpu.core_type<tc>, window_params = [{transform_indices = @transform_0, window_bounds = array<i64: 16, 128>}, {transform_indices = @transform_1, window_bounds = array<i64: 128, 128>}, {transform_indices = @transform_2, window_bounds = array<i64: 16, 128>}, {transform_indices = @transform_3, window_bounds = array<i64: 8, 128>}, {transform_indices = @transform_4, window_bounds = array<i64: 8, 128>}]} {
    %c0_i32 = arith.constant 0 : i32
    %0 = arith.cmpi eq, %arg2, %c0_i32 : i32
    %1 = arith.extui %0 : i1 to i32
    %c0_i32_0 = arith.constant 0 : i32
    %2 = arith.cmpi ne, %1, %c0_i32_0 : i32
    scf.if %2 {
      %cst_10 = arith.constant 0.000000e+00 : f32
      %12 = vector.broadcast %cst_10 : f32 to vector<16x128xf32>
      %c0_11 = arith.constant 0 : index
      %c0_12 = arith.constant 0 : index
      %13 = vector.load %arg8[%c0_11, %c0_12] : memref<16x128xf32, #tpu.memory_space<vmem>>, vector<16x128xf32>
      tpu.vector_store %arg8[%c0_11, %c0_12], %12 {strides = array<i32>} : memref<16x128xf32, #tpu.memory_space<vmem>>, vector<16x128xf32>,
    } else {
    }
    %c0 = arith.constant 0 : index
    %c0_1 = arith.constant 0 : index
    %3 = vector.load %arg8[%c0, %c0_1] : memref<16x128xf32, #tpu.memory_space<vmem>>, vector<16x128xf32>
    %c0_2 = arith.constant 0 : index
    %c0_3 = arith.constant 0 : index
    %4 = vector.load %arg3[%c0_2, %c0_3] : memref<16x128xbf16, #tpu.memory_space<vmem>>, vector<16x128xbf16>
    %c0_4 = arith.constant 0 : index
    %c0_5 = arith.constant 0 : index
    %5 = vector.load %arg4[%c0_4, %c0_5] : memref<128x128xbf16, #tpu.memory_space<vmem>>, vector<128x128xbf16>
    %cst = arith.constant dense<0.000000e+00> : vector<16x128xf32>
    %6 = tpu.matmul %4, %5, %cst {dimension_numbers = #tpu.dot_dimension_numbers<[1], [0], [0], [1], [0, 0, 1, 1], [], []>} : vector<16x128xbf16>, vector<128x128xbf16>, vector<16x128xf32> -> vector<16x128xf32>
    %7 = arith.addf %3, %6 : vector<16x128xf32>
    %c0_6 = arith.constant 0 : index
    %c0_7 = arith.constant 0 : index
    %8 = vector.load %arg8[%c0_6, %c0_7] : memref<16x128xf32, #tpu.memory_space<vmem>>, vector<16x128xf32>
    tpu.vector_store %arg8[%c0_6, %c0_7], %7 {strides = array<i32>} : memref<16x128xf32, #tpu.memory_space<vmem>>, vector<16x128xf32>,
    %c0_i32_8 = arith.constant 0 : i32
    %9 = arith.cmpi eq, %arg2, %c0_i32_8 : i32
    %10 = arith.extui %9 : i1 to i32
    %c0_i32_9 = arith.constant 0 : i32
    %11 = arith.cmpi ne, %10, %c0_i32_9 : i32
    scf.if %11 {
      %c0_10 = arith.constant 0 : index
      %c0_11 = arith.constant 0 : index
      %12 = vector.load %arg8[%c0_10, %c0_11] : memref<16x128xf32, #tpu.memory_space<vmem>>, vector<16x128xf32>
      %13 = arith.truncf %12 : vector<16x128xf32> to vector<16x128xbf16>
      %c0_12 = arith.constant 0 : index
      %c0_13 = arith.constant 0 : index
      %14 = vector.load %arg5[%c0_12, %c0_13] : memref<16x128xbf16, #tpu.memory_space<vmem>>, vector<16x128xbf16>
      tpu.vector_store %arg5[%c0_12, %c0_13], %13 {strides = array<i32>} : memref<16x128xbf16, #tpu.memory_space<vmem>>, vector<16x128xbf16>,
      %cst_14 = arith.constant dense<0.000000e+00> : vector<128xf32>
      %15 = vector.multi_reduction <add>, %12, %cst_14 [0] : vector<16x128xf32> to vector<128xf32>
      %16 = vector.shape_cast %15 : vector<128xf32> to vector<1x128xf32>
      %17 = arith.mulf %12, %12 : vector<16x128xf32>
      %cst_15 = arith.constant dense<0.000000e+00> : vector<128xf32>
      %18 = vector.multi_reduction <add>, %17, %cst_15 [0] : vector<16x128xf32> to vector<128xf32>
      %19 = vector.shape_cast %18 : vector<128xf32> to vector<1x128xf32>
      %20 = vector.shape_cast %16 : vector<1x128xf32> to vector<1x128xf32>
      %21 = vector.broadcast %20 : vector<1x128xf32> to vector<8x128xf32>
      %c0_16 = arith.constant 0 : index
      %c0_17 = arith.constant 0 : index
      %22 = vector.load %arg6[%c0_16, %c0_17] : memref<8x128xf32, #tpu.memory_space<vmem>>, vector<8x128xf32>
      tpu.vector_store %arg6[%c0_16, %c0_17], %21 {strides = array<i32>} : memref<8x128xf32, #tpu.memory_space<vmem>>, vector<8x128xf32>,
      %23 = vector.shape_cast %19 : vector<1x128xf32> to vector<1x128xf32>
      %24 = vector.broadcast %23 : vector<1x128xf32> to vector<8x128xf32>
      %c0_18 = arith.constant 0 : index
      %c0_19 = arith.constant 0 : index
      %25 = vector.load %arg7[%c0_18, %c0_19] : memref<8x128xf32, #tpu.memory_space<vmem>>, vector<8x128xf32>
      tpu.vector_store %arg7[%c0_18, %c0_19], %24 {strides = array<i32>} : memref<8x128xf32, #tpu.memory_space<vmem>>, vector<8x128xf32>,
    } else {
    }
    return
  }
  func.func @transform_0(%arg0: i32, %arg1: i32, %arg2: i32) -> (i32, i32) {
    %c0_i32 = arith.constant 0 : i32
    return %arg0, %arg2 : i32, i32
  }
  func.func @transform_1(%arg0: i32, %arg1: i32, %arg2: i32) -> (i32, i32) {
    %c0_i32 = arith.constant 0 : i32
    return %arg2, %arg1 : i32, i32
  }
  func.func @transform_2(%arg0: i32, %arg1: i32, %arg2: i32) -> (i32, i32) {
    %c0_i32 = arith.constant 0 : i32
    return %arg0, %arg1 : i32, i32
  }
  func.func @transform_3(%arg0: i32, %arg1: i32, %arg2: i32) -> (i32, i32) {
    %c0_i32 = arith.constant 0 : i32
    return %arg0, %arg1 : i32, i32
  }
  func.func @transform_4(%arg0: i32, %arg1: i32, %arg2: i32) -> (i32, i32) {
    %c0_i32 = arith.constant 0 : i32
    return %arg0, %arg1 : i32, i32
  }
}

module attributes {stable_mosaic.version = 11 : i64} {
  func.func @_conv_matmul_kernel(%arg0: i32, %arg1: i32, %arg2: i32, %arg3: memref<16x128xbf16, #tpu.memory_space<vmem>>, %arg4: memref<128x128xbf16, #tpu.memory_space<vmem>>, %arg5: memref<16x128xbf16, #tpu.memory_space<vmem>>, %arg6: memref<8x128xf32, #tpu.memory_space<vmem>>, %arg7: memref<8x128xf32, #tpu.memory_space<vmem>>, %arg8: memref<16x128xf32, #tpu.memory_space<vmem>>) attributes {dimension_semantics = [#tpu.dimension_semantics<parallel>, #tpu.dimension_semantics<parallel>, #tpu.dimension_semantics<arbitrary>], iteration_bounds = array<i64: 1, 1, 5>, scalar_prefetch = 0 : i64, scratch_operands = 1 : i64, tpu.core_type = #tpu.core_type<tc>, window_params = [{transform_indices = @transform_0, window_bounds = array<i64: 16, 128>}, {transform_indices = @transform_1, window_bounds = array<i64: 128, 128>}, {transform_indices = @transform_2, window_bounds = array<i64: 16, 128>}, {transform_indices = @transform_3, window_bounds = array<i64: 8, 128>}, {transform_indices = @transform_4, window_bounds = array<i64: 8, 128>}]} {
    %c0_i32 = arith.constant 0 : i32
    %0 = arith.cmpi eq, %arg2, %c0_i32 : i32
    %1 = arith.extui %0 : i1 to i32
    %c0_i32_0 = arith.constant 0 : i32
    %2 = arith.cmpi ne, %1, %c0_i32_0 : i32
    scf.if %2 {
      %cst_9 = arith.constant 0.000000e+00 : f32
      %12 = vector.broadcast %cst_9 : f32 to vector<16x128xf32>
      %c0_10 = arith.constant 0 : index
      %c0_11 = arith.constant 0 : index
      %13 = vector.load %arg8[%c0_10, %c0_11] : memref<16x128xf32, #tpu.memory_space<vmem>>, vector<16x128xf32>
      tpu.vector_store %arg8[%c0_10, %c0_11], %12 {strides = array<i32>} : memref<16x128xf32, #tpu.memory_space<vmem>>, vector<16x128xf32>,
    } else {
    }
    %c0 = arith.constant 0 : index
    %c0_1 = arith.constant 0 : index
    %3 = vector.load %arg8[%c0, %c0_1] : memref<16x128xf32, #tpu.memory_space<vmem>>, vector<16x128xf32>
    %c0_2 = arith.constant 0 : index
    %c0_3 = arith.constant 0 : index
    %4 = vector.load %arg3[%c0_2, %c0_3] : memref<16x128xbf16, #tpu.memory_space<vmem>>, vector<16x128xbf16>
    %c0_4 = arith.constant 0 : index
    %c0_5 = arith.constant 0 : index
    %5 = vector.load %arg4[%c0_4, %c0_5] : memref<128x128xbf16, #tpu.memory_space<vmem>>, vector<128x128xbf16>
    %cst = arith.constant dense<0.000000e+00> : vector<16x128xf32>
    %6 = tpu.matmul %4, %5, %cst {dimension_numbers = #tpu.dot_dimension_numbers<[1], [0], [0], [1], [0, 0, 1, 1], [], []>} : vector<16x128xbf16>, vector<128x128xbf16>, vector<16x128xf32> -> vector<16x128xf32>
    %7 = arith.addf %3, %6 : vector<16x128xf32>
    %c0_6 = arith.constant 0 : index
    %c0_7 = arith.constant 0 : index
    %8 = vector.load %arg8[%c0_6, %c0_7] : memref<16x128xf32, #tpu.memory_space<vmem>>, vector<16x128xf32>
    tpu.vector_store %arg8[%c0_6, %c0_7], %7 {strides = array<i32>} : memref<16x128xf32, #tpu.memory_space<vmem>>, vector<16x128xf32>,
    %c4_i32 = arith.constant 4 : i32
    %9 = arith.cmpi eq, %arg2, %c4_i32 : i32
    %10 = arith.extui %9 : i1 to i32
    %c0_i32_8 = arith.constant 0 : i32
    %11 = arith.cmpi ne, %10, %c0_i32_8 : i32
    scf.if %11 {
      %c0_9 = arith.constant 0 : index
      %c0_10 = arith.constant 0 : index
      %12 = vector.load %arg8[%c0_9, %c0_10] : memref<16x128xf32, #tpu.memory_space<vmem>>, vector<16x128xf32>
      %13 = arith.truncf %12 : vector<16x128xf32> to vector<16x128xbf16>
      %c0_11 = arith.constant 0 : index
      %c0_12 = arith.constant 0 : index
      %14 = vector.load %arg5[%c0_11, %c0_12] : memref<16x128xbf16, #tpu.memory_space<vmem>>, vector<16x128xbf16>
      tpu.vector_store %arg5[%c0_11, %c0_12], %13 {strides = array<i32>} : memref<16x128xbf16, #tpu.memory_space<vmem>>, vector<16x128xbf16>,
      %cst_13 = arith.constant dense<0.000000e+00> : vector<128xf32>
      %15 = vector.multi_reduction <add>, %12, %cst_13 [0] : vector<16x128xf32> to vector<128xf32>
      %16 = vector.shape_cast %15 : vector<128xf32> to vector<1x128xf32>
      %17 = arith.mulf %12, %12 : vector<16x128xf32>
      %cst_14 = arith.constant dense<0.000000e+00> : vector<128xf32>
      %18 = vector.multi_reduction <add>, %17, %cst_14 [0] : vector<16x128xf32> to vector<128xf32>
      %19 = vector.shape_cast %18 : vector<128xf32> to vector<1x128xf32>
      %20 = vector.shape_cast %16 : vector<1x128xf32> to vector<1x128xf32>
      %21 = vector.broadcast %20 : vector<1x128xf32> to vector<8x128xf32>
      %c0_15 = arith.constant 0 : index
      %c0_16 = arith.constant 0 : index
      %22 = vector.load %arg6[%c0_15, %c0_16] : memref<8x128xf32, #tpu.memory_space<vmem>>, vector<8x128xf32>
      tpu.vector_store %arg6[%c0_15, %c0_16], %21 {strides = array<i32>} : memref<8x128xf32, #tpu.memory_space<vmem>>, vector<8x128xf32>,
      %23 = vector.shape_cast %19 : vector<1x128xf32> to vector<1x128xf32>
      %24 = vector.broadcast %23 : vector<1x128xf32> to vector<8x128xf32>
      %c0_17 = arith.constant 0 : index
      %c0_18 = arith.constant 0 : index
      %25 = vector.load %arg7[%c0_17, %c0_18] : memref<8x128xf32, #tpu.memory_space<vmem>>, vector<8x128xf32>
      tpu.vector_store %arg7[%c0_17, %c0_18], %24 {strides = array<i32>} : memref<8x128xf32, #tpu.memory_space<vmem>>, vector<8x128xf32>,
    } else {
    }
    return
  }
  func.func @transform_0(%arg0: i32, %arg1: i32, %arg2: i32) -> (i32, i32) {
    %c0_i32 = arith.constant 0 : i32
    return %arg0, %arg2 : i32, i32
  }
  func.func @transform_1(%arg0: i32, %arg1: i32, %arg2: i32) -> (i32, i32) {
    %c0_i32 = arith.constant 0 : i32
    return %arg2, %arg1 : i32, i32
  }
  func.func @transform_2(%arg0: i32, %arg1: i32, %arg2: i32) -> (i32, i32) {
    %c0_i32 = arith.constant 0 : i32
    return %arg0, %arg1 : i32, i32
  }
  func.func @transform_3(%arg0: i32, %arg1: i32, %arg2: i32) -> (i32, i32) {
    %c0_i32 = arith.constant 0 : i32
    return %arg0, %arg1 : i32, i32
  }
  func.func @transform_4(%arg0: i32, %arg1: i32, %arg2: i32) -> (i32, i32) {
    %c0_i32 = arith.constant 0 : i32
    return %arg0, %arg1 : i32, i32
  }
}

module attributes {stable_mosaic.version = 11 : i64} {
  func.func @_bn_relu_kernel(%arg0: i32, %arg1: memref<16x128xbf16, #tpu.memory_space<vmem>>, %arg2: memref<1x128xf32, #tpu.memory_space<vmem>>, %arg3: memref<1x128xf32, #tpu.memory_space<vmem>>, %arg4: memref<16x128xbf16, #tpu.memory_space<vmem>>) attributes {dimension_semantics = [#tpu.dimension_semantics<parallel>], iteration_bounds = array<i64: 1>, scalar_prefetch = 0 : i64, scratch_operands = 0 : i64, tpu.core_type = #tpu.core_type<tc>, window_params = [{transform_indices = @transform_0, window_bounds = array<i64: 16, 128>}, {pipeline_mode = #tpu.pipeline_mode<synchronous>, transform_indices = @transform_1, window_bounds = array<i64: 1, 128>}, {pipeline_mode = #tpu.pipeline_mode<synchronous>, transform_indices = @transform_2, window_bounds = array<i64: 1, 128>}, {transform_indices = @transform_3, window_bounds = array<i64: 16, 128>}]} {
    %c0 = arith.constant 0 : index
    %c0_0 = arith.constant 0 : index
    %0 = vector.load %arg1[%c0, %c0_0] : memref<16x128xbf16, #tpu.memory_space<vmem>>, vector<16x128xbf16>
    %1 = arith.extf %0 : vector<16x128xbf16> to vector<16x128xf32>
    %c0_1 = arith.constant 0 : index
    %c0_2 = arith.constant 0 : index
    %2 = vector.load %arg2[%c0_1, %c0_2] : memref<1x128xf32, #tpu.memory_space<vmem>>, vector<1x128xf32>
    %3 = vector.broadcast %2 : vector<1x128xf32> to vector<16x128xf32>
    %4 = arith.mulf %1, %3 : vector<16x128xf32>
    %c0_3 = arith.constant 0 : index
    %c0_4 = arith.constant 0 : index
    %5 = vector.load %arg3[%c0_3, %c0_4] : memref<1x128xf32, #tpu.memory_space<vmem>>, vector<1x128xf32>
    %6 = vector.broadcast %5 : vector<1x128xf32> to vector<16x128xf32>
    %7 = arith.addf %4, %6 : vector<16x128xf32>
    %cst = arith.constant 0.000000e+00 : f32
    %8 = vector.broadcast %cst : f32 to vector<16x128xf32>
    %9 = arith.maximumf %7, %8 : vector<16x128xf32>
    %10 = arith.truncf %9 : vector<16x128xf32> to vector<16x128xbf16>
    %c0_5 = arith.constant 0 : index
    %c0_6 = arith.constant 0 : index
    %11 = vector.load %arg4[%c0_5, %c0_6] : memref<16x128xbf16, #tpu.memory_space<vmem>>, vector<16x128xbf16>
    tpu.vector_store %arg4[%c0_5, %c0_6], %10 {strides = array<i32>} : memref<16x128xbf16, #tpu.memory_space<vmem>>, vector<16x128xbf16>,
    return
  }
  func.func @transform_0(%arg0: i32) -> (i32, i32) {
    %c0_i32 = arith.constant 0 : i32
    %c0_i32_0 = arith.constant 0 : i32
    return %arg0, %c0_i32 : i32, i32
  }
  func.func @transform_1(%arg0: i32) -> (i32, i32) {
    %c0_i32 = arith.constant 0 : i32
    %c0_i32_0 = arith.constant 0 : i32
    %c0_i32_1 = arith.constant 0 : i32
    return %c0_i32, %c0_i32_0 : i32, i32
  }
  func.func @transform_2(%arg0: i32) -> (i32, i32) {
    %c0_i32 = arith.constant 0 : i32
    %c0_i32_0 = arith.constant 0 : i32
    %c0_i32_1 = arith.constant 0 : i32
    return %c0_i32, %c0_i32_0 : i32, i32
  }
  func.func @transform_3(%arg0: i32) -> (i32, i32) {
    %c0_i32 = arith.constant 0 : i32
    %c0_i32_0 = arith.constant 0 : i32
    return %arg0, %c0_i32 : i32, i32
  }
}

module attributes {stable_mosaic.version = 11 : i64} {
  func.func @_bn_add_relu_kernel(%arg0: i32, %arg1: memref<16x128xbf16, #tpu.memory_space<vmem>>, %arg2: memref<1x128xf32, #tpu.memory_space<vmem>>, %arg3: memref<1x128xf32, #tpu.memory_space<vmem>>, %arg4: memref<16x128xbf16, #tpu.memory_space<vmem>>, %arg5: memref<1x128xf32, #tpu.memory_space<vmem>>, %arg6: memref<1x128xf32, #tpu.memory_space<vmem>>, %arg7: memref<16x128xbf16, #tpu.memory_space<vmem>>) attributes {dimension_semantics = [#tpu.dimension_semantics<parallel>], iteration_bounds = array<i64: 1>, scalar_prefetch = 0 : i64, scratch_operands = 0 : i64, tpu.core_type = #tpu.core_type<tc>, window_params = [{transform_indices = @transform_0, window_bounds = array<i64: 16, 128>}, {pipeline_mode = #tpu.pipeline_mode<synchronous>, transform_indices = @transform_1, window_bounds = array<i64: 1, 128>}, {pipeline_mode = #tpu.pipeline_mode<synchronous>, transform_indices = @transform_2, window_bounds = array<i64: 1, 128>}, {transform_indices = @transform_3, window_bounds = array<i64: 16, 128>}, {pipeline_mode = #tpu.pipeline_mode<synchronous>, transform_indices = @transform_4, window_bounds = array<i64: 1, 128>}, {pipeline_mode = #tpu.pipeline_mode<synchronous>, transform_indices = @transform_5, window_bounds = array<i64: 1, 128>}, {transform_indices = @transform_6, window_bounds = array<i64: 16, 128>}]} {
    %c0 = arith.constant 0 : index
    %c0_0 = arith.constant 0 : index
    %0 = vector.load %arg1[%c0, %c0_0] : memref<16x128xbf16, #tpu.memory_space<vmem>>, vector<16x128xbf16>
    %1 = arith.extf %0 : vector<16x128xbf16> to vector<16x128xf32>
    %c0_1 = arith.constant 0 : index
    %c0_2 = arith.constant 0 : index
    %2 = vector.load %arg2[%c0_1, %c0_2] : memref<1x128xf32, #tpu.memory_space<vmem>>, vector<1x128xf32>
    %3 = vector.broadcast %2 : vector<1x128xf32> to vector<16x128xf32>
    %4 = arith.mulf %1, %3 : vector<16x128xf32>
    %c0_3 = arith.constant 0 : index
    %c0_4 = arith.constant 0 : index
    %5 = vector.load %arg3[%c0_3, %c0_4] : memref<1x128xf32, #tpu.memory_space<vmem>>, vector<1x128xf32>
    %6 = vector.broadcast %5 : vector<1x128xf32> to vector<16x128xf32>
    %7 = arith.addf %4, %6 : vector<16x128xf32>
    %cst = arith.constant 0.000000e+00 : f32
    %8 = vector.broadcast %cst : f32 to vector<16x128xf32>
    %9 = arith.maximumf %7, %8 : vector<16x128xf32>
    %c0_5 = arith.constant 0 : index
    %c0_6 = arith.constant 0 : index
    %10 = vector.load %arg4[%c0_5, %c0_6] : memref<16x128xbf16, #tpu.memory_space<vmem>>, vector<16x128xbf16>
    %11 = arith.extf %10 : vector<16x128xbf16> to vector<16x128xf32>
    %c0_7 = arith.constant 0 : index
    %c0_8 = arith.constant 0 : index
    %12 = vector.load %arg5[%c0_7, %c0_8] : memref<1x128xf32, #tpu.memory_space<vmem>>, vector<1x128xf32>
    %13 = vector.broadcast %12 : vector<1x128xf32> to vector<16x128xf32>
    %14 = arith.mulf %11, %13 : vector<16x128xf32>
    %c0_9 = arith.constant 0 : index
    %c0_10 = arith.constant 0 : index
    %15 = vector.load %arg6[%c0_9, %c0_10] : memref<1x128xf32, #tpu.memory_space<vmem>>, vector<1x128xf32>
    %16 = vector.broadcast %15 : vector<1x128xf32> to vector<16x128xf32>
    %17 = arith.addf %14, %16 : vector<16x128xf32>
    %18 = arith.addf %9, %17 : vector<16x128xf32>
    %cst_11 = arith.constant 0.000000e+00 : f32
    %19 = vector.broadcast %cst_11 : f32 to vector<16x128xf32>
    %20 = arith.maximumf %18, %19 : vector<16x128xf32>
    %21 = arith.truncf %20 : vector<16x128xf32> to vector<16x128xbf16>
    %c0_12 = arith.constant 0 : index
    %c0_13 = arith.constant 0 : index
    %22 = vector.load %arg7[%c0_12, %c0_13] : memref<16x128xbf16, #tpu.memory_space<vmem>>, vector<16x128xbf16>
    tpu.vector_store %arg7[%c0_12, %c0_13], %21 {strides = array<i32>} : memref<16x128xbf16, #tpu.memory_space<vmem>>, vector<16x128xbf16>,
    return
  }
  func.func @transform_0(%arg0: i32) -> (i32, i32) {
    %c0_i32 = arith.constant 0 : i32
    %c0_i32_0 = arith.constant 0 : i32
    return %arg0, %c0_i32 : i32, i32
  }
  func.func @transform_1(%arg0: i32) -> (i32, i32) {
    %c0_i32 = arith.constant 0 : i32
    %c0_i32_0 = arith.constant 0 : i32
    %c0_i32_1 = arith.constant 0 : i32
    return %c0_i32, %c0_i32_0 : i32, i32
  }
  func.func @transform_2(%arg0: i32) -> (i32, i32) {
    %c0_i32 = arith.constant 0 : i32
    %c0_i32_0 = arith.constant 0 : i32
    %c0_i32_1 = arith.constant 0 : i32
    return %c0_i32, %c0_i32_0 : i32, i32
  }
  func.func @transform_3(%arg0: i32) -> (i32, i32) {
    %c0_i32 = arith.constant 0 : i32
    %c0_i32_0 = arith.constant 0 : i32
    return %arg0, %c0_i32 : i32, i32
  }
  func.func @transform_4(%arg0: i32) -> (i32, i32) {
    %c0_i32 = arith.constant 0 : i32
    %c0_i32_0 = arith.constant 0 : i32
    %c0_i32_1 = arith.constant 0 : i32
    return %c0_i32, %c0_i32_0 : i32, i32
  }
  func.func @transform_5(%arg0: i32) -> (i32, i32) {
    %c0_i32 = arith.constant 0 : i32
    %c0_i32_0 = arith.constant 0 : i32
    %c0_i32_1 = arith.constant 0 : i32
    return %c0_i32, %c0_i32_0 : i32, i32
  }
  func.func @transform_6(%arg0: i32) -> (i32, i32) {
    %c0_i32 = arith.constant 0 : i32
    %c0_i32_0 = arith.constant 0 : i32
    return %arg0, %c0_i32 : i32, i32
  }
}

module attributes {stable_mosaic.version = 11 : i64} {
  func.func @_conv_matmul_kernel(%arg0: i32, %arg1: i32, %arg2: i32, %arg3: memref<16x384xbf16, #tpu.memory_space<vmem>>, %arg4: memref<384x128xbf16, #tpu.memory_space<vmem>>, %arg5: memref<16x128xbf16, #tpu.memory_space<vmem>>, %arg6: memref<8x128xf32, #tpu.memory_space<vmem>>, %arg7: memref<8x128xf32, #tpu.memory_space<vmem>>, %arg8: memref<16x128xf32, #tpu.memory_space<vmem>>) attributes {dimension_semantics = [#tpu.dimension_semantics<parallel>, #tpu.dimension_semantics<parallel>, #tpu.dimension_semantics<arbitrary>], iteration_bounds = array<i64: 1, 1, 3>, scalar_prefetch = 0 : i64, scratch_operands = 1 : i64, tpu.core_type = #tpu.core_type<tc>, window_params = [{transform_indices = @transform_0, window_bounds = array<i64: 16, 384>}, {transform_indices = @transform_1, window_bounds = array<i64: 384, 128>}, {transform_indices = @transform_2, window_bounds = array<i64: 16, 128>}, {transform_indices = @transform_3, window_bounds = array<i64: 8, 128>}, {transform_indices = @transform_4, window_bounds = array<i64: 8, 128>}]} {
    %c0_i32 = arith.constant 0 : i32
    %0 = arith.cmpi eq, %arg2, %c0_i32 : i32
    %1 = arith.extui %0 : i1 to i32
    %c0_i32_0 = arith.constant 0 : i32
    %2 = arith.cmpi ne, %1, %c0_i32_0 : i32
    scf.if %2 {
      %cst_9 = arith.constant 0.000000e+00 : f32
      %12 = vector.broadcast %cst_9 : f32 to vector<16x128xf32>
      %c0_10 = arith.constant 0 : index
      %c0_11 = arith.constant 0 : index
      %13 = vector.load %arg8[%c0_10, %c0_11] : memref<16x128xf32, #tpu.memory_space<vmem>>, vector<16x128xf32>
      tpu.vector_store %arg8[%c0_10, %c0_11], %12 {strides = array<i32>} : memref<16x128xf32, #tpu.memory_space<vmem>>, vector<16x128xf32>,
    } else {
    }
    %c0 = arith.constant 0 : index
    %c0_1 = arith.constant 0 : index
    %3 = vector.load %arg8[%c0, %c0_1] : memref<16x128xf32, #tpu.memory_space<vmem>>, vector<16x128xf32>
    %c0_2 = arith.constant 0 : index
    %c0_3 = arith.constant 0 : index
    %4 = vector.load %arg3[%c0_2, %c0_3] : memref<16x384xbf16, #tpu.memory_space<vmem>>, vector<16x384xbf16>
    %c0_4 = arith.constant 0 : index
    %c0_5 = arith.constant 0 : index
    %5 = vector.load %arg4[%c0_4, %c0_5] : memref<384x128xbf16, #tpu.memory_space<vmem>>, vector<384x128xbf16>
    %cst = arith.constant dense<0.000000e+00> : vector<16x128xf32>
    %6 = tpu.matmul %4, %5, %cst {dimension_numbers = #tpu.dot_dimension_numbers<[1], [0], [0], [1], [0, 0, 1, 1], [], []>} : vector<16x384xbf16>, vector<384x128xbf16>, vector<16x128xf32> -> vector<16x128xf32>
    %7 = arith.addf %3, %6 : vector<16x128xf32>
    %c0_6 = arith.constant 0 : index
    %c0_7 = arith.constant 0 : index
    %8 = vector.load %arg8[%c0_6, %c0_7] : memref<16x128xf32, #tpu.memory_space<vmem>>, vector<16x128xf32>
    tpu.vector_store %arg8[%c0_6, %c0_7], %7 {strides = array<i32>} : memref<16x128xf32, #tpu.memory_space<vmem>>, vector<16x128xf32>,
    %c2_i32 = arith.constant 2 : i32
    %9 = arith.cmpi eq, %arg2, %c2_i32 : i32
    %10 = arith.extui %9 : i1 to i32
    %c0_i32_8 = arith.constant 0 : i32
    %11 = arith.cmpi ne, %10, %c0_i32_8 : i32
    scf.if %11 {
      %c0_9 = arith.constant 0 : index
      %c0_10 = arith.constant 0 : index
      %12 = vector.load %arg8[%c0_9, %c0_10] : memref<16x128xf32, #tpu.memory_space<vmem>>, vector<16x128xf32>
      %13 = arith.truncf %12 : vector<16x128xf32> to vector<16x128xbf16>
      %c0_11 = arith.constant 0 : index
      %c0_12 = arith.constant 0 : index
      %14 = vector.load %arg5[%c0_11, %c0_12] : memref<16x128xbf16, #tpu.memory_space<vmem>>, vector<16x128xbf16>
      tpu.vector_store %arg5[%c0_11, %c0_12], %13 {strides = array<i32>} : memref<16x128xbf16, #tpu.memory_space<vmem>>, vector<16x128xbf16>,
      %cst_13 = arith.constant dense<0.000000e+00> : vector<128xf32>
      %15 = vector.multi_reduction <add>, %12, %cst_13 [0] : vector<16x128xf32> to vector<128xf32>
      %16 = vector.shape_cast %15 : vector<128xf32> to vector<1x128xf32>
      %17 = arith.mulf %12, %12 : vector<16x128xf32>
      %cst_14 = arith.constant dense<0.000000e+00> : vector<128xf32>
      %18 = vector.multi_reduction <add>, %17, %cst_14 [0] : vector<16x128xf32> to vector<128xf32>
      %19 = vector.shape_cast %18 : vector<128xf32> to vector<1x128xf32>
      %20 = vector.shape_cast %16 : vector<1x128xf32> to vector<1x128xf32>
      %21 = vector.broadcast %20 : vector<1x128xf32> to vector<8x128xf32>
      %c0_15 = arith.constant 0 : index
      %c0_16 = arith.constant 0 : index
      %22 = vector.load %arg6[%c0_15, %c0_16] : memref<8x128xf32, #tpu.memory_space<vmem>>, vector<8x128xf32>
      tpu.vector_store %arg6[%c0_15, %c0_16], %21 {strides = array<i32>} : memref<8x128xf32, #tpu.memory_space<vmem>>, vector<8x128xf32>,
      %23 = vector.shape_cast %19 : vector<1x128xf32> to vector<1x128xf32>
      %24 = vector.broadcast %23 : vector<1x128xf32> to vector<8x128xf32>
      %c0_17 = arith.constant 0 : index
      %c0_18 = arith.constant 0 : index
      %25 = vector.load %arg7[%c0_17, %c0_18] : memref<8x128xf32, #tpu.memory_space<vmem>>, vector<8x128xf32>
      tpu.vector_store %arg7[%c0_17, %c0_18], %24 {strides = array<i32>} : memref<8x128xf32, #tpu.memory_space<vmem>>, vector<8x128xf32>,
    } else {
    }
    return
  }
  func.func @transform_0(%arg0: i32, %arg1: i32, %arg2: i32) -> (i32, i32) {
    %c0_i32 = arith.constant 0 : i32
    return %arg0, %arg2 : i32, i32
  }
  func.func @transform_1(%arg0: i32, %arg1: i32, %arg2: i32) -> (i32, i32) {
    %c0_i32 = arith.constant 0 : i32
    return %arg2, %arg1 : i32, i32
  }
  func.func @transform_2(%arg0: i32, %arg1: i32, %arg2: i32) -> (i32, i32) {
    %c0_i32 = arith.constant 0 : i32
    return %arg0, %arg1 : i32, i32
  }
  func.func @transform_3(%arg0: i32, %arg1: i32, %arg2: i32) -> (i32, i32) {
    %c0_i32 = arith.constant 0 : i32
    return %arg0, %arg1 : i32, i32
  }
  func.func @transform_4(%arg0: i32, %arg1: i32, %arg2: i32) -> (i32, i32) {
    %c0_i32 = arith.constant 0 : i32
    return %arg0, %arg1 : i32, i32
  }
}

module attributes {stable_mosaic.version = 11 : i64} {
  func.func @_conv_matmul_kernel(%arg0: i32, %arg1: i32, %arg2: i32, %arg3: memref<16x128xbf16, #tpu.memory_space<vmem>>, %arg4: memref<128x256xbf16, #tpu.memory_space<vmem>>, %arg5: memref<16x256xbf16, #tpu.memory_space<vmem>>, %arg6: memref<8x256xf32, #tpu.memory_space<vmem>>, %arg7: memref<8x256xf32, #tpu.memory_space<vmem>>, %arg8: memref<16x256xf32, #tpu.memory_space<vmem>>) attributes {dimension_semantics = [#tpu.dimension_semantics<parallel>, #tpu.dimension_semantics<parallel>, #tpu.dimension_semantics<arbitrary>], iteration_bounds = array<i64: 1, 1, 1>, scalar_prefetch = 0 : i64, scratch_operands = 1 : i64, tpu.core_type = #tpu.core_type<tc>, window_params = [{transform_indices = @transform_0, window_bounds = array<i64: 16, 128>}, {transform_indices = @transform_1, window_bounds = array<i64: 128, 256>}, {transform_indices = @transform_2, window_bounds = array<i64: 16, 256>}, {transform_indices = @transform_3, window_bounds = array<i64: 8, 256>}, {transform_indices = @transform_4, window_bounds = array<i64: 8, 256>}]} {
    %c0_i32 = arith.constant 0 : i32
    %0 = arith.cmpi eq, %arg2, %c0_i32 : i32
    %1 = arith.extui %0 : i1 to i32
    %c0_i32_0 = arith.constant 0 : i32
    %2 = arith.cmpi ne, %1, %c0_i32_0 : i32
    scf.if %2 {
      %cst_10 = arith.constant 0.000000e+00 : f32
      %12 = vector.broadcast %cst_10 : f32 to vector<16x256xf32>
      %c0_11 = arith.constant 0 : index
      %c0_12 = arith.constant 0 : index
      %13 = vector.load %arg8[%c0_11, %c0_12] : memref<16x256xf32, #tpu.memory_space<vmem>>, vector<16x256xf32>
      tpu.vector_store %arg8[%c0_11, %c0_12], %12 {strides = array<i32>} : memref<16x256xf32, #tpu.memory_space<vmem>>, vector<16x256xf32>,
    } else {
    }
    %c0 = arith.constant 0 : index
    %c0_1 = arith.constant 0 : index
    %3 = vector.load %arg8[%c0, %c0_1] : memref<16x256xf32, #tpu.memory_space<vmem>>, vector<16x256xf32>
    %c0_2 = arith.constant 0 : index
    %c0_3 = arith.constant 0 : index
    %4 = vector.load %arg3[%c0_2, %c0_3] : memref<16x128xbf16, #tpu.memory_space<vmem>>, vector<16x128xbf16>
    %c0_4 = arith.constant 0 : index
    %c0_5 = arith.constant 0 : index
    %5 = vector.load %arg4[%c0_4, %c0_5] : memref<128x256xbf16, #tpu.memory_space<vmem>>, vector<128x256xbf16>
    %cst = arith.constant dense<0.000000e+00> : vector<16x256xf32>
    %6 = tpu.matmul %4, %5, %cst {dimension_numbers = #tpu.dot_dimension_numbers<[1], [0], [0], [1], [0, 0, 1, 1], [], []>} : vector<16x128xbf16>, vector<128x256xbf16>, vector<16x256xf32> -> vector<16x256xf32>
    %7 = arith.addf %3, %6 : vector<16x256xf32>
    %c0_6 = arith.constant 0 : index
    %c0_7 = arith.constant 0 : index
    %8 = vector.load %arg8[%c0_6, %c0_7] : memref<16x256xf32, #tpu.memory_space<vmem>>, vector<16x256xf32>
    tpu.vector_store %arg8[%c0_6, %c0_7], %7 {strides = array<i32>} : memref<16x256xf32, #tpu.memory_space<vmem>>, vector<16x256xf32>,
    %c0_i32_8 = arith.constant 0 : i32
    %9 = arith.cmpi eq, %arg2, %c0_i32_8 : i32
    %10 = arith.extui %9 : i1 to i32
    %c0_i32_9 = arith.constant 0 : i32
    %11 = arith.cmpi ne, %10, %c0_i32_9 : i32
    scf.if %11 {
      %c0_10 = arith.constant 0 : index
      %c0_11 = arith.constant 0 : index
      %12 = vector.load %arg8[%c0_10, %c0_11] : memref<16x256xf32, #tpu.memory_space<vmem>>, vector<16x256xf32>
      %13 = arith.truncf %12 : vector<16x256xf32> to vector<16x256xbf16>
      %c0_12 = arith.constant 0 : index
      %c0_13 = arith.constant 0 : index
      %14 = vector.load %arg5[%c0_12, %c0_13] : memref<16x256xbf16, #tpu.memory_space<vmem>>, vector<16x256xbf16>
      tpu.vector_store %arg5[%c0_12, %c0_13], %13 {strides = array<i32>} : memref<16x256xbf16, #tpu.memory_space<vmem>>, vector<16x256xbf16>,
      %cst_14 = arith.constant dense<0.000000e+00> : vector<256xf32>
      %15 = vector.multi_reduction <add>, %12, %cst_14 [0] : vector<16x256xf32> to vector<256xf32>
      %16 = vector.shape_cast %15 : vector<256xf32> to vector<1x256xf32>
      %17 = arith.mulf %12, %12 : vector<16x256xf32>
      %cst_15 = arith.constant dense<0.000000e+00> : vector<256xf32>
      %18 = vector.multi_reduction <add>, %17, %cst_15 [0] : vector<16x256xf32> to vector<256xf32>
      %19 = vector.shape_cast %18 : vector<256xf32> to vector<1x256xf32>
      %20 = vector.shape_cast %16 : vector<1x256xf32> to vector<1x256xf32>
      %21 = vector.broadcast %20 : vector<1x256xf32> to vector<8x256xf32>
      %c0_16 = arith.constant 0 : index
      %c0_17 = arith.constant 0 : index
      %22 = vector.load %arg6[%c0_16, %c0_17] : memref<8x256xf32, #tpu.memory_space<vmem>>, vector<8x256xf32>
      tpu.vector_store %arg6[%c0_16, %c0_17], %21 {strides = array<i32>} : memref<8x256xf32, #tpu.memory_space<vmem>>, vector<8x256xf32>,
      %23 = vector.shape_cast %19 : vector<1x256xf32> to vector<1x256xf32>
      %24 = vector.broadcast %23 : vector<1x256xf32> to vector<8x256xf32>
      %c0_18 = arith.constant 0 : index
      %c0_19 = arith.constant 0 : index
      %25 = vector.load %arg7[%c0_18, %c0_19] : memref<8x256xf32, #tpu.memory_space<vmem>>, vector<8x256xf32>
      tpu.vector_store %arg7[%c0_18, %c0_19], %24 {strides = array<i32>} : memref<8x256xf32, #tpu.memory_space<vmem>>, vector<8x256xf32>,
    } else {
    }
    return
  }
  func.func @transform_0(%arg0: i32, %arg1: i32, %arg2: i32) -> (i32, i32) {
    %c0_i32 = arith.constant 0 : i32
    return %arg0, %arg2 : i32, i32
  }
  func.func @transform_1(%arg0: i32, %arg1: i32, %arg2: i32) -> (i32, i32) {
    %c0_i32 = arith.constant 0 : i32
    return %arg2, %arg1 : i32, i32
  }
  func.func @transform_2(%arg0: i32, %arg1: i32, %arg2: i32) -> (i32, i32) {
    %c0_i32 = arith.constant 0 : i32
    return %arg0, %arg1 : i32, i32
  }
  func.func @transform_3(%arg0: i32, %arg1: i32, %arg2: i32) -> (i32, i32) {
    %c0_i32 = arith.constant 0 : i32
    return %arg0, %arg1 : i32, i32
  }
  func.func @transform_4(%arg0: i32, %arg1: i32, %arg2: i32) -> (i32, i32) {
    %c0_i32 = arith.constant 0 : i32
    return %arg0, %arg1 : i32, i32
  }
}

module attributes {stable_mosaic.version = 11 : i64} {
  func.func @_conv_matmul_kernel(%arg0: i32, %arg1: i32, %arg2: i32, %arg3: memref<16x384xbf16, #tpu.memory_space<vmem>>, %arg4: memref<384x256xbf16, #tpu.memory_space<vmem>>, %arg5: memref<16x256xbf16, #tpu.memory_space<vmem>>, %arg6: memref<8x256xf32, #tpu.memory_space<vmem>>, %arg7: memref<8x256xf32, #tpu.memory_space<vmem>>, %arg8: memref<16x256xf32, #tpu.memory_space<vmem>>) attributes {dimension_semantics = [#tpu.dimension_semantics<parallel>, #tpu.dimension_semantics<parallel>, #tpu.dimension_semantics<arbitrary>], iteration_bounds = array<i64: 1, 1, 3>, scalar_prefetch = 0 : i64, scratch_operands = 1 : i64, tpu.core_type = #tpu.core_type<tc>, window_params = [{transform_indices = @transform_0, window_bounds = array<i64: 16, 384>}, {transform_indices = @transform_1, window_bounds = array<i64: 384, 256>}, {transform_indices = @transform_2, window_bounds = array<i64: 16, 256>}, {transform_indices = @transform_3, window_bounds = array<i64: 8, 256>}, {transform_indices = @transform_4, window_bounds = array<i64: 8, 256>}]} {
    %c0_i32 = arith.constant 0 : i32
    %0 = arith.cmpi eq, %arg2, %c0_i32 : i32
    %1 = arith.extui %0 : i1 to i32
    %c0_i32_0 = arith.constant 0 : i32
    %2 = arith.cmpi ne, %1, %c0_i32_0 : i32
    scf.if %2 {
      %cst_9 = arith.constant 0.000000e+00 : f32
      %12 = vector.broadcast %cst_9 : f32 to vector<16x256xf32>
      %c0_10 = arith.constant 0 : index
      %c0_11 = arith.constant 0 : index
      %13 = vector.load %arg8[%c0_10, %c0_11] : memref<16x256xf32, #tpu.memory_space<vmem>>, vector<16x256xf32>
      tpu.vector_store %arg8[%c0_10, %c0_11], %12 {strides = array<i32>} : memref<16x256xf32, #tpu.memory_space<vmem>>, vector<16x256xf32>,
    } else {
    }
    %c0 = arith.constant 0 : index
    %c0_1 = arith.constant 0 : index
    %3 = vector.load %arg8[%c0, %c0_1] : memref<16x256xf32, #tpu.memory_space<vmem>>, vector<16x256xf32>
    %c0_2 = arith.constant 0 : index
    %c0_3 = arith.constant 0 : index
    %4 = vector.load %arg3[%c0_2, %c0_3] : memref<16x384xbf16, #tpu.memory_space<vmem>>, vector<16x384xbf16>
    %c0_4 = arith.constant 0 : index
    %c0_5 = arith.constant 0 : index
    %5 = vector.load %arg4[%c0_4, %c0_5] : memref<384x256xbf16, #tpu.memory_space<vmem>>, vector<384x256xbf16>
    %cst = arith.constant dense<0.000000e+00> : vector<16x256xf32>
    %6 = tpu.matmul %4, %5, %cst {dimension_numbers = #tpu.dot_dimension_numbers<[1], [0], [0], [1], [0, 0, 1, 1], [], []>} : vector<16x384xbf16>, vector<384x256xbf16>, vector<16x256xf32> -> vector<16x256xf32>
    %7 = arith.addf %3, %6 : vector<16x256xf32>
    %c0_6 = arith.constant 0 : index
    %c0_7 = arith.constant 0 : index
    %8 = vector.load %arg8[%c0_6, %c0_7] : memref<16x256xf32, #tpu.memory_space<vmem>>, vector<16x256xf32>
    tpu.vector_store %arg8[%c0_6, %c0_7], %7 {strides = array<i32>} : memref<16x256xf32, #tpu.memory_space<vmem>>, vector<16x256xf32>,
    %c2_i32 = arith.constant 2 : i32
    %9 = arith.cmpi eq, %arg2, %c2_i32 : i32
    %10 = arith.extui %9 : i1 to i32
    %c0_i32_8 = arith.constant 0 : i32
    %11 = arith.cmpi ne, %10, %c0_i32_8 : i32
    scf.if %11 {
      %c0_9 = arith.constant 0 : index
      %c0_10 = arith.constant 0 : index
      %12 = vector.load %arg8[%c0_9, %c0_10] : memref<16x256xf32, #tpu.memory_space<vmem>>, vector<16x256xf32>
      %13 = arith.truncf %12 : vector<16x256xf32> to vector<16x256xbf16>
      %c0_11 = arith.constant 0 : index
      %c0_12 = arith.constant 0 : index
      %14 = vector.load %arg5[%c0_11, %c0_12] : memref<16x256xbf16, #tpu.memory_space<vmem>>, vector<16x256xbf16>
      tpu.vector_store %arg5[%c0_11, %c0_12], %13 {strides = array<i32>} : memref<16x256xbf16, #tpu.memory_space<vmem>>, vector<16x256xbf16>,
      %cst_13 = arith.constant dense<0.000000e+00> : vector<256xf32>
      %15 = vector.multi_reduction <add>, %12, %cst_13 [0] : vector<16x256xf32> to vector<256xf32>
      %16 = vector.shape_cast %15 : vector<256xf32> to vector<1x256xf32>
      %17 = arith.mulf %12, %12 : vector<16x256xf32>
      %cst_14 = arith.constant dense<0.000000e+00> : vector<256xf32>
      %18 = vector.multi_reduction <add>, %17, %cst_14 [0] : vector<16x256xf32> to vector<256xf32>
      %19 = vector.shape_cast %18 : vector<256xf32> to vector<1x256xf32>
      %20 = vector.shape_cast %16 : vector<1x256xf32> to vector<1x256xf32>
      %21 = vector.broadcast %20 : vector<1x256xf32> to vector<8x256xf32>
      %c0_15 = arith.constant 0 : index
      %c0_16 = arith.constant 0 : index
      %22 = vector.load %arg6[%c0_15, %c0_16] : memref<8x256xf32, #tpu.memory_space<vmem>>, vector<8x256xf32>
      tpu.vector_store %arg6[%c0_15, %c0_16], %21 {strides = array<i32>} : memref<8x256xf32, #tpu.memory_space<vmem>>, vector<8x256xf32>,
      %23 = vector.shape_cast %19 : vector<1x256xf32> to vector<1x256xf32>
      %24 = vector.broadcast %23 : vector<1x256xf32> to vector<8x256xf32>
      %c0_17 = arith.constant 0 : index
      %c0_18 = arith.constant 0 : index
      %25 = vector.load %arg7[%c0_17, %c0_18] : memref<8x256xf32, #tpu.memory_space<vmem>>, vector<8x256xf32>
      tpu.vector_store %arg7[%c0_17, %c0_18], %24 {strides = array<i32>} : memref<8x256xf32, #tpu.memory_space<vmem>>, vector<8x256xf32>,
    } else {
    }
    return
  }
  func.func @transform_0(%arg0: i32, %arg1: i32, %arg2: i32) -> (i32, i32) {
    %c0_i32 = arith.constant 0 : i32
    return %arg0, %arg2 : i32, i32
  }
  func.func @transform_1(%arg0: i32, %arg1: i32, %arg2: i32) -> (i32, i32) {
    %c0_i32 = arith.constant 0 : i32
    return %arg2, %arg1 : i32, i32
  }
  func.func @transform_2(%arg0: i32, %arg1: i32, %arg2: i32) -> (i32, i32) {
    %c0_i32 = arith.constant 0 : i32
    return %arg0, %arg1 : i32, i32
  }
  func.func @transform_3(%arg0: i32, %arg1: i32, %arg2: i32) -> (i32, i32) {
    %c0_i32 = arith.constant 0 : i32
    return %arg0, %arg1 : i32, i32
  }
  func.func @transform_4(%arg0: i32, %arg1: i32, %arg2: i32) -> (i32, i32) {
    %c0_i32 = arith.constant 0 : i32
    return %arg0, %arg1 : i32, i32
  }
}

module attributes {stable_mosaic.version = 11 : i64} {
  func.func @_bn_relu_kernel(%arg0: i32, %arg1: memref<16x256xbf16, #tpu.memory_space<vmem>>, %arg2: memref<1x256xf32, #tpu.memory_space<vmem>>, %arg3: memref<1x256xf32, #tpu.memory_space<vmem>>, %arg4: memref<16x256xbf16, #tpu.memory_space<vmem>>) attributes {dimension_semantics = [#tpu.dimension_semantics<parallel>], iteration_bounds = array<i64: 1>, scalar_prefetch = 0 : i64, scratch_operands = 0 : i64, tpu.core_type = #tpu.core_type<tc>, window_params = [{transform_indices = @transform_0, window_bounds = array<i64: 16, 256>}, {pipeline_mode = #tpu.pipeline_mode<synchronous>, transform_indices = @transform_1, window_bounds = array<i64: 1, 256>}, {pipeline_mode = #tpu.pipeline_mode<synchronous>, transform_indices = @transform_2, window_bounds = array<i64: 1, 256>}, {transform_indices = @transform_3, window_bounds = array<i64: 16, 256>}]} {
    %c0 = arith.constant 0 : index
    %c0_0 = arith.constant 0 : index
    %0 = vector.load %arg1[%c0, %c0_0] : memref<16x256xbf16, #tpu.memory_space<vmem>>, vector<16x256xbf16>
    %1 = arith.extf %0 : vector<16x256xbf16> to vector<16x256xf32>
    %c0_1 = arith.constant 0 : index
    %c0_2 = arith.constant 0 : index
    %2 = vector.load %arg2[%c0_1, %c0_2] : memref<1x256xf32, #tpu.memory_space<vmem>>, vector<1x256xf32>
    %3 = vector.broadcast %2 : vector<1x256xf32> to vector<16x256xf32>
    %4 = arith.mulf %1, %3 : vector<16x256xf32>
    %c0_3 = arith.constant 0 : index
    %c0_4 = arith.constant 0 : index
    %5 = vector.load %arg3[%c0_3, %c0_4] : memref<1x256xf32, #tpu.memory_space<vmem>>, vector<1x256xf32>
    %6 = vector.broadcast %5 : vector<1x256xf32> to vector<16x256xf32>
    %7 = arith.addf %4, %6 : vector<16x256xf32>
    %cst = arith.constant 0.000000e+00 : f32
    %8 = vector.broadcast %cst : f32 to vector<16x256xf32>
    %9 = arith.maximumf %7, %8 : vector<16x256xf32>
    %10 = arith.truncf %9 : vector<16x256xf32> to vector<16x256xbf16>
    %c0_5 = arith.constant 0 : index
    %c0_6 = arith.constant 0 : index
    %11 = vector.load %arg4[%c0_5, %c0_6] : memref<16x256xbf16, #tpu.memory_space<vmem>>, vector<16x256xbf16>
    tpu.vector_store %arg4[%c0_5, %c0_6], %10 {strides = array<i32>} : memref<16x256xbf16, #tpu.memory_space<vmem>>, vector<16x256xbf16>,
    return
  }
  func.func @transform_0(%arg0: i32) -> (i32, i32) {
    %c0_i32 = arith.constant 0 : i32
    %c0_i32_0 = arith.constant 0 : i32
    return %arg0, %c0_i32 : i32, i32
  }
  func.func @transform_1(%arg0: i32) -> (i32, i32) {
    %c0_i32 = arith.constant 0 : i32
    %c0_i32_0 = arith.constant 0 : i32
    %c0_i32_1 = arith.constant 0 : i32
    return %c0_i32, %c0_i32_0 : i32, i32
  }
  func.func @transform_2(%arg0: i32) -> (i32, i32) {
    %c0_i32 = arith.constant 0 : i32
    %c0_i32_0 = arith.constant 0 : i32
    %c0_i32_1 = arith.constant 0 : i32
    return %c0_i32, %c0_i32_0 : i32, i32
  }
  func.func @transform_3(%arg0: i32) -> (i32, i32) {
    %c0_i32 = arith.constant 0 : i32
    %c0_i32_0 = arith.constant 0 : i32
    return %arg0, %c0_i32 : i32, i32
  }
}

module attributes {stable_mosaic.version = 11 : i64} {
  func.func @_conv_matmul_kernel(%arg0: i32, %arg1: i32, %arg2: i32, %arg3: memref<16x384xbf16, #tpu.memory_space<vmem>>, %arg4: memref<384x256xbf16, #tpu.memory_space<vmem>>, %arg5: memref<16x256xbf16, #tpu.memory_space<vmem>>, %arg6: memref<8x256xf32, #tpu.memory_space<vmem>>, %arg7: memref<8x256xf32, #tpu.memory_space<vmem>>, %arg8: memref<16x256xf32, #tpu.memory_space<vmem>>) attributes {dimension_semantics = [#tpu.dimension_semantics<parallel>, #tpu.dimension_semantics<parallel>, #tpu.dimension_semantics<arbitrary>], iteration_bounds = array<i64: 1, 1, 6>, scalar_prefetch = 0 : i64, scratch_operands = 1 : i64, tpu.core_type = #tpu.core_type<tc>, window_params = [{transform_indices = @transform_0, window_bounds = array<i64: 16, 384>}, {transform_indices = @transform_1, window_bounds = array<i64: 384, 256>}, {transform_indices = @transform_2, window_bounds = array<i64: 16, 256>}, {transform_indices = @transform_3, window_bounds = array<i64: 8, 256>}, {transform_indices = @transform_4, window_bounds = array<i64: 8, 256>}]} {
    %c0_i32 = arith.constant 0 : i32
    %0 = arith.cmpi eq, %arg2, %c0_i32 : i32
    %1 = arith.extui %0 : i1 to i32
    %c0_i32_0 = arith.constant 0 : i32
    %2 = arith.cmpi ne, %1, %c0_i32_0 : i32
    scf.if %2 {
      %cst_9 = arith.constant 0.000000e+00 : f32
      %12 = vector.broadcast %cst_9 : f32 to vector<16x256xf32>
      %c0_10 = arith.constant 0 : index
      %c0_11 = arith.constant 0 : index
      %13 = vector.load %arg8[%c0_10, %c0_11] : memref<16x256xf32, #tpu.memory_space<vmem>>, vector<16x256xf32>
      tpu.vector_store %arg8[%c0_10, %c0_11], %12 {strides = array<i32>} : memref<16x256xf32, #tpu.memory_space<vmem>>, vector<16x256xf32>,
    } else {
    }
    %c0 = arith.constant 0 : index
    %c0_1 = arith.constant 0 : index
    %3 = vector.load %arg8[%c0, %c0_1] : memref<16x256xf32, #tpu.memory_space<vmem>>, vector<16x256xf32>
    %c0_2 = arith.constant 0 : index
    %c0_3 = arith.constant 0 : index
    %4 = vector.load %arg3[%c0_2, %c0_3] : memref<16x384xbf16, #tpu.memory_space<vmem>>, vector<16x384xbf16>
    %c0_4 = arith.constant 0 : index
    %c0_5 = arith.constant 0 : index
    %5 = vector.load %arg4[%c0_4, %c0_5] : memref<384x256xbf16, #tpu.memory_space<vmem>>, vector<384x256xbf16>
    %cst = arith.constant dense<0.000000e+00> : vector<16x256xf32>
    %6 = tpu.matmul %4, %5, %cst {dimension_numbers = #tpu.dot_dimension_numbers<[1], [0], [0], [1], [0, 0, 1, 1], [], []>} : vector<16x384xbf16>, vector<384x256xbf16>, vector<16x256xf32> -> vector<16x256xf32>
    %7 = arith.addf %3, %6 : vector<16x256xf32>
    %c0_6 = arith.constant 0 : index
    %c0_7 = arith.constant 0 : index
    %8 = vector.load %arg8[%c0_6, %c0_7] : memref<16x256xf32, #tpu.memory_space<vmem>>, vector<16x256xf32>
    tpu.vector_store %arg8[%c0_6, %c0_7], %7 {strides = array<i32>} : memref<16x256xf32, #tpu.memory_space<vmem>>, vector<16x256xf32>,
    %c5_i32 = arith.constant 5 : i32
    %9 = arith.cmpi eq, %arg2, %c5_i32 : i32
    %10 = arith.extui %9 : i1 to i32
    %c0_i32_8 = arith.constant 0 : i32
    %11 = arith.cmpi ne, %10, %c0_i32_8 : i32
    scf.if %11 {
      %c0_9 = arith.constant 0 : index
      %c0_10 = arith.constant 0 : index
      %12 = vector.load %arg8[%c0_9, %c0_10] : memref<16x256xf32, #tpu.memory_space<vmem>>, vector<16x256xf32>
      %13 = arith.truncf %12 : vector<16x256xf32> to vector<16x256xbf16>
      %c0_11 = arith.constant 0 : index
      %c0_12 = arith.constant 0 : index
      %14 = vector.load %arg5[%c0_11, %c0_12] : memref<16x256xbf16, #tpu.memory_space<vmem>>, vector<16x256xbf16>
      tpu.vector_store %arg5[%c0_11, %c0_12], %13 {strides = array<i32>} : memref<16x256xbf16, #tpu.memory_space<vmem>>, vector<16x256xbf16>,
      %cst_13 = arith.constant dense<0.000000e+00> : vector<256xf32>
      %15 = vector.multi_reduction <add>, %12, %cst_13 [0] : vector<16x256xf32> to vector<256xf32>
      %16 = vector.shape_cast %15 : vector<256xf32> to vector<1x256xf32>
      %17 = arith.mulf %12, %12 : vector<16x256xf32>
      %cst_14 = arith.constant dense<0.000000e+00> : vector<256xf32>
      %18 = vector.multi_reduction <add>, %17, %cst_14 [0] : vector<16x256xf32> to vector<256xf32>
      %19 = vector.shape_cast %18 : vector<256xf32> to vector<1x256xf32>
      %20 = vector.shape_cast %16 : vector<1x256xf32> to vector<1x256xf32>
      %21 = vector.broadcast %20 : vector<1x256xf32> to vector<8x256xf32>
      %c0_15 = arith.constant 0 : index
      %c0_16 = arith.constant 0 : index
      %22 = vector.load %arg6[%c0_15, %c0_16] : memref<8x256xf32, #tpu.memory_space<vmem>>, vector<8x256xf32>
      tpu.vector_store %arg6[%c0_15, %c0_16], %21 {strides = array<i32>} : memref<8x256xf32, #tpu.memory_space<vmem>>, vector<8x256xf32>,
      %23 = vector.shape_cast %19 : vector<1x256xf32> to vector<1x256xf32>
      %24 = vector.broadcast %23 : vector<1x256xf32> to vector<8x256xf32>
      %c0_17 = arith.constant 0 : index
      %c0_18 = arith.constant 0 : index
      %25 = vector.load %arg7[%c0_17, %c0_18] : memref<8x256xf32, #tpu.memory_space<vmem>>, vector<8x256xf32>
      tpu.vector_store %arg7[%c0_17, %c0_18], %24 {strides = array<i32>} : memref<8x256xf32, #tpu.memory_space<vmem>>, vector<8x256xf32>,
    } else {
    }
    return
  }
  func.func @transform_0(%arg0: i32, %arg1: i32, %arg2: i32) -> (i32, i32) {
    %c0_i32 = arith.constant 0 : i32
    return %arg0, %arg2 : i32, i32
  }
  func.func @transform_1(%arg0: i32, %arg1: i32, %arg2: i32) -> (i32, i32) {
    %c0_i32 = arith.constant 0 : i32
    return %arg2, %arg1 : i32, i32
  }
  func.func @transform_2(%arg0: i32, %arg1: i32, %arg2: i32) -> (i32, i32) {
    %c0_i32 = arith.constant 0 : i32
    return %arg0, %arg1 : i32, i32
  }
  func.func @transform_3(%arg0: i32, %arg1: i32, %arg2: i32) -> (i32, i32) {
    %c0_i32 = arith.constant 0 : i32
    return %arg0, %arg1 : i32, i32
  }
  func.func @transform_4(%arg0: i32, %arg1: i32, %arg2: i32) -> (i32, i32) {
    %c0_i32 = arith.constant 0 : i32
    return %arg0, %arg1 : i32, i32
  }
}

module attributes {stable_mosaic.version = 11 : i64} {
  func.func @_bn_add_relu_kernel(%arg0: i32, %arg1: memref<16x256xbf16, #tpu.memory_space<vmem>>, %arg2: memref<1x256xf32, #tpu.memory_space<vmem>>, %arg3: memref<1x256xf32, #tpu.memory_space<vmem>>, %arg4: memref<16x256xbf16, #tpu.memory_space<vmem>>, %arg5: memref<1x256xf32, #tpu.memory_space<vmem>>, %arg6: memref<1x256xf32, #tpu.memory_space<vmem>>, %arg7: memref<16x256xbf16, #tpu.memory_space<vmem>>) attributes {dimension_semantics = [#tpu.dimension_semantics<parallel>], iteration_bounds = array<i64: 1>, scalar_prefetch = 0 : i64, scratch_operands = 0 : i64, tpu.core_type = #tpu.core_type<tc>, window_params = [{transform_indices = @transform_0, window_bounds = array<i64: 16, 256>}, {pipeline_mode = #tpu.pipeline_mode<synchronous>, transform_indices = @transform_1, window_bounds = array<i64: 1, 256>}, {pipeline_mode = #tpu.pipeline_mode<synchronous>, transform_indices = @transform_2, window_bounds = array<i64: 1, 256>}, {transform_indices = @transform_3, window_bounds = array<i64: 16, 256>}, {pipeline_mode = #tpu.pipeline_mode<synchronous>, transform_indices = @transform_4, window_bounds = array<i64: 1, 256>}, {pipeline_mode = #tpu.pipeline_mode<synchronous>, transform_indices = @transform_5, window_bounds = array<i64: 1, 256>}, {transform_indices = @transform_6, window_bounds = array<i64: 16, 256>}]} {
    %c0 = arith.constant 0 : index
    %c0_0 = arith.constant 0 : index
    %0 = vector.load %arg1[%c0, %c0_0] : memref<16x256xbf16, #tpu.memory_space<vmem>>, vector<16x256xbf16>
    %1 = arith.extf %0 : vector<16x256xbf16> to vector<16x256xf32>
    %c0_1 = arith.constant 0 : index
    %c0_2 = arith.constant 0 : index
    %2 = vector.load %arg2[%c0_1, %c0_2] : memref<1x256xf32, #tpu.memory_space<vmem>>, vector<1x256xf32>
    %3 = vector.broadcast %2 : vector<1x256xf32> to vector<16x256xf32>
    %4 = arith.mulf %1, %3 : vector<16x256xf32>
    %c0_3 = arith.constant 0 : index
    %c0_4 = arith.constant 0 : index
    %5 = vector.load %arg3[%c0_3, %c0_4] : memref<1x256xf32, #tpu.memory_space<vmem>>, vector<1x256xf32>
    %6 = vector.broadcast %5 : vector<1x256xf32> to vector<16x256xf32>
    %7 = arith.addf %4, %6 : vector<16x256xf32>
    %cst = arith.constant 0.000000e+00 : f32
    %8 = vector.broadcast %cst : f32 to vector<16x256xf32>
    %9 = arith.maximumf %7, %8 : vector<16x256xf32>
    %c0_5 = arith.constant 0 : index
    %c0_6 = arith.constant 0 : index
    %10 = vector.load %arg4[%c0_5, %c0_6] : memref<16x256xbf16, #tpu.memory_space<vmem>>, vector<16x256xbf16>
    %11 = arith.extf %10 : vector<16x256xbf16> to vector<16x256xf32>
    %c0_7 = arith.constant 0 : index
    %c0_8 = arith.constant 0 : index
    %12 = vector.load %arg5[%c0_7, %c0_8] : memref<1x256xf32, #tpu.memory_space<vmem>>, vector<1x256xf32>
    %13 = vector.broadcast %12 : vector<1x256xf32> to vector<16x256xf32>
    %14 = arith.mulf %11, %13 : vector<16x256xf32>
    %c0_9 = arith.constant 0 : index
    %c0_10 = arith.constant 0 : index
    %15 = vector.load %arg6[%c0_9, %c0_10] : memref<1x256xf32, #tpu.memory_space<vmem>>, vector<1x256xf32>
    %16 = vector.broadcast %15 : vector<1x256xf32> to vector<16x256xf32>
    %17 = arith.addf %14, %16 : vector<16x256xf32>
    %18 = arith.addf %9, %17 : vector<16x256xf32>
    %cst_11 = arith.constant 0.000000e+00 : f32
    %19 = vector.broadcast %cst_11 : f32 to vector<16x256xf32>
    %20 = arith.maximumf %18, %19 : vector<16x256xf32>
    %21 = arith.truncf %20 : vector<16x256xf32> to vector<16x256xbf16>
    %c0_12 = arith.constant 0 : index
    %c0_13 = arith.constant 0 : index
    %22 = vector.load %arg7[%c0_12, %c0_13] : memref<16x256xbf16, #tpu.memory_space<vmem>>, vector<16x256xbf16>
    tpu.vector_store %arg7[%c0_12, %c0_13], %21 {strides = array<i32>} : memref<16x256xbf16, #tpu.memory_space<vmem>>, vector<16x256xbf16>,
    return
  }
  func.func @transform_0(%arg0: i32) -> (i32, i32) {
    %c0_i32 = arith.constant 0 : i32
    %c0_i32_0 = arith.constant 0 : i32
    return %arg0, %c0_i32 : i32, i32
  }
  func.func @transform_1(%arg0: i32) -> (i32, i32) {
    %c0_i32 = arith.constant 0 : i32
    %c0_i32_0 = arith.constant 0 : i32
    %c0_i32_1 = arith.constant 0 : i32
    return %c0_i32, %c0_i32_0 : i32, i32
  }
  func.func @transform_2(%arg0: i32) -> (i32, i32) {
    %c0_i32 = arith.constant 0 : i32
    %c0_i32_0 = arith.constant 0 : i32
    %c0_i32_1 = arith.constant 0 : i32
    return %c0_i32, %c0_i32_0 : i32, i32
  }
  func.func @transform_3(%arg0: i32) -> (i32, i32) {
    %c0_i32 = arith.constant 0 : i32
    %c0_i32_0 = arith.constant 0 : i32
    return %arg0, %c0_i32 : i32, i32
  }
  func.func @transform_4(%arg0: i32) -> (i32, i32) {
    %c0_i32 = arith.constant 0 : i32
    %c0_i32_0 = arith.constant 0 : i32
    %c0_i32_1 = arith.constant 0 : i32
    return %c0_i32, %c0_i32_0 : i32, i32
  }
  func.func @transform_5(%arg0: i32) -> (i32, i32) {
    %c0_i32 = arith.constant 0 : i32
    %c0_i32_0 = arith.constant 0 : i32
    %c0_i32_1 = arith.constant 0 : i32
    return %c0_i32, %c0_i32_0 : i32, i32
  }
  func.func @transform_6(%arg0: i32) -> (i32, i32) {
    %c0_i32 = arith.constant 0 : i32
    %c0_i32_0 = arith.constant 0 : i32
    return %arg0, %c0_i32 : i32, i32
  }
}

module attributes {stable_mosaic.version = 11 : i64} {
  func.func @_conv_matmul_kernel(%arg0: i32, %arg1: i32, %arg2: i32, %arg3: memref<16x256xbf16, #tpu.memory_space<vmem>>, %arg4: memref<256x256xbf16, #tpu.memory_space<vmem>>, %arg5: memref<16x256xbf16, #tpu.memory_space<vmem>>, %arg6: memref<8x256xf32, #tpu.memory_space<vmem>>, %arg7: memref<8x256xf32, #tpu.memory_space<vmem>>, %arg8: memref<16x256xf32, #tpu.memory_space<vmem>>) attributes {dimension_semantics = [#tpu.dimension_semantics<parallel>, #tpu.dimension_semantics<parallel>, #tpu.dimension_semantics<arbitrary>], iteration_bounds = array<i64: 1, 1, 1>, scalar_prefetch = 0 : i64, scratch_operands = 1 : i64, tpu.core_type = #tpu.core_type<tc>, window_params = [{transform_indices = @transform_0, window_bounds = array<i64: 16, 256>}, {transform_indices = @transform_1, window_bounds = array<i64: 256, 256>}, {transform_indices = @transform_2, window_bounds = array<i64: 16, 256>}, {transform_indices = @transform_3, window_bounds = array<i64: 8, 256>}, {transform_indices = @transform_4, window_bounds = array<i64: 8, 256>}]} {
    %c0_i32 = arith.constant 0 : i32
    %0 = arith.cmpi eq, %arg2, %c0_i32 : i32
    %1 = arith.extui %0 : i1 to i32
    %c0_i32_0 = arith.constant 0 : i32
    %2 = arith.cmpi ne, %1, %c0_i32_0 : i32
    scf.if %2 {
      %cst_10 = arith.constant 0.000000e+00 : f32
      %12 = vector.broadcast %cst_10 : f32 to vector<16x256xf32>
      %c0_11 = arith.constant 0 : index
      %c0_12 = arith.constant 0 : index
      %13 = vector.load %arg8[%c0_11, %c0_12] : memref<16x256xf32, #tpu.memory_space<vmem>>, vector<16x256xf32>
      tpu.vector_store %arg8[%c0_11, %c0_12], %12 {strides = array<i32>} : memref<16x256xf32, #tpu.memory_space<vmem>>, vector<16x256xf32>,
    } else {
    }
    %c0 = arith.constant 0 : index
    %c0_1 = arith.constant 0 : index
    %3 = vector.load %arg8[%c0, %c0_1] : memref<16x256xf32, #tpu.memory_space<vmem>>, vector<16x256xf32>
    %c0_2 = arith.constant 0 : index
    %c0_3 = arith.constant 0 : index
    %4 = vector.load %arg3[%c0_2, %c0_3] : memref<16x256xbf16, #tpu.memory_space<vmem>>, vector<16x256xbf16>
    %c0_4 = arith.constant 0 : index
    %c0_5 = arith.constant 0 : index
    %5 = vector.load %arg4[%c0_4, %c0_5] : memref<256x256xbf16, #tpu.memory_space<vmem>>, vector<256x256xbf16>
    %cst = arith.constant dense<0.000000e+00> : vector<16x256xf32>
    %6 = tpu.matmul %4, %5, %cst {dimension_numbers = #tpu.dot_dimension_numbers<[1], [0], [0], [1], [0, 0, 1, 1], [], []>} : vector<16x256xbf16>, vector<256x256xbf16>, vector<16x256xf32> -> vector<16x256xf32>
    %7 = arith.addf %3, %6 : vector<16x256xf32>
    %c0_6 = arith.constant 0 : index
    %c0_7 = arith.constant 0 : index
    %8 = vector.load %arg8[%c0_6, %c0_7] : memref<16x256xf32, #tpu.memory_space<vmem>>, vector<16x256xf32>
    tpu.vector_store %arg8[%c0_6, %c0_7], %7 {strides = array<i32>} : memref<16x256xf32, #tpu.memory_space<vmem>>, vector<16x256xf32>,
    %c0_i32_8 = arith.constant 0 : i32
    %9 = arith.cmpi eq, %arg2, %c0_i32_8 : i32
    %10 = arith.extui %9 : i1 to i32
    %c0_i32_9 = arith.constant 0 : i32
    %11 = arith.cmpi ne, %10, %c0_i32_9 : i32
    scf.if %11 {
      %c0_10 = arith.constant 0 : index
      %c0_11 = arith.constant 0 : index
      %12 = vector.load %arg8[%c0_10, %c0_11] : memref<16x256xf32, #tpu.memory_space<vmem>>, vector<16x256xf32>
      %13 = arith.truncf %12 : vector<16x256xf32> to vector<16x256xbf16>
      %c0_12 = arith.constant 0 : index
      %c0_13 = arith.constant 0 : index
      %14 = vector.load %arg5[%c0_12, %c0_13] : memref<16x256xbf16, #tpu.memory_space<vmem>>, vector<16x256xbf16>
      tpu.vector_store %arg5[%c0_12, %c0_13], %13 {strides = array<i32>} : memref<16x256xbf16, #tpu.memory_space<vmem>>, vector<16x256xbf16>,
      %cst_14 = arith.constant dense<0.000000e+00> : vector<256xf32>
      %15 = vector.multi_reduction <add>, %12, %cst_14 [0] : vector<16x256xf32> to vector<256xf32>
      %16 = vector.shape_cast %15 : vector<256xf32> to vector<1x256xf32>
      %17 = arith.mulf %12, %12 : vector<16x256xf32>
      %cst_15 = arith.constant dense<0.000000e+00> : vector<256xf32>
      %18 = vector.multi_reduction <add>, %17, %cst_15 [0] : vector<16x256xf32> to vector<256xf32>
      %19 = vector.shape_cast %18 : vector<256xf32> to vector<1x256xf32>
      %20 = vector.shape_cast %16 : vector<1x256xf32> to vector<1x256xf32>
      %21 = vector.broadcast %20 : vector<1x256xf32> to vector<8x256xf32>
      %c0_16 = arith.constant 0 : index
      %c0_17 = arith.constant 0 : index
      %22 = vector.load %arg6[%c0_16, %c0_17] : memref<8x256xf32, #tpu.memory_space<vmem>>, vector<8x256xf32>
      tpu.vector_store %arg6[%c0_16, %c0_17], %21 {strides = array<i32>} : memref<8x256xf32, #tpu.memory_space<vmem>>, vector<8x256xf32>,
      %23 = vector.shape_cast %19 : vector<1x256xf32> to vector<1x256xf32>
      %24 = vector.broadcast %23 : vector<1x256xf32> to vector<8x256xf32>
      %c0_18 = arith.constant 0 : index
      %c0_19 = arith.constant 0 : index
      %25 = vector.load %arg7[%c0_18, %c0_19] : memref<8x256xf32, #tpu.memory_space<vmem>>, vector<8x256xf32>
      tpu.vector_store %arg7[%c0_18, %c0_19], %24 {strides = array<i32>} : memref<8x256xf32, #tpu.memory_space<vmem>>, vector<8x256xf32>,
    } else {
    }
    return
  }
  func.func @transform_0(%arg0: i32, %arg1: i32, %arg2: i32) -> (i32, i32) {
    %c0_i32 = arith.constant 0 : i32
    return %arg0, %arg2 : i32, i32
  }
  func.func @transform_1(%arg0: i32, %arg1: i32, %arg2: i32) -> (i32, i32) {
    %c0_i32 = arith.constant 0 : i32
    return %arg2, %arg1 : i32, i32
  }
  func.func @transform_2(%arg0: i32, %arg1: i32, %arg2: i32) -> (i32, i32) {
    %c0_i32 = arith.constant 0 : i32
    return %arg0, %arg1 : i32, i32
  }
  func.func @transform_3(%arg0: i32, %arg1: i32, %arg2: i32) -> (i32, i32) {
    %c0_i32 = arith.constant 0 : i32
    return %arg0, %arg1 : i32, i32
  }
  func.func @transform_4(%arg0: i32, %arg1: i32, %arg2: i32) -> (i32, i32) {
    %c0_i32 = arith.constant 0 : i32
    return %arg0, %arg1 : i32, i32
  }
}

module attributes {stable_mosaic.version = 11 : i64} {
  func.func @_conv_matmul_kernel(%arg0: i32, %arg1: i32, %arg2: i32, %arg3: memref<16x256xbf16, #tpu.memory_space<vmem>>, %arg4: memref<256x256xbf16, #tpu.memory_space<vmem>>, %arg5: memref<16x256xbf16, #tpu.memory_space<vmem>>, %arg6: memref<8x256xf32, #tpu.memory_space<vmem>>, %arg7: memref<8x256xf32, #tpu.memory_space<vmem>>, %arg8: memref<16x256xf32, #tpu.memory_space<vmem>>) attributes {dimension_semantics = [#tpu.dimension_semantics<parallel>, #tpu.dimension_semantics<parallel>, #tpu.dimension_semantics<arbitrary>], iteration_bounds = array<i64: 1, 2, 1>, scalar_prefetch = 0 : i64, scratch_operands = 1 : i64, tpu.core_type = #tpu.core_type<tc>, window_params = [{transform_indices = @transform_0, window_bounds = array<i64: 16, 256>}, {transform_indices = @transform_1, window_bounds = array<i64: 256, 256>}, {transform_indices = @transform_2, window_bounds = array<i64: 16, 256>}, {transform_indices = @transform_3, window_bounds = array<i64: 8, 256>}, {transform_indices = @transform_4, window_bounds = array<i64: 8, 256>}]} {
    %c0_i32 = arith.constant 0 : i32
    %0 = arith.cmpi eq, %arg2, %c0_i32 : i32
    %1 = arith.extui %0 : i1 to i32
    %c0_i32_0 = arith.constant 0 : i32
    %2 = arith.cmpi ne, %1, %c0_i32_0 : i32
    scf.if %2 {
      %cst_10 = arith.constant 0.000000e+00 : f32
      %12 = vector.broadcast %cst_10 : f32 to vector<16x256xf32>
      %c0_11 = arith.constant 0 : index
      %c0_12 = arith.constant 0 : index
      %13 = vector.load %arg8[%c0_11, %c0_12] : memref<16x256xf32, #tpu.memory_space<vmem>>, vector<16x256xf32>
      tpu.vector_store %arg8[%c0_11, %c0_12], %12 {strides = array<i32>} : memref<16x256xf32, #tpu.memory_space<vmem>>, vector<16x256xf32>,
    } else {
    }
    %c0 = arith.constant 0 : index
    %c0_1 = arith.constant 0 : index
    %3 = vector.load %arg8[%c0, %c0_1] : memref<16x256xf32, #tpu.memory_space<vmem>>, vector<16x256xf32>
    %c0_2 = arith.constant 0 : index
    %c0_3 = arith.constant 0 : index
    %4 = vector.load %arg3[%c0_2, %c0_3] : memref<16x256xbf16, #tpu.memory_space<vmem>>, vector<16x256xbf16>
    %c0_4 = arith.constant 0 : index
    %c0_5 = arith.constant 0 : index
    %5 = vector.load %arg4[%c0_4, %c0_5] : memref<256x256xbf16, #tpu.memory_space<vmem>>, vector<256x256xbf16>
    %cst = arith.constant dense<0.000000e+00> : vector<16x256xf32>
    %6 = tpu.matmul %4, %5, %cst {dimension_numbers = #tpu.dot_dimension_numbers<[1], [0], [0], [1], [0, 0, 1, 1], [], []>} : vector<16x256xbf16>, vector<256x256xbf16>, vector<16x256xf32> -> vector<16x256xf32>
    %7 = arith.addf %3, %6 : vector<16x256xf32>
    %c0_6 = arith.constant 0 : index
    %c0_7 = arith.constant 0 : index
    %8 = vector.load %arg8[%c0_6, %c0_7] : memref<16x256xf32, #tpu.memory_space<vmem>>, vector<16x256xf32>
    tpu.vector_store %arg8[%c0_6, %c0_7], %7 {strides = array<i32>} : memref<16x256xf32, #tpu.memory_space<vmem>>, vector<16x256xf32>,
    %c0_i32_8 = arith.constant 0 : i32
    %9 = arith.cmpi eq, %arg2, %c0_i32_8 : i32
    %10 = arith.extui %9 : i1 to i32
    %c0_i32_9 = arith.constant 0 : i32
    %11 = arith.cmpi ne, %10, %c0_i32_9 : i32
    scf.if %11 {
      %c0_10 = arith.constant 0 : index
      %c0_11 = arith.constant 0 : index
      %12 = vector.load %arg8[%c0_10, %c0_11] : memref<16x256xf32, #tpu.memory_space<vmem>>, vector<16x256xf32>
      %13 = arith.truncf %12 : vector<16x256xf32> to vector<16x256xbf16>
      %c0_12 = arith.constant 0 : index
      %c0_13 = arith.constant 0 : index
      %14 = vector.load %arg5[%c0_12, %c0_13] : memref<16x256xbf16, #tpu.memory_space<vmem>>, vector<16x256xbf16>
      tpu.vector_store %arg5[%c0_12, %c0_13], %13 {strides = array<i32>} : memref<16x256xbf16, #tpu.memory_space<vmem>>, vector<16x256xbf16>,
      %cst_14 = arith.constant dense<0.000000e+00> : vector<256xf32>
      %15 = vector.multi_reduction <add>, %12, %cst_14 [0] : vector<16x256xf32> to vector<256xf32>
      %16 = vector.shape_cast %15 : vector<256xf32> to vector<1x256xf32>
      %17 = arith.mulf %12, %12 : vector<16x256xf32>
      %cst_15 = arith.constant dense<0.000000e+00> : vector<256xf32>
      %18 = vector.multi_reduction <add>, %17, %cst_15 [0] : vector<16x256xf32> to vector<256xf32>
      %19 = vector.shape_cast %18 : vector<256xf32> to vector<1x256xf32>
      %20 = vector.shape_cast %16 : vector<1x256xf32> to vector<1x256xf32>
      %21 = vector.broadcast %20 : vector<1x256xf32> to vector<8x256xf32>
      %c0_16 = arith.constant 0 : index
      %c0_17 = arith.constant 0 : index
      %22 = vector.load %arg6[%c0_16, %c0_17] : memref<8x256xf32, #tpu.memory_space<vmem>>, vector<8x256xf32>
      tpu.vector_store %arg6[%c0_16, %c0_17], %21 {strides = array<i32>} : memref<8x256xf32, #tpu.memory_space<vmem>>, vector<8x256xf32>,
      %23 = vector.shape_cast %19 : vector<1x256xf32> to vector<1x256xf32>
      %24 = vector.broadcast %23 : vector<1x256xf32> to vector<8x256xf32>
      %c0_18 = arith.constant 0 : index
      %c0_19 = arith.constant 0 : index
      %25 = vector.load %arg7[%c0_18, %c0_19] : memref<8x256xf32, #tpu.memory_space<vmem>>, vector<8x256xf32>
      tpu.vector_store %arg7[%c0_18, %c0_19], %24 {strides = array<i32>} : memref<8x256xf32, #tpu.memory_space<vmem>>, vector<8x256xf32>,
    } else {
    }
    return
  }
  func.func @transform_0(%arg0: i32, %arg1: i32, %arg2: i32) -> (i32, i32) {
    %c0_i32 = arith.constant 0 : i32
    return %arg0, %arg2 : i32, i32
  }
  func.func @transform_1(%arg0: i32, %arg1: i32, %arg2: i32) -> (i32, i32) {
    %c0_i32 = arith.constant 0 : i32
    return %arg2, %arg1 : i32, i32
  }
  func.func @transform_2(%arg0: i32, %arg1: i32, %arg2: i32) -> (i32, i32) {
    %c0_i32 = arith.constant 0 : i32
    return %arg0, %arg1 : i32, i32
  }
  func.func @transform_3(%arg0: i32, %arg1: i32, %arg2: i32) -> (i32, i32) {
    %c0_i32 = arith.constant 0 : i32
    return %arg0, %arg1 : i32, i32
  }
  func.func @transform_4(%arg0: i32, %arg1: i32, %arg2: i32) -> (i32, i32) {
    %c0_i32 = arith.constant 0 : i32
    return %arg0, %arg1 : i32, i32
  }
}

module attributes {stable_mosaic.version = 11 : i64} {
  func.func @_bn_relu_kernel(%arg0: i32, %arg1: memref<16x512xbf16, #tpu.memory_space<vmem>>, %arg2: memref<1x512xf32, #tpu.memory_space<vmem>>, %arg3: memref<1x512xf32, #tpu.memory_space<vmem>>, %arg4: memref<16x512xbf16, #tpu.memory_space<vmem>>) attributes {dimension_semantics = [#tpu.dimension_semantics<parallel>], iteration_bounds = array<i64: 1>, scalar_prefetch = 0 : i64, scratch_operands = 0 : i64, tpu.core_type = #tpu.core_type<tc>, window_params = [{transform_indices = @transform_0, window_bounds = array<i64: 16, 512>}, {pipeline_mode = #tpu.pipeline_mode<synchronous>, transform_indices = @transform_1, window_bounds = array<i64: 1, 512>}, {pipeline_mode = #tpu.pipeline_mode<synchronous>, transform_indices = @transform_2, window_bounds = array<i64: 1, 512>}, {transform_indices = @transform_3, window_bounds = array<i64: 16, 512>}]} {
    %c0 = arith.constant 0 : index
    %c0_0 = arith.constant 0 : index
    %0 = vector.load %arg1[%c0, %c0_0] : memref<16x512xbf16, #tpu.memory_space<vmem>>, vector<16x512xbf16>
    %1 = arith.extf %0 : vector<16x512xbf16> to vector<16x512xf32>
    %c0_1 = arith.constant 0 : index
    %c0_2 = arith.constant 0 : index
    %2 = vector.load %arg2[%c0_1, %c0_2] : memref<1x512xf32, #tpu.memory_space<vmem>>, vector<1x512xf32>
    %3 = vector.broadcast %2 : vector<1x512xf32> to vector<16x512xf32>
    %4 = arith.mulf %1, %3 : vector<16x512xf32>
    %c0_3 = arith.constant 0 : index
    %c0_4 = arith.constant 0 : index
    %5 = vector.load %arg3[%c0_3, %c0_4] : memref<1x512xf32, #tpu.memory_space<vmem>>, vector<1x512xf32>
    %6 = vector.broadcast %5 : vector<1x512xf32> to vector<16x512xf32>
    %7 = arith.addf %4, %6 : vector<16x512xf32>
    %cst = arith.constant 0.000000e+00 : f32
    %8 = vector.broadcast %cst : f32 to vector<16x512xf32>
    %9 = arith.maximumf %7, %8 : vector<16x512xf32>
    %10 = arith.truncf %9 : vector<16x512xf32> to vector<16x512xbf16>
    %c0_5 = arith.constant 0 : index
    %c0_6 = arith.constant 0 : index
    %11 = vector.load %arg4[%c0_5, %c0_6] : memref<16x512xbf16, #tpu.memory_space<vmem>>, vector<16x512xbf16>
    tpu.vector_store %arg4[%c0_5, %c0_6], %10 {strides = array<i32>} : memref<16x512xbf16, #tpu.memory_space<vmem>>, vector<16x512xbf16>,
    return
  }
  func.func @transform_0(%arg0: i32) -> (i32, i32) {
    %c0_i32 = arith.constant 0 : i32
    %c0_i32_0 = arith.constant 0 : i32
    return %arg0, %c0_i32 : i32, i32
  }
  func.func @transform_1(%arg0: i32) -> (i32, i32) {
    %c0_i32 = arith.constant 0 : i32
    %c0_i32_0 = arith.constant 0 : i32
    %c0_i32_1 = arith.constant 0 : i32
    return %c0_i32, %c0_i32_0 : i32, i32
  }
  func.func @transform_2(%arg0: i32) -> (i32, i32) {
    %c0_i32 = arith.constant 0 : i32
    %c0_i32_0 = arith.constant 0 : i32
    %c0_i32_1 = arith.constant 0 : i32
    return %c0_i32, %c0_i32_0 : i32, i32
  }
  func.func @transform_3(%arg0: i32) -> (i32, i32) {
    %c0_i32 = arith.constant 0 : i32
    %c0_i32_0 = arith.constant 0 : i32
    return %arg0, %c0_i32 : i32, i32
  }
}

module attributes {stable_mosaic.version = 11 : i64} {
  func.func @_conv_matmul_kernel(%arg0: i32, %arg1: i32, %arg2: i32, %arg3: memref<16x384xbf16, #tpu.memory_space<vmem>>, %arg4: memref<384x256xbf16, #tpu.memory_space<vmem>>, %arg5: memref<16x256xbf16, #tpu.memory_space<vmem>>, %arg6: memref<8x256xf32, #tpu.memory_space<vmem>>, %arg7: memref<8x256xf32, #tpu.memory_space<vmem>>, %arg8: memref<16x256xf32, #tpu.memory_space<vmem>>) attributes {dimension_semantics = [#tpu.dimension_semantics<parallel>, #tpu.dimension_semantics<parallel>, #tpu.dimension_semantics<arbitrary>], iteration_bounds = array<i64: 1, 2, 6>, scalar_prefetch = 0 : i64, scratch_operands = 1 : i64, tpu.core_type = #tpu.core_type<tc>, window_params = [{transform_indices = @transform_0, window_bounds = array<i64: 16, 384>}, {transform_indices = @transform_1, window_bounds = array<i64: 384, 256>}, {transform_indices = @transform_2, window_bounds = array<i64: 16, 256>}, {transform_indices = @transform_3, window_bounds = array<i64: 8, 256>}, {transform_indices = @transform_4, window_bounds = array<i64: 8, 256>}]} {
    %c0_i32 = arith.constant 0 : i32
    %0 = arith.cmpi eq, %arg2, %c0_i32 : i32
    %1 = arith.extui %0 : i1 to i32
    %c0_i32_0 = arith.constant 0 : i32
    %2 = arith.cmpi ne, %1, %c0_i32_0 : i32
    scf.if %2 {
      %cst_9 = arith.constant 0.000000e+00 : f32
      %12 = vector.broadcast %cst_9 : f32 to vector<16x256xf32>
      %c0_10 = arith.constant 0 : index
      %c0_11 = arith.constant 0 : index
      %13 = vector.load %arg8[%c0_10, %c0_11] : memref<16x256xf32, #tpu.memory_space<vmem>>, vector<16x256xf32>
      tpu.vector_store %arg8[%c0_10, %c0_11], %12 {strides = array<i32>} : memref<16x256xf32, #tpu.memory_space<vmem>>, vector<16x256xf32>,
    } else {
    }
    %c0 = arith.constant 0 : index
    %c0_1 = arith.constant 0 : index
    %3 = vector.load %arg8[%c0, %c0_1] : memref<16x256xf32, #tpu.memory_space<vmem>>, vector<16x256xf32>
    %c0_2 = arith.constant 0 : index
    %c0_3 = arith.constant 0 : index
    %4 = vector.load %arg3[%c0_2, %c0_3] : memref<16x384xbf16, #tpu.memory_space<vmem>>, vector<16x384xbf16>
    %c0_4 = arith.constant 0 : index
    %c0_5 = arith.constant 0 : index
    %5 = vector.load %arg4[%c0_4, %c0_5] : memref<384x256xbf16, #tpu.memory_space<vmem>>, vector<384x256xbf16>
    %cst = arith.constant dense<0.000000e+00> : vector<16x256xf32>
    %6 = tpu.matmul %4, %5, %cst {dimension_numbers = #tpu.dot_dimension_numbers<[1], [0], [0], [1], [0, 0, 1, 1], [], []>} : vector<16x384xbf16>, vector<384x256xbf16>, vector<16x256xf32> -> vector<16x256xf32>
    %7 = arith.addf %3, %6 : vector<16x256xf32>
    %c0_6 = arith.constant 0 : index
    %c0_7 = arith.constant 0 : index
    %8 = vector.load %arg8[%c0_6, %c0_7] : memref<16x256xf32, #tpu.memory_space<vmem>>, vector<16x256xf32>
    tpu.vector_store %arg8[%c0_6, %c0_7], %7 {strides = array<i32>} : memref<16x256xf32, #tpu.memory_space<vmem>>, vector<16x256xf32>,
    %c5_i32 = arith.constant 5 : i32
    %9 = arith.cmpi eq, %arg2, %c5_i32 : i32
    %10 = arith.extui %9 : i1 to i32
    %c0_i32_8 = arith.constant 0 : i32
    %11 = arith.cmpi ne, %10, %c0_i32_8 : i32
    scf.if %11 {
      %c0_9 = arith.constant 0 : index
      %c0_10 = arith.constant 0 : index
      %12 = vector.load %arg8[%c0_9, %c0_10] : memref<16x256xf32, #tpu.memory_space<vmem>>, vector<16x256xf32>
      %13 = arith.truncf %12 : vector<16x256xf32> to vector<16x256xbf16>
      %c0_11 = arith.constant 0 : index
      %c0_12 = arith.constant 0 : index
      %14 = vector.load %arg5[%c0_11, %c0_12] : memref<16x256xbf16, #tpu.memory_space<vmem>>, vector<16x256xbf16>
      tpu.vector_store %arg5[%c0_11, %c0_12], %13 {strides = array<i32>} : memref<16x256xbf16, #tpu.memory_space<vmem>>, vector<16x256xbf16>,
      %cst_13 = arith.constant dense<0.000000e+00> : vector<256xf32>
      %15 = vector.multi_reduction <add>, %12, %cst_13 [0] : vector<16x256xf32> to vector<256xf32>
      %16 = vector.shape_cast %15 : vector<256xf32> to vector<1x256xf32>
      %17 = arith.mulf %12, %12 : vector<16x256xf32>
      %cst_14 = arith.constant dense<0.000000e+00> : vector<256xf32>
      %18 = vector.multi_reduction <add>, %17, %cst_14 [0] : vector<16x256xf32> to vector<256xf32>
      %19 = vector.shape_cast %18 : vector<256xf32> to vector<1x256xf32>
      %20 = vector.shape_cast %16 : vector<1x256xf32> to vector<1x256xf32>
      %21 = vector.broadcast %20 : vector<1x256xf32> to vector<8x256xf32>
      %c0_15 = arith.constant 0 : index
      %c0_16 = arith.constant 0 : index
      %22 = vector.load %arg6[%c0_15, %c0_16] : memref<8x256xf32, #tpu.memory_space<vmem>>, vector<8x256xf32>
      tpu.vector_store %arg6[%c0_15, %c0_16], %21 {strides = array<i32>} : memref<8x256xf32, #tpu.memory_space<vmem>>, vector<8x256xf32>,
      %23 = vector.shape_cast %19 : vector<1x256xf32> to vector<1x256xf32>
      %24 = vector.broadcast %23 : vector<1x256xf32> to vector<8x256xf32>
      %c0_17 = arith.constant 0 : index
      %c0_18 = arith.constant 0 : index
      %25 = vector.load %arg7[%c0_17, %c0_18] : memref<8x256xf32, #tpu.memory_space<vmem>>, vector<8x256xf32>
      tpu.vector_store %arg7[%c0_17, %c0_18], %24 {strides = array<i32>} : memref<8x256xf32, #tpu.memory_space<vmem>>, vector<8x256xf32>,
    } else {
    }
    return
  }
  func.func @transform_0(%arg0: i32, %arg1: i32, %arg2: i32) -> (i32, i32) {
    %c0_i32 = arith.constant 0 : i32
    return %arg0, %arg2 : i32, i32
  }
  func.func @transform_1(%arg0: i32, %arg1: i32, %arg2: i32) -> (i32, i32) {
    %c0_i32 = arith.constant 0 : i32
    return %arg2, %arg1 : i32, i32
  }
  func.func @transform_2(%arg0: i32, %arg1: i32, %arg2: i32) -> (i32, i32) {
    %c0_i32 = arith.constant 0 : i32
    return %arg0, %arg1 : i32, i32
  }
  func.func @transform_3(%arg0: i32, %arg1: i32, %arg2: i32) -> (i32, i32) {
    %c0_i32 = arith.constant 0 : i32
    return %arg0, %arg1 : i32, i32
  }
  func.func @transform_4(%arg0: i32, %arg1: i32, %arg2: i32) -> (i32, i32) {
    %c0_i32 = arith.constant 0 : i32
    return %arg0, %arg1 : i32, i32
  }
}

module attributes {stable_mosaic.version = 11 : i64} {
  func.func @_conv_matmul_kernel(%arg0: i32, %arg1: i32, %arg2: i32, %arg3: memref<16x512xbf16, #tpu.memory_space<vmem>>, %arg4: memref<512x256xbf16, #tpu.memory_space<vmem>>, %arg5: memref<16x256xbf16, #tpu.memory_space<vmem>>, %arg6: memref<8x256xf32, #tpu.memory_space<vmem>>, %arg7: memref<8x256xf32, #tpu.memory_space<vmem>>, %arg8: memref<16x256xf32, #tpu.memory_space<vmem>>) attributes {dimension_semantics = [#tpu.dimension_semantics<parallel>, #tpu.dimension_semantics<parallel>, #tpu.dimension_semantics<arbitrary>], iteration_bounds = array<i64: 1, 2, 9>, scalar_prefetch = 0 : i64, scratch_operands = 1 : i64, tpu.core_type = #tpu.core_type<tc>, window_params = [{transform_indices = @transform_0, window_bounds = array<i64: 16, 512>}, {transform_indices = @transform_1, window_bounds = array<i64: 512, 256>}, {transform_indices = @transform_2, window_bounds = array<i64: 16, 256>}, {transform_indices = @transform_3, window_bounds = array<i64: 8, 256>}, {transform_indices = @transform_4, window_bounds = array<i64: 8, 256>}]} {
    %c0_i32 = arith.constant 0 : i32
    %0 = arith.cmpi eq, %arg2, %c0_i32 : i32
    %1 = arith.extui %0 : i1 to i32
    %c0_i32_0 = arith.constant 0 : i32
    %2 = arith.cmpi ne, %1, %c0_i32_0 : i32
    scf.if %2 {
      %cst_9 = arith.constant 0.000000e+00 : f32
      %12 = vector.broadcast %cst_9 : f32 to vector<16x256xf32>
      %c0_10 = arith.constant 0 : index
      %c0_11 = arith.constant 0 : index
      %13 = vector.load %arg8[%c0_10, %c0_11] : memref<16x256xf32, #tpu.memory_space<vmem>>, vector<16x256xf32>
      tpu.vector_store %arg8[%c0_10, %c0_11], %12 {strides = array<i32>} : memref<16x256xf32, #tpu.memory_space<vmem>>, vector<16x256xf32>,
    } else {
    }
    %c0 = arith.constant 0 : index
    %c0_1 = arith.constant 0 : index
    %3 = vector.load %arg8[%c0, %c0_1] : memref<16x256xf32, #tpu.memory_space<vmem>>, vector<16x256xf32>
    %c0_2 = arith.constant 0 : index
    %c0_3 = arith.constant 0 : index
    %4 = vector.load %arg3[%c0_2, %c0_3] : memref<16x512xbf16, #tpu.memory_space<vmem>>, vector<16x512xbf16>
    %c0_4 = arith.constant 0 : index
    %c0_5 = arith.constant 0 : index
    %5 = vector.load %arg4[%c0_4, %c0_5] : memref<512x256xbf16, #tpu.memory_space<vmem>>, vector<512x256xbf16>
    %cst = arith.constant dense<0.000000e+00> : vector<16x256xf32>
    %6 = tpu.matmul %4, %5, %cst {dimension_numbers = #tpu.dot_dimension_numbers<[1], [0], [0], [1], [0, 0, 1, 1], [], []>} : vector<16x512xbf16>, vector<512x256xbf16>, vector<16x256xf32> -> vector<16x256xf32>
    %7 = arith.addf %3, %6 : vector<16x256xf32>
    %c0_6 = arith.constant 0 : index
    %c0_7 = arith.constant 0 : index
    %8 = vector.load %arg8[%c0_6, %c0_7] : memref<16x256xf32, #tpu.memory_space<vmem>>, vector<16x256xf32>
    tpu.vector_store %arg8[%c0_6, %c0_7], %7 {strides = array<i32>} : memref<16x256xf32, #tpu.memory_space<vmem>>, vector<16x256xf32>,
    %c8_i32 = arith.constant 8 : i32
    %9 = arith.cmpi eq, %arg2, %c8_i32 : i32
    %10 = arith.extui %9 : i1 to i32
    %c0_i32_8 = arith.constant 0 : i32
    %11 = arith.cmpi ne, %10, %c0_i32_8 : i32
    scf.if %11 {
      %c0_9 = arith.constant 0 : index
      %c0_10 = arith.constant 0 : index
      %12 = vector.load %arg8[%c0_9, %c0_10] : memref<16x256xf32, #tpu.memory_space<vmem>>, vector<16x256xf32>
      %13 = arith.truncf %12 : vector<16x256xf32> to vector<16x256xbf16>
      %c0_11 = arith.constant 0 : index
      %c0_12 = arith.constant 0 : index
      %14 = vector.load %arg5[%c0_11, %c0_12] : memref<16x256xbf16, #tpu.memory_space<vmem>>, vector<16x256xbf16>
      tpu.vector_store %arg5[%c0_11, %c0_12], %13 {strides = array<i32>} : memref<16x256xbf16, #tpu.memory_space<vmem>>, vector<16x256xbf16>,
      %cst_13 = arith.constant dense<0.000000e+00> : vector<256xf32>
      %15 = vector.multi_reduction <add>, %12, %cst_13 [0] : vector<16x256xf32> to vector<256xf32>
      %16 = vector.shape_cast %15 : vector<256xf32> to vector<1x256xf32>
      %17 = arith.mulf %12, %12 : vector<16x256xf32>
      %cst_14 = arith.constant dense<0.000000e+00> : vector<256xf32>
      %18 = vector.multi_reduction <add>, %17, %cst_14 [0] : vector<16x256xf32> to vector<256xf32>
      %19 = vector.shape_cast %18 : vector<256xf32> to vector<1x256xf32>
      %20 = vector.shape_cast %16 : vector<1x256xf32> to vector<1x256xf32>
      %21 = vector.broadcast %20 : vector<1x256xf32> to vector<8x256xf32>
      %c0_15 = arith.constant 0 : index
      %c0_16 = arith.constant 0 : index
      %22 = vector.load %arg6[%c0_15, %c0_16] : memref<8x256xf32, #tpu.memory_space<vmem>>, vector<8x256xf32>
      tpu.vector_store %arg6[%c0_15, %c0_16], %21 {strides = array<i32>} : memref<8x256xf32, #tpu.memory_space<vmem>>, vector<8x256xf32>,
      %23 = vector.shape_cast %19 : vector<1x256xf32> to vector<1x256xf32>
      %24 = vector.broadcast %23 : vector<1x256xf32> to vector<8x256xf32>
      %c0_17 = arith.constant 0 : index
      %c0_18 = arith.constant 0 : index
      %25 = vector.load %arg7[%c0_17, %c0_18] : memref<8x256xf32, #tpu.memory_space<vmem>>, vector<8x256xf32>
      tpu.vector_store %arg7[%c0_17, %c0_18], %24 {strides = array<i32>} : memref<8x256xf32, #tpu.memory_space<vmem>>, vector<8x256xf32>,
    } else {
    }
    return
  }
  func.func @transform_0(%arg0: i32, %arg1: i32, %arg2: i32) -> (i32, i32) {
    %c0_i32 = arith.constant 0 : i32
    return %arg0, %arg2 : i32, i32
  }
  func.func @transform_1(%arg0: i32, %arg1: i32, %arg2: i32) -> (i32, i32) {
    %c0_i32 = arith.constant 0 : i32
    return %arg2, %arg1 : i32, i32
  }
  func.func @transform_2(%arg0: i32, %arg1: i32, %arg2: i32) -> (i32, i32) {
    %c0_i32 = arith.constant 0 : i32
    return %arg0, %arg1 : i32, i32
  }
  func.func @transform_3(%arg0: i32, %arg1: i32, %arg2: i32) -> (i32, i32) {
    %c0_i32 = arith.constant 0 : i32
    return %arg0, %arg1 : i32, i32
  }
  func.func @transform_4(%arg0: i32, %arg1: i32, %arg2: i32) -> (i32, i32) {
    %c0_i32 = arith.constant 0 : i32
    return %arg0, %arg1 : i32, i32
  }
}

module attributes {stable_mosaic.version = 11 : i64} {
  func.func @_bn_add_relu_kernel(%arg0: i32, %arg1: memref<16x512xbf16, #tpu.memory_space<vmem>>, %arg2: memref<1x512xf32, #tpu.memory_space<vmem>>, %arg3: memref<1x512xf32, #tpu.memory_space<vmem>>, %arg4: memref<16x512xbf16, #tpu.memory_space<vmem>>, %arg5: memref<1x512xf32, #tpu.memory_space<vmem>>, %arg6: memref<1x512xf32, #tpu.memory_space<vmem>>, %arg7: memref<16x512xbf16, #tpu.memory_space<vmem>>) attributes {dimension_semantics = [#tpu.dimension_semantics<parallel>], iteration_bounds = array<i64: 1>, scalar_prefetch = 0 : i64, scratch_operands = 0 : i64, tpu.core_type = #tpu.core_type<tc>, window_params = [{transform_indices = @transform_0, window_bounds = array<i64: 16, 512>}, {pipeline_mode = #tpu.pipeline_mode<synchronous>, transform_indices = @transform_1, window_bounds = array<i64: 1, 512>}, {pipeline_mode = #tpu.pipeline_mode<synchronous>, transform_indices = @transform_2, window_bounds = array<i64: 1, 512>}, {transform_indices = @transform_3, window_bounds = array<i64: 16, 512>}, {pipeline_mode = #tpu.pipeline_mode<synchronous>, transform_indices = @transform_4, window_bounds = array<i64: 1, 512>}, {pipeline_mode = #tpu.pipeline_mode<synchronous>, transform_indices = @transform_5, window_bounds = array<i64: 1, 512>}, {transform_indices = @transform_6, window_bounds = array<i64: 16, 512>}]} {
    %c0 = arith.constant 0 : index
    %c0_0 = arith.constant 0 : index
    %0 = vector.load %arg1[%c0, %c0_0] : memref<16x512xbf16, #tpu.memory_space<vmem>>, vector<16x512xbf16>
    %1 = arith.extf %0 : vector<16x512xbf16> to vector<16x512xf32>
    %c0_1 = arith.constant 0 : index
    %c0_2 = arith.constant 0 : index
    %2 = vector.load %arg2[%c0_1, %c0_2] : memref<1x512xf32, #tpu.memory_space<vmem>>, vector<1x512xf32>
    %3 = vector.broadcast %2 : vector<1x512xf32> to vector<16x512xf32>
    %4 = arith.mulf %1, %3 : vector<16x512xf32>
    %c0_3 = arith.constant 0 : index
    %c0_4 = arith.constant 0 : index
    %5 = vector.load %arg3[%c0_3, %c0_4] : memref<1x512xf32, #tpu.memory_space<vmem>>, vector<1x512xf32>
    %6 = vector.broadcast %5 : vector<1x512xf32> to vector<16x512xf32>
    %7 = arith.addf %4, %6 : vector<16x512xf32>
    %cst = arith.constant 0.000000e+00 : f32
    %8 = vector.broadcast %cst : f32 to vector<16x512xf32>
    %9 = arith.maximumf %7, %8 : vector<16x512xf32>
    %c0_5 = arith.constant 0 : index
    %c0_6 = arith.constant 0 : index
    %10 = vector.load %arg4[%c0_5, %c0_6] : memref<16x512xbf16, #tpu.memory_space<vmem>>, vector<16x512xbf16>
    %11 = arith.extf %10 : vector<16x512xbf16> to vector<16x512xf32>
    %c0_7 = arith.constant 0 : index
    %c0_8 = arith.constant 0 : index
    %12 = vector.load %arg5[%c0_7, %c0_8] : memref<1x512xf32, #tpu.memory_space<vmem>>, vector<1x512xf32>
    %13 = vector.broadcast %12 : vector<1x512xf32> to vector<16x512xf32>
    %14 = arith.mulf %11, %13 : vector<16x512xf32>
    %c0_9 = arith.constant 0 : index
    %c0_10 = arith.constant 0 : index
    %15 = vector.load %arg6[%c0_9, %c0_10] : memref<1x512xf32, #tpu.memory_space<vmem>>, vector<1x512xf32>
    %16 = vector.broadcast %15 : vector<1x512xf32> to vector<16x512xf32>
    %17 = arith.addf %14, %16 : vector<16x512xf32>
    %18 = arith.addf %9, %17 : vector<16x512xf32>
    %cst_11 = arith.constant 0.000000e+00 : f32
    %19 = vector.broadcast %cst_11 : f32 to vector<16x512xf32>
    %20 = arith.maximumf %18, %19 : vector<16x512xf32>
    %21 = arith.truncf %20 : vector<16x512xf32> to vector<16x512xbf16>
    %c0_12 = arith.constant 0 : index
    %c0_13 = arith.constant 0 : index
    %22 = vector.load %arg7[%c0_12, %c0_13] : memref<16x512xbf16, #tpu.memory_space<vmem>>, vector<16x512xbf16>
    tpu.vector_store %arg7[%c0_12, %c0_13], %21 {strides = array<i32>} : memref<16x512xbf16, #tpu.memory_space<vmem>>, vector<16x512xbf16>,
    return
  }
  func.func @transform_0(%arg0: i32) -> (i32, i32) {
    %c0_i32 = arith.constant 0 : i32
    %c0_i32_0 = arith.constant 0 : i32
    return %arg0, %c0_i32 : i32, i32
  }
  func.func @transform_1(%arg0: i32) -> (i32, i32) {
    %c0_i32 = arith.constant 0 : i32
    %c0_i32_0 = arith.constant 0 : i32
    %c0_i32_1 = arith.constant 0 : i32
    return %c0_i32, %c0_i32_0 : i32, i32
  }
  func.func @transform_2(%arg0: i32) -> (i32, i32) {
    %c0_i32 = arith.constant 0 : i32
    %c0_i32_0 = arith.constant 0 : i32
    %c0_i32_1 = arith.constant 0 : i32
    return %c0_i32, %c0_i32_0 : i32, i32
  }
  func.func @transform_3(%arg0: i32) -> (i32, i32) {
    %c0_i32 = arith.constant 0 : i32
    %c0_i32_0 = arith.constant 0 : i32
    return %arg0, %c0_i32 : i32, i32
  }
  func.func @transform_4(%arg0: i32) -> (i32, i32) {
    %c0_i32 = arith.constant 0 : i32
    %c0_i32_0 = arith.constant 0 : i32
    %c0_i32_1 = arith.constant 0 : i32
    return %c0_i32, %c0_i32_0 : i32, i32
  }
  func.func @transform_5(%arg0: i32) -> (i32, i32) {
    %c0_i32 = arith.constant 0 : i32
    %c0_i32_0 = arith.constant 0 : i32
    %c0_i32_1 = arith.constant 0 : i32
    return %c0_i32, %c0_i32_0 : i32, i32
  }
  func.func @transform_6(%arg0: i32) -> (i32, i32) {
    %c0_i32 = arith.constant 0 : i32
    %c0_i32_0 = arith.constant 0 : i32
    return %arg0, %c0_i32 : i32, i32
  }
}

module attributes {stable_mosaic.version = 11 : i64} {
  func.func @_conv_matmul_kernel(%arg0: i32, %arg1: i32, %arg2: i32, %arg3: memref<16x512xbf16, #tpu.memory_space<vmem>>, %arg4: memref<512x256xbf16, #tpu.memory_space<vmem>>, %arg5: memref<16x256xbf16, #tpu.memory_space<vmem>>, %arg6: memref<8x256xf32, #tpu.memory_space<vmem>>, %arg7: memref<8x256xf32, #tpu.memory_space<vmem>>, %arg8: memref<16x256xf32, #tpu.memory_space<vmem>>) attributes {dimension_semantics = [#tpu.dimension_semantics<parallel>, #tpu.dimension_semantics<parallel>, #tpu.dimension_semantics<arbitrary>], iteration_bounds = array<i64: 1, 2, 1>, scalar_prefetch = 0 : i64, scratch_operands = 1 : i64, tpu.core_type = #tpu.core_type<tc>, window_params = [{transform_indices = @transform_0, window_bounds = array<i64: 16, 512>}, {transform_indices = @transform_1, window_bounds = array<i64: 512, 256>}, {transform_indices = @transform_2, window_bounds = array<i64: 16, 256>}, {transform_indices = @transform_3, window_bounds = array<i64: 8, 256>}, {transform_indices = @transform_4, window_bounds = array<i64: 8, 256>}]} {
    %c0_i32 = arith.constant 0 : i32
    %0 = arith.cmpi eq, %arg2, %c0_i32 : i32
    %1 = arith.extui %0 : i1 to i32
    %c0_i32_0 = arith.constant 0 : i32
    %2 = arith.cmpi ne, %1, %c0_i32_0 : i32
    scf.if %2 {
      %cst_10 = arith.constant 0.000000e+00 : f32
      %12 = vector.broadcast %cst_10 : f32 to vector<16x256xf32>
      %c0_11 = arith.constant 0 : index
      %c0_12 = arith.constant 0 : index
      %13 = vector.load %arg8[%c0_11, %c0_12] : memref<16x256xf32, #tpu.memory_space<vmem>>, vector<16x256xf32>
      tpu.vector_store %arg8[%c0_11, %c0_12], %12 {strides = array<i32>} : memref<16x256xf32, #tpu.memory_space<vmem>>, vector<16x256xf32>,
    } else {
    }
    %c0 = arith.constant 0 : index
    %c0_1 = arith.constant 0 : index
    %3 = vector.load %arg8[%c0, %c0_1] : memref<16x256xf32, #tpu.memory_space<vmem>>, vector<16x256xf32>
    %c0_2 = arith.constant 0 : index
    %c0_3 = arith.constant 0 : index
    %4 = vector.load %arg3[%c0_2, %c0_3] : memref<16x512xbf16, #tpu.memory_space<vmem>>, vector<16x512xbf16>
    %c0_4 = arith.constant 0 : index
    %c0_5 = arith.constant 0 : index
    %5 = vector.load %arg4[%c0_4, %c0_5] : memref<512x256xbf16, #tpu.memory_space<vmem>>, vector<512x256xbf16>
    %cst = arith.constant dense<0.000000e+00> : vector<16x256xf32>
    %6 = tpu.matmul %4, %5, %cst {dimension_numbers = #tpu.dot_dimension_numbers<[1], [0], [0], [1], [0, 0, 1, 1], [], []>} : vector<16x512xbf16>, vector<512x256xbf16>, vector<16x256xf32> -> vector<16x256xf32>
    %7 = arith.addf %3, %6 : vector<16x256xf32>
    %c0_6 = arith.constant 0 : index
    %c0_7 = arith.constant 0 : index
    %8 = vector.load %arg8[%c0_6, %c0_7] : memref<16x256xf32, #tpu.memory_space<vmem>>, vector<16x256xf32>
    tpu.vector_store %arg8[%c0_6, %c0_7], %7 {strides = array<i32>} : memref<16x256xf32, #tpu.memory_space<vmem>>, vector<16x256xf32>,
    %c0_i32_8 = arith.constant 0 : i32
    %9 = arith.cmpi eq, %arg2, %c0_i32_8 : i32
    %10 = arith.extui %9 : i1 to i32
    %c0_i32_9 = arith.constant 0 : i32
    %11 = arith.cmpi ne, %10, %c0_i32_9 : i32
    scf.if %11 {
      %c0_10 = arith.constant 0 : index
      %c0_11 = arith.constant 0 : index
      %12 = vector.load %arg8[%c0_10, %c0_11] : memref<16x256xf32, #tpu.memory_space<vmem>>, vector<16x256xf32>
      %13 = arith.truncf %12 : vector<16x256xf32> to vector<16x256xbf16>
      %c0_12 = arith.constant 0 : index
      %c0_13 = arith.constant 0 : index
      %14 = vector.load %arg5[%c0_12, %c0_13] : memref<16x256xbf16, #tpu.memory_space<vmem>>, vector<16x256xbf16>
      tpu.vector_store %arg5[%c0_12, %c0_13], %13 {strides = array<i32>} : memref<16x256xbf16, #tpu.memory_space<vmem>>, vector<16x256xbf16>,
      %cst_14 = arith.constant dense<0.000000e+00> : vector<256xf32>
      %15 = vector.multi_reduction <add>, %12, %cst_14 [0] : vector<16x256xf32> to vector<256xf32>
      %16 = vector.shape_cast %15 : vector<256xf32> to vector<1x256xf32>
      %17 = arith.mulf %12, %12 : vector<16x256xf32>
      %cst_15 = arith.constant dense<0.000000e+00> : vector<256xf32>
      %18 = vector.multi_reduction <add>, %17, %cst_15 [0] : vector<16x256xf32> to vector<256xf32>
      %19 = vector.shape_cast %18 : vector<256xf32> to vector<1x256xf32>
      %20 = vector.shape_cast %16 : vector<1x256xf32> to vector<1x256xf32>
      %21 = vector.broadcast %20 : vector<1x256xf32> to vector<8x256xf32>
      %c0_16 = arith.constant 0 : index
      %c0_17 = arith.constant 0 : index
      %22 = vector.load %arg6[%c0_16, %c0_17] : memref<8x256xf32, #tpu.memory_space<vmem>>, vector<8x256xf32>
      tpu.vector_store %arg6[%c0_16, %c0_17], %21 {strides = array<i32>} : memref<8x256xf32, #tpu.memory_space<vmem>>, vector<8x256xf32>,
      %23 = vector.shape_cast %19 : vector<1x256xf32> to vector<1x256xf32>
      %24 = vector.broadcast %23 : vector<1x256xf32> to vector<8x256xf32>
      %c0_18 = arith.constant 0 : index
      %c0_19 = arith.constant 0 : index
      %25 = vector.load %arg7[%c0_18, %c0_19] : memref<8x256xf32, #tpu.memory_space<vmem>>, vector<8x256xf32>
      tpu.vector_store %arg7[%c0_18, %c0_19], %24 {strides = array<i32>} : memref<8x256xf32, #tpu.memory_space<vmem>>, vector<8x256xf32>,
    } else {
    }
    return
  }
  func.func @transform_0(%arg0: i32, %arg1: i32, %arg2: i32) -> (i32, i32) {
    %c0_i32 = arith.constant 0 : i32
    return %arg0, %arg2 : i32, i32
  }
  func.func @transform_1(%arg0: i32, %arg1: i32, %arg2: i32) -> (i32, i32) {
    %c0_i32 = arith.constant 0 : i32
    return %arg2, %arg1 : i32, i32
  }
  func.func @transform_2(%arg0: i32, %arg1: i32, %arg2: i32) -> (i32, i32) {
    %c0_i32 = arith.constant 0 : i32
    return %arg0, %arg1 : i32, i32
  }
  func.func @transform_3(%arg0: i32, %arg1: i32, %arg2: i32) -> (i32, i32) {
    %c0_i32 = arith.constant 0 : i32
    return %arg0, %arg1 : i32, i32
  }
  func.func @transform_4(%arg0: i32, %arg1: i32, %arg2: i32) -> (i32, i32) {
    %c0_i32 = arith.constant 0 : i32
    return %arg0, %arg1 : i32, i32
  }
}

</mosaic_0001>

<bundles_post_ra>
// kernel: forward.83
= control target key start
LH: loop header
LB: loop body
LE: loop exit
PB: predicated region body
PF: predicated region fallthrough
CT: control target
= control target key end

     0   :  { %s222_s0 = inlined_call_operand.vmem [shape: bf16[64,128], index: 0, kind: input, shape index: {}]   ;;  %s223_s1 = inlined_call_operand.vmem [shape: f32[1,128], index: 1, kind: input, shape index: {}]   ;;  %s224_s2 = inlined_call_operand.vmem [shape: f32[1,128], index: 2, kind: input, shape index: {}]   ;;  %s225_s3 = inlined_call_operand.vmem [shape: bf16[64,128], index: 3, kind: output, shape index: {}]  }
   0x1   :  { %v131_v0 = vld [vmem:[%s222_s0] sm:$0xff]   ;;  %v166_v4 = vld [vmem:[%s222_s0 + $0x8] sm:$0xff]   ;;  %v167_v5 = vld [vmem:[%s222_s0 + $0x10] sm:$0xff]  }
   0x2   :  { %v112_v1 = vld [vmem:[%s223_s1] ss:$0 sm:$0xff]  ;;  %v132_v2 = vunpack.c.l.bf16 %v131_v0  ;;  %v133_v3 = vunpack.c.h.bf16 %v131_v0  ;;  %v168_v6 = vld [vmem:[%s222_s0 + $0x18] sm:$0xff]   ;;  %v136_v8 = vunpack.c.l.bf16 %v166_v4  ;;  %v137_v9 = vunpack.c.h.bf16 %v166_v4 }
   0x3   :  { %v113_v7 = vld [vmem:[%s224_s2] ss:$0 sm:$0xff]  ;;  %v140_v10 = vunpack.c.l.bf16 %v167_v5  ;;  %v141_v11 = vunpack.c.h.bf16 %v167_v5  ;;  %v144_v14 = vunpack.c.l.bf16 %v168_v6  ;;  %v145_v15 = vunpack.c.h.bf16 %v168_v6 }
   0x4   :  { %v37_v12 = vmul.f32 %v132_v2, %v112_v1  ;;  %v38_v13 = vmul.f32 %v133_v3, %v112_v1  ;;  %v39_v16 = vmul.f32 %v136_v8, %v112_v1  ;;  %v40_v17 = vmul.f32 %v137_v9, %v112_v1 }
   0x5   :  { %v41_v18 = vmul.f32 %v140_v10, %v112_v1  ;;  %v42_v19 = vmul.f32 %v141_v11, %v112_v1  ;;  %v43_v22 = vmul.f32 %v144_v14, %v112_v1  ;;  %v44_v23 = vmul.f32 %v145_v15, %v112_v1 }
   0x6   :  { %v52_v20 = vadd.f32 %v113_v7, %v37_v12  ;;  %v53_v21 = vadd.f32 %v113_v7, %v38_v13  ;;  %v54_v24 = vadd.f32 %v113_v7, %v39_v16  ;;  %v55_v25 = vadd.f32 %v113_v7, %v40_v17 }
   0x7   :  { %v56_v26 = vadd.f32 %v113_v7, %v41_v18  ;;  %v57_v27 = vadd.f32 %v113_v7, %v42_v19  ;;  %v58_v30 = vadd.f32 %v113_v7, %v43_v22  ;;  %v59_v31 = vadd.f32 %v113_v7, %v44_v23 }
   0x8   :  { %v60_v28 = vmax.f32 %v52_v20, 0.0  ;;  %v61_v29 = vmax.f32 %v53_v21, 0.0  ;;  %v62_v32 = vmax.f32 %v54_v24, 0.0  ;;  %v63_v33 = vmax.f32 %v55_v25, 0.0 }
   0x9   :  { %v64_v34 = vmax.f32 %v56_v26, 0.0  ;;  %v65_v35 = vmax.f32 %v57_v27, 0.0  ;;  %v66_v37 = vmax.f32 %v58_v30, 0.0  ;;  %v67_v38 = vmax.f32 %v59_v31, 0.0 }
   0xa   :  { %v149_v36 = vpack.c.bf16 %v61_v29, %v60_v28  ;;  %v154_v39 = vpack.c.bf16 %v63_v33, %v62_v32 }
   0xb   :  { %v159_v40 = vpack.c.bf16 %v65_v35, %v64_v34  ;;  %v164_v41 = vpack.c.bf16 %v67_v38, %v66_v37 }
   0xc   :  { %150 = vst [vmem:[%s225_s3] sm:$0xff] %v149_v36   ;;  %169 = vst [vmem:[%s225_s3 + $0x8] sm:$0xff] %v154_v39  }
   0xd   :  { %170 = vst [vmem:[%s225_s3 + $0x10] sm:$0xff] %v159_v40   ;;  %171 = vst [vmem:[%s225_s3 + $0x18] sm:$0xff] %v164_v41  }

// kernel: forward.82
= control target key start
LH: loop header
LB: loop body
LE: loop exit
PB: predicated region body
PF: predicated region fallthrough
CT: control target
= control target key end

     0   :  { %s653_s1 = inlined_call_operand.vmem [shape: bf16[256,128], index: 1, kind: input, shape index: {}]   ;;  %s654_s0 = inlined_call_operand.vmem [shape: bf16[64,256], index: 0, kind: input, shape index: {}]   ;;  %s655_s2 = inlined_call_operand.vmem [shape: bf16[64,128], index: 2, kind: output, shape index: {0}]   ;;  %s656_s3 = inlined_call_operand.vmem [shape: f32[8,128], index: 3, kind: output, shape index: {1}]   ;;  %s657_s4 = inlined_call_operand.vmem [shape: f32[8,128], index: 4, kind: output, shape index: {2}]  }
   0x1   :  { %v510_v0 = vld [vmem:[%s653_s1 + $0x78] sm:$0xff]   ;;  %v512_v2 = vld [vmem:[%s653_s1 + $0x70] sm:$0xff]   ;;  %v514_v4 = vld [vmem:[%s653_s1 + $0x68] sm:$0xff]  }
   0x2   :  { %v511_v1 = vld [vmem:[%s653_s1 + $0x38] sm:$0xff]   ;;  %454 = vmatprep.subr.bf16.mxu0 %v510_v0  ;;  %494 = vmatprep.subr.bf16.mxu1 %v510_v0  ;;  %v513_v3 = vld [vmem:[%s653_s1 + $0x30] sm:$0xff]   ;;  %v515_v5 = vld [vmem:[%s653_s1 + $0x28] sm:$0xff]  }
   0x3   :  { %455 = vmatpush3.bf16.msra.mxu0 %v511_v1  ;;  %502 = vmatpush3.bf16.msra.mxu1 %v511_v1  ;;  %v516_v6 = vld [vmem:[%s653_s1 + $0x60] sm:$0xff]   ;;  %v518_v8 = vld [vmem:[%s653_s1 + $0x58] sm:$0xff]   ;;  %v520_v10 = vld [vmem:[%s653_s1 + $0x50] sm:$0xff]  }
   0x4   :  { %456 = vmatprep.subr.bf16.mxu0 %v512_v2  ;;  %495 = vmatprep.subr.bf16.mxu1 %v512_v2  ;;  %v517_v7 = vld [vmem:[%s653_s1 + $0x20] sm:$0xff]   ;;  %v519_v9 = vld [vmem:[%s653_s1 + $0x18] sm:$0xff]   ;;  %v521_v13 = vld [vmem:[%s653_s1 + $0x10] sm:$0xff]  }
   0x5   :  { %v528_v11 = vld [vmem:[%s654_s0 + $0x4] ss:$8 sps:$4 sm:$0xff]   ;;  %v526_v18 = vld [vmem:[%s654_s0] ss:$8 sps:$4 sm:$0xff]   ;;  %v532_v20 = vld [vmem:[%s654_s0 + $0x14] ss:$8 sps:$4 sm:$0xff]  }
   0x6   :  { %v531_v12 = vld [vmem:[%s654_s0 + $0x24] ss:$8 sps:$4 sm:$0xff]   ;;  %243 = vmatprep.mubr.bf16.mxu0 %v528_v11  ;;  %v529_v19 = vld [vmem:[%s654_s0 + $0x20] ss:$8 sps:$4 sm:$0xff]   ;;  %v535_v21 = vld [vmem:[%s654_s0 + $0x34] ss:$8 sps:$4 sm:$0xff]  }
   0x7   :  { %457 = vmatpush3.bf16.msra.mxu0 %v513_v3  ;;  %503 = vmatpush3.bf16.msra.mxu1 %v513_v3  ;;  %v522_v14 = vld [vmem:[%s653_s1 + $0x48] sm:$0xff]   ;;  %v524_v16 = vld [vmem:[%s653_s1 + $0x40] sm:$0xff]   ;;  %v534_v22 = vld [vmem:[%s654_s0 + $0x10] ss:$8 sps:$4 sm:$0xff]  }
   0x8   :  { %458 = vmatprep.subr.bf16.mxu0 %v514_v4  ;;  %496 = vmatprep.subr.bf16.mxu1 %v514_v4  ;;  %v523_v15 = vld [vmem:[%s653_s1 + $0x8] sm:$0xff]   ;;  %v525_v17 = vld [vmem:[%s653_s1] sm:$0xff]   ;;  %v537_v23 = vld [vmem:[%s654_s0 + $0x30] ss:$8 sps:$4 sm:$0xff]  }
   0x9   :  { %259 = vmatprep.mubr.bf16.mxu1 %v531_v12 }
   0xb   :  { %459 = vmatpush3.bf16.msra.mxu0 %v515_v5  ;;  %504 = vmatpush3.bf16.msra.mxu1 %v515_v5 }
   0xc   :  { %460 = vmatprep.subr.bf16.mxu0 %v516_v6  ;;  %497 = vmatprep.subr.bf16.mxu1 %v516_v6 }
   0xf   :  { %461 = vmatpush3.bf16.msra.mxu0 %v517_v7  ;;  %505 = vmatpush3.bf16.msra.mxu1 %v517_v7 }
  0x10   :  { %462 = vmatprep.subr.bf16.mxu0 %v518_v8  ;;  %498 = vmatprep.subr.bf16.mxu1 %v518_v8 }
  0x13   :  { %463 = vmatpush3.bf16.msra.mxu0 %v519_v9  ;;  %506 = vmatpush3.bf16.msra.mxu1 %v519_v9 }
  0x14   :  { %464 = vmatprep.subr.bf16.mxu0 %v520_v10  ;;  %499 = vmatprep.subr.bf16.mxu1 %v520_v10 }
  0x17   :  { %465 = vmatpush3.bf16.msra.mxu0 %v521_v13  ;;  %507 = vmatpush3.bf16.msra.mxu1 %v521_v13 }
  0x18   :  { %466 = vmatprep.subr.bf16.mxu0 %v522_v14  ;;  %500 = vmatprep.subr.bf16.mxu1 %v522_v14 }
  0x1b   :  { %467 = vmatpush3.bf16.msra.mxu0 %v523_v15  ;;  %508 = vmatpush3.bf16.msra.mxu1 %v523_v15 }
  0x1c   :  { %468 = vmatprep.subr.bf16.mxu0 %v524_v16  ;;  %501 = vmatprep.subr.bf16.mxu1 %v524_v16 }
  0x1f   :  { %469 = vmatpush3.bf16.msra.mxu0 %v525_v17  ;;  %509 = vmatpush3.bf16.msra.mxu1 %v525_v17 }
  0x22   :  { %244 = vmatmul.mubr.bf16.vlgmr.msra.gmra.mxu0 %v526_v18  ;;  %260 = vmatmul.mubr.bf16.vlgmr.msra.gmra.mxu1 %v529_v19 }
  0x23   :  { %251 = vmatprep.mubr.bf16.mxu0 %v532_v20  ;;  %267 = vmatprep.mubr.bf16.mxu1 %v535_v21 }
  0x2a   :  { %252 = vmatmul.mubr.bf16.gmra.mxu0 %v534_v22  ;;  %268 = vmatmul.mubr.bf16.gmra.mxu1 %v537_v23 }
  0xe2   :  { %v470_v24 = vpop.f32.mrf.mxu0  ;;  %v482_v25 = vpop.f32.mrf.mxu1 }
  0xe4   :  { %v471_v26 = vpop.f32.mrf.mxu0  ;;  %v483_v27 = vpop.f32.mrf.mxu1 }
  0xe5   :  { %v484_v30 = vadd.f32 %v483_v27, %v482_v25  ;;  %v472_v33 = vadd.f32 %v471_v26, %v470_v24 }
  0xe6   :  { %v473_v28 = vpop.f32.mrf.mxu0  ;;  %v485_v29 = vpop.f32.mrf.mxu1 }
  0xe7   :  { %v356_v44 = vmul.f32 %v472_v33, %v472_v33  ;;  %v360_v61 = vmul.f32 %v484_v30, %v484_v30 }
  0xe8   :  { %v474_v31 = vpop.f32.mrf.mxu0  ;;  %v486_v32 = vpop.f32.mrf.mxu1 }
  0xe9   :  { %v475_v34 = vadd.f32 %v474_v31, %v473_v28  ;;  %v487_v35 = vadd.f32 %v486_v32, %v485_v29 }
  0xea   :  { %v476_v36 = vpop.f32.mrf.mxu0  ;;  %v488_v37 = vpop.f32.mrf.mxu1 }
  0xeb   :  { %v434_v38 = vpack.c.bf16 %v475_v34, %v472_v33  ;;  %v444_v39 = vpack.c.bf16 %v487_v35, %v484_v30  ;;  %v357_v40 = vmul.f32 %v475_v34, %v475_v34  ;;  %v343_v47 = vadd.f32 %v475_v34, %v472_v33 }
  0xec   :  { %v477_v41 = vpop.f32.mrf.mxu0  ;;  %v489_v42 = vpop.f32.mrf.mxu1  ;;  %v361_v0 = vmul.f32 %v487_v35, %v487_v35 }
  0xed   :  { %435 = vst [vmem:[%s655_s2] sm:$0xff] %v434_v38   ;;  %452 = vst [vmem:[%s655_s2 + $0x10] sm:$0xff] %v444_v39   ;;  %v478_v43 = vadd.f32 %v477_v41, %v476_v36  ;;  %v490_v49 = vadd.f32 %v489_v42, %v488_v37  ;;  %v364_v50 = vadd.f32 %v357_v40, %v356_v44 }
  0xee   :  { %v479_v45 = vpop.f32.mrf.mxu0  ;;  %v491_v46 = vpop.f32.mrf.mxu1 }
  0xef   :  { %v358_v48 = vmul.f32 %v478_v43, %v478_v43  ;;  %v344_v53 = vadd.f32 %v478_v43, %v343_v47  ;;  %v362_v3 = vmul.f32 %v490_v49, %v490_v49 }
  0xf0   :  { %v480_v51 = vpop.f32.mrf.mxu0  ;;  %v492_v52 = vpop.f32.mrf.mxu1 }
  0xf1   :  { %v481_v54 = vadd.f32 %v480_v51, %v479_v45  ;;  %v493_v55 = vadd.f32 %v492_v52, %v491_v46  ;;  %v365_v56 = vadd.f32 %v364_v50, %v358_v48 }
  0xf3   :  { %v439_v57 = vpack.c.bf16 %v481_v54, %v478_v43  ;;  %v345_v58 = vadd.f32 %v481_v54, %v344_v53  ;;  %v359_v59 = vmul.f32 %v481_v54, %v481_v54  ;;  %v449_v60 = vpack.c.bf16 %v493_v55, %v490_v49 }
  0xf4   :  { %v363_v7 = vmul.f32 %v493_v55, %v493_v55 }
  0xf5   :  { %451 = vst [vmem:[%s655_s2 + $0x8] sm:$0xff] %v439_v57   ;;  %v346_v62 = vadd.f32 %v484_v30, %v345_v58  ;;  %v366_v63 = vadd.f32 %v365_v56, %v359_v59  ;;  %453 = vst [vmem:[%s655_s2 + $0x18] sm:$0xff] %v449_v60  }
  0xf7   :  { %v367_v1 = vadd.f32 %v366_v63, %v360_v61  ;;  %v347_v2 = vadd.f32 %v487_v35, %v346_v62 }
  0xf9   :  { %v348_v4 = vadd.f32 %v490_v49, %v347_v2  ;;  %v368_v5 = vadd.f32 %v367_v1, %v361_v0 }
  0xfb   :  { %v349_v6 = vadd.f32 %v493_v55, %v348_v4  ;;  %v369_v8 = vadd.f32 %v368_v5, %v362_v3 }
  0xfd   :  { %v350_v9 = vrot.slane %v349_v6, 4  ;;  %v370_v10 = vadd.f32 %v369_v8, %v363_v7 }
  0xff   :  { %v351_v11 = vadd.f32 %v350_v9, %v349_v6  ;;  %v371_v12 = vrot.slane %v370_v10, 4 }
 0x101   :  { %v352_v13 = vrot.slane %v351_v11, 2  ;;  %v372_v14 = vadd.f32 %v371_v12, %v370_v10 }
 0x103   :  { %v353_v15 = vadd.f32 %v352_v13, %v351_v11  ;;  %v373_v16 = vrot.slane %v372_v14, 2 }
 0x105   :  { %v354_v17 = vrot.slane %v353_v15, 1  ;;  %v374_v18 = vadd.f32 %v373_v16, %v372_v14 }
 0x107   :  { %v355_v19 = vadd.f32 %v354_v17, %v353_v15  ;;  %v375_v20 = vrot.slane %v374_v18, 1 }
 0x109   :  { %v376_v21 = vadd.f32 %v375_v20, %v374_v18  ;;  %377 = vst [vmem:[%s656_s3] sm:$0xff] %v355_v19 }
 0x10b   :  { %378 = vst [vmem:[%s657_s4] sm:$0xff] %v376_v21 }

// kernel: forward.87
= control target key start
LH: loop header
LB: loop body
LE: loop exit
PB: predicated region body
PF: predicated region fallthrough
CT: control target
= control target key end

     0   :  { %v243_v0 = vmov 0.0   ;;  %vm244_vm0 = vmmov 0   ;;  %s306_s1 = inlined_call_operand.vmem [shape: bf16[128,128], index: 1, kind: input, shape index: {}]   ;;  %s307_s0 = inlined_call_operand.vmem [shape: bf16[16,128], index: 0, kind: input, shape index: {}]   ;;  %s308_s2 = inlined_call_operand.vmem [shape: bf16[16,128], index: 2, kind: output, shape index: {0}]   ;;  %s309_s3 = inlined_call_operand.vmem [shape: f32[8,128], index: 3, kind: output, shape index: {1}]   ;;  %s310_s4 = inlined_call_operand.vmem [shape: f32[8,128], index: 4, kind: output, shape index: {2}]  }
   0x1   :  { %212 = vmatprep.subr.bf16.mxu0 %v243_v0  ;;  %v234_v1 = vld [vmem:[%s306_s1 + $0x38] sm:$0xff]   ;;  %228 = vmatprep.mubr.msk.bf16.mxu0 %vm244_vm0, %v243_v0  ;;  %v235_v2 = vld [vmem:[%s306_s1 + $0x30] sm:$0xff]   ;;  %v236_v3 = vld [vmem:[%s306_s1 + $0x28] sm:$0xff]  }
   0x2   :  { %213 = vmatpush3.bf16.msra.mxu0 %v234_v1  ;;  %v237_v4 = vld [vmem:[%s306_s1 + $0x20] sm:$0xff]   ;;  %v238_v5 = vld [vmem:[%s306_s1 + $0x18] sm:$0xff]   ;;  %v239_v6 = vld [vmem:[%s306_s1 + $0x10] sm:$0xff]  }
   0x3   :  { %214 = vmatprep.subr.bf16.mxu0 %v243_v0  ;;  %v240_v7 = vld [vmem:[%s306_s1 + $0x8] sm:$0xff]   ;;  %v241_v8 = vld [vmem:[%s306_s1] sm:$0xff]  }
   0x4   :  { %v242_v9 = vld [vmem:[%s307_s0] sm:$0xff]  }
   0x6   :  { %215 = vmatpush3.bf16.msra.mxu0 %v235_v2 }
   0x7   :  { %216 = vmatprep.subr.bf16.mxu0 %v243_v0 }
   0xa   :  { %217 = vmatpush3.bf16.msra.mxu0 %v236_v3 }
   0xb   :  { %218 = vmatprep.subr.bf16.mxu0 %v243_v0 }
   0xe   :  { %219 = vmatpush3.bf16.msra.mxu0 %v237_v4 }
   0xf   :  { %220 = vmatprep.subr.bf16.mxu0 %v243_v0 }
  0x12   :  { %221 = vmatpush3.bf16.msra.mxu0 %v238_v5 }
  0x13   :  { %222 = vmatprep.subr.bf16.mxu0 %v243_v0 }
  0x16   :  { %223 = vmatpush3.bf16.msra.mxu0 %v239_v6 }
  0x17   :  { %224 = vmatprep.subr.bf16.mxu0 %v243_v0 }
  0x1a   :  { %225 = vmatpush3.bf16.msra.mxu0 %v240_v7 }
  0x1b   :  { %226 = vmatprep.subr.bf16.mxu0 %v243_v0 }
  0x1e   :  { %227 = vmatpush3.bf16.msra.mxu0 %v241_v8 }
  0x21   :  { %229 = vmatmul.mubr.bf16.vlgmr.msra.gmra.mxu0 %v242_v9 }
  0xe1   :  { %v129_v10 = vpop.f32.mrf.mxu0 }
  0xe2   :  { %v162_v13 = vmul.f32 %v129_v10, %v129_v10 }
  0xe3   :  { %v230_v11 = vpop.f32.mrf.mxu0 }
  0xe5   :  { %v132_v12 = vpop.f32.mrf.mxu0 }
  0xe6   :  { %v201_v14 = vpack.c.bf16 %v132_v12, %v129_v10  ;;  %v155_v15 = vadd.f32 %v132_v12, %v129_v10  ;;  %v163_v16 = vmul.f32 %v132_v12, %v132_v12 }
  0xe7   :  { %v231_v17 = vpop.f32.mrf.mxu0 }
  0xe8   :  { %202 = vst [vmem:[%s308_s2] sm:$0xff] %v201_v14   ;;  %v156_v18 = vrot.slane %v155_v15, 4  ;;  %v164_v19 = vadd.f32 %v163_v16, %v162_v13 }
  0xea   :  { %v157_v20 = vadd.f32 %v156_v18, %v155_v15  ;;  %v165_v21 = vrot.slane %v164_v19, 4 }
  0xec   :  { %v158_v22 = vrot.slane %v157_v20, 2  ;;  %v166_v23 = vadd.f32 %v165_v21, %v164_v19 }
  0xee   :  { %v159_v24 = vadd.f32 %v158_v22, %v157_v20  ;;  %v167_v25 = vrot.slane %v166_v23, 2 }
  0xf0   :  { %v160_v26 = vrot.slane %v159_v24, 1  ;;  %v168_v27 = vadd.f32 %v167_v25, %v166_v23 }
  0xf2   :  { %v161_v28 = vadd.f32 %v160_v26, %v159_v24  ;;  %v169_v29 = vrot.slane %v168_v27, 1 }
  0xf4   :  { %v170_v30 = vadd.f32 %v169_v29, %v168_v27  ;;  %171 = vst [vmem:[%s309_s3] sm:$0xff] %v161_v28 }
  0xf6   :  { %172 = vst [vmem:[%s310_s4] sm:$0xff] %v170_v30 }

// kernel: forward.84
= control target key start
LH: loop header
LB: loop body
LE: loop exit
PB: predicated region body
PF: predicated region fallthrough
CT: control target
= control target key end

     0   :  { %s867_s15 = smov 0   ;;  %s869_s16 = smov 0   ;;  %s958_s0 = inlined_call_operand.vmem [shape: bf16[16,640], index: 0, kind: input, shape index: {}]   ;;  %s959_s1 = inlined_call_operand.vmem [shape: bf16[640,128], index: 1, kind: input, shape index: {}]   ;;  %s960_s2 = inlined_call_operand.vmem [shape: bf16[16,128], index: 2, kind: output, shape index: {0}]   ;;  %s961_s3 = inlined_call_operand.vmem [shape: f32[8,128], index: 3, kind: output, shape index: {1}]   ;;  %s962_s4 = inlined_call_operand.vmem [shape: f32[8,128], index: 4, kind: output, shape index: {2}]  }
   0x1   :  { %s871_s17 = smov 0   ;;  %s873_s18 = smov 0  }
   0x2   :  { %s875_s19 = smov 0  }
   0x3 LB: > { %s27_s20 = sadd.s32 1, %s833_s18  ;;  %p50_p1 = scmp.ne.s32.totalorder %s825_s16, %s821_s15  ;;  %s837_s19 = sphi %s875_s19, %s15_s19   ;;  %s833_s18 = sphi %s873_s18, %s966_s18   ;;  %s829_s17 = sphi %s871_s17, %s965_s17   ;;  %s825_s16 = sphi %s869_s16, %s964_s16   ;;  %s821_s15 = sphi %s867_s15, %s963_s15  }
   0x4   : > { %p28_p0 = scmp.ge.s32.totalorder %s27_s20, 5  ;;  %p51_p2 = scmp.eq.s32.totalorder %s837_s19, 0 }
   0x5   : > { %s43_s22 = sadd.s32 1, %s825_s16  ;;  %p685_p5 = scmp.ge.s32.totalorder %s837_s19, 5 }
   0x6   : > { %s968_s20 = smov (%p28_p0, %s27_s20), 0  ;;  %p52_p3 = por %p51_p2, %p50_p1 }
   0x7   : > { %s39_s21 = ssub.s32 %s833_s18, %s968_s20  ;;  %188 = sbr.rel (%p685_p5) target bundleno = 17 (0x11), region = 16 }
   0x8   : > { %p41_p4 = scmp.eq.s32.totalorder %s39_s21, 0 }
   0xa   : > { %s902_s23 = scalar_select %p41_p4, %s825_s16, %s43_s22  }
   0xc   : > { %191 = sbr.rel (!%p52_p3) target bundleno = 17 (0x11), region = 20  ;;  %s193_s24 = sand.u32 (%p52_p3), 1, %s825_s16  }
   0xd   : > { %s687_s25 = sshll.u32 (%p52_p3), %s833_s18, 2  ;;  %s686_s26 = sshll.u32 (%p52_p3), %s193_s24, 3 }
   0xe   : > { %s200_s29 = scalar_lea.vmem (%p52_p3), %s958_s0, %s687_s25  ;;  %s195_s30 = scalar_lea.vmem (%p52_p3), [#allocation3], %s686_s26 }
   0xf   : > { %v217_v0 = vld [vmem:[%s200_s29] sm:$0xf] (%p52_p3)  ;;  %v219_v1 = vld [vmem:[%s200_s29 + $0x14] sm:$0xf] (%p52_p3) }
  0x10   : > { %218 = vst [vmem:[%s195_s30] sm:$0xf] (%p52_p3), %v217_v0  ;;  %220 = vst [vmem:[%s195_s30 + $0x4] sm:$0xf] (%p52_p3), %v219_v1 }
  0x11 PF: > { %p688_p6 = scmp.ge.s32.totalorder %s837_s19, 1  ;;  %p259_p7 = scmp.lt.s32.totalorder %s837_s19, 6 }
  0x13   : > { %p260_p8 = pnand %p688_p6, %p259_p7 }
  0x14   : > { %s266_s5 = sand.u32 (!%p260_p8), 1, %s821_s15   ;;  %s690_s6 = sshll.u32 (!%p260_p8), %s829_s17, 4 }
  0x15   : > { %263 = sbr.rel (%p260_p8) target bundleno = 290 (0x122), region = 65  ;;  %s914_s7 = sshll.u32 (!%p260_p8), %s266_s5, 3 }
  0x16   : > { %p318_p9 = scmp.lt.s32.totalorder (!%p260_p8), %s690_s6, 79  ;;  %s268_s12 = scalar_lea.vmem (!%p260_p8), [#allocation3], %s914_s7 }
  0x17   : > { %p692_p10 = scmp.ne.s32.totalorder (!%p260_p8), %s829_s17, 0 }
  0x1a   : > { %s970_s6 = smov (!%p318_p9, %s690_s6), 79  ;;  %353 = sbr.rel (%p692_p10) target bundleno = 33 (0x21), region = 73 }
  0x1b   : > { %s691_s8 = sshll.u32 %s970_s6, 2 }
  0x1c   : > { %s919_s11 = scalar_lea.vmem %s959_s1, %s691_s8 }
  0x1f   : > { %v839_v2 = vmov 0.0  }
  0x20   : > { %354 = vst [vmem:[#allocation2] sm:$0xff] %v839_v2  ;;  %355 = vst [vmem:[#allocation2 + $0x8] sm:$0xff] %v839_v2 }
  0x21 PF: > { %v790_v3 = vld [vmem:[%s919_s11 + $0x38] sm:$0xff]   ;;  %v840_v4 = vmov 0.0   ;;  %v791_v5 = vld [vmem:[%s919_s11 + $0x30] sm:$0xff]   ;;  %vm841_vm0 = vmmov 0   ;;  %v792_v6 = vld [vmem:[%s919_s11 + $0x28] sm:$0xff]   ;;  %p702_p11 = scmp.ne.s32.totalorder %s829_s17, 4 }
  0x22   : > { %727 = vmatprep.subr.bf16.mxu0 %v840_v4  ;;  %743 = vmatprep.mubr.msk.bf16.mxu0 %vm841_vm0, %v840_v4  ;;  %v793_v7 = vld [vmem:[%s919_s11 + $0x20] sm:$0xff]   ;;  %v794_v8 = vld [vmem:[%s919_s11 + $0x18] sm:$0xff]   ;;  %v795_v9 = vld [vmem:[%s919_s11 + $0x10] sm:$0xff]  }
  0x23   : > { %728 = vmatpush3.bf16.msra.mxu0 %v790_v3  ;;  %v796_v10 = vld [vmem:[%s919_s11 + $0x8] sm:$0xff]   ;;  %v797_v11 = vld [vmem:[%s919_s11] sm:$0xff]   ;;  %v798_v12 = vld [vmem:[%s268_s12] sm:$0xff]  }
  0x24   : > { %729 = vmatprep.subr.bf16.mxu0 %v840_v4 }
  0x27   : > { %730 = vmatpush3.bf16.msra.mxu0 %v791_v5  ;;  %v356_v13 = vld [vmem:[#allocation2] sm:$0xff]  ;;  %v357_v17 = vld [vmem:[#allocation2 + $0x8] sm:$0xff] }
  0x28   : > { %731 = vmatprep.subr.bf16.mxu0 %v840_v4 }
  0x2b   : > { %732 = vmatpush3.bf16.msra.mxu0 %v792_v6 }
  0x2c   : > { %733 = vmatprep.subr.bf16.mxu0 %v840_v4 }
  0x2f   : > { %734 = vmatpush3.bf16.msra.mxu0 %v793_v7 }
  0x30   : > { %735 = vmatprep.subr.bf16.mxu0 %v840_v4 }
  0x33   : > { %736 = vmatpush3.bf16.msra.mxu0 %v794_v8 }
  0x34   : > { %737 = vmatprep.subr.bf16.mxu0 %v840_v4 }
  0x37   : > { %738 = vmatpush3.bf16.msra.mxu0 %v795_v9 }
  0x38   : > { %739 = vmatprep.subr.bf16.mxu0 %v840_v4 }
  0x3b   : > { %740 = vmatpush3.bf16.msra.mxu0 %v796_v10 }
  0x3c   : > { %741 = vmatprep.subr.bf16.mxu0 %v840_v4 }
  0x3f   : > { %742 = vmatpush3.bf16.msra.mxu0 %v797_v11 }
  0x42   : > { %744 = vmatmul.mubr.bf16.vlgmr.msra.gmra.mxu0 %v798_v12 }
 0x102   : > { %v464_v14 = vpop.f32.mrf.mxu0 }
 0x103   : > { %v471_v15 = vadd.f32 %v464_v14, %v356_v13 }
 0x104   : > { %v745_v16 = vpop.f32.mrf.mxu0 }
 0x105   : > { %473 = vst [vmem:[#allocation2] sm:$0xff] %v471_v15  ;;  %478 = sbr.rel (%p702_p11) target bundleno = 290 (0x122), region = 77 }
 0x106   : > { %v467_v18 = vpop.f32.mrf.mxu0 }
 0x107   : > { %v472_v19 = vadd.f32 %v467_v18, %v357_v17 }
 0x108   : > { %v746_v20 = vpop.f32.mrf.mxu0 }
 0x109   : > { %474 = vst [vmem:[#allocation2 + $0x8] sm:$0xff] %v472_v19 }
 0x10c   : > { %v479_v21 = vld [vmem:[#allocation2] sm:$0xff] }
 0x10d   : > { %v498_v25 = vmul.f32 %v479_v21, %v479_v21 }
 0x110   : > { %v480_v22 = vld [vmem:[#allocation2 + $0x8] sm:$0xff] }
 0x111   : > { %v716_v23 = vpack.c.bf16 %v480_v22, %v479_v21  ;;  %v491_v24 = vadd.f32 %v480_v22, %v479_v21  ;;  %v499_v26 = vmul.f32 %v480_v22, %v480_v22 }
 0x113   : > { %717 = vst [vmem:[%s960_s2] sm:$0xff] %v716_v23   ;;  %v492_v27 = vrot.slane %v491_v24, 4  ;;  %v500_v28 = vadd.f32 %v499_v26, %v498_v25 }
 0x115   : > { %v493_v29 = vadd.f32 %v492_v27, %v491_v24  ;;  %v501_v30 = vrot.slane %v500_v28, 4 }
 0x117   : > { %v494_v31 = vrot.slane %v493_v29, 2  ;;  %v502_v32 = vadd.f32 %v501_v30, %v500_v28 }
 0x119   : > { %v495_v33 = vadd.f32 %v494_v31, %v493_v29  ;;  %v503_v34 = vrot.slane %v502_v32, 2 }
 0x11b   : > { %v496_v35 = vrot.slane %v495_v33, 1  ;;  %v504_v36 = vadd.f32 %v503_v34, %v502_v32 }
 0x11d   : > { %v497_v37 = vadd.f32 %v496_v35, %v495_v33  ;;  %v505_v38 = vrot.slane %v504_v36, 1 }
 0x11f   : > { %507 = vst [vmem:[%s961_s3] sm:$0xff] %v497_v37  ;;  %v506_v39 = vadd.f32 %v505_v38, %v504_v36 }
 0x121   : > { %508 = vst [vmem:[%s962_s4] sm:$0xff] %v506_v39 }
 0x122 PF: > { %s15_s19 = sadd.s32 1, %s837_s19   ;;  %s963_s15 = smov %s825_s16 }
 0x123   : > { %p12_p12 = scmp.ge.s32.totalorder %s15_s19, 7   ;;  %s964_s16 = smov %s902_s23 }
 0x124   : > { %s965_s17 = smov %s833_s18  ;;  %s966_s18 = smov %s968_s20 }
 0x125   :  { %14 = sbr.rel (!%p12_p12) target bundleno = 3 (0x3), region = 139 }

// kernel: forward.85
= control target key start
LH: loop header
LB: loop body
LE: loop exit
PB: predicated region body
PF: predicated region fallthrough
CT: control target
= control target key end

     0   :  { %s99_s0 = inlined_call_operand.vmem [shape: bf16[16,128], index: 0, kind: input, shape index: {}]   ;;  %s100_s1 = inlined_call_operand.vmem [shape: f32[1,128], index: 1, kind: input, shape index: {}]   ;;  %s101_s2 = inlined_call_operand.vmem [shape: f32[1,128], index: 2, kind: input, shape index: {}]   ;;  %s102_s3 = inlined_call_operand.vmem [shape: bf16[16,128], index: 3, kind: output, shape index: {}]  }
   0x1   :  { %v59_v0 = vld [vmem:[%s99_s0] sm:$0xff]  }
   0x2   :  { %v52_v1 = vld [vmem:[%s100_s1] ss:$0 sm:$0xff]  ;;  %v60_v2 = vunpack.c.l.bf16 %v59_v0  ;;  %v61_v3 = vunpack.c.h.bf16 %v59_v0 }
   0x3   :  { %v53_v4 = vld [vmem:[%s101_s2] ss:$0 sm:$0xff] }
   0x4   :  { %v25_v5 = vmul.f32 %v60_v2, %v52_v1  ;;  %v26_v6 = vmul.f32 %v61_v3, %v52_v1 }
   0x6   :  { %v34_v7 = vadd.f32 %v53_v4, %v25_v5  ;;  %v35_v8 = vadd.f32 %v53_v4, %v26_v6 }
   0x8   :  { %v36_v9 = vmax.f32 %v34_v7, 0.0  ;;  %v37_v10 = vmax.f32 %v35_v8, 0.0 }
   0xa   :  { %v65_v11 = vpack.c.bf16 %v37_v10, %v36_v9 }
   0xc   :  { %66 = vst [vmem:[%s102_s3] sm:$0xff] %v65_v11  }

// kernel: forward.88
= control target key start
LH: loop header
LB: loop body
LE: loop exit
PB: predicated region body
PF: predicated region fallthrough
CT: control target
= control target key end

     0   :  { %s164_s0 = inlined_call_operand.vmem [shape: bf16[16,128], index: 0, kind: input, shape index: {}]   ;;  %s165_s1 = inlined_call_operand.vmem [shape: f32[1,128], index: 1, kind: input, shape index: {}]   ;;  %s166_s2 = inlined_call_operand.vmem [shape: f32[1,128], index: 2, kind: input, shape index: {}]   ;;  %s167_s3 = inlined_call_operand.vmem [shape: bf16[16,128], index: 3, kind: input, shape index: {}]   ;;  %s168_s4 = inlined_call_operand.vmem [shape: f32[1,128], index: 4, kind: input, shape index: {}]   ;;  %s169_s5 = inlined_call_operand.vmem [shape: f32[1,128], index: 5, kind: input, shape index: {}]   ;;  %s170_s6 = inlined_call_operand.vmem [shape: bf16[16,128], index: 6, kind: output, shape index: {}]  }
   0x1   :  { %v96_v0 = vld [vmem:[%s164_s0] sm:$0xff]  }
   0x2   :  { %v87_v1 = vld [vmem:[%s165_s1] ss:$0 sm:$0xff]  ;;  %v97_v2 = vunpack.c.l.bf16 %v96_v0  ;;  %v98_v3 = vunpack.c.h.bf16 %v96_v0 }
   0x3   :  { %v100_v4 = vld [vmem:[%s167_s3] sm:$0xff]  }
   0x4   :  { %v89_v5 = vld [vmem:[%s168_s4] ss:$0 sm:$0xff]  ;;  %v101_v7 = vunpack.c.l.bf16 %v100_v4  ;;  %v102_v8 = vunpack.c.h.bf16 %v100_v4  ;;  %v34_v9 = vmul.f32 %v97_v2, %v87_v1  ;;  %v35_v10 = vmul.f32 %v98_v3, %v87_v1 }
   0x5   :  { %v88_v6 = vld [vmem:[%s166_s2] ss:$0 sm:$0xff] }
   0x6   :  { %v90_v11 = vld [vmem:[%s169_s5] ss:$0 sm:$0xff]  ;;  %v58_v12 = vmul.f32 %v101_v7, %v89_v5  ;;  %v59_v13 = vmul.f32 %v102_v8, %v89_v5  ;;  %v43_v14 = vadd.f32 %v88_v6, %v34_v9  ;;  %v44_v15 = vadd.f32 %v88_v6, %v35_v10 }
   0x8   :  { %v67_v16 = vadd.f32 %v90_v11, %v58_v12  ;;  %v68_v17 = vadd.f32 %v90_v11, %v59_v13  ;;  %v45_v18 = vmax.f32 %v43_v14, 0.0  ;;  %v46_v19 = vmax.f32 %v44_v15, 0.0 }
   0xa   :  { %v69_v20 = vadd.f32 %v67_v16, %v45_v18  ;;  %v70_v21 = vadd.f32 %v68_v17, %v46_v19 }
   0xc   :  { %v71_v22 = vmax.f32 %v69_v20, 0.0  ;;  %v72_v23 = vmax.f32 %v70_v21, 0.0 }
   0xe   :  { %v106_v24 = vpack.c.bf16 %v72_v23, %v71_v22 }
  0x10   :  { %107 = vst [vmem:[%s170_s6] sm:$0xff] %v106_v24  }

// kernel: forward.101
= control target key start
LH: loop header
LB: loop body
LE: loop exit
PB: predicated region body
PF: predicated region fallthrough
CT: control target
= control target key end

     0   :  { %s1106_s15 = smov 0   ;;  %s1108_s16 = smov 0   ;;  %s1213_s0 = inlined_call_operand.vmem [shape: bf16[16,1152], index: 0, kind: input, shape index: {}]   ;;  %s1214_s1 = inlined_call_operand.vmem [shape: bf16[1152,128], index: 1, kind: input, shape index: {}]   ;;  %s1215_s2 = inlined_call_operand.vmem [shape: bf16[16,128], index: 2, kind: output, shape index: {0}]   ;;  %s1216_s3 = inlined_call_operand.vmem [shape: f32[8,128], index: 3, kind: output, shape index: {1}]   ;;  %s1217_s4 = inlined_call_operand.vmem [shape: f32[8,128], index: 4, kind: output, shape index: {2}]  }
   0x1   :  { %s1110_s17 = smov 0   ;;  %s1112_s18 = smov 0  }
   0x2   :  { %s1114_s19 = smov 0  }
   0x3 LB: > { %s27_s20 = sadd.s32 1, %s1072_s18  ;;  %p50_p1 = scmp.ne.s32.totalorder %s1064_s16, %s1060_s15  ;;  %s1076_s19 = sphi %s1114_s19, %s15_s19   ;;  %s1072_s18 = sphi %s1112_s18, %s1221_s18   ;;  %s1068_s17 = sphi %s1110_s17, %s1220_s17   ;;  %s1064_s16 = sphi %s1108_s16, %s1219_s16   ;;  %s1060_s15 = sphi %s1106_s15, %s1218_s15  }
   0x4   : > { %p28_p0 = scmp.ge.s32.totalorder %s27_s20, 3  ;;  %p51_p2 = scmp.eq.s32.totalorder %s1076_s19, 0 }
   0x5   : > { %s43_s22 = sadd.s32 1, %s1064_s16  ;;  %p861_p5 = scmp.ge.s32.totalorder %s1076_s19, 3 }
   0x6   : > { %s1223_s20 = smov (%p28_p0, %s27_s20), 0  ;;  %p52_p3 = por %p51_p2, %p50_p1 }
   0x7   : > { %s39_s21 = ssub.s32 %s1072_s18, %s1223_s20  ;;  %188 = sbr.rel (%p861_p5) target bundleno = 19 (0x13), region = 16 }
   0x8   : > { %p41_p4 = scmp.eq.s32.totalorder %s39_s21, 0 }
   0xa   : > { %s1141_s23 = scalar_select %p41_p4, %s1064_s16, %s43_s22  }
   0xc   : > { %191 = sbr.rel (!%p52_p3) target bundleno = 19 (0x13), region = 20  ;;  %s193_s24 = sand.u32 (%p52_p3), 1, %s1064_s16  }
   0xd   : > { %s906_s25 = smul.u32 (%p52_p3), 12, %s1072_s18 }
   0xe   : > { %s965_s26 = smul.u32 (%p52_p3), 24, %s193_s24 }
   0xf   : > { %s201_s29 = scalar_lea.vmem (%p52_p3), %s1213_s0, %s906_s25 }
  0x10   : > { %v216_v0 = vld [vmem:[%s201_s29] sm:$0xff] (%p52_p3)  ;;  %v863_v2 = vld [vmem:[%s201_s29 + $0x8] sm:$0xf] (%p52_p3)  ;;  %s195_s30 = scalar_lea.vmem (%p52_p3), [#allocation3], %s965_s26  ;;  %v865_v3 = vld [vmem:[%s201_s29 + $0x2c] sm:$0xf] (%p52_p3) }
  0x11   : > { %v218_v1 = vld [vmem:[%s201_s29 + $0x24] sm:$0xff]  ;;  %217 = vst [vmem:[%s195_s30] sm:$0xff] %v216_v0  ;;  %864 = vst [vmem:[%s195_s30 + $0x8] sm:$0xf] %v863_v2 }
  0x12   : > { %219 = vst [vmem:[%s195_s30 + $0xc] sm:$0xff] %v218_v1  ;;  %866 = vst [vmem:[%s195_s30 + $0x14] sm:$0xf] %v865_v3 }
  0x13 PF: > { %p867_p6 = scmp.ge.s32.totalorder %s1076_s19, 1  ;;  %p248_p7 = scmp.lt.s32.totalorder %s1076_s19, 4 }
  0x15   : > { %p249_p8 = pnand %p867_p6, %p248_p7 }
  0x16   : > { %s255_s5 = sand.u32 (!%p249_p8), 1, %s1060_s15   ;;  %s307_s6 = smul.u32 (!%p249_p8), 48, %s1068_s17 }
  0x17   : > { %252 = sbr.rel (%p249_p8) target bundleno = 299 (0x12b), region = 50  ;;  %p869_p10 = scmp.ne.s32.totalorder (!%p249_p8), %s1068_s17, 0 }
  0x18   : > { %s966_s7 = smul.u32 (!%p249_p8), 24, %s255_s5  ;;  %p308_p9 = scmp.lt.s32.totalorder (!%p249_p8), %s307_s6, 143 }
  0x1a   : > { %s1158_s12 = scalar_lea.vmem (!%p249_p8), [#allocation3], %s966_s7 }
  0x1c   : > { %s1225_s6 = smov (!%p308_p9, %s307_s6), 143  ;;  %343 = sbr.rel (%p869_p10) target bundleno = 35 (0x23), region = 58 }
  0x1d   : > { %s868_s8 = sshll.u32 %s1225_s6, 2 }
  0x1e   : > { %s1156_s11 = scalar_lea.vmem %s1214_s1, %s868_s8 }
  0x21   : > { %v1078_v4 = vmov 0.0  }
  0x22   : > { %344 = vst [vmem:[#allocation2] sm:$0xff] %v1078_v4  ;;  %345 = vst [vmem:[#allocation2 + $0x8] sm:$0xff] %v1078_v4 }
  0x23 PF: > { %v1010_v5 = vld [vmem:[%s1156_s11 + $0x78] sm:$0xff]   ;;  %v1079_v6 = vmov 0.0   ;;  %vm1080_vm0 = vmmov 0   ;;  %v1013_v9 = vld [vmem:[%s1156_s11 + $0x70] sm:$0xff]   ;;  %v1016_v12 = vld [vmem:[%s1156_s11 + $0x68] sm:$0xff]   ;;  %p897_p11 = scmp.ne.s32.totalorder %s1068_s17, 2 }
  0x24   : > { %945 = vmatprep.subr.bf16.mxu1 %v1079_v6  ;;  %v1011_v7 = vld [vmem:[%s1156_s11 + $0xb8] sm:$0xff]   ;;  %914 = vmatprep.subr.bf16.mxu0 %v1010_v5  ;;  %v1014_v10 = vld [vmem:[%s1156_s11 + $0xb0] sm:$0xff]   ;;  %v1017_v13 = vld [vmem:[%s1156_s11 + $0xa8] sm:$0xff]  }
  0x25   : > { %v1012_v8 = vld [vmem:[%s1156_s11 + $0x38] sm:$0xff]   ;;  %961 = vmatprep.mubr.msk.bf16.mxu1 %vm1080_vm0, %v1079_v6  ;;  %946 = vmatpush3.bf16.msra.mxu1 %v1011_v7  ;;  %v1015_v11 = vld [vmem:[%s1156_s11 + $0x30] sm:$0xff]   ;;  %v1018_v14 = vld [vmem:[%s1156_s11 + $0x28] sm:$0xff]  }
  0x26   : > { %915 = vmatpush3.bf16.msra.mxu0 %v1012_v8  ;;  %947 = vmatprep.subr.bf16.mxu1 %v1079_v6  ;;  %v1019_v15 = vld [vmem:[%s1156_s11 + $0x60] sm:$0xff]   ;;  %v1022_v18 = vld [vmem:[%s1156_s11 + $0x58] sm:$0xff]   ;;  %v1025_v21 = vld [vmem:[%s1156_s11 + $0x50] sm:$0xff]  }
  0x27   : > { %916 = vmatprep.subr.bf16.mxu0 %v1013_v9  ;;  %v1020_v16 = vld [vmem:[%s1156_s11 + $0xa0] sm:$0xff]   ;;  %v1023_v19 = vld [vmem:[%s1156_s11 + $0x98] sm:$0xff]   ;;  %v1026_v22 = vld [vmem:[%s1156_s11 + $0x90] sm:$0xff]  }
  0x28   : > { %v1021_v17 = vld [vmem:[%s1156_s11 + $0x20] sm:$0xff]   ;;  %v1024_v20 = vld [vmem:[%s1156_s11 + $0x18] sm:$0xff]   ;;  %v1027_v23 = vld [vmem:[%s1156_s11 + $0x10] sm:$0xff]  }
  0x29   : > { %948 = vmatpush3.bf16.msra.mxu1 %v1014_v10  ;;  %v1028_v24 = vld [vmem:[%s1156_s11 + $0x48] sm:$0xff]   ;;  %v1031_v27 = vld [vmem:[%s1156_s11 + $0x40] sm:$0xff]  }
  0x2a   : > { %917 = vmatpush3.bf16.msra.mxu0 %v1015_v11  ;;  %949 = vmatprep.subr.bf16.mxu1 %v1079_v6  ;;  %v1029_v25 = vld [vmem:[%s1156_s11 + $0x88] sm:$0xff]   ;;  %v1032_v29 = vld [vmem:[%s1156_s11 + $0x80] sm:$0xff]  }
  0x2b   : > { %918 = vmatprep.subr.bf16.mxu0 %v1016_v12  ;;  %v1030_v26 = vld [vmem:[%s1156_s11 + $0x8] sm:$0xff]   ;;  %v1033_v30 = vld [vmem:[%s1156_s11] sm:$0xff]  }
  0x2c   : > { %v1036_v28 = vld [vmem:[%s1158_s12 + $0x4] ss:$12 sps:$4 sm:$0xff]   ;;  %v1037_v31 = vld [vmem:[%s1158_s12 + $0x8] ss:$12 sps:$4 sm:$0xff]   ;;  %v1034_v32 = vld [vmem:[%s1158_s12] ss:$12 sps:$4 sm:$0xff]  }
  0x2d   : > { %950 = vmatpush3.bf16.msra.mxu1 %v1017_v13  ;;  %592 = vmatprep.mubr.bf16.mxu0 %v1036_v28  ;;  %v346_v39 = vld [vmem:[#allocation2] sm:$0xff]  ;;  %v347_v46 = vld [vmem:[#allocation2 + $0x8] sm:$0xff] }
  0x2e   : > { %919 = vmatpush3.bf16.msra.mxu0 %v1018_v14  ;;  %951 = vmatprep.subr.bf16.mxu1 %v1079_v6 }
  0x2f   : > { %920 = vmatprep.subr.bf16.mxu0 %v1019_v15 }
  0x31   : > { %952 = vmatpush3.bf16.msra.mxu1 %v1020_v16 }
  0x32   : > { %921 = vmatpush3.bf16.msra.mxu0 %v1021_v17  ;;  %953 = vmatprep.subr.bf16.mxu1 %v1079_v6 }
  0x33   : > { %922 = vmatprep.subr.bf16.mxu0 %v1022_v18 }
  0x35   : > { %954 = vmatpush3.bf16.msra.mxu1 %v1023_v19 }
  0x36   : > { %923 = vmatpush3.bf16.msra.mxu0 %v1024_v20  ;;  %955 = vmatprep.subr.bf16.mxu1 %v1079_v6 }
  0x37   : > { %924 = vmatprep.subr.bf16.mxu0 %v1025_v21 }
  0x39   : > { %956 = vmatpush3.bf16.msra.mxu1 %v1026_v22 }
  0x3a   : > { %925 = vmatpush3.bf16.msra.mxu0 %v1027_v23  ;;  %957 = vmatprep.subr.bf16.mxu1 %v1079_v6 }
  0x3b   : > { %926 = vmatprep.subr.bf16.mxu0 %v1028_v24 }
  0x3d   : > { %958 = vmatpush3.bf16.msra.mxu1 %v1029_v25 }
  0x3e   : > { %927 = vmatpush3.bf16.msra.mxu0 %v1030_v26  ;;  %959 = vmatprep.subr.bf16.mxu1 %v1079_v6 }
  0x3f   : > { %928 = vmatprep.subr.bf16.mxu0 %v1031_v27 }
  0x41   : > { %960 = vmatpush3.bf16.msra.mxu1 %v1032_v29 }
  0x42   : > { %929 = vmatpush3.bf16.msra.mxu0 %v1033_v30 }
  0x44   : > { %962 = vmatmul.mubr.bf16.vlgmr.msra.gmra.mxu1 %v1037_v31 }
  0x45   : > { %593 = vmatmul.mubr.bf16.vlgmr.msra.gmra.mxu0 %v1034_v32 }
 0x104   : > { %v635_v33 = vpop.f32.mrf.mxu1 }
 0x105   : > { %v930_v34 = vpop.f32.mrf.mxu0 }
 0x106   : > { %v963_v35 = vpop.f32.mrf.mxu1 }
 0x107   : > { %v931_v36 = vpop.f32.mrf.mxu0 }
 0x108   : > { %v932_v37 = vadd.f32 %v931_v36, %v930_v34  ;;  %v638_v38 = vpop.f32.mrf.mxu1 }
 0x109   : > { %v933_v40 = vpop.f32.mrf.mxu0 }
 0x10a   : > { %v636_v41 = vadd.f32 %v932_v37, %v635_v33  ;;  %v964_v42 = vpop.f32.mrf.mxu1 }
 0x10b   : > { %v934_v43 = vpop.f32.mrf.mxu0 }
 0x10c   : > { %v642_v44 = vadd.f32 %v636_v41, %v346_v39  ;;  %v935_v45 = vadd.f32 %v934_v43, %v933_v40 }
 0x10e   : > { %644 = vst [vmem:[#allocation2] sm:$0xff] %v642_v44  ;;  %v639_v47 = vadd.f32 %v935_v45, %v638_v38  ;;  %649 = sbr.rel (%p897_p11) target bundleno = 299 (0x12b), region = 62 }
 0x110   : > { %v643_v48 = vadd.f32 %v639_v47, %v347_v46 }
 0x112   : > { %645 = vst [vmem:[#allocation2 + $0x8] sm:$0xff] %v643_v48 }
 0x115   : > { %v650_v49 = vld [vmem:[#allocation2] sm:$0xff] }
 0x116   : > { %v669_v53 = vmul.f32 %v650_v49, %v650_v49 }
 0x119   : > { %v651_v50 = vld [vmem:[#allocation2 + $0x8] sm:$0xff] }
 0x11a   : > { %v912_v51 = vpack.c.bf16 %v651_v50, %v650_v49  ;;  %v662_v52 = vadd.f32 %v651_v50, %v650_v49  ;;  %v670_v54 = vmul.f32 %v651_v50, %v651_v50 }
 0x11c   : > { %913 = vst [vmem:[%s1215_s2] sm:$0xff] %v912_v51   ;;  %v663_v55 = vrot.slane %v662_v52, 4  ;;  %v671_v56 = vadd.f32 %v670_v54, %v669_v53 }
 0x11e   : > { %v664_v57 = vadd.f32 %v663_v55, %v662_v52  ;;  %v672_v58 = vrot.slane %v671_v56, 4 }
 0x120   : > { %v665_v59 = vrot.slane %v664_v57, 2  ;;  %v673_v60 = vadd.f32 %v672_v58, %v671_v56 }
 0x122   : > { %v666_v61 = vadd.f32 %v665_v59, %v664_v57  ;;  %v674_v62 = vrot.slane %v673_v60, 2 }
 0x124   : > { %v667_v63 = vrot.slane %v666_v61, 1  ;;  %v675_v0 = vadd.f32 %v674_v62, %v673_v60 }
 0x126   : > { %v668_v1 = vadd.f32 %v667_v63, %v666_v61  ;;  %v676_v2 = vrot.slane %v675_v0, 1 }
 0x128   : > { %678 = vst [vmem:[%s1216_s3] sm:$0xff] %v668_v1  ;;  %v677_v3 = vadd.f32 %v676_v2, %v675_v0 }
 0x12a   : > { %679 = vst [vmem:[%s1217_s4] sm:$0xff] %v677_v3 }
 0x12b PF: > { %s15_s19 = sadd.s32 1, %s1076_s19   ;;  %s1218_s15 = smov %s1064_s16 }
 0x12c   : > { %p12_p12 = scmp.ge.s32.totalorder %s15_s19, 5   ;;  %s1219_s16 = smov %s1141_s23 }
 0x12d   : > { %s1220_s17 = smov %s1072_s18  ;;  %s1221_s18 = smov %s1223_s20 }
 0x12e   :  { %14 = sbr.rel (!%p12_p12) target bundleno = 3 (0x3), region = 130 }

// kernel: forward.122
= control target key start
LH: loop header
LB: loop body
LE: loop exit
PB: predicated region body
PF: predicated region fallthrough
CT: control target
= control target key end

     0   :  { %v298_v1 = vmov 0   ;;  %s393_s1 = inlined_call_operand.vmem [shape: bf16[128,256], index: 1, kind: input, shape index: {}]   ;;  %s394_s0 = inlined_call_operand.vmem [shape: bf16[16,128], index: 0, kind: input, shape index: {}]   ;;  %s395_s2 = inlined_call_operand.vmem [shape: bf16[16,256], index: 2, kind: output, shape index: {0}]   ;;  %s396_s3 = inlined_call_operand.vmem [shape: f32[8,256], index: 3, kind: output, shape index: {1}]   ;;  %s397_s4 = inlined_call_operand.vmem [shape: f32[8,256], index: 4, kind: output, shape index: {2}]  }
   0x1   :  { %v273_v0 = vld [vmem:[%s393_s1 + $0x74] ss:$8 sps:$4 sm:$0xff]   ;;  %163 = vmatprep.mubr.bf16.mxu0 %v298_v1  ;;  %v275_v2 = vld [vmem:[%s393_s1 + $0x70] ss:$8 sps:$4 sm:$0xff]   ;;  %v276_v3 = vld [vmem:[%s393_s1 + $0x64] ss:$8 sps:$4 sm:$0xff]  }
   0x2   :  { %131 = vmatprep.subr.bf16.mxu0 %v273_v0  ;;  %v278_v4 = vld [vmem:[%s393_s1 + $0x60] ss:$8 sps:$4 sm:$0xff]   ;;  %v279_v5 = vld [vmem:[%s393_s1 + $0x54] ss:$8 sps:$4 sm:$0xff]   ;;  %v281_v6 = vld [vmem:[%s393_s1 + $0x50] ss:$8 sps:$4 sm:$0xff]  }
   0x3   :  { %132 = vmatpush1.bf16.msra.mxu0 %v275_v2  ;;  %v282_v7 = vld [vmem:[%s393_s1 + $0x44] ss:$8 sps:$4 sm:$0xff]   ;;  %v284_v8 = vld [vmem:[%s393_s1 + $0x40] ss:$8 sps:$4 sm:$0xff]   ;;  %v285_v9 = vld [vmem:[%s393_s1 + $0x34] ss:$8 sps:$4 sm:$0xff]  }
   0x4   :  { %133 = vmatprep.subr.bf16.mxu0 %v276_v3  ;;  %v287_v10 = vld [vmem:[%s393_s1 + $0x30] ss:$8 sps:$4 sm:$0xff]   ;;  %v288_v11 = vld [vmem:[%s393_s1 + $0x24] ss:$8 sps:$4 sm:$0xff]   ;;  %v290_v12 = vld [vmem:[%s393_s1 + $0x20] ss:$8 sps:$4 sm:$0xff]  }
   0x5   :  { %v291_v13 = vld [vmem:[%s393_s1 + $0x14] ss:$8 sps:$4 sm:$0xff]   ;;  %v293_v14 = vld [vmem:[%s393_s1 + $0x10] ss:$8 sps:$4 sm:$0xff]   ;;  %v294_v15 = vld [vmem:[%s393_s1 + $0x4] ss:$8 sps:$4 sm:$0xff]  }
   0x6   :  { %v296_v16 = vld [vmem:[%s393_s1] ss:$8 sps:$4 sm:$0xff]  }
   0x7   :  { %134 = vmatpush1.bf16.msra.mxu0 %v278_v4  ;;  %v297_v17 = vld [vmem:[%s394_s0] sm:$0xff]  }
   0x8   :  { %135 = vmatprep.subr.bf16.mxu0 %v279_v5 }
   0xb   :  { %136 = vmatpush1.bf16.msra.mxu0 %v281_v6 }
   0xc   :  { %137 = vmatprep.subr.bf16.mxu0 %v282_v7 }
   0xf   :  { %138 = vmatpush1.bf16.msra.mxu0 %v284_v8 }
  0x10   :  { %139 = vmatprep.subr.bf16.mxu0 %v285_v9 }
  0x13   :  { %140 = vmatpush1.bf16.msra.mxu0 %v287_v10 }
  0x14   :  { %141 = vmatprep.subr.bf16.mxu0 %v288_v11 }
  0x17   :  { %142 = vmatpush1.bf16.msra.mxu0 %v290_v12 }
  0x18   :  { %143 = vmatprep.subr.bf16.mxu0 %v291_v13 }
  0x1b   :  { %144 = vmatpush1.bf16.msra.mxu0 %v293_v14 }
  0x1c   :  { %145 = vmatprep.subr.bf16.mxu0 %v294_v15 }
  0x1f   :  { %146 = vmatpush1.bf16.msra.mxu0 %v296_v16 }
  0x22   :  { %164 = vmatmul.mubr.bf16.vlgmr.msra.gmra.mxu0 %v297_v17 }
  0xe2   :  { %v165_v18 = vpop.f32.mrf.mxu0 }
  0xe3   :  { %v217_v22 = vmul.f32 %v165_v18, %v165_v18 }
  0xe4   :  { %v167_v19 = vpop.f32.mrf.mxu0 }
  0xe5   :  { %v270_v20 = vpack.c.bf16 %v167_v19, %v165_v18  ;;  %v218_v30 = vmul.f32 %v167_v19, %v167_v19 }
  0xe6   :  { %v169_v21 = vpop.f32.mrf.mxu0 }
  0xe7   :  { %v203_v23 = vadd.f32 %v169_v21, %v165_v18  ;;  %v219_v24 = vmul.f32 %v169_v21, %v169_v21  ;;  %201 = vst [vmem:[%s395_s2] sm:$0xff] %v270_v20 }
  0xe8   :  { %v171_v25 = vpop.f32.mrf.mxu0 }
  0xe9   :  { %v204_v26 = vrot.slane %v203_v23, 4  ;;  %v221_v27 = vadd.f32 %v219_v24, %v217_v22  ;;  %v271_v28 = vpack.c.bf16 %v171_v25, %v169_v21  ;;  %v210_v29 = vadd.f32 %v171_v25, %v167_v19 }
  0xea   :  { %v220_v31 = vmul.f32 %v171_v25, %v171_v25 }
  0xeb   :  { %v205_v32 = vadd.f32 %v204_v26, %v203_v23  ;;  %v222_v33 = vrot.slane %v221_v27, 4  ;;  %202 = vst [vmem:[%s395_s2 + $0x8] sm:$0xff] %v271_v28  ;;  %v211_v34 = vrot.slane %v210_v29, 4 }
  0xec   :  { %v228_v35 = vadd.f32 %v220_v31, %v218_v30 }
  0xed   :  { %v206_v36 = vrot.slane %v205_v32, 2  ;;  %v223_v37 = vadd.f32 %v222_v33, %v221_v27  ;;  %v212_v38 = vadd.f32 %v211_v34, %v210_v29 }
  0xee   :  { %v229_v39 = vrot.slane %v228_v35, 4 }
  0xef   :  { %v207_v40 = vadd.f32 %v206_v36, %v205_v32  ;;  %v224_v41 = vrot.slane %v223_v37, 2  ;;  %v213_v42 = vrot.slane %v212_v38, 2 }
  0xf0   :  { %v230_v43 = vadd.f32 %v229_v39, %v228_v35 }
  0xf1   :  { %v208_v44 = vrot.slane %v207_v40, 1  ;;  %v225_v45 = vadd.f32 %v224_v41, %v223_v37  ;;  %v214_v46 = vadd.f32 %v213_v42, %v212_v38 }
  0xf2   :  { %v231_v47 = vrot.slane %v230_v43, 2 }
  0xf3   :  { %v209_v48 = vadd.f32 %v208_v44, %v207_v40  ;;  %v226_v49 = vrot.slane %v225_v45, 1  ;;  %v215_v50 = vrot.slane %v214_v46, 1 }
  0xf4   :  { %v232_v51 = vadd.f32 %v231_v47, %v230_v43 }
  0xf5   :  { %v227_v52 = vadd.f32 %v226_v49, %v225_v45  ;;  %v216_v53 = vadd.f32 %v215_v50, %v214_v46  ;;  %235 = vst [vmem:[%s396_s3] sm:$0xff] %v209_v48 }
  0xf6   :  { %v233_v54 = vrot.slane %v232_v51, 1 }
  0xf7   :  { %236 = vst [vmem:[%s396_s3 + $0x8] sm:$0xff] %v216_v53  ;;  %237 = vst [vmem:[%s397_s4] sm:$0xff] %v227_v52 }
  0xf8   :  { %v234_v55 = vadd.f32 %v233_v54, %v232_v51 }
  0xfa   :  { %238 = vst [vmem:[%s397_s4 + $0x8] sm:$0xff] %v234_v55 }

// kernel: forward.120
= control target key start
LH: loop header
LB: loop body
LE: loop exit
PB: predicated region body
PF: predicated region fallthrough
CT: control target
= control target key end

     0   :  { %v22_v0 = vlaneseq  ;;  %s116_s0 = inlined_call_operand.vmem [shape: bf16[16,256], index: 0, kind: input, shape index: {}]   ;;  %s117_s1 = inlined_call_operand.vmem [shape: f32[1,256], index: 1, kind: input, shape index: {}]   ;;  %s118_s2 = inlined_call_operand.vmem [shape: f32[1,256], index: 2, kind: input, shape index: {}]   ;;  %s119_s3 = inlined_call_operand.vmem [shape: bf16[16,256], index: 3, kind: output, shape index: {}]  }
   0x1   :  { %v14_v1 = vld [vmem:[%s116_s0] sm:$0xff]  ;;  %v15_v3 = vld [vmem:[%s116_s0 + $0x8] sm:$0xff] }
   0x2   :  { %v23_v2 = vshrl.u32 %v22_v0, 7  ;;  %v16_v4 = vunpack.c.l.bf16 %v14_v1  ;;  %v17_v5 = vunpack.c.h.bf16 %v14_v1  ;;  %v20_v6 = vld [vmem:[%s117_s1] sm:$0x3]  ;;  %v18_v10 = vunpack.c.l.bf16 %v15_v3 }
   0x3   :  { %v36_v7 = vld [vmem:[%s118_s2] sm:$0x3]  ;;  %v19_v11 = vunpack.c.h.bf16 %v15_v3 }
   0x4   :  { %v24_v8 = vsub.s32 0, %v23_v2  ;;  %v28_v9 = vsub.s32 1, %v23_v2 }
   0x6   :  { %v25_v12 = vrot.slane %v20_v6, %v24_v8  ;;  %v29_v13 = vrot.slane %v20_v6, %v28_v9  ;;  %v41_v14 = vrot.slane %v36_v7, %v24_v8  ;;  %v45_v15 = vrot.slane %v36_v7, %v28_v9 }
   0x8   :  { %v32_v16 = vmul.f32 %v25_v12, %v16_v4  ;;  %v33_v17 = vmul.f32 %v29_v13, %v17_v5  ;;  %v34_v18 = vmul.f32 %v25_v12, %v18_v10  ;;  %v35_v19 = vmul.f32 %v29_v13, %v19_v11 }
   0xa   :  { %v48_v20 = vadd.f32 %v41_v14, %v32_v16  ;;  %v49_v21 = vadd.f32 %v45_v15, %v33_v17  ;;  %v50_v22 = vadd.f32 %v41_v14, %v34_v18  ;;  %v51_v23 = vadd.f32 %v45_v15, %v35_v19 }
   0xc   :  { %v52_v24 = vmax.f32 %v48_v20, 0.0  ;;  %v53_v25 = vmax.f32 %v49_v21, 0.0  ;;  %v54_v26 = vmax.f32 %v50_v22, 0.0  ;;  %v55_v27 = vmax.f32 %v51_v23, 0.0 }
   0xe   :  { %v76_v28 = vpack.c.bf16 %v53_v25, %v52_v24  ;;  %v77_v29 = vpack.c.bf16 %v55_v27, %v54_v26 }
  0x10   :  { %68 = vst [vmem:[%s119_s3] sm:$0xff] %v76_v28  ;;  %69 = vst [vmem:[%s119_s3 + $0x8] sm:$0xff] %v77_v29 }

// kernel: forward.119
= control target key start
LH: loop header
LB: loop body
LE: loop exit
PB: predicated region body
PF: predicated region fallthrough
CT: control target
= control target key end

     0   :  { %s1309_s15 = smov 0   ;;  %s1311_s16 = smov 0   ;;  %s1449_s0 = inlined_call_operand.vmem [shape: bf16[16,1152], index: 0, kind: input, shape index: {}]   ;;  %s1450_s1 = inlined_call_operand.vmem [shape: bf16[1152,256], index: 1, kind: input, shape index: {}]   ;;  %s1451_s2 = inlined_call_operand.vmem [shape: bf16[16,256], index: 2, kind: output, shape index: {0}]   ;;  %s1452_s3 = inlined_call_operand.vmem [shape: f32[8,256], index: 3, kind: output, shape index: {1}]   ;;  %s1453_s4 = inlined_call_operand.vmem [shape: f32[8,256], index: 4, kind: output, shape index: {2}]  }
   0x1   :  { %s1313_s17 = smov 0   ;;  %s1315_s18 = smov 0  }
   0x2   :  { %s1317_s19 = smov 0  }
   0x3 LB: > { %s27_s20 = sadd.s32 1, %s1276_s18  ;;  %p50_p1 = scmp.ne.s32.totalorder %s1268_s16, %s1264_s15  ;;  %s1280_s19 = sphi %s1317_s19, %s15_s19   ;;  %s1276_s18 = sphi %s1315_s18, %s1457_s18   ;;  %s1272_s17 = sphi %s1313_s17, %s1456_s17   ;;  %s1268_s16 = sphi %s1311_s16, %s1455_s16   ;;  %s1264_s15 = sphi %s1309_s15, %s1454_s15  }
   0x4   : > { %p28_p0 = scmp.ge.s32.totalorder %s27_s20, 3  ;;  %p51_p2 = scmp.eq.s32.totalorder %s1280_s19, 0 }
   0x5   : > { %s43_s22 = sadd.s32 1, %s1268_s16  ;;  %p1046_p5 = scmp.ge.s32.totalorder %s1280_s19, 3 }
   0x6   : > { %s1459_s20 = smov (%p28_p0, %s27_s20), 0  ;;  %p52_p3 = por %p51_p2, %p50_p1 }
   0x7   : > { %s39_s21 = ssub.s32 %s1276_s18, %s1459_s20  ;;  %188 = sbr.rel (%p1046_p5) target bundleno = 19 (0x13), region = 16 }
   0x8   : > { %p41_p4 = scmp.eq.s32.totalorder %s39_s21, 0 }
   0xa   : > { %s1344_s23 = scalar_select %p41_p4, %s1268_s16, %s43_s22  }
   0xc   : > { %191 = sbr.rel (!%p52_p3) target bundleno = 19 (0x13), region = 20  ;;  %s193_s24 = sand.u32 (%p52_p3), 1, %s1268_s16  }
   0xd   : > { %s1118_s25 = smul.u32 (%p52_p3), 12, %s1276_s18 }
   0xe   : > { %s1122_s26 = smul.u32 (%p52_p3), 24, %s193_s24 }
   0xf   : > { %s201_s29 = scalar_lea.vmem (%p52_p3), %s1449_s0, %s1118_s25 }
  0x10   : > { %v216_v0 = vld [vmem:[%s201_s29] sm:$0xff] (%p52_p3)  ;;  %v1048_v2 = vld [vmem:[%s201_s29 + $0x8] sm:$0xf] (%p52_p3)  ;;  %s195_s30 = scalar_lea.vmem (%p52_p3), [#allocation3], %s1122_s26  ;;  %v1050_v3 = vld [vmem:[%s201_s29 + $0x2c] sm:$0xf] (%p52_p3) }
  0x11   : > { %v218_v1 = vld [vmem:[%s201_s29 + $0x24] sm:$0xff]  ;;  %217 = vst [vmem:[%s195_s30] sm:$0xff] %v216_v0  ;;  %1049 = vst [vmem:[%s195_s30 + $0x8] sm:$0xf] %v1048_v2 }
  0x12   : > { %219 = vst [vmem:[%s195_s30 + $0xc] sm:$0xff] %v218_v1  ;;  %1051 = vst [vmem:[%s195_s30 + $0x14] sm:$0xf] %v1050_v3 }
  0x13 PF: > { %p1052_p6 = scmp.ge.s32.totalorder %s1280_s19, 1  ;;  %p251_p7 = scmp.lt.s32.totalorder %s1280_s19, 4 }
  0x15   : > { %p252_p8 = pnand %p1052_p6, %p251_p7 }
  0x16   : > { %s258_s5 = sand.u32 (!%p252_p8), 1, %s1264_s15   ;;  %s318_s6 = smul.u32 (!%p252_p8), 48, %s1272_s17 }
  0x17   : > { %255 = sbr.rel (%p252_p8) target bundleno = 329 (0x149), region = 50  ;;  %p1055_p10 = scmp.ne.s32.totalorder (!%p252_p8), %s1272_s17, 0 }
  0x18   : > { %s1123_s7 = smul.u32 (!%p252_p8), 24, %s258_s5  ;;  %p320_p9 = scmp.lt.s32.totalorder (!%p252_p8), %s318_s6, 143 }
  0x1a   : > { %s1361_s12 = scalar_lea.vmem (!%p252_p8), [#allocation3], %s1123_s7 }
  0x1c   : > { %s1461_s6 = smov (!%p320_p9, %s318_s6), 143  ;;  %366 = sbr.rel (%p1055_p10) target bundleno = 36 (0x24), region = 58 }
  0x1d   : > { %s1119_s8 = sshll.u32 %s1461_s6, 3 }
  0x1e   : > { %s1359_s11 = scalar_lea.vmem %s1450_s1, %s1119_s8 }
  0x21   : > { %v1282_v4 = vmov 0.0  }
  0x22   : > { %367 = vst [vmem:[#allocation2 + $0x10] sm:$0xff] %v1282_v4  ;;  %368 = vst [vmem:[#allocation2] sm:$0xff] %v1282_v4 }
  0x23   : > { %369 = vst [vmem:[#allocation2 + $0x18] sm:$0xff] %v1282_v4  ;;  %370 = vst [vmem:[#allocation2 + $0x8] sm:$0xff] %v1282_v4 }
  0x24 PF: > { %v1166_v5 = vld [vmem:[%s1359_s11 + $0x74] ss:$8 sps:$4 sm:$0xff]   ;;  %v1168_v6 = vld [vmem:[%s1359_s11 + $0x70] ss:$8 sps:$4 sm:$0xff]   ;;  %v1283_v7 = vmov 0   ;;  %p1107_p11 = scmp.ne.s32.totalorder %s1272_s17, 2 }
  0x25   : > { %758 = vmatprep.mubr.bf16.mxu1 %v1283_v7  ;;  %683 = vmatprep.subr.bf16.mxu0 %v1166_v5  ;;  %v1169_v8 = vld [vmem:[%s1359_s11 + $0x64] ss:$8 sps:$4 sm:$0xff]   ;;  %v1171_v9 = vld [vmem:[%s1359_s11 + $0x60] ss:$8 sps:$4 sm:$0xff]   ;;  %v1172_v10 = vld [vmem:[%s1359_s11 + $0x54] ss:$8 sps:$4 sm:$0xff]  }
  0x26   : > { %684 = vmatpush1.bf16.msra.mxu0 %v1168_v6  ;;  %v1174_v11 = vld [vmem:[%s1359_s11 + $0x50] ss:$8 sps:$4 sm:$0xff]   ;;  %v1175_v12 = vld [vmem:[%s1359_s11 + $0x44] ss:$8 sps:$4 sm:$0xff]   ;;  %v1187_v13 = vld [vmem:[%s1359_s11 + $0x174] ss:$8 sps:$4 sm:$0xff]  }
  0x27   : > { %685 = vmatprep.subr.bf16.mxu0 %v1169_v8  ;;  %v1189_v14 = vld [vmem:[%s1359_s11 + $0x170] ss:$8 sps:$4 sm:$0xff]   ;;  %v1177_v15 = vld [vmem:[%s1359_s11 + $0x40] ss:$8 sps:$4 sm:$0xff]   ;;  %v1178_v16 = vld [vmem:[%s1359_s11 + $0x34] ss:$8 sps:$4 sm:$0xff]   ;;  %726 = vmatprep.subr.bf16.mxu1 %v1187_v13 }
  0x28   : > { %v1193_v17 = vld [vmem:[%s1359_s11 + $0x164] ss:$8 sps:$4 sm:$0xff]   ;;  %727 = vmatpush1.bf16.msra.mxu1 %v1189_v14  ;;  %v1195_v18 = vld [vmem:[%s1359_s11 + $0x160] ss:$8 sps:$4 sm:$0xff]   ;;  %v1180_v19 = vld [vmem:[%s1359_s11 + $0x30] ss:$8 sps:$4 sm:$0xff]  }
  0x29   : > { %728 = vmatprep.subr.bf16.mxu1 %v1193_v17  ;;  %v1199_v20 = vld [vmem:[%s1359_s11 + $0x154] ss:$8 sps:$4 sm:$0xff]   ;;  %v1181_v21 = vld [vmem:[%s1359_s11 + $0x24] ss:$8 sps:$4 sm:$0xff]   ;;  %v1201_v22 = vld [vmem:[%s1359_s11 + $0x150] ss:$8 sps:$4 sm:$0xff]  }
  0x2a   : > { %686 = vmatpush1.bf16.msra.mxu0 %v1171_v9  ;;  %v1205_v23 = vld [vmem:[%s1359_s11 + $0x144] ss:$8 sps:$4 sm:$0xff]   ;;  %v1183_v24 = vld [vmem:[%s1359_s11 + $0x20] ss:$8 sps:$4 sm:$0xff]   ;;  %v1184_v25 = vld [vmem:[%s1359_s11 + $0x14] ss:$8 sps:$4 sm:$0xff]  }
  0x2b   : > { %687 = vmatprep.subr.bf16.mxu0 %v1172_v10  ;;  %v1207_v26 = vld [vmem:[%s1359_s11 + $0x140] ss:$8 sps:$4 sm:$0xff]   ;;  %v1211_v27 = vld [vmem:[%s1359_s11 + $0x134] ss:$8 sps:$4 sm:$0xff]   ;;  %v1186_v28 = vld [vmem:[%s1359_s11 + $0x10] ss:$8 sps:$4 sm:$0xff]  }
  0x2c   : > { %729 = vmatpush1.bf16.msra.mxu1 %v1195_v18  ;;  %v1190_v29 = vld [vmem:[%s1359_s11 + $0x4] ss:$8 sps:$4 sm:$0xff]   ;;  %v1213_v30 = vld [vmem:[%s1359_s11 + $0x130] ss:$8 sps:$4 sm:$0xff]   ;;  %v1192_v32 = vld [vmem:[%s1359_s11] ss:$8 sps:$4 sm:$0xff]  }
  0x2d   : > { %730 = vmatprep.subr.bf16.mxu1 %v1199_v20  ;;  %v1217_v31 = vld [vmem:[%s1359_s11 + $0x124] ss:$8 sps:$4 sm:$0xff]   ;;  %v1196_v33 = vld [vmem:[%s1359_s11 + $0xf4] ss:$8 sps:$4 sm:$0xff]   ;;  %v1219_v34 = vld [vmem:[%s1359_s11 + $0x120] ss:$8 sps:$4 sm:$0xff]  }
  0x2e   : > { %688 = vmatpush1.bf16.msra.mxu0 %v1174_v11  ;;  %v1223_v35 = vld [vmem:[%s1359_s11 + $0x114] ss:$8 sps:$4 sm:$0xff]   ;;  %v1198_v36 = vld [vmem:[%s1359_s11 + $0xf0] ss:$8 sps:$4 sm:$0xff]   ;;  %v1202_v37 = vld [vmem:[%s1359_s11 + $0xe4] ss:$8 sps:$4 sm:$0xff]  }
  0x2f   : > { %689 = vmatprep.subr.bf16.mxu0 %v1175_v12  ;;  %v1225_v38 = vld [vmem:[%s1359_s11 + $0x110] ss:$8 sps:$4 sm:$0xff]   ;;  %v1229_v39 = vld [vmem:[%s1359_s11 + $0x104] ss:$8 sps:$4 sm:$0xff]   ;;  %v1204_v41 = vld [vmem:[%s1359_s11 + $0xe0] ss:$8 sps:$4 sm:$0xff]  }
  0x30   : > { %731 = vmatpush1.bf16.msra.mxu1 %v1201_v22  ;;  %v1241_v40 = vld [vmem:[%s1361_s12 + $0x4] ss:$12 sps:$4 sm:$0xff]   ;;  %v1235_v46 = vld [vmem:[%s1361_s12 + $0x8] ss:$12 sps:$4 sm:$0xff]   ;;  %v1239_v56 = vld [vmem:[%s1361_s12] ss:$12 sps:$4 sm:$0xff]  }
  0x31   : > { %732 = vmatprep.subr.bf16.mxu1 %v1205_v23  ;;  %v1208_v42 = vld [vmem:[%s1359_s11 + $0xd4] ss:$8 sps:$4 sm:$0xff]   ;;  %715 = vmatprep.mubr.bf16.mxu0 %v1241_v40  ;;  %v1231_v43 = vld [vmem:[%s1359_s11 + $0x100] ss:$8 sps:$4 sm:$0xff]   ;;  %v1210_v44 = vld [vmem:[%s1359_s11 + $0xd0] ss:$8 sps:$4 sm:$0xff]  }
  0x32   : > { %690 = vmatpush1.bf16.msra.mxu0 %v1177_v15  ;;  %v1214_v45 = vld [vmem:[%s1359_s11 + $0xc4] ss:$8 sps:$4 sm:$0xff]   ;;  %v1216_v47 = vld [vmem:[%s1359_s11 + $0xc0] ss:$8 sps:$4 sm:$0xff]   ;;  %v1220_v48 = vld [vmem:[%s1359_s11 + $0xb4] ss:$8 sps:$4 sm:$0xff]  }
  0x33   : > { %691 = vmatprep.subr.bf16.mxu0 %v1178_v16  ;;  %v1222_v49 = vld [vmem:[%s1359_s11 + $0xb0] ss:$8 sps:$4 sm:$0xff]   ;;  %v1226_v50 = vld [vmem:[%s1359_s11 + $0xa4] ss:$8 sps:$4 sm:$0xff]   ;;  %v1228_v51 = vld [vmem:[%s1359_s11 + $0xa0] ss:$8 sps:$4 sm:$0xff]  }
  0x34   : > { %733 = vmatpush1.bf16.msra.mxu1 %v1207_v26  ;;  %v1232_v52 = vld [vmem:[%s1359_s11 + $0x94] ss:$8 sps:$4 sm:$0xff]   ;;  %v1234_v53 = vld [vmem:[%s1359_s11 + $0x90] ss:$8 sps:$4 sm:$0xff]   ;;  %v1236_v54 = vld [vmem:[%s1359_s11 + $0x84] ss:$8 sps:$4 sm:$0xff]  }
  0x35   : > { %734 = vmatprep.subr.bf16.mxu1 %v1211_v27  ;;  %v1238_v55 = vld [vmem:[%s1359_s11 + $0x80] ss:$8 sps:$4 sm:$0xff]   ;;  %v371_v59 = vld [vmem:[#allocation2 + $0x10] sm:$0xff]  ;;  %v373_v3 = vld [vmem:[#allocation2 + $0x18] sm:$0xff] }
  0x36   : > { %692 = vmatpush1.bf16.msra.mxu0 %v1180_v19  ;;  %v372_v63 = vld [vmem:[#allocation2] sm:$0xff]  ;;  %v374_v8 = vld [vmem:[#allocation2 + $0x8] sm:$0xff] }
  0x37   : > { %693 = vmatprep.subr.bf16.mxu0 %v1181_v21 }
  0x38   : > { %735 = vmatpush1.bf16.msra.mxu1 %v1213_v30 }
  0x39   : > { %736 = vmatprep.subr.bf16.mxu1 %v1217_v31 }
  0x3a   : > { %694 = vmatpush1.bf16.msra.mxu0 %v1183_v24 }
  0x3b   : > { %695 = vmatprep.subr.bf16.mxu0 %v1184_v25 }
  0x3c   : > { %737 = vmatpush1.bf16.msra.mxu1 %v1219_v34 }
  0x3d   : > { %738 = vmatprep.subr.bf16.mxu1 %v1223_v35 }
  0x3e   : > { %696 = vmatpush1.bf16.msra.mxu0 %v1186_v28 }
  0x3f   : > { %697 = vmatprep.subr.bf16.mxu0 %v1190_v29 }
  0x40   : > { %739 = vmatpush1.bf16.msra.mxu1 %v1225_v38 }
  0x41   : > { %740 = vmatprep.subr.bf16.mxu1 %v1229_v39 }
  0x42   : > { %698 = vmatpush1.bf16.msra.mxu0 %v1192_v32 }
  0x43   : > { %699 = vmatprep.subr.bf16.mxu0 %v1196_v33 }
  0x44   : > { %741 = vmatpush1.bf16.msra.mxu1 %v1231_v43 }
  0x46   : > { %700 = vmatpush2.bf16.msra.mxu0 %v1198_v36 }
  0x47   : > { %701 = vmatprep.subr.bf16.mxu0 %v1202_v37  ;;  %759 = vmatmul.mubr.bf16.vlgmr.msra.gmra.mxu1 %v1235_v46 }
  0x4a   : > { %702 = vmatpush2.bf16.msra.mxu0 %v1204_v41 }
  0x4b   : > { %703 = vmatprep.subr.bf16.mxu0 %v1208_v42 }
  0x4e   : > { %704 = vmatpush2.bf16.msra.mxu0 %v1210_v44 }
  0x4f   : > { %705 = vmatprep.subr.bf16.mxu0 %v1214_v45 }
  0x52   : > { %706 = vmatpush2.bf16.msra.mxu0 %v1216_v47 }
  0x53   : > { %707 = vmatprep.subr.bf16.mxu0 %v1220_v48 }
  0x56   : > { %708 = vmatpush2.bf16.msra.mxu0 %v1222_v49 }
  0x57   : > { %709 = vmatprep.subr.bf16.mxu0 %v1226_v50 }
  0x5a   : > { %710 = vmatpush2.bf16.msra.mxu0 %v1228_v51 }
  0x5b   : > { %711 = vmatprep.subr.bf16.mxu0 %v1232_v52 }
  0x5e   : > { %712 = vmatpush2.bf16.msra.mxu0 %v1234_v53 }
  0x5f   : > { %713 = vmatprep.subr.bf16.mxu0 %v1236_v54 }
  0x62   : > { %714 = vmatpush2.bf16.msra.mxu0 %v1238_v55 }
  0x65   : > { %716 = vmatmul.mubr.bf16.vlgmr.msra.gmra.mxu0 %v1239_v56 }
 0x107   : > { %v760_v57 = vpop.f32.mrf.mxu1 }
 0x109   : > { %v762_v58 = vpop.f32.mrf.mxu1 }
 0x10b   : > { %v764_v62 = vpop.f32.mrf.mxu1 }
 0x10d   : > { %v766_v7 = vpop.f32.mrf.mxu1 }
 0x125   : > { %v717_v60 = vpop.f32.mrf.mxu0 }
 0x126   : > { %v761_v61 = vadd.f32 %v760_v57, %v717_v60 }
 0x127   : > { %v719_v0 = vpop.f32.mrf.mxu0 }
 0x128   : > { %v769_v1 = vadd.f32 %v761_v61, %v371_v59  ;;  %v763_v2 = vadd.f32 %v762_v58, %v719_v0 }
 0x129   : > { %v721_v4 = vpop.f32.mrf.mxu0 }
 0x12a   : > { %773 = vst [vmem:[#allocation2 + $0x10] sm:$0xff] %v769_v1  ;;  %v770_v5 = vadd.f32 %v763_v2, %v372_v63  ;;  %v765_v6 = vadd.f32 %v764_v62, %v721_v4 }
 0x12b   : > { %v723_v9 = vpop.f32.mrf.mxu0 }
 0x12c   : > { %774 = vst [vmem:[#allocation2] sm:$0xff] %v770_v5  ;;  %v771_v10 = vadd.f32 %v765_v6, %v373_v3  ;;  %v767_v11 = vadd.f32 %v766_v7, %v723_v9  ;;  %780 = sbr.rel (%p1107_p11) target bundleno = 329 (0x149), region = 62 }
 0x12e   : > { %775 = vst [vmem:[#allocation2 + $0x18] sm:$0xff] %v771_v10  ;;  %v772_v12 = vadd.f32 %v767_v11, %v374_v8 }
 0x130   : > { %776 = vst [vmem:[#allocation2 + $0x8] sm:$0xff] %v772_v12 }
 0x131   : > { %v781_v13 = vld [vmem:[#allocation2 + $0x10] sm:$0xff] }
 0x132   : > { %v813_v17 = vmul.f32 %v781_v13, %v781_v13 }
 0x133   : > { %v782_v14 = vld [vmem:[#allocation2] sm:$0xff] }
 0x134   : > { %v1120_v16 = vpack.c.bf16 %v782_v14, %v781_v13  ;;  %v814_v18 = vmul.f32 %v782_v14, %v782_v14 }
 0x135   : > { %v783_v15 = vld [vmem:[#allocation2 + $0x18] sm:$0xff] }
 0x136   : > { %v799_v20 = vadd.f32 %v783_v15, %v781_v13  ;;  %v815_v23 = vmul.f32 %v783_v15, %v783_v15  ;;  %797 = vst [vmem:[%s1451_s2] sm:$0xff] %v1120_v16 }
 0x137   : > { %v784_v19 = vld [vmem:[#allocation2 + $0x8] sm:$0xff] }
 0x138   : > { %v1121_v21 = vpack.c.bf16 %v784_v19, %v783_v15  ;;  %v806_v22 = vadd.f32 %v784_v19, %v782_v14  ;;  %v816_v24 = vmul.f32 %v784_v19, %v784_v19  ;;  %v800_v25 = vrot.slane %v799_v20, 4 }
 0x139   : > { %v817_v27 = vadd.f32 %v815_v23, %v813_v17 }
 0x13a   : > { %798 = vst [vmem:[%s1451_s2 + $0x8] sm:$0xff] %v1121_v21  ;;  %v807_v26 = vrot.slane %v806_v22, 4  ;;  %v824_v28 = vadd.f32 %v816_v24, %v814_v18  ;;  %v801_v29 = vadd.f32 %v800_v25, %v799_v20 }
 0x13b   : > { %v818_v31 = vrot.slane %v817_v27, 4 }
 0x13c   : > { %v808_v30 = vadd.f32 %v807_v26, %v806_v22  ;;  %v825_v32 = vrot.slane %v824_v28, 4  ;;  %v802_v33 = vrot.slane %v801_v29, 2 }
 0x13d   : > { %v819_v35 = vadd.f32 %v818_v31, %v817_v27 }
 0x13e   : > { %v809_v34 = vrot.slane %v808_v30, 2  ;;  %v826_v36 = vadd.f32 %v825_v32, %v824_v28  ;;  %v803_v37 = vadd.f32 %v802_v33, %v801_v29 }
 0x13f   : > { %v820_v39 = vrot.slane %v819_v35, 2 }
 0x140   : > { %v810_v38 = vadd.f32 %v809_v34, %v808_v30  ;;  %v827_v40 = vrot.slane %v826_v36, 2  ;;  %v804_v41 = vrot.slane %v803_v37, 1 }
 0x141   : > { %v821_v43 = vadd.f32 %v820_v39, %v819_v35 }
 0x142   : > { %v811_v42 = vrot.slane %v810_v38, 1  ;;  %v828_v44 = vadd.f32 %v827_v40, %v826_v36  ;;  %v805_v45 = vadd.f32 %v804_v41, %v803_v37 }
 0x143   : > { %v822_v47 = vrot.slane %v821_v43, 1 }
 0x144   : > { %v812_v46 = vadd.f32 %v811_v42, %v810_v38  ;;  %v829_v48 = vrot.slane %v828_v44, 1  ;;  %831 = vst [vmem:[%s1452_s3] sm:$0xff] %v805_v45 }
 0x145   : > { %v823_v49 = vadd.f32 %v822_v47, %v821_v43 }
 0x146   : > { %832 = vst [vmem:[%s1452_s3 + $0x8] sm:$0xff] %v812_v46  ;;  %v830_v50 = vadd.f32 %v829_v48, %v828_v44 }
 0x147   : > { %833 = vst [vmem:[%s1453_s4] sm:$0xff] %v823_v49 }
 0x148   : > { %834 = vst [vmem:[%s1453_s4 + $0x8] sm:$0xff] %v830_v50 }
 0x149 PF: > { %s15_s19 = sadd.s32 1, %s1280_s19   ;;  %s1454_s15 = smov %s1268_s16 }
 0x14a   : > { %p12_p12 = scmp.ge.s32.totalorder %s15_s19, 5   ;;  %s1455_s16 = smov %s1344_s23 }
 0x14b   : > { %s1456_s17 = smov %s1276_s18  ;;  %s1457_s18 = smov %s1459_s20 }
 0x14c   :  { %14 = sbr.rel (!%p12_p12) target bundleno = 3 (0x3), region = 130 }

// kernel: forward.123
= control target key start
LH: loop header
LB: loop body
LE: loop exit
PB: predicated region body
PF: predicated region fallthrough
CT: control target
= control target key end

     0   :  { %v31_v0 = vlaneseq  ;;  %s198_s0 = inlined_call_operand.vmem [shape: bf16[16,256], index: 0, kind: input, shape index: {}]   ;;  %s199_s1 = inlined_call_operand.vmem [shape: f32[1,256], index: 1, kind: input, shape index: {}]   ;;  %s200_s2 = inlined_call_operand.vmem [shape: f32[1,256], index: 2, kind: input, shape index: {}]   ;;  %s201_s3 = inlined_call_operand.vmem [shape: bf16[16,256], index: 3, kind: input, shape index: {}]   ;;  %s202_s4 = inlined_call_operand.vmem [shape: f32[1,256], index: 4, kind: input, shape index: {}]   ;;  %s203_s5 = inlined_call_operand.vmem [shape: f32[1,256], index: 5, kind: input, shape index: {}]   ;;  %s204_s6 = inlined_call_operand.vmem [shape: bf16[16,256], index: 6, kind: output, shape index: {}]  }
   0x1   :  { %v23_v1 = vld [vmem:[%s198_s0] sm:$0xff]  ;;  %v24_v8 = vld [vmem:[%s198_s0 + $0x8] sm:$0xff] }
   0x2   :  { %v29_v2 = vld [vmem:[%s199_s1] sm:$0x3]  ;;  %v32_v3 = vshrl.u32 %v31_v0, 7  ;;  %v25_v5 = vunpack.c.l.bf16 %v23_v1  ;;  %v26_v6 = vunpack.c.h.bf16 %v23_v1  ;;  %v66_v9 = vld [vmem:[%s201_s3 + $0x8] sm:$0xff]  ;;  %v27_v14 = vunpack.c.l.bf16 %v24_v8 }
   0x3   :  { %v65_v4 = vld [vmem:[%s201_s3] sm:$0xff]  ;;  %v28_v15 = vunpack.c.h.bf16 %v24_v8  ;;  %v69_v18 = vunpack.c.l.bf16 %v66_v9  ;;  %v70_v19 = vunpack.c.h.bf16 %v66_v9 }
   0x4   :  { %v45_v7 = vld [vmem:[%s200_s2] sm:$0x3]  ;;  %v33_v10 = vsub.s32 0, %v32_v3  ;;  %v37_v11 = vsub.s32 1, %v32_v3  ;;  %v67_v16 = vunpack.c.l.bf16 %v65_v4  ;;  %v68_v17 = vunpack.c.h.bf16 %v65_v4 }
   0x5   :  { %v71_v12 = vld [vmem:[%s202_s4] sm:$0x3] }
   0x6   :  { %v87_v13 = vld [vmem:[%s203_s5] sm:$0x3]  ;;  %v34_v20 = vrot.slane %v29_v2, %v33_v10  ;;  %v38_v21 = vrot.slane %v29_v2, %v37_v11  ;;  %v50_v22 = vrot.slane %v45_v7, %v33_v10  ;;  %v54_v23 = vrot.slane %v45_v7, %v37_v11 }
   0x7   :  { %v76_v24 = vrot.slane %v71_v12, %v33_v10  ;;  %v80_v25 = vrot.slane %v71_v12, %v37_v11  ;;  %v92_v26 = vrot.slane %v87_v13, %v33_v10  ;;  %v96_v27 = vrot.slane %v87_v13, %v37_v11 }
   0x8   :  { %v41_v28 = vmul.f32 %v34_v20, %v25_v5  ;;  %v42_v29 = vmul.f32 %v38_v21, %v26_v6  ;;  %v43_v30 = vmul.f32 %v34_v20, %v27_v14  ;;  %v44_v31 = vmul.f32 %v38_v21, %v28_v15 }
   0x9   :  { %v83_v32 = vmul.f32 %v76_v24, %v67_v16  ;;  %v84_v33 = vmul.f32 %v80_v25, %v68_v17  ;;  %v85_v34 = vmul.f32 %v76_v24, %v69_v18  ;;  %v86_v35 = vmul.f32 %v80_v25, %v70_v19 }
   0xa   :  { %v57_v36 = vadd.f32 %v50_v22, %v41_v28  ;;  %v58_v37 = vadd.f32 %v54_v23, %v42_v29  ;;  %v59_v38 = vadd.f32 %v50_v22, %v43_v30  ;;  %v60_v39 = vadd.f32 %v54_v23, %v44_v31 }
   0xb   :  { %v99_v40 = vadd.f32 %v92_v26, %v83_v32  ;;  %v100_v41 = vadd.f32 %v96_v27, %v84_v33  ;;  %v101_v42 = vadd.f32 %v92_v26, %v85_v34  ;;  %v102_v43 = vadd.f32 %v96_v27, %v86_v35 }
   0xc   :  { %v61_v44 = vmax.f32 %v57_v36, 0.0  ;;  %v62_v45 = vmax.f32 %v58_v37, 0.0  ;;  %v63_v46 = vmax.f32 %v59_v38, 0.0  ;;  %v64_v47 = vmax.f32 %v60_v39, 0.0 }
   0xe   :  { %v103_v48 = vadd.f32 %v99_v40, %v61_v44  ;;  %v104_v49 = vadd.f32 %v100_v41, %v62_v45  ;;  %v105_v50 = vadd.f32 %v101_v42, %v63_v46  ;;  %v106_v51 = vadd.f32 %v102_v43, %v64_v47 }
  0x10   :  { %v107_v52 = vmax.f32 %v103_v48, 0.0  ;;  %v108_v53 = vmax.f32 %v104_v49, 0.0  ;;  %v109_v54 = vmax.f32 %v105_v50, 0.0  ;;  %v110_v55 = vmax.f32 %v106_v51, 0.0 }
  0x12   :  { %v131_v56 = vpack.c.bf16 %v108_v53, %v107_v52  ;;  %v132_v57 = vpack.c.bf16 %v110_v55, %v109_v54 }
  0x14   :  { %123 = vst [vmem:[%s204_s6] sm:$0xff] %v131_v56  ;;  %124 = vst [vmem:[%s204_s6 + $0x8] sm:$0xff] %v132_v57 }

// kernel: forward.121
= control target key start
LH: loop header
LB: loop body
LE: loop exit
PB: predicated region body
PF: predicated region fallthrough
CT: control target
= control target key end

     0   :  { %s1309_s15 = smov 0   ;;  %s1311_s16 = smov 0   ;;  %s1449_s0 = inlined_call_operand.vmem [shape: bf16[16,2304], index: 0, kind: input, shape index: {}]   ;;  %s1450_s1 = inlined_call_operand.vmem [shape: bf16[2304,256], index: 1, kind: input, shape index: {}]   ;;  %s1451_s2 = inlined_call_operand.vmem [shape: bf16[16,256], index: 2, kind: output, shape index: {0}]   ;;  %s1452_s3 = inlined_call_operand.vmem [shape: f32[8,256], index: 3, kind: output, shape index: {1}]   ;;  %s1453_s4 = inlined_call_operand.vmem [shape: f32[8,256], index: 4, kind: output, shape index: {2}]  }
   0x1   :  { %s1313_s17 = smov 0   ;;  %s1315_s18 = smov 0  }
   0x2   :  { %s1317_s19 = smov 0  }
   0x3 LB: > { %s27_s20 = sadd.s32 1, %s1276_s18  ;;  %p50_p1 = scmp.ne.s32.totalorder %s1268_s16, %s1264_s15  ;;  %s1280_s19 = sphi %s1317_s19, %s15_s19   ;;  %s1276_s18 = sphi %s1315_s18, %s1457_s18   ;;  %s1272_s17 = sphi %s1313_s17, %s1456_s17   ;;  %s1268_s16 = sphi %s1311_s16, %s1455_s16   ;;  %s1264_s15 = sphi %s1309_s15, %s1454_s15  }
   0x4   : > { %p28_p0 = scmp.ge.s32.totalorder %s27_s20, 6  ;;  %p51_p2 = scmp.eq.s32.totalorder %s1280_s19, 0 }
   0x5   : > { %s43_s22 = sadd.s32 1, %s1268_s16  ;;  %p1046_p5 = scmp.ge.s32.totalorder %s1280_s19, 6 }
   0x6   : > { %s1459_s20 = smov (%p28_p0, %s27_s20), 0  ;;  %p52_p3 = por %p51_p2, %p50_p1 }
   0x7   : > { %s39_s21 = ssub.s32 %s1276_s18, %s1459_s20  ;;  %188 = sbr.rel (%p1046_p5) target bundleno = 19 (0x13), region = 16 }
   0x8   : > { %p41_p4 = scmp.eq.s32.totalorder %s39_s21, 0 }
   0xa   : > { %s1344_s23 = scalar_select %p41_p4, %s1268_s16, %s43_s22  }
   0xc   : > { %191 = sbr.rel (!%p52_p3) target bundleno = 19 (0x13), region = 20  ;;  %s193_s24 = sand.u32 (%p52_p3), 1, %s1268_s16  }
   0xd   : > { %s1118_s25 = smul.u32 (%p52_p3), 12, %s1276_s18 }
   0xe   : > { %s1122_s26 = smul.u32 (%p52_p3), 24, %s193_s24 }
   0xf   : > { %s201_s29 = scalar_lea.vmem (%p52_p3), %s1449_s0, %s1118_s25 }
  0x10   : > { %v216_v0 = vld [vmem:[%s201_s29] sm:$0xff] (%p52_p3)  ;;  %v218_v1 = vld [vmem:[%s201_s29 + $0x48] sm:$0xff] (%p52_p3)  ;;  %s195_s30 = scalar_lea.vmem (%p52_p3), [#allocation3], %s1122_s26  ;;  %v1050_v3 = vld [vmem:[%s201_s29 + $0x50] sm:$0xf] (%p52_p3) }
  0x11   : > { %v1048_v2 = vld [vmem:[%s201_s29 + $0x8] sm:$0xf]  ;;  %217 = vst [vmem:[%s195_s30] sm:$0xff] %v216_v0  ;;  %219 = vst [vmem:[%s195_s30 + $0xc] sm:$0xff] %v218_v1 }
  0x12   : > { %1049 = vst [vmem:[%s195_s30 + $0x8] sm:$0xf] %v1048_v2  ;;  %1051 = vst [vmem:[%s195_s30 + $0x14] sm:$0xf] %v1050_v3 }
  0x13 PF: > { %p1052_p6 = scmp.ge.s32.totalorder %s1280_s19, 1  ;;  %p251_p7 = scmp.lt.s32.totalorder %s1280_s19, 7 }
  0x15   : > { %p252_p8 = pnand %p1052_p6, %p251_p7 }
  0x16   : > { %s258_s5 = sand.u32 (!%p252_p8), 1, %s1264_s15   ;;  %s318_s6 = smul.u32 (!%p252_p8), 48, %s1272_s17 }
  0x17   : > { %255 = sbr.rel (%p252_p8) target bundleno = 329 (0x149), region = 50  ;;  %p1055_p10 = scmp.ne.s32.totalorder (!%p252_p8), %s1272_s17, 0 }
  0x18   : > { %s1123_s7 = smul.u32 (!%p252_p8), 24, %s258_s5  ;;  %p320_p9 = scmp.lt.s32.totalorder (!%p252_p8), %s318_s6, 287 }
  0x1a   : > { %s1361_s12 = scalar_lea.vmem (!%p252_p8), [#allocation3], %s1123_s7 }
  0x1c   : > { %s1461_s6 = smov (!%p320_p9, %s318_s6), 287  ;;  %366 = sbr.rel (%p1055_p10) target bundleno = 36 (0x24), region = 58 }
  0x1d   : > { %s1119_s8 = sshll.u32 %s1461_s6, 3 }
  0x1e   : > { %s1359_s11 = scalar_lea.vmem %s1450_s1, %s1119_s8 }
  0x21   : > { %v1282_v4 = vmov 0.0  }
  0x22   : > { %367 = vst [vmem:[#allocation2 + $0x10] sm:$0xff] %v1282_v4  ;;  %368 = vst [vmem:[#allocation2] sm:$0xff] %v1282_v4 }
  0x23   : > { %369 = vst [vmem:[#allocation2 + $0x18] sm:$0xff] %v1282_v4  ;;  %370 = vst [vmem:[#allocation2 + $0x8] sm:$0xff] %v1282_v4 }
  0x24 PF: > { %v1166_v5 = vld [vmem:[%s1359_s11 + $0x74] ss:$8 sps:$4 sm:$0xff]   ;;  %v1168_v6 = vld [vmem:[%s1359_s11 + $0x70] ss:$8 sps:$4 sm:$0xff]   ;;  %v1283_v7 = vmov 0   ;;  %p1107_p11 = scmp.ne.s32.totalorder %s1272_s17, 5 }
  0x25   : > { %758 = vmatprep.mubr.bf16.mxu1 %v1283_v7  ;;  %683 = vmatprep.subr.bf16.mxu0 %v1166_v5  ;;  %v1169_v8 = vld [vmem:[%s1359_s11 + $0x64] ss:$8 sps:$4 sm:$0xff]   ;;  %v1171_v9 = vld [vmem:[%s1359_s11 + $0x60] ss:$8 sps:$4 sm:$0xff]   ;;  %v1172_v10 = vld [vmem:[%s1359_s11 + $0x54] ss:$8 sps:$4 sm:$0xff]  }
  0x26   : > { %684 = vmatpush1.bf16.msra.mxu0 %v1168_v6  ;;  %v1174_v11 = vld [vmem:[%s1359_s11 + $0x50] ss:$8 sps:$4 sm:$0xff]   ;;  %v1175_v12 = vld [vmem:[%s1359_s11 + $0x44] ss:$8 sps:$4 sm:$0xff]   ;;  %v1187_v13 = vld [vmem:[%s1359_s11 + $0x174] ss:$8 sps:$4 sm:$0xff]  }
  0x27   : > { %685 = vmatprep.subr.bf16.mxu0 %v1169_v8  ;;  %v1189_v14 = vld [vmem:[%s1359_s11 + $0x170] ss:$8 sps:$4 sm:$0xff]   ;;  %v1177_v15 = vld [vmem:[%s1359_s11 + $0x40] ss:$8 sps:$4 sm:$0xff]   ;;  %v1178_v16 = vld [vmem:[%s1359_s11 + $0x34] ss:$8 sps:$4 sm:$0xff]   ;;  %726 = vmatprep.subr.bf16.mxu1 %v1187_v13 }
  0x28   : > { %v1193_v17 = vld [vmem:[%s1359_s11 + $0x164] ss:$8 sps:$4 sm:$0xff]   ;;  %727 = vmatpush1.bf16.msra.mxu1 %v1189_v14  ;;  %v1195_v18 = vld [vmem:[%s1359_s11 + $0x160] ss:$8 sps:$4 sm:$0xff]   ;;  %v1180_v19 = vld [vmem:[%s1359_s11 + $0x30] ss:$8 sps:$4 sm:$0xff]  }
  0x29   : > { %728 = vmatprep.subr.bf16.mxu1 %v1193_v17  ;;  %v1199_v20 = vld [vmem:[%s1359_s11 + $0x154] ss:$8 sps:$4 sm:$0xff]   ;;  %v1181_v21 = vld [vmem:[%s1359_s11 + $0x24] ss:$8 sps:$4 sm:$0xff]   ;;  %v1201_v22 = vld [vmem:[%s1359_s11 + $0x150] ss:$8 sps:$4 sm:$0xff]  }
  0x2a   : > { %686 = vmatpush1.bf16.msra.mxu0 %v1171_v9  ;;  %v1205_v23 = vld [vmem:[%s1359_s11 + $0x144] ss:$8 sps:$4 sm:$0xff]   ;;  %v1183_v24 = vld [vmem:[%s1359_s11 + $0x20] ss:$8 sps:$4 sm:$0xff]   ;;  %v1184_v25 = vld [vmem:[%s1359_s11 + $0x14] ss:$8 sps:$4 sm:$0xff]  }
  0x2b   : > { %687 = vmatprep.subr.bf16.mxu0 %v1172_v10  ;;  %v1207_v26 = vld [vmem:[%s1359_s11 + $0x140] ss:$8 sps:$4 sm:$0xff]   ;;  %v1211_v27 = vld [vmem:[%s1359_s11 + $0x134] ss:$8 sps:$4 sm:$0xff]   ;;  %v1186_v28 = vld [vmem:[%s1359_s11 + $0x10] ss:$8 sps:$4 sm:$0xff]  }
  0x2c   : > { %729 = vmatpush1.bf16.msra.mxu1 %v1195_v18  ;;  %v1190_v29 = vld [vmem:[%s1359_s11 + $0x4] ss:$8 sps:$4 sm:$0xff]   ;;  %v1213_v30 = vld [vmem:[%s1359_s11 + $0x130] ss:$8 sps:$4 sm:$0xff]   ;;  %v1192_v32 = vld [vmem:[%s1359_s11] ss:$8 sps:$4 sm:$0xff]  }
  0x2d   : > { %730 = vmatprep.subr.bf16.mxu1 %v1199_v20  ;;  %v1217_v31 = vld [vmem:[%s1359_s11 + $0x124] ss:$8 sps:$4 sm:$0xff]   ;;  %v1196_v33 = vld [vmem:[%s1359_s11 + $0xf4] ss:$8 sps:$4 sm:$0xff]   ;;  %v1219_v34 = vld [vmem:[%s1359_s11 + $0x120] ss:$8 sps:$4 sm:$0xff]  }
  0x2e   : > { %688 = vmatpush1.bf16.msra.mxu0 %v1174_v11  ;;  %v1223_v35 = vld [vmem:[%s1359_s11 + $0x114] ss:$8 sps:$4 sm:$0xff]   ;;  %v1198_v36 = vld [vmem:[%s1359_s11 + $0xf0] ss:$8 sps:$4 sm:$0xff]   ;;  %v1202_v37 = vld [vmem:[%s1359_s11 + $0xe4] ss:$8 sps:$4 sm:$0xff]  }
  0x2f   : > { %689 = vmatprep.subr.bf16.mxu0 %v1175_v12  ;;  %v1225_v38 = vld [vmem:[%s1359_s11 + $0x110] ss:$8 sps:$4 sm:$0xff]   ;;  %v1229_v39 = vld [vmem:[%s1359_s11 + $0x104] ss:$8 sps:$4 sm:$0xff]   ;;  %v1204_v41 = vld [vmem:[%s1359_s11 + $0xe0] ss:$8 sps:$4 sm:$0xff]  }
  0x30   : > { %731 = vmatpush1.bf16.msra.mxu1 %v1201_v22  ;;  %v1241_v40 = vld [vmem:[%s1361_s12 + $0x4] ss:$12 sps:$4 sm:$0xff]   ;;  %v1235_v46 = vld [vmem:[%s1361_s12 + $0x8] ss:$12 sps:$4 sm:$0xff]   ;;  %v1239_v56 = vld [vmem:[%s1361_s12] ss:$12 sps:$4 sm:$0xff]  }
  0x31   : > { %732 = vmatprep.subr.bf16.mxu1 %v1205_v23  ;;  %v1208_v42 = vld [vmem:[%s1359_s11 + $0xd4] ss:$8 sps:$4 sm:$0xff]   ;;  %715 = vmatprep.mubr.bf16.mxu0 %v1241_v40  ;;  %v1231_v43 = vld [vmem:[%s1359_s11 + $0x100] ss:$8 sps:$4 sm:$0xff]   ;;  %v1210_v44 = vld [vmem:[%s1359_s11 + $0xd0] ss:$8 sps:$4 sm:$0xff]  }
  0x32   : > { %690 = vmatpush1.bf16.msra.mxu0 %v1177_v15  ;;  %v1214_v45 = vld [vmem:[%s1359_s11 + $0xc4] ss:$8 sps:$4 sm:$0xff]   ;;  %v1216_v47 = vld [vmem:[%s1359_s11 + $0xc0] ss:$8 sps:$4 sm:$0xff]   ;;  %v1220_v48 = vld [vmem:[%s1359_s11 + $0xb4] ss:$8 sps:$4 sm:$0xff]  }
  0x33   : > { %691 = vmatprep.subr.bf16.mxu0 %v1178_v16  ;;  %v1222_v49 = vld [vmem:[%s1359_s11 + $0xb0] ss:$8 sps:$4 sm:$0xff]   ;;  %v1226_v50 = vld [vmem:[%s1359_s11 + $0xa4] ss:$8 sps:$4 sm:$0xff]   ;;  %v1228_v51 = vld [vmem:[%s1359_s11 + $0xa0] ss:$8 sps:$4 sm:$0xff]  }
  0x34   : > { %733 = vmatpush1.bf16.msra.mxu1 %v1207_v26  ;;  %v1232_v52 = vld [vmem:[%s1359_s11 + $0x94] ss:$8 sps:$4 sm:$0xff]   ;;  %v1234_v53 = vld [vmem:[%s1359_s11 + $0x90] ss:$8 sps:$4 sm:$0xff]   ;;  %v1236_v54 = vld [vmem:[%s1359_s11 + $0x84] ss:$8 sps:$4 sm:$0xff]  }
  0x35   : > { %734 = vmatprep.subr.bf16.mxu1 %v1211_v27  ;;  %v1238_v55 = vld [vmem:[%s1359_s11 + $0x80] ss:$8 sps:$4 sm:$0xff]   ;;  %v371_v59 = vld [vmem:[#allocation2 + $0x10] sm:$0xff]  ;;  %v373_v3 = vld [vmem:[#allocation2 + $0x18] sm:$0xff] }
  0x36   : > { %692 = vmatpush1.bf16.msra.mxu0 %v1180_v19  ;;  %v372_v63 = vld [vmem:[#allocation2] sm:$0xff]  ;;  %v374_v8 = vld [vmem:[#allocation2 + $0x8] sm:$0xff] }
  0x37   : > { %693 = vmatprep.subr.bf16.mxu0 %v1181_v21 }
  0x38   : > { %735 = vmatpush1.bf16.msra.mxu1 %v1213_v30 }
  0x39   : > { %736 = vmatprep.subr.bf16.mxu1 %v1217_v31 }
  0x3a   : > { %694 = vmatpush1.bf16.msra.mxu0 %v1183_v24 }
  0x3b   : > { %695 = vmatprep.subr.bf16.mxu0 %v1184_v25 }
  0x3c   : > { %737 = vmatpush1.bf16.msra.mxu1 %v1219_v34 }
  0x3d   : > { %738 = vmatprep.subr.bf16.mxu1 %v1223_v35 }
  0x3e   : > { %696 = vmatpush1.bf16.msra.mxu0 %v1186_v28 }
  0x3f   : > { %697 = vmatprep.subr.bf16.mxu0 %v1190_v29 }
  0x40   : > { %739 = vmatpush1.bf16.msra.mxu1 %v1225_v38 }
  0x41   : > { %740 = vmatprep.subr.bf16.mxu1 %v1229_v39 }
  0x42   : > { %698 = vmatpush1.bf16.msra.mxu0 %v1192_v32 }
  0x43   : > { %699 = vmatprep.subr.bf16.mxu0 %v1196_v33 }
  0x44   : > { %741 = vmatpush1.bf16.msra.mxu1 %v1231_v43 }
  0x46   : > { %700 = vmatpush2.bf16.msra.mxu0 %v1198_v36 }
  0x47   : > { %701 = vmatprep.subr.bf16.mxu0 %v1202_v37  ;;  %759 = vmatmul.mubr.bf16.vlgmr.msra.gmra.mxu1 %v1235_v46 }
  0x4a   : > { %702 = vmatpush2.bf16.msra.mxu0 %v1204_v41 }
  0x4b   : > { %703 = vmatprep.subr.bf16.mxu0 %v1208_v42 }
  0x4e   : > { %704 = vmatpush2.bf16.msra.mxu0 %v1210_v44 }
  0x4f   : > { %705 = vmatprep.subr.bf16.mxu0 %v1214_v45 }
  0x52   : > { %706 = vmatpush2.bf16.msra.mxu0 %v1216_v47 }
  0x53   : > { %707 = vmatprep.subr.bf16.mxu0 %v1220_v48 }
  0x56   : > { %708 = vmatpush2.bf16.msra.mxu0 %v1222_v49 }
  0x57   : > { %709 = vmatprep.subr.bf16.mxu0 %v1226_v50 }
  0x5a   : > { %710 = vmatpush2.bf16.msra.mxu0 %v1228_v51 }
  0x5b   : > { %711 = vmatprep.subr.bf16.mxu0 %v1232_v52 }
  0x5e   : > { %712 = vmatpush2.bf16.msra.mxu0 %v1234_v53 }
  0x5f   : > { %713 = vmatprep.subr.bf16.mxu0 %v1236_v54 }
  0x62   : > { %714 = vmatpush2.bf16.msra.mxu0 %v1238_v55 }
  0x65   : > { %716 = vmatmul.mubr.bf16.vlgmr.msra.gmra.mxu0 %v1239_v56 }
 0x107   : > { %v760_v57 = vpop.f32.mrf.mxu1 }
 0x109   : > { %v762_v58 = vpop.f32.mrf.mxu1 }
 0x10b   : > { %v764_v62 = vpop.f32.mrf.mxu1 }
 0x10d   : > { %v766_v7 = vpop.f32.mrf.mxu1 }
 0x125   : > { %v717_v60 = vpop.f32.mrf.mxu0 }
 0x126   : > { %v761_v61 = vadd.f32 %v760_v57, %v717_v60 }
 0x127   : > { %v719_v0 = vpop.f32.mrf.mxu0 }
 0x128   : > { %v769_v1 = vadd.f32 %v761_v61, %v371_v59  ;;  %v763_v2 = vadd.f32 %v762_v58, %v719_v0 }
 0x129   : > { %v721_v4 = vpop.f32.mrf.mxu0 }
 0x12a   : > { %773 = vst [vmem:[#allocation2 + $0x10] sm:$0xff] %v769_v1  ;;  %v770_v5 = vadd.f32 %v763_v2, %v372_v63  ;;  %v765_v6 = vadd.f32 %v764_v62, %v721_v4 }
 0x12b   : > { %v723_v9 = vpop.f32.mrf.mxu0 }
 0x12c   : > { %774 = vst [vmem:[#allocation2] sm:$0xff] %v770_v5  ;;  %v771_v10 = vadd.f32 %v765_v6, %v373_v3  ;;  %v767_v11 = vadd.f32 %v766_v7, %v723_v9  ;;  %780 = sbr.rel (%p1107_p11) target bundleno = 329 (0x149), region = 62 }
 0x12e   : > { %775 = vst [vmem:[#allocation2 + $0x18] sm:$0xff] %v771_v10  ;;  %v772_v12 = vadd.f32 %v767_v11, %v374_v8 }
 0x130   : > { %776 = vst [vmem:[#allocation2 + $0x8] sm:$0xff] %v772_v12 }
 0x131   : > { %v781_v13 = vld [vmem:[#allocation2 + $0x10] sm:$0xff] }
 0x132   : > { %v813_v17 = vmul.f32 %v781_v13, %v781_v13 }
 0x133   : > { %v782_v14 = vld [vmem:[#allocation2] sm:$0xff] }
 0x134   : > { %v1120_v16 = vpack.c.bf16 %v782_v14, %v781_v13  ;;  %v814_v18 = vmul.f32 %v782_v14, %v782_v14 }
 0x135   : > { %v783_v15 = vld [vmem:[#allocation2 + $0x18] sm:$0xff] }
 0x136   : > { %v799_v20 = vadd.f32 %v783_v15, %v781_v13  ;;  %v815_v23 = vmul.f32 %v783_v15, %v783_v15  ;;  %797 = vst [vmem:[%s1451_s2] sm:$0xff] %v1120_v16 }
 0x137   : > { %v784_v19 = vld [vmem:[#allocation2 + $0x8] sm:$0xff] }
 0x138   : > { %v1121_v21 = vpack.c.bf16 %v784_v19, %v783_v15  ;;  %v806_v22 = vadd.f32 %v784_v19, %v782_v14  ;;  %v816_v24 = vmul.f32 %v784_v19, %v784_v19  ;;  %v800_v25 = vrot.slane %v799_v20, 4 }
 0x139   : > { %v817_v27 = vadd.f32 %v815_v23, %v813_v17 }
 0x13a   : > { %798 = vst [vmem:[%s1451_s2 + $0x8] sm:$0xff] %v1121_v21  ;;  %v807_v26 = vrot.slane %v806_v22, 4  ;;  %v824_v28 = vadd.f32 %v816_v24, %v814_v18  ;;  %v801_v29 = vadd.f32 %v800_v25, %v799_v20 }
 0x13b   : > { %v818_v31 = vrot.slane %v817_v27, 4 }
 0x13c   : > { %v808_v30 = vadd.f32 %v807_v26, %v806_v22  ;;  %v825_v32 = vrot.slane %v824_v28, 4  ;;  %v802_v33 = vrot.slane %v801_v29, 2 }
 0x13d   : > { %v819_v35 = vadd.f32 %v818_v31, %v817_v27 }
 0x13e   : > { %v809_v34 = vrot.slane %v808_v30, 2  ;;  %v826_v36 = vadd.f32 %v825_v32, %v824_v28  ;;  %v803_v37 = vadd.f32 %v802_v33, %v801_v29 }
 0x13f   : > { %v820_v39 = vrot.slane %v819_v35, 2 }
 0x140   : > { %v810_v38 = vadd.f32 %v809_v34, %v808_v30  ;;  %v827_v40 = vrot.slane %v826_v36, 2  ;;  %v804_v41 = vrot.slane %v803_v37, 1 }
 0x141   : > { %v821_v43 = vadd.f32 %v820_v39, %v819_v35 }
 0x142   : > { %v811_v42 = vrot.slane %v810_v38, 1  ;;  %v828_v44 = vadd.f32 %v827_v40, %v826_v36  ;;  %v805_v45 = vadd.f32 %v804_v41, %v803_v37 }
 0x143   : > { %v822_v47 = vrot.slane %v821_v43, 1 }
 0x144   : > { %v812_v46 = vadd.f32 %v811_v42, %v810_v38  ;;  %v829_v48 = vrot.slane %v828_v44, 1  ;;  %831 = vst [vmem:[%s1452_s3] sm:$0xff] %v805_v45 }
 0x145   : > { %v823_v49 = vadd.f32 %v822_v47, %v821_v43 }
 0x146   : > { %832 = vst [vmem:[%s1452_s3 + $0x8] sm:$0xff] %v812_v46  ;;  %v830_v50 = vadd.f32 %v829_v48, %v828_v44 }
 0x147   : > { %833 = vst [vmem:[%s1453_s4] sm:$0xff] %v823_v49 }
 0x148   : > { %834 = vst [vmem:[%s1453_s4 + $0x8] sm:$0xff] %v830_v50 }
 0x149 PF: > { %s15_s19 = sadd.s32 1, %s1280_s19   ;;  %s1454_s15 = smov %s1268_s16 }
 0x14a   : > { %p12_p12 = scmp.ge.s32.totalorder %s15_s19, 8   ;;  %s1455_s16 = smov %s1344_s23 }
 0x14b   : > { %s1456_s17 = smov %s1276_s18  ;;  %s1457_s18 = smov %s1459_s20 }
 0x14c   :  { %14 = sbr.rel (!%p12_p12) target bundleno = 3 (0x3), region = 130 }

// kernel: forward.127
= control target key start
LH: loop header
LB: loop body
LE: loop exit
PB: predicated region body
PF: predicated region fallthrough
CT: control target
= control target key end

     0   :  { %s584_s1 = inlined_call_operand.vmem [shape: bf16[256,256], index: 1, kind: input, shape index: {}]   ;;  %s585_s0 = inlined_call_operand.vmem [shape: bf16[16,256], index: 0, kind: input, shape index: {}]   ;;  %s586_s2 = inlined_call_operand.vmem [shape: bf16[16,256], index: 2, kind: output, shape index: {0}]   ;;  %s587_s3 = inlined_call_operand.vmem [shape: f32[8,256], index: 3, kind: output, shape index: {1}]   ;;  %s588_s4 = inlined_call_operand.vmem [shape: f32[8,256], index: 4, kind: output, shape index: {2}]  }
   0x1   :  { %v388_v0 = vld [vmem:[%s584_s1 + $0x74] ss:$8 sps:$4 sm:$0xff]   ;;  %v390_v1 = vld [vmem:[%s584_s1 + $0x70] ss:$8 sps:$4 sm:$0xff]   ;;  %v391_v2 = vld [vmem:[%s584_s1 + $0x64] ss:$8 sps:$4 sm:$0xff]  }
   0x2   :  { %230 = vmatprep.subr.bf16.mxu0 %v388_v0  ;;  %v393_v3 = vld [vmem:[%s584_s1 + $0x60] ss:$8 sps:$4 sm:$0xff]   ;;  %v394_v4 = vld [vmem:[%s584_s1 + $0x54] ss:$8 sps:$4 sm:$0xff]   ;;  %v396_v5 = vld [vmem:[%s584_s1 + $0x50] ss:$8 sps:$4 sm:$0xff]  }
   0x3   :  { %231 = vmatpush1.bf16.msra.mxu0 %v390_v1  ;;  %v397_v6 = vld [vmem:[%s584_s1 + $0x44] ss:$8 sps:$4 sm:$0xff]   ;;  %v399_v7 = vld [vmem:[%s584_s1 + $0x40] ss:$8 sps:$4 sm:$0xff]   ;;  %v400_v8 = vld [vmem:[%s584_s1 + $0x34] ss:$8 sps:$4 sm:$0xff]  }
   0x4   :  { %232 = vmatprep.subr.bf16.mxu0 %v391_v2  ;;  %v402_v9 = vld [vmem:[%s584_s1 + $0x30] ss:$8 sps:$4 sm:$0xff]   ;;  %v403_v10 = vld [vmem:[%s584_s1 + $0x24] ss:$8 sps:$4 sm:$0xff]   ;;  %v405_v11 = vld [vmem:[%s584_s1 + $0x20] ss:$8 sps:$4 sm:$0xff]  }
   0x5   :  { %v406_v12 = vld [vmem:[%s584_s1 + $0x14] ss:$8 sps:$4 sm:$0xff]   ;;  %v438_v13 = vld [vmem:[%s585_s0 + $0x4] ss:$8 sps:$4 sm:$0xff]   ;;  %v408_v14 = vld [vmem:[%s584_s1 + $0x10] ss:$8 sps:$4 sm:$0xff]  }
   0x6   :  { %v409_v15 = vld [vmem:[%s584_s1 + $0x4] ss:$8 sps:$4 sm:$0xff]   ;;  %262 = vmatprep.mubr.bf16.mxu0 %v438_v13  ;;  %v411_v16 = vld [vmem:[%s584_s1] ss:$8 sps:$4 sm:$0xff]   ;;  %v412_v17 = vld [vmem:[%s584_s1 + $0xf4] ss:$8 sps:$4 sm:$0xff]  }
   0x7   :  { %233 = vmatpush1.bf16.msra.mxu0 %v393_v3  ;;  %v414_v18 = vld [vmem:[%s584_s1 + $0xf0] ss:$8 sps:$4 sm:$0xff]   ;;  %v415_v19 = vld [vmem:[%s584_s1 + $0xe4] ss:$8 sps:$4 sm:$0xff]   ;;  %v417_v20 = vld [vmem:[%s584_s1 + $0xe0] ss:$8 sps:$4 sm:$0xff]  }
   0x8   :  { %234 = vmatprep.subr.bf16.mxu0 %v394_v4  ;;  %v418_v21 = vld [vmem:[%s584_s1 + $0xd4] ss:$8 sps:$4 sm:$0xff]   ;;  %v420_v22 = vld [vmem:[%s584_s1 + $0xd0] ss:$8 sps:$4 sm:$0xff]   ;;  %v421_v23 = vld [vmem:[%s584_s1 + $0xc4] ss:$8 sps:$4 sm:$0xff]  }
   0x9   :  { %v423_v24 = vld [vmem:[%s584_s1 + $0xc0] ss:$8 sps:$4 sm:$0xff]   ;;  %v424_v25 = vld [vmem:[%s584_s1 + $0xb4] ss:$8 sps:$4 sm:$0xff]   ;;  %v426_v26 = vld [vmem:[%s584_s1 + $0xb0] ss:$8 sps:$4 sm:$0xff]  }
   0xa   :  { %v427_v27 = vld [vmem:[%s584_s1 + $0xa4] ss:$8 sps:$4 sm:$0xff]   ;;  %v429_v28 = vld [vmem:[%s584_s1 + $0xa0] ss:$8 sps:$4 sm:$0xff]   ;;  %v430_v29 = vld [vmem:[%s584_s1 + $0x94] ss:$8 sps:$4 sm:$0xff]  }
   0xb   :  { %235 = vmatpush1.bf16.msra.mxu0 %v396_v5  ;;  %v432_v30 = vld [vmem:[%s584_s1 + $0x90] ss:$8 sps:$4 sm:$0xff]   ;;  %v433_v31 = vld [vmem:[%s584_s1 + $0x84] ss:$8 sps:$4 sm:$0xff]   ;;  %v435_v32 = vld [vmem:[%s584_s1 + $0x80] ss:$8 sps:$4 sm:$0xff]  }
   0xc   :  { %236 = vmatprep.subr.bf16.mxu0 %v397_v6  ;;  %v436_v33 = vld [vmem:[%s585_s0] ss:$8 sps:$4 sm:$0xff]  }
   0xf   :  { %237 = vmatpush1.bf16.msra.mxu0 %v399_v7 }
  0x10   :  { %238 = vmatprep.subr.bf16.mxu0 %v400_v8 }
  0x13   :  { %239 = vmatpush1.bf16.msra.mxu0 %v402_v9 }
  0x14   :  { %240 = vmatprep.subr.bf16.mxu0 %v403_v10 }
  0x17   :  { %241 = vmatpush1.bf16.msra.mxu0 %v405_v11 }
  0x18   :  { %242 = vmatprep.subr.bf16.mxu0 %v406_v12 }
  0x1b   :  { %243 = vmatpush1.bf16.msra.mxu0 %v408_v14 }
  0x1c   :  { %244 = vmatprep.subr.bf16.mxu0 %v409_v15 }
  0x1f   :  { %245 = vmatpush1.bf16.msra.mxu0 %v411_v16 }
  0x20   :  { %246 = vmatprep.subr.bf16.mxu0 %v412_v17 }
  0x23   :  { %247 = vmatpush2.bf16.msra.mxu0 %v414_v18 }
  0x24   :  { %248 = vmatprep.subr.bf16.mxu0 %v415_v19 }
  0x27   :  { %249 = vmatpush2.bf16.msra.mxu0 %v417_v20 }
  0x28   :  { %250 = vmatprep.subr.bf16.mxu0 %v418_v21 }
  0x2b   :  { %251 = vmatpush2.bf16.msra.mxu0 %v420_v22 }
  0x2c   :  { %252 = vmatprep.subr.bf16.mxu0 %v421_v23 }
  0x2f   :  { %253 = vmatpush2.bf16.msra.mxu0 %v423_v24 }
  0x30   :  { %254 = vmatprep.subr.bf16.mxu0 %v424_v25 }
  0x33   :  { %255 = vmatpush2.bf16.msra.mxu0 %v426_v26 }
  0x34   :  { %256 = vmatprep.subr.bf16.mxu0 %v427_v27 }
  0x37   :  { %257 = vmatpush2.bf16.msra.mxu0 %v429_v28 }
  0x38   :  { %258 = vmatprep.subr.bf16.mxu0 %v430_v29 }
  0x3b   :  { %259 = vmatpush2.bf16.msra.mxu0 %v432_v30 }
  0x3c   :  { %260 = vmatprep.subr.bf16.mxu0 %v433_v31 }
  0x3f   :  { %261 = vmatpush2.bf16.msra.mxu0 %v435_v32 }
  0x42   :  { %263 = vmatmul.mubr.bf16.vlgmr.msra.gmra.mxu0 %v436_v33 }
 0x102   :  { %v264_v34 = vpop.f32.mrf.mxu0 }
 0x103   :  { %v316_v38 = vmul.f32 %v264_v34, %v264_v34 }
 0x104   :  { %v266_v35 = vpop.f32.mrf.mxu0 }
 0x105   :  { %v386_v36 = vpack.c.bf16 %v266_v35, %v264_v34  ;;  %v317_v46 = vmul.f32 %v266_v35, %v266_v35 }
 0x106   :  { %v268_v37 = vpop.f32.mrf.mxu0 }
 0x107   :  { %v302_v39 = vadd.f32 %v268_v37, %v264_v34  ;;  %v318_v40 = vmul.f32 %v268_v37, %v268_v37  ;;  %300 = vst [vmem:[%s586_s2] sm:$0xff] %v386_v36 }
 0x108   :  { %v270_v41 = vpop.f32.mrf.mxu0 }
 0x109   :  { %v303_v42 = vrot.slane %v302_v39, 4  ;;  %v320_v43 = vadd.f32 %v318_v40, %v316_v38  ;;  %v387_v44 = vpack.c.bf16 %v270_v41, %v268_v37  ;;  %v309_v45 = vadd.f32 %v270_v41, %v266_v35 }
 0x10a   :  { %v319_v47 = vmul.f32 %v270_v41, %v270_v41 }
 0x10b   :  { %v304_v48 = vadd.f32 %v303_v42, %v302_v39  ;;  %v321_v49 = vrot.slane %v320_v43, 4  ;;  %301 = vst [vmem:[%s586_s2 + $0x8] sm:$0xff] %v387_v44  ;;  %v310_v50 = vrot.slane %v309_v45, 4 }
 0x10c   :  { %v327_v51 = vadd.f32 %v319_v47, %v317_v46 }
 0x10d   :  { %v305_v52 = vrot.slane %v304_v48, 2  ;;  %v322_v53 = vadd.f32 %v321_v49, %v320_v43  ;;  %v311_v54 = vadd.f32 %v310_v50, %v309_v45 }
 0x10e   :  { %v328_v55 = vrot.slane %v327_v51, 4 }
 0x10f   :  { %v306_v56 = vadd.f32 %v305_v52, %v304_v48  ;;  %v323_v57 = vrot.slane %v322_v53, 2  ;;  %v312_v58 = vrot.slane %v311_v54, 2 }
 0x110   :  { %v329_v59 = vadd.f32 %v328_v55, %v327_v51 }
 0x111   :  { %v307_v60 = vrot.slane %v306_v56, 1  ;;  %v324_v61 = vadd.f32 %v323_v57, %v322_v53  ;;  %v313_v62 = vadd.f32 %v312_v58, %v311_v54 }
 0x112   :  { %v330_v63 = vrot.slane %v329_v59, 2 }
 0x113   :  { %v308_v0 = vadd.f32 %v307_v60, %v306_v56  ;;  %v325_v1 = vrot.slane %v324_v61, 1  ;;  %v314_v2 = vrot.slane %v313_v62, 1 }
 0x114   :  { %v331_v3 = vadd.f32 %v330_v63, %v329_v59 }
 0x115   :  { %v326_v4 = vadd.f32 %v325_v1, %v324_v61  ;;  %v315_v5 = vadd.f32 %v314_v2, %v313_v62  ;;  %334 = vst [vmem:[%s587_s3] sm:$0xff] %v308_v0 }
 0x116   :  { %v332_v6 = vrot.slane %v331_v3, 1 }
 0x117   :  { %335 = vst [vmem:[%s587_s3 + $0x8] sm:$0xff] %v315_v5  ;;  %336 = vst [vmem:[%s588_s4] sm:$0xff] %v326_v4 }
 0x118   :  { %v333_v7 = vadd.f32 %v332_v6, %v331_v3 }
 0x11a   :  { %337 = vst [vmem:[%s588_s4 + $0x8] sm:$0xff] %v333_v7 }

// kernel: forward.152
= control target key start
LH: loop header
LB: loop body
LE: loop exit
PB: predicated region body
PF: predicated region fallthrough
CT: control target
= control target key end

     0   :  { %s1255_s15 = smov 0   ;;  %s1257_s16 = smov 0   ;;  %s1452_s0 = inlined_call_operand.vmem [shape: bf16[16,256], index: 0, kind: input, shape index: {}]   ;;  %s1453_s1 = inlined_call_operand.vmem [shape: bf16[256,512], index: 1, kind: input, shape index: {}]   ;;  %s1454_s2 = inlined_call_operand.vmem [shape: bf16[16,512], index: 2, kind: output, shape index: {0}]   ;;  %s1455_s3 = inlined_call_operand.vmem [shape: f32[8,512], index: 3, kind: output, shape index: {1}]   ;;  %s1456_s4 = inlined_call_operand.vmem [shape: f32[8,512], index: 4, kind: output, shape index: {2}]  }
   0x1   :  { %s1259_s17 = smov 0   ;;  %s1261_s18 = smov 0  }
   0x2   :  { %s1263_s19 = smov 0  }
   0x3 LB: > { %s30_s20 = sadd.s32 1, %s1224_s18  ;;  %s1039_s21 = sadd.s32 4294967295, %s1228_s19   ;;  %s1228_s19 = sphi %s1263_s19, %s15_s19   ;;  %s1224_s18 = sphi %s1261_s18, %s1461_s18   ;;  %s1220_s17 = sphi %s1259_s17, %s1460_s17   ;;  %s1216_s16 = sphi %s1257_s16, %s1459_s16   ;;  %s1212_s15 = sphi %s1255_s15, %s1458_s15  }
   0x4   : > { %p32_p0 = scmp.ge.s32.totalorder %s30_s20, 2  ;;  %p78_p1 = scmp.ne.s32.totalorder %s1216_s16, %s1212_s15 }
   0x5   : > { %p79_p2 = scmp.eq.s32.totalorder %s1228_s19, 0  ;;  %p110_p4 = scmp.eq.s32.totalorder %s1039_s21, 1 }
   0x6   : > { %s1463_s20 = smov (%p32_p0, %s30_s20), 0  ;;  %s71_s23 = sadd.s32 1, %s1216_s16 }
   0x7   : > { %p80_p3 = por %p79_p2, %p78_p1  ;;  %s67_s22 = ssub.s32 %s1224_s18, %s1463_s20 }
   0x8   : > { %p69_p5 = scmp.eq.s32.totalorder %s67_s22, 0  ;;  %p1290_p6 = por %p110_p4, %p78_p1 }
   0x9   : > { %p1043_p7 = scmp.ge.s32.totalorder %s1228_s19, 2 }
   0xa   : > { %s1295_s25 = scalar_select %p69_p5, %s1216_s16, %s71_s23  }
   0xb   : > { %203 = sbr.rel (%p1043_p7) target bundleno = 36 (0x24), region = 20 }
  0x10   : > { %206 = sbr.rel (!%p80_p3) target bundleno = 36 (0x24), region = 24  ;;  %s208_s26 = sand.u32 (%p80_p3), 1, %s1216_s16  }
  0x11   : > { %s1095_s27 = sshll.u32 (%p80_p3), %s1224_s18, 3  ;;  %s1044_s28 = sshll.u32 (%p80_p3), %s208_s26, 8 }
  0x12   : > { %s1303_s5 = scalar_lea.vmem (%p80_p3), %s1453_s1, %s1095_s27  ;;  %s1308_s6 = scalar_lea.vmem (%p80_p3), [#allocation3], %s1044_s28 }
  0x13   : > { %v307_v0 = vld [vmem:[%s1303_s5] sm:$0xff] (%p80_p3)  ;;  %v309_v1 = vld [vmem:[%s1303_s5 + $0x10] sm:$0xff] (%p80_p3) }
  0x14   : > { %v311_v2 = vld [vmem:[%s1303_s5 + $0x20] sm:$0xff] (%p80_p3)  ;;  %308 = vst [vmem:[%s1308_s6] sm:$0xff] (%p80_p3), %v307_v0  ;;  %310 = vst [vmem:[%s1308_s6 + $0x8] sm:$0xff] (%p80_p3), %v309_v1  ;;  %v313_v3 = vld [vmem:[%s1303_s5 + $0x30] sm:$0xff] (%p80_p3) }
  0x15   : > { %312 = vst [vmem:[%s1308_s6 + $0x10] sm:$0xff] %v311_v2  ;;  %v315_v4 = vld [vmem:[%s1303_s5 + $0x40] sm:$0xff]  ;;  %v317_v5 = vld [vmem:[%s1303_s5 + $0x50] sm:$0xff]  ;;  %314 = vst [vmem:[%s1308_s6 + $0x18] sm:$0xff] %v313_v3 }
  0x16   : > { %316 = vst [vmem:[%s1308_s6 + $0x20] sm:$0xff] %v315_v4  ;;  %318 = vst [vmem:[%s1308_s6 + $0x28] sm:$0xff] %v317_v5  ;;  %v319_v6 = vld [vmem:[%s1303_s5 + $0x60] sm:$0xff]  ;;  %v321_v7 = vld [vmem:[%s1303_s5 + $0x70] sm:$0xff] }
  0x17   : > { %v323_v8 = vld [vmem:[%s1303_s5 + $0x80] sm:$0xff]  ;;  %320 = vst [vmem:[%s1308_s6 + $0x30] sm:$0xff] %v319_v6  ;;  %322 = vst [vmem:[%s1308_s6 + $0x38] sm:$0xff] %v321_v7  ;;  %v325_v9 = vld [vmem:[%s1303_s5 + $0x90] sm:$0xff] }
  0x18   : > { %324 = vst [vmem:[%s1308_s6 + $0x40] sm:$0xff] %v323_v8  ;;  %v327_v10 = vld [vmem:[%s1303_s5 + $0xa0] sm:$0xff]  ;;  %v329_v11 = vld [vmem:[%s1303_s5 + $0xb0] sm:$0xff]  ;;  %326 = vst [vmem:[%s1308_s6 + $0x48] sm:$0xff] %v325_v9 }
  0x19   : > { %328 = vst [vmem:[%s1308_s6 + $0x50] sm:$0xff] %v327_v10  ;;  %330 = vst [vmem:[%s1308_s6 + $0x58] sm:$0xff] %v329_v11  ;;  %v331_v12 = vld [vmem:[%s1303_s5 + $0xc0] sm:$0xff]  ;;  %v333_v13 = vld [vmem:[%s1303_s5 + $0xd0] sm:$0xff] }
  0x1a   : > { %v335_v14 = vld [vmem:[%s1303_s5 + $0xe0] sm:$0xff]  ;;  %332 = vst [vmem:[%s1308_s6 + $0x60] sm:$0xff] %v331_v12  ;;  %334 = vst [vmem:[%s1308_s6 + $0x68] sm:$0xff] %v333_v13  ;;  %v337_v15 = vld [vmem:[%s1303_s5 + $0xf0] sm:$0xff] }
  0x1b   : > { %336 = vst [vmem:[%s1308_s6 + $0x70] sm:$0xff] %v335_v14  ;;  %v339_v16 = vld [vmem:[%s1303_s5 + $0x100] sm:$0xff]  ;;  %v341_v17 = vld [vmem:[%s1303_s5 + $0x110] sm:$0xff]  ;;  %338 = vst [vmem:[%s1308_s6 + $0x78] sm:$0xff] %v337_v15 }
  0x1c   : > { %340 = vst [vmem:[%s1308_s6 + $0x80] sm:$0xff] %v339_v16  ;;  %342 = vst [vmem:[%s1308_s6 + $0x88] sm:$0xff] %v341_v17  ;;  %v343_v18 = vld [vmem:[%s1303_s5 + $0x120] sm:$0xff]  ;;  %v345_v19 = vld [vmem:[%s1303_s5 + $0x130] sm:$0xff] }
  0x1d   : > { %v347_v20 = vld [vmem:[%s1303_s5 + $0x140] sm:$0xff]  ;;  %344 = vst [vmem:[%s1308_s6 + $0x90] sm:$0xff] %v343_v18  ;;  %346 = vst [vmem:[%s1308_s6 + $0x98] sm:$0xff] %v345_v19  ;;  %v349_v21 = vld [vmem:[%s1303_s5 + $0x150] sm:$0xff] }
  0x1e   : > { %348 = vst [vmem:[%s1308_s6 + $0xa0] sm:$0xff] %v347_v20  ;;  %v351_v22 = vld [vmem:[%s1303_s5 + $0x160] sm:$0xff]  ;;  %v353_v23 = vld [vmem:[%s1303_s5 + $0x170] sm:$0xff]  ;;  %350 = vst [vmem:[%s1308_s6 + $0xa8] sm:$0xff] %v349_v21 }
  0x1f   : > { %352 = vst [vmem:[%s1308_s6 + $0xb0] sm:$0xff] %v351_v22  ;;  %354 = vst [vmem:[%s1308_s6 + $0xb8] sm:$0xff] %v353_v23  ;;  %v355_v24 = vld [vmem:[%s1303_s5 + $0x180] sm:$0xff]  ;;  %v357_v25 = vld [vmem:[%s1303_s5 + $0x190] sm:$0xff] }
  0x20   : > { %v359_v26 = vld [vmem:[%s1303_s5 + $0x1a0] sm:$0xff]  ;;  %356 = vst [vmem:[%s1308_s6 + $0xc0] sm:$0xff] %v355_v24  ;;  %358 = vst [vmem:[%s1308_s6 + $0xc8] sm:$0xff] %v357_v25  ;;  %v361_v27 = vld [vmem:[%s1303_s5 + $0x1b0] sm:$0xff] }
  0x21   : > { %360 = vst [vmem:[%s1308_s6 + $0xd0] sm:$0xff] %v359_v26  ;;  %v363_v28 = vld [vmem:[%s1303_s5 + $0x1c0] sm:$0xff]  ;;  %v365_v29 = vld [vmem:[%s1303_s5 + $0x1d0] sm:$0xff]  ;;  %362 = vst [vmem:[%s1308_s6 + $0xd8] sm:$0xff] %v361_v27 }
  0x22   : > { %364 = vst [vmem:[%s1308_s6 + $0xe0] sm:$0xff] %v363_v28  ;;  %366 = vst [vmem:[%s1308_s6 + $0xe8] sm:$0xff] %v365_v29  ;;  %v367_v30 = vld [vmem:[%s1303_s5 + $0x1e0] sm:$0xff]  ;;  %v369_v31 = vld [vmem:[%s1303_s5 + $0x1f0] sm:$0xff] }
  0x23   : > { %368 = vst [vmem:[%s1308_s6 + $0xf0] sm:$0xff] %v367_v30  ;;  %370 = vst [vmem:[%s1308_s6 + $0xf8] sm:$0xff] %v369_v31 }
  0x24 PF: > { %p1047_p8 = scmp.ge.s32.totalorder %s1228_s19, 1  ;;  %p375_p9 = scmp.lt.s32.totalorder %s1228_s19, 3 }
  0x26   : > { %p376_p10 = pnand %p1047_p8, %p375_p9 }
  0x27   : > { %s382_s7 = sand.u32 (!%p376_p10), 1, %s1212_s15   ;;  %s1050_s21 = sshll.u32 (!%p376_p10), %s1220_s17, 1 }
  0x28   : > { %379 = sbr.rel (%p376_p10) target bundleno = 327 (0x147), region = 62  ;;  %s1048_s8 = sshll.u32 (!%p376_p10), %s382_s7, 8 }
  0x29   : > { %s1379_s11 = scalar_lea.vmem (!%p376_p10), [#allocation3], %s1048_s8  ;;  %s1049_s14 = sshll.u32 (!%p376_p10), %s382_s7, 4 }
  0x2a   : > { %p453_p11 = scmp.lt.s32.totalorder (!%p376_p10), %s1050_s21, 3  ;;  %s1419_s22 = scalar_lea.vmem (!%p376_p10), [#allocation4], %s1049_s14 }
  0x2d   : > { %v1189_v32 = vld [vmem:[%s1452_s0 + $0x4] ss:$8 sps:$4 sm:$0xff]   ;;  %v1139_v33 = vld [vmem:[%s1379_s11 + $0x74] ss:$8 sps:$4 sm:$0xff]   ;;  %v1141_v34 = vld [vmem:[%s1379_s11 + $0x70] ss:$8 sps:$4 sm:$0xff]  }
  0x2e   : > { %718 = vmatprep.mubr.bf16.mxu0 %v1189_v32  ;;  %686 = vmatprep.subr.bf16.mxu0 %v1139_v33  ;;  %v1142_v35 = vld [vmem:[%s1379_s11 + $0x64] ss:$8 sps:$4 sm:$0xff]   ;;  %v1144_v36 = vld [vmem:[%s1379_s11 + $0x60] ss:$8 sps:$4 sm:$0xff]   ;;  %v1145_v37 = vld [vmem:[%s1379_s11 + $0x54] ss:$8 sps:$4 sm:$0xff]  }
  0x2f   : > { %687 = vmatpush1.bf16.msra.mxu0 %v1141_v34  ;;  %v1147_v38 = vld [vmem:[%s1379_s11 + $0x50] ss:$8 sps:$4 sm:$0xff]   ;;  %v1148_v39 = vld [vmem:[%s1379_s11 + $0x44] ss:$8 sps:$4 sm:$0xff]   ;;  %v1150_v40 = vld [vmem:[%s1379_s11 + $0x40] ss:$8 sps:$4 sm:$0xff]  }
  0x30   : > { %688 = vmatprep.subr.bf16.mxu0 %v1142_v35  ;;  %v1151_v41 = vld [vmem:[%s1379_s11 + $0x34] ss:$8 sps:$4 sm:$0xff]   ;;  %v1153_v42 = vld [vmem:[%s1379_s11 + $0x30] ss:$8 sps:$4 sm:$0xff]   ;;  %v1154_v43 = vld [vmem:[%s1379_s11 + $0x24] ss:$8 sps:$4 sm:$0xff]  }
  0x31   : > { %v1156_v44 = vld [vmem:[%s1379_s11 + $0x20] ss:$8 sps:$4 sm:$0xff]   ;;  %v1157_v45 = vld [vmem:[%s1379_s11 + $0x14] ss:$8 sps:$4 sm:$0xff]   ;;  %v1159_v46 = vld [vmem:[%s1379_s11 + $0x10] ss:$8 sps:$4 sm:$0xff]  }
  0x32   : > { %v1160_v47 = vld [vmem:[%s1379_s11 + $0x4] ss:$8 sps:$4 sm:$0xff]   ;;  %v1162_v48 = vld [vmem:[%s1379_s11] ss:$8 sps:$4 sm:$0xff]   ;;  %v1163_v49 = vld [vmem:[%s1379_s11 + $0xf4] ss:$8 sps:$4 sm:$0xff]  }
  0x33   : > { %689 = vmatpush1.bf16.msra.mxu0 %v1144_v36  ;;  %v1165_v50 = vld [vmem:[%s1379_s11 + $0xf0] ss:$8 sps:$4 sm:$0xff]   ;;  %v1166_v51 = vld [vmem:[%s1379_s11 + $0xe4] ss:$8 sps:$4 sm:$0xff]   ;;  %v1168_v52 = vld [vmem:[%s1379_s11 + $0xe0] ss:$8 sps:$4 sm:$0xff]  }
  0x34   : > { %690 = vmatprep.subr.bf16.mxu0 %v1145_v37  ;;  %v1169_v53 = vld [vmem:[%s1379_s11 + $0xd4] ss:$8 sps:$4 sm:$0xff]   ;;  %v1171_v54 = vld [vmem:[%s1379_s11 + $0xd0] ss:$8 sps:$4 sm:$0xff]   ;;  %v1172_v55 = vld [vmem:[%s1379_s11 + $0xc4] ss:$8 sps:$4 sm:$0xff]  }
  0x35   : > { %v1174_v56 = vld [vmem:[%s1379_s11 + $0xc0] ss:$8 sps:$4 sm:$0xff]   ;;  %v1175_v57 = vld [vmem:[%s1379_s11 + $0xb4] ss:$8 sps:$4 sm:$0xff]   ;;  %v1177_v58 = vld [vmem:[%s1379_s11 + $0xb0] ss:$8 sps:$4 sm:$0xff]  }
  0x36   : > { %v1178_v59 = vld [vmem:[%s1379_s11 + $0xa4] ss:$8 sps:$4 sm:$0xff]   ;;  %v1180_v60 = vld [vmem:[%s1379_s11 + $0xa0] ss:$8 sps:$4 sm:$0xff]   ;;  %v1181_v61 = vld [vmem:[%s1379_s11 + $0x94] ss:$8 sps:$4 sm:$0xff]  }
  0x37   : > { %691 = vmatpush1.bf16.msra.mxu0 %v1147_v38  ;;  %v1183_v62 = vld [vmem:[%s1379_s11 + $0x90] ss:$8 sps:$4 sm:$0xff]   ;;  %v1184_v63 = vld [vmem:[%s1379_s11 + $0x84] ss:$8 sps:$4 sm:$0xff]   ;;  %v1186_v0 = vld [vmem:[%s1379_s11 + $0x80] ss:$8 sps:$4 sm:$0xff]  }
  0x38   : > { %692 = vmatprep.subr.bf16.mxu0 %v1148_v39  ;;  %v1187_v1 = vld [vmem:[%s1452_s0] ss:$8 sps:$4 sm:$0xff]   ;;  %s1465_s21 = smov (!%p453_p11, %s1050_s21), 3  ;;  %s1098_s5 = sshll.u32 (%p1290_p6), %s1220_s17, 3 }
  0x39   : > { %s1051_s15 = sshll.u32 %s1465_s21, 3  ;;  %s824_s8 = scalar_lea.vmem (%p1290_p6), %s1454_s2, %s1098_s5 }
  0x3a   : > { %s458_s27 = scalar_lea.vmem %s1455_s3, %s1051_s15  ;;  %s468_s30 = scalar_lea.vmem %s1456_s4, %s1051_s15 }
  0x3b   : > { %693 = vmatpush1.bf16.msra.mxu0 %v1150_v40 }
  0x3c   : > { %694 = vmatprep.subr.bf16.mxu0 %v1151_v41 }
  0x3f   : > { %695 = vmatpush1.bf16.msra.mxu0 %v1153_v42 }
  0x40   : > { %696 = vmatprep.subr.bf16.mxu0 %v1154_v43 }
  0x43   : > { %697 = vmatpush1.bf16.msra.mxu0 %v1156_v44 }
  0x44   : > { %698 = vmatprep.subr.bf16.mxu0 %v1157_v45 }
  0x47   : > { %699 = vmatpush1.bf16.msra.mxu0 %v1159_v46 }
  0x48   : > { %700 = vmatprep.subr.bf16.mxu0 %v1160_v47 }
  0x4b   : > { %701 = vmatpush1.bf16.msra.mxu0 %v1162_v48 }
  0x4c   : > { %702 = vmatprep.subr.bf16.mxu0 %v1163_v49 }
  0x4f   : > { %703 = vmatpush2.bf16.msra.mxu0 %v1165_v50 }
  0x50   : > { %704 = vmatprep.subr.bf16.mxu0 %v1166_v51 }
  0x53   : > { %705 = vmatpush2.bf16.msra.mxu0 %v1168_v52 }
  0x54   : > { %706 = vmatprep.subr.bf16.mxu0 %v1169_v53 }
  0x57   : > { %707 = vmatpush2.bf16.msra.mxu0 %v1171_v54 }
  0x58   : > { %708 = vmatprep.subr.bf16.mxu0 %v1172_v55 }
  0x5b   : > { %709 = vmatpush2.bf16.msra.mxu0 %v1174_v56 }
  0x5c   : > { %710 = vmatprep.subr.bf16.mxu0 %v1175_v57 }
  0x5f   : > { %711 = vmatpush2.bf16.msra.mxu0 %v1177_v58 }
  0x60   : > { %712 = vmatprep.subr.bf16.mxu0 %v1178_v59 }
  0x63   : > { %713 = vmatpush2.bf16.msra.mxu0 %v1180_v60 }
  0x64   : > { %714 = vmatprep.subr.bf16.mxu0 %v1181_v61 }
  0x67   : > { %715 = vmatpush2.bf16.msra.mxu0 %v1183_v62 }
  0x68   : > { %716 = vmatprep.subr.bf16.mxu0 %v1184_v63 }
  0x6b   : > { %717 = vmatpush2.bf16.msra.mxu0 %v1186_v0 }
  0x6e   : > { %719 = vmatmul.mubr.bf16.vlgmr.msra.gmra.mxu0 %v1187_v1 }
 0x12e   : > { %v720_v2 = vpop.f32.mrf.mxu0 }
 0x12f   : > { %v772_v6 = vmul.f32 %v720_v2, %v720_v2 }
 0x130   : > { %v722_v3 = vpop.f32.mrf.mxu0 }
 0x131   : > { %v1096_v4 = vpack.c.bf16 %v722_v3, %v720_v2  ;;  %v773_v14 = vmul.f32 %v722_v3, %v722_v3 }
 0x132   : > { %v724_v5 = vpop.f32.mrf.mxu0 }
 0x133   : > { %v758_v7 = vadd.f32 %v724_v5, %v720_v2  ;;  %v774_v8 = vmul.f32 %v724_v5, %v724_v5  ;;  %756 = vst [vmem:[%s1419_s22] sm:$0xff] %v1096_v4 }
 0x134   : > { %v726_v9 = vpop.f32.mrf.mxu0 }
 0x135   : > { %v759_v10 = vrot.slane %v758_v7, 4  ;;  %v776_v11 = vadd.f32 %v774_v8, %v772_v6  ;;  %v1097_v12 = vpack.c.bf16 %v726_v9, %v724_v5  ;;  %v765_v13 = vadd.f32 %v726_v9, %v722_v3 }
 0x136   : > { %v775_v15 = vmul.f32 %v726_v9, %v726_v9 }
 0x137   : > { %v760_v16 = vadd.f32 %v759_v10, %v758_v7  ;;  %v777_v17 = vrot.slane %v776_v11, 4  ;;  %757 = vst [vmem:[%s1419_s22 + $0x8] sm:$0xff] %v1097_v12  ;;  %v766_v18 = vrot.slane %v765_v13, 4 }
 0x138   : > { %v783_v19 = vadd.f32 %v775_v15, %v773_v14 }
 0x139   : > { %v761_v20 = vrot.slane %v760_v16, 2  ;;  %v778_v21 = vadd.f32 %v777_v17, %v776_v11  ;;  %v767_v22 = vadd.f32 %v766_v18, %v765_v13 }
 0x13a   : > { %v784_v23 = vrot.slane %v783_v19, 4  ;;  %v855_v40 = vld [vmem:[%s1419_s22] sm:$0xff] (%p1290_p6) }
 0x13b   : > { %v762_v24 = vadd.f32 %v761_v20, %v760_v16  ;;  %v779_v25 = vrot.slane %v778_v21, 2  ;;  %v768_v26 = vrot.slane %v767_v22, 2  ;;  %856 = vst [vmem:[%s824_s8] sm:$0xff] (%p1290_p6), %v855_v40 }
 0x13c   : > { %v785_v27 = vadd.f32 %v784_v23, %v783_v19 }
 0x13d   : > { %v763_v28 = vrot.slane %v762_v24, 1  ;;  %v780_v29 = vadd.f32 %v779_v25, %v778_v21  ;;  %v769_v30 = vadd.f32 %v768_v26, %v767_v22 }
 0x13e   : > { %v786_v31 = vrot.slane %v785_v27, 2  ;;  %v857_v41 = vld [vmem:[%s1419_s22 + $0x8] sm:$0xff] (%p1290_p6) }
 0x13f   : > { %v764_v32 = vadd.f32 %v763_v28, %v762_v24  ;;  %v781_v33 = vrot.slane %v780_v29, 1  ;;  %v770_v34 = vrot.slane %v769_v30, 1  ;;  %858 = vst [vmem:[%s824_s8 + $0x10] sm:$0xff] (%p1290_p6), %v857_v41 }
 0x140   : > { %v787_v35 = vadd.f32 %v786_v31, %v785_v27 }
 0x141   : > { %v782_v36 = vadd.f32 %v781_v33, %v780_v29  ;;  %790 = vst [vmem:[%s458_s27] sm:$0xff] %v764_v32  ;;  %v771_v37 = vadd.f32 %v770_v34, %v769_v30 }
 0x142   : > { %v788_v38 = vrot.slane %v787_v35, 1  ;;  %818 = sbr.rel (!%p1290_p6) target bundleno = 327 (0x147), region = 78 }
 0x143   : > { %792 = vst [vmem:[%s468_s30] sm:$0xff] %v782_v36  ;;  %791 = vst [vmem:[%s458_s27 + $0x8] sm:$0xff] %v771_v37 }
 0x144   : > { %v789_v39 = vadd.f32 %v788_v38, %v787_v35 }
 0x146   : > { %793 = vst [vmem:[%s468_s30 + $0x8] sm:$0xff] %v789_v39 }
 0x147 PF: > { %s15_s19 = sadd.s32 1, %s1228_s19   ;;  %s1458_s15 = smov %s1216_s16 }
 0x148   : > { %p12_p12 = scmp.ge.s32.totalorder %s15_s19, 4   ;;  %s1459_s16 = smov %s1295_s25 }
 0x149   : > { %s1460_s17 = smov %s1224_s18  ;;  %s1461_s18 = smov %s1463_s20 }
 0x14a   :  { %14 = sbr.rel (!%p12_p12) target bundleno = 3 (0x3), region = 174 }

// kernel: forward.150
= control target key start
LH: loop header
LB: loop body
LE: loop exit
PB: predicated region body
PF: predicated region fallthrough
CT: control target
= control target key end

     0   :  { %v28_v0 = vlaneseq  ;;  %s184_s0 = inlined_call_operand.vmem [shape: bf16[16,512], index: 0, kind: input, shape index: {}]   ;;  %s185_s1 = inlined_call_operand.vmem [shape: f32[1,512], index: 1, kind: input, shape index: {}]   ;;  %s186_s2 = inlined_call_operand.vmem [shape: f32[1,512], index: 2, kind: input, shape index: {}]   ;;  %s187_s3 = inlined_call_operand.vmem [shape: bf16[16,512], index: 3, kind: output, shape index: {}]  }
   0x1   :  { %v14_v1 = vld [vmem:[%s184_s0] sm:$0xff]  ;;  %v15_v3 = vld [vmem:[%s184_s0 + $0x8] sm:$0xff]  ;;  %v16_v4 = vld [vmem:[%s184_s0 + $0x10] sm:$0xff] }
   0x2   :  { %v29_v2 = vshrl.u32 %v28_v0, 7  ;;  %v17_v5 = vld [vmem:[%s184_s0 + $0x18] sm:$0xff]  ;;  %v18_v6 = vunpack.c.l.bf16 %v14_v1  ;;  %v19_v7 = vunpack.c.h.bf16 %v14_v1  ;;  %v26_v8 = vld [vmem:[%s185_s1] sm:$0xf]  ;;  %v22_v10 = vunpack.c.l.bf16 %v16_v4 }
   0x3   :  { %v56_v9 = vld [vmem:[%s186_s2] sm:$0xf]  ;;  %v23_v11 = vunpack.c.h.bf16 %v16_v4  ;;  %v20_v16 = vunpack.c.l.bf16 %v15_v3  ;;  %v21_v17 = vunpack.c.h.bf16 %v15_v3  ;;  %v24_v18 = vunpack.c.l.bf16 %v17_v5 }
   0x4   :  { %v30_v12 = vsub.s32 0, %v29_v2  ;;  %v34_v13 = vsub.s32 1, %v29_v2  ;;  %v38_v14 = vsub.s32 2, %v29_v2  ;;  %v42_v15 = vsub.s32 3, %v29_v2 }
   0x5   :  { %v25_v19 = vunpack.c.h.bf16 %v17_v5 }
   0x6   :  { %v31_v20 = vrot.slane %v26_v8, %v30_v12  ;;  %v35_v21 = vrot.slane %v26_v8, %v34_v13  ;;  %v61_v22 = vrot.slane %v56_v9, %v30_v12  ;;  %v65_v23 = vrot.slane %v56_v9, %v34_v13 }
   0x7   :  { %v39_v24 = vrot.slane %v26_v8, %v38_v14  ;;  %v43_v25 = vrot.slane %v26_v8, %v42_v15  ;;  %v69_v26 = vrot.slane %v56_v9, %v38_v14  ;;  %v73_v27 = vrot.slane %v56_v9, %v42_v15 }
   0x8   :  { %v48_v28 = vmul.f32 %v31_v20, %v18_v6  ;;  %v49_v29 = vmul.f32 %v35_v21, %v19_v7  ;;  %v52_v30 = vmul.f32 %v31_v20, %v22_v10  ;;  %v53_v31 = vmul.f32 %v35_v21, %v23_v11 }
   0x9   :  { %v50_v32 = vmul.f32 %v39_v24, %v20_v16  ;;  %v51_v33 = vmul.f32 %v43_v25, %v21_v17  ;;  %v54_v34 = vmul.f32 %v39_v24, %v24_v18  ;;  %v55_v35 = vmul.f32 %v43_v25, %v25_v19 }
   0xa   :  { %v78_v36 = vadd.f32 %v61_v22, %v48_v28  ;;  %v79_v37 = vadd.f32 %v65_v23, %v49_v29  ;;  %v82_v38 = vadd.f32 %v61_v22, %v52_v30  ;;  %v83_v39 = vadd.f32 %v65_v23, %v53_v31 }
   0xb   :  { %v80_v40 = vadd.f32 %v69_v26, %v50_v32  ;;  %v81_v41 = vadd.f32 %v73_v27, %v51_v33  ;;  %v84_v42 = vadd.f32 %v69_v26, %v54_v34  ;;  %v85_v43 = vadd.f32 %v73_v27, %v55_v35 }
   0xc   :  { %v86_v44 = vmax.f32 %v78_v36, 0.0  ;;  %v87_v45 = vmax.f32 %v79_v37, 0.0  ;;  %v90_v46 = vmax.f32 %v82_v38, 0.0  ;;  %v91_v47 = vmax.f32 %v83_v39, 0.0 }
   0xd   :  { %v88_v48 = vmax.f32 %v80_v40, 0.0  ;;  %v89_v49 = vmax.f32 %v81_v41, 0.0  ;;  %v92_v50 = vmax.f32 %v84_v42, 0.0  ;;  %v93_v51 = vmax.f32 %v85_v43, 0.0 }
   0xe   :  { %v130_v52 = vpack.c.bf16 %v87_v45, %v86_v44  ;;  %v132_v53 = vpack.c.bf16 %v91_v47, %v90_v46 }
   0xf   :  { %v131_v54 = vpack.c.bf16 %v89_v49, %v88_v48  ;;  %v133_v55 = vpack.c.bf16 %v93_v51, %v92_v50 }
  0x10   :  { %118 = vst [vmem:[%s187_s3] sm:$0xff] %v130_v52  ;;  %120 = vst [vmem:[%s187_s3 + $0x10] sm:$0xff] %v132_v53 }
  0x11   :  { %119 = vst [vmem:[%s187_s3 + $0x8] sm:$0xff] %v131_v54  ;;  %121 = vst [vmem:[%s187_s3 + $0x18] sm:$0xff] %v133_v55 }

// kernel: forward.149
= control target key start
LH: loop header
LB: loop body
LE: loop exit
PB: predicated region body
PF: predicated region fallthrough
CT: control target
= control target key end

     0   :  { %s1985_s0 = inlined_call_operand.vmem [shape: bf16[16,2304], index: 0, kind: input, shape index: {}]   ;;  %s1986_s1 = inlined_call_operand.vmem [shape: bf16[2304,512], index: 1, kind: input, shape index: {}]   ;;  %s1987_s2 = inlined_call_operand.vmem [shape: bf16[16,512], index: 2, kind: output, shape index: {0}]   ;;  %s1988_s3 = inlined_call_operand.vmem [shape: f32[8,512], index: 3, kind: output, shape index: {1}]   ;;  %s1989_s4 = inlined_call_operand.vmem [shape: f32[8,512], index: 4, kind: output, shape index: {2}]  }
   0x1   :  { %1993 = sst [smem:[#allocation9_spill]] %s1985_s0 }
   0x2   :  { %1994 = sst [smem:[#allocation10_spill]] %s1986_s1 }
   0x3   :  { %s1649_s15 = smov 0   ;;  %s1651_s16 = smov 0  }
   0x4   :  { %s1653_s17 = smov 0   ;;  %s1655_s18 = smov 0  }
   0x5   :  { %s1657_s19 = smov 0   ;;  %s1659_s20 = smov 0  }
   0x6   :  { %s1661_s21 = smov 0   ;;  %s1663_s22 = smov 0  }
   0x7   :  { %s1665_s23 = smov 0   ;;  %s1667_s24 = smov 0  }
   0x8   :  { %s1669_s25 = smov 0  }
   0x9 LB: > { %1995 = sst [smem:[#allocation6_spill]] %s1616_s24  ;;  %s1281_s26 = sadd.s32 4294967295, %s1620_s25   ;;  %s1620_s25 = sphi %s1669_s25, %s15_s25   ;;  %s1616_s24 = sphi %s1667_s24, %s2014_s24   ;;  %s1612_s23 = sphi %s1665_s23, %s2013_s23   ;;  %s1608_s22 = sphi %s1663_s22, %s2003_s22   ;;  %s1604_s21 = sphi %s1661_s21, %s2012_s21   ;;  %s1600_s20 = sphi %s1659_s20, %s2011_s20   ;;  %s1596_s19 = sphi %s1657_s19, %s2010_s19   ;;  %s1592_s18 = sphi %s1655_s18, %s2009_s18   ;;  %s1588_s17 = sphi %s1653_s17, %s2008_s17   ;;  %s1584_s16 = sphi %s1651_s16, %s2007_s16   ;;  %s1580_s15 = sphi %s1649_s15, %s2006_s15  }
   0xa   : > { %s27_s27 = sadd.s32 1, %s1612_s23  ;;  %s30_s28 = sadd.s32 1, %s1616_s24 }
   0xb   : > { %p28_p0 = scmp.ge.s32.totalorder %s27_s27, 6  ;;  %s43_s29 = sadd.s32 1, %s1600_s20 }
   0xc   : > { %p50_p1 = scmp.ne.s32.totalorder %s1600_s20, %s1596_s19  ;;  %p51_p2 = scmp.eq.s32.totalorder %s1620_s25, 0 }
   0xd   : > { %s2016_s27 = smov (%p28_p0, %s27_s27), 0  ;;  %s2018_s28 = smov (!%p28_p0, %s30_s28), %s1616_s24 }
   0xe   : > { %1996 = sst [smem:[#allocation7_spill]] %s2016_s27  ;;  %s39_s30 = ssub.s32 %s1612_s23, %s2016_s27 }
   0xf   : > { %p32_p3 = scmp.ge.s32.totalorder %s2018_s28, 2  ;;  %p41_p4 = scmp.eq.s32.totalorder %s39_s30, 0 }
  0x10   : > { %p1716_p5 = por %p51_p2, %p50_p1  ;;  %s71_s6 = sadd.s32 1, %s1592_s18 }
  0x11   : > { %s2020_s28 = smov (%p32_p3, %s2018_s28), 0  ;;  %p78_p6 = scmp.ne.s32.totalorder %s1592_s18, %s1588_s17 }
  0x12   : > { %1998 = sst [smem:[#allocation8_spill]] %s2020_s28  ;;  %s67_s8 = ssub.s32 %s1616_s24, %s2020_s28 }
  0x13   : > { %s1724_s7 = scalar_select %p41_p4, %s1600_s20, %s43_s29  }
  0x14   : > { %s68_s9 = sor.u32 %s67_s8, %s39_s30  ;;  %p97_p7 = scmp.eq.s32.totalorder %s67_s8, 0 }
  0x15   : > { %p69_p8 = scmp.eq.s32.totalorder %s68_s9, 0  ;;  %p1730_p9 = por %p78_p6, %p51_p2 }
  0x16   : > { %s99_s11 = sadd.s32 1, %s1584_s16  ;;  %p109_p10 = scmp.ne.s32.totalorder %s1584_s16, %s1580_s15 }
  0x17   : > { %s1738_s12 = scalar_select %p69_p8, %s1592_s18, %s71_s6  }
  0x18   : > { %s1741_s13 = scalar_select %p97_p7, %s1584_s16, %s99_s11  }
  0x19   : > { %p110_p11 = scmp.eq.s32.totalorder %s1281_s26, 11  ;;  %p1284_p13 = scmp.ge.s32.totalorder %s1620_s25, 12 }
  0x1b   : > { %p1743_p12 = por %p110_p11, %p109_p10  ;;  %188 = sbr.rel (%p1284_p13) target bundleno = 77 (0x4d), region = 16 }
  0x20   : > { %191 = sbr.rel (!%p1716_p5) target bundleno = 43 (0x2b), region = 20  ;;  %s193_s29 = sand.u32 (%p1716_p5), 1, %s1600_s20  }
  0x21   : > { %s1359_s30 = smul.u32 (%p1716_p5), 12, %s1612_s23  ;;  %s2001_s0 = sld [smem:[#allocation9_spill]] (%p1716_p5) }
  0x22   : > { %s1364_s8 = smul.u32 (%p1716_p5), 24, %s193_s29 }
  0x24   : > { %s195_s26 = scalar_lea.vmem (%p1716_p5), [#allocation3], %s1364_s8 }
  0x27   : > { %s201_s11 = scalar_lea.vmem %s2001_s0, %s1359_s30 }
  0x28   : > { %v216_v0 = vld [vmem:[%s201_s11] sm:$0xff]  ;;  %v218_v1 = vld [vmem:[%s201_s11 + $0x48] sm:$0xff]  ;;  %v1288_v3 = vld [vmem:[%s201_s11 + $0x50] sm:$0xf] }
  0x29   : > { %v1286_v2 = vld [vmem:[%s201_s11 + $0x8] sm:$0xf]  ;;  %217 = vst [vmem:[%s195_s26] sm:$0xff] %v216_v0  ;;  %219 = vst [vmem:[%s195_s26 + $0xc] sm:$0xff] %v218_v1 }
  0x2a   : > { %1287 = vst [vmem:[%s195_s26 + $0x8] sm:$0xf] %v1286_v2  ;;  %1289 = vst [vmem:[%s195_s26 + $0x14] sm:$0xf] %v1288_v3 }
  0x2b PF: > { %237 = sbr.rel (!%p1730_p9) target bundleno = 77 (0x4d), region = 46  ;;  %s239_s5 = sand.u32 (%p1730_p9), 1, %s1592_s18  }
  0x2c   : > { %s1365_s29 = smul.u32 (%p1730_p9), 384, %s239_s5  ;;  %s1290_s6 = sshll.u32 (%p1730_p9), %s1616_s24, 1 }
  0x2d   : > { %s1360_s30 = smul.u32 (%p1730_p9), 192, %s1612_s23  ;;  %s2002_s1 = sld [smem:[#allocation10_spill]] (%p1730_p9) }
  0x2e   : > { %s1768_s10 = scalar_lea.vmem (%p1730_p9), [#allocation4], %s1365_s29 }
  0x2f   : > { %s245_s9 = sadd.s32 (%p1730_p9), %s1360_s30, %s1290_s6 }
  0x30   : > { %s1292_s0 = sshll.u32 %s245_s9, 2 }
  0x33   : > { %s1763_s27 = scalar_lea.vmem %s2002_s1, %s1292_s0 }
  0x34   : > { %v370_v4 = vld [vmem:[%s1763_s27] sm:$0xff]  ;;  %v372_v5 = vld [vmem:[%s1763_s27 + $0x10] sm:$0xff] }
  0x35   : > { %v374_v6 = vld [vmem:[%s1763_s27 + $0x20] sm:$0xff]  ;;  %371 = vst [vmem:[%s1768_s10] sm:$0xff] %v370_v4  ;;  %373 = vst [vmem:[%s1768_s10 + $0x8] sm:$0xff] %v372_v5  ;;  %v376_v7 = vld [vmem:[%s1763_s27 + $0x30] sm:$0xff] }
  0x36   : > { %375 = vst [vmem:[%s1768_s10 + $0x10] sm:$0xff] %v374_v6  ;;  %v378_v8 = vld [vmem:[%s1763_s27 + $0x40] sm:$0xff]  ;;  %v380_v9 = vld [vmem:[%s1763_s27 + $0x50] sm:$0xff]  ;;  %377 = vst [vmem:[%s1768_s10 + $0x18] sm:$0xff] %v376_v7 }
  0x37   : > { %379 = vst [vmem:[%s1768_s10 + $0x20] sm:$0xff] %v378_v8  ;;  %381 = vst [vmem:[%s1768_s10 + $0x28] sm:$0xff] %v380_v9  ;;  %v382_v10 = vld [vmem:[%s1763_s27 + $0x60] sm:$0xff]  ;;  %v384_v11 = vld [vmem:[%s1763_s27 + $0x70] sm:$0xff] }
  0x38   : > { %v386_v12 = vld [vmem:[%s1763_s27 + $0x80] sm:$0xff]  ;;  %383 = vst [vmem:[%s1768_s10 + $0x30] sm:$0xff] %v382_v10  ;;  %385 = vst [vmem:[%s1768_s10 + $0x38] sm:$0xff] %v384_v11  ;;  %v388_v13 = vld [vmem:[%s1763_s27 + $0x90] sm:$0xff] }
  0x39   : > { %387 = vst [vmem:[%s1768_s10 + $0x40] sm:$0xff] %v386_v12  ;;  %v390_v14 = vld [vmem:[%s1763_s27 + $0xa0] sm:$0xff]  ;;  %v392_v15 = vld [vmem:[%s1763_s27 + $0xb0] sm:$0xff]  ;;  %389 = vst [vmem:[%s1768_s10 + $0x48] sm:$0xff] %v388_v13 }
  0x3a   : > { %391 = vst [vmem:[%s1768_s10 + $0x50] sm:$0xff] %v390_v14  ;;  %393 = vst [vmem:[%s1768_s10 + $0x58] sm:$0xff] %v392_v15  ;;  %v394_v16 = vld [vmem:[%s1763_s27 + $0xc0] sm:$0xff]  ;;  %v396_v17 = vld [vmem:[%s1763_s27 + $0xd0] sm:$0xff] }
  0x3b   : > { %v398_v18 = vld [vmem:[%s1763_s27 + $0xe0] sm:$0xff]  ;;  %395 = vst [vmem:[%s1768_s10 + $0x60] sm:$0xff] %v394_v16  ;;  %397 = vst [vmem:[%s1768_s10 + $0x68] sm:$0xff] %v396_v17  ;;  %v400_v19 = vld [vmem:[%s1763_s27 + $0xf0] sm:$0xff] }
  0x3c   : > { %399 = vst [vmem:[%s1768_s10 + $0x70] sm:$0xff] %v398_v18  ;;  %v402_v20 = vld [vmem:[%s1763_s27 + $0x100] sm:$0xff]  ;;  %v404_v21 = vld [vmem:[%s1763_s27 + $0x110] sm:$0xff]  ;;  %401 = vst [vmem:[%s1768_s10 + $0x78] sm:$0xff] %v400_v19 }
  0x3d   : > { %403 = vst [vmem:[%s1768_s10 + $0x80] sm:$0xff] %v402_v20  ;;  %405 = vst [vmem:[%s1768_s10 + $0x88] sm:$0xff] %v404_v21  ;;  %v406_v22 = vld [vmem:[%s1763_s27 + $0x120] sm:$0xff]  ;;  %v408_v23 = vld [vmem:[%s1763_s27 + $0x130] sm:$0xff] }
  0x3e   : > { %v410_v24 = vld [vmem:[%s1763_s27 + $0x140] sm:$0xff]  ;;  %407 = vst [vmem:[%s1768_s10 + $0x90] sm:$0xff] %v406_v22  ;;  %409 = vst [vmem:[%s1768_s10 + $0x98] sm:$0xff] %v408_v23  ;;  %v412_v25 = vld [vmem:[%s1763_s27 + $0x150] sm:$0xff] }
  0x3f   : > { %411 = vst [vmem:[%s1768_s10 + $0xa0] sm:$0xff] %v410_v24  ;;  %v414_v26 = vld [vmem:[%s1763_s27 + $0x160] sm:$0xff]  ;;  %v416_v27 = vld [vmem:[%s1763_s27 + $0x170] sm:$0xff]  ;;  %413 = vst [vmem:[%s1768_s10 + $0xa8] sm:$0xff] %v412_v25 }
  0x40   : > { %415 = vst [vmem:[%s1768_s10 + $0xb0] sm:$0xff] %v414_v26  ;;  %417 = vst [vmem:[%s1768_s10 + $0xb8] sm:$0xff] %v416_v27  ;;  %v418_v28 = vld [vmem:[%s1763_s27 + $0x180] sm:$0xff]  ;;  %v420_v29 = vld [vmem:[%s1763_s27 + $0x190] sm:$0xff] }
  0x41   : > { %v422_v30 = vld [vmem:[%s1763_s27 + $0x1a0] sm:$0xff]  ;;  %419 = vst [vmem:[%s1768_s10 + $0xc0] sm:$0xff] %v418_v28  ;;  %421 = vst [vmem:[%s1768_s10 + $0xc8] sm:$0xff] %v420_v29  ;;  %v424_v31 = vld [vmem:[%s1763_s27 + $0x1b0] sm:$0xff] }
  0x42   : > { %423 = vst [vmem:[%s1768_s10 + $0xd0] sm:$0xff] %v422_v30  ;;  %v426_v32 = vld [vmem:[%s1763_s27 + $0x1c0] sm:$0xff]  ;;  %v428_v33 = vld [vmem:[%s1763_s27 + $0x1d0] sm:$0xff]  ;;  %425 = vst [vmem:[%s1768_s10 + $0xd8] sm:$0xff] %v424_v31 }
  0x43   : > { %427 = vst [vmem:[%s1768_s10 + $0xe0] sm:$0xff] %v426_v32  ;;  %429 = vst [vmem:[%s1768_s10 + $0xe8] sm:$0xff] %v428_v33  ;;  %v430_v34 = vld [vmem:[%s1763_s27 + $0x1e0] sm:$0xff]  ;;  %v432_v35 = vld [vmem:[%s1763_s27 + $0x1f0] sm:$0xff] }
  0x44   : > { %v434_v36 = vld [vmem:[%s1763_s27 + $0x200] sm:$0xff]  ;;  %431 = vst [vmem:[%s1768_s10 + $0xf0] sm:$0xff] %v430_v34  ;;  %433 = vst [vmem:[%s1768_s10 + $0xf8] sm:$0xff] %v432_v35  ;;  %v436_v37 = vld [vmem:[%s1763_s27 + $0x210] sm:$0xff] }
  0x45   : > { %435 = vst [vmem:[%s1768_s10 + $0x100] sm:$0xff] %v434_v36  ;;  %v438_v38 = vld [vmem:[%s1763_s27 + $0x220] sm:$0xff]  ;;  %v440_v39 = vld [vmem:[%s1763_s27 + $0x230] sm:$0xff]  ;;  %437 = vst [vmem:[%s1768_s10 + $0x108] sm:$0xff] %v436_v37 }
  0x46   : > { %439 = vst [vmem:[%s1768_s10 + $0x110] sm:$0xff] %v438_v38  ;;  %441 = vst [vmem:[%s1768_s10 + $0x118] sm:$0xff] %v440_v39  ;;  %v442_v40 = vld [vmem:[%s1763_s27 + $0x240] sm:$0xff]  ;;  %v444_v41 = vld [vmem:[%s1763_s27 + $0x250] sm:$0xff] }
  0x47   : > { %v446_v42 = vld [vmem:[%s1763_s27 + $0x260] sm:$0xff]  ;;  %443 = vst [vmem:[%s1768_s10 + $0x120] sm:$0xff] %v442_v40  ;;  %445 = vst [vmem:[%s1768_s10 + $0x128] sm:$0xff] %v444_v41  ;;  %v448_v43 = vld [vmem:[%s1763_s27 + $0x270] sm:$0xff] }
  0x48   : > { %447 = vst [vmem:[%s1768_s10 + $0x130] sm:$0xff] %v446_v42  ;;  %v450_v44 = vld [vmem:[%s1763_s27 + $0x280] sm:$0xff]  ;;  %v452_v45 = vld [vmem:[%s1763_s27 + $0x290] sm:$0xff]  ;;  %449 = vst [vmem:[%s1768_s10 + $0x138] sm:$0xff] %v448_v43 }
  0x49   : > { %451 = vst [vmem:[%s1768_s10 + $0x140] sm:$0xff] %v450_v44  ;;  %453 = vst [vmem:[%s1768_s10 + $0x148] sm:$0xff] %v452_v45  ;;  %v454_v46 = vld [vmem:[%s1763_s27 + $0x2a0] sm:$0xff]  ;;  %v456_v47 = vld [vmem:[%s1763_s27 + $0x2b0] sm:$0xff] }
  0x4a   : > { %v458_v48 = vld [vmem:[%s1763_s27 + $0x2c0] sm:$0xff]  ;;  %455 = vst [vmem:[%s1768_s10 + $0x150] sm:$0xff] %v454_v46  ;;  %457 = vst [vmem:[%s1768_s10 + $0x158] sm:$0xff] %v456_v47  ;;  %v460_v49 = vld [vmem:[%s1763_s27 + $0x2d0] sm:$0xff] }
  0x4b   : > { %459 = vst [vmem:[%s1768_s10 + $0x160] sm:$0xff] %v458_v48  ;;  %v462_v50 = vld [vmem:[%s1763_s27 + $0x2e0] sm:$0xff]  ;;  %v464_v51 = vld [vmem:[%s1763_s27 + $0x2f0] sm:$0xff]  ;;  %461 = vst [vmem:[%s1768_s10 + $0x168] sm:$0xff] %v460_v49 }
  0x4c   : > { %463 = vst [vmem:[%s1768_s10 + $0x170] sm:$0xff] %v462_v50  ;;  %465 = vst [vmem:[%s1768_s10 + $0x178] sm:$0xff] %v464_v51 }
  0x4d PF: > { %p1293_p0 = scmp.ge.s32.totalorder %s1620_s25, 1  ;;  %p470_p1 = scmp.lt.s32.totalorder %s1620_s25, 13 }
  0x4f   : > { %p471_p2 = pnand %p1293_p0, %p470_p1 }
  0x50   : > { %s477_s0 = sand.u32 (!%p471_p2), 1, %s1596_s19   ;;  %s484_s28 = sand.u32 (!%p471_p2), 1, %s1588_s17  }
  0x51   : > { %474 = sbr.rel (%p471_p2) target bundleno = 395 (0x18b), region = 84  ;;  %s505_s26 = sand.u32 (!%p471_p2), 1, %s1580_s15  }
  0x52   : > { %s1366_s11 = smul.u32 (!%p471_p2), 24, %s477_s0  ;;  %s1294_s5 = sshll.u32 (!%p471_p2), %s505_s26, 4 }
  0x53   : > { %s1367_s27 = smul.u32 (!%p471_p2), 384, %s484_s28  ;;  %s1295_s29 = sshll.u32 (!%p471_p2), %s1608_s22, 1 }
  0x54   : > { %p539_p3 = scmp.lt.s32.totalorder (!%p471_p2), %s1295_s29, 3  ;;  %s1879_s19 = scalar_lea.vmem (!%p471_p2), [#allocation3], %s1366_s11 }
  0x55   : > { %s1881_s17 = scalar_lea.vmem (!%p471_p2), [#allocation4], %s1367_s27  ;;  %s1883_s15 = scalar_lea.vmem (!%p471_p2), [#allocation5], %s1294_s5 }
  0x56   : > { %s2022_s29 = smov (!%p539_p3, %s1295_s29), 3  ;;  %p1299_p4 = scmp.ne.s32.totalorder %s1604_s21, 0 }
  0x57   : > { %s1296_s6 = sshll.u32 %s2022_s29, 3 }
  0x58   : > { %s1872_s8 = scalar_lea.vmem %s1988_s3, %s1296_s6  ;;  %s1877_s24 = scalar_lea.vmem %s1989_s4, %s1296_s6 }
  0x59   : > { %560 = sbr.rel (%p1299_p4) target bundleno = 97 (0x61), region = 96 }
  0x5e   : > { %v1622_v52 = vmov 0.0  }
  0x5f   : > { %561 = vst [vmem:[#allocation2 + $0x10] sm:$0xff] %v1622_v52  ;;  %562 = vst [vmem:[#allocation2] sm:$0xff] %v1622_v52 }
  0x60   : > { %563 = vst [vmem:[#allocation2 + $0x18] sm:$0xff] %v1622_v52  ;;  %564 = vst [vmem:[#allocation2 + $0x8] sm:$0xff] %v1622_v52 }
  0x61 PF: > { %v1458_v53 = vld [vmem:[%s1881_s17 + $0x74] ss:$8 sps:$4 sm:$0xff]   ;;  %v1460_v54 = vld [vmem:[%s1881_s17 + $0x70] ss:$8 sps:$4 sm:$0xff]   ;;  %v1623_v55 = vmov 0   ;;  %p1351_p5 = scmp.ne.s32.totalorder %s1604_s21, 5 }
  0x62   : > { %952 = vmatprep.mubr.bf16.mxu1 %v1623_v55  ;;  %877 = vmatprep.subr.bf16.mxu0 %v1458_v53  ;;  %v1461_v56 = vld [vmem:[%s1881_s17 + $0x64] ss:$8 sps:$4 sm:$0xff]   ;;  %v1463_v57 = vld [vmem:[%s1881_s17 + $0x60] ss:$8 sps:$4 sm:$0xff]   ;;  %v1464_v58 = vld [vmem:[%s1881_s17 + $0x54] ss:$8 sps:$4 sm:$0xff]  }
  0x63   : > { %878 = vmatpush1.bf16.msra.mxu0 %v1460_v54  ;;  %v1466_v59 = vld [vmem:[%s1881_s17 + $0x50] ss:$8 sps:$4 sm:$0xff]   ;;  %v1467_v60 = vld [vmem:[%s1881_s17 + $0x44] ss:$8 sps:$4 sm:$0xff]   ;;  %v1479_v61 = vld [vmem:[%s1881_s17 + $0x174] ss:$8 sps:$4 sm:$0xff]  }
  0x64   : > { %879 = vmatprep.subr.bf16.mxu0 %v1461_v56  ;;  %v1481_v62 = vld [vmem:[%s1881_s17 + $0x170] ss:$8 sps:$4 sm:$0xff]   ;;  %v1469_v63 = vld [vmem:[%s1881_s17 + $0x40] ss:$8 sps:$4 sm:$0xff]   ;;  %v1470_v0 = vld [vmem:[%s1881_s17 + $0x34] ss:$8 sps:$4 sm:$0xff]   ;;  %920 = vmatprep.subr.bf16.mxu1 %v1479_v61 }
  0x65   : > { %v1485_v1 = vld [vmem:[%s1881_s17 + $0x164] ss:$8 sps:$4 sm:$0xff]   ;;  %921 = vmatpush1.bf16.msra.mxu1 %v1481_v62  ;;  %v1487_v2 = vld [vmem:[%s1881_s17 + $0x160] ss:$8 sps:$4 sm:$0xff]   ;;  %v1472_v3 = vld [vmem:[%s1881_s17 + $0x30] ss:$8 sps:$4 sm:$0xff]  }
  0x66   : > { %922 = vmatprep.subr.bf16.mxu1 %v1485_v1  ;;  %v1491_v4 = vld [vmem:[%s1881_s17 + $0x154] ss:$8 sps:$4 sm:$0xff]   ;;  %v1473_v5 = vld [vmem:[%s1881_s17 + $0x24] ss:$8 sps:$4 sm:$0xff]   ;;  %v1493_v6 = vld [vmem:[%s1881_s17 + $0x150] ss:$8 sps:$4 sm:$0xff]  }
  0x67   : > { %880 = vmatpush1.bf16.msra.mxu0 %v1463_v57  ;;  %v1497_v7 = vld [vmem:[%s1881_s17 + $0x144] ss:$8 sps:$4 sm:$0xff]   ;;  %v1475_v8 = vld [vmem:[%s1881_s17 + $0x20] ss:$8 sps:$4 sm:$0xff]   ;;  %v1476_v9 = vld [vmem:[%s1881_s17 + $0x14] ss:$8 sps:$4 sm:$0xff]  }
  0x68   : > { %881 = vmatprep.subr.bf16.mxu0 %v1464_v58  ;;  %v1499_v10 = vld [vmem:[%s1881_s17 + $0x140] ss:$8 sps:$4 sm:$0xff]   ;;  %v1503_v11 = vld [vmem:[%s1881_s17 + $0x134] ss:$8 sps:$4 sm:$0xff]   ;;  %v1478_v12 = vld [vmem:[%s1881_s17 + $0x10] ss:$8 sps:$4 sm:$0xff]  }
  0x69   : > { %923 = vmatpush1.bf16.msra.mxu1 %v1487_v2  ;;  %v1482_v13 = vld [vmem:[%s1881_s17 + $0x4] ss:$8 sps:$4 sm:$0xff]   ;;  %v1505_v14 = vld [vmem:[%s1881_s17 + $0x130] ss:$8 sps:$4 sm:$0xff]   ;;  %v1484_v16 = vld [vmem:[%s1881_s17] ss:$8 sps:$4 sm:$0xff]  }
  0x6a   : > { %924 = vmatprep.subr.bf16.mxu1 %v1491_v4  ;;  %v1509_v15 = vld [vmem:[%s1881_s17 + $0x124] ss:$8 sps:$4 sm:$0xff]   ;;  %v1488_v17 = vld [vmem:[%s1881_s17 + $0xf4] ss:$8 sps:$4 sm:$0xff]   ;;  %v1511_v18 = vld [vmem:[%s1881_s17 + $0x120] ss:$8 sps:$4 sm:$0xff]  }
  0x6b   : > { %882 = vmatpush1.bf16.msra.mxu0 %v1466_v59  ;;  %v1515_v19 = vld [vmem:[%s1881_s17 + $0x114] ss:$8 sps:$4 sm:$0xff]   ;;  %v1490_v20 = vld [vmem:[%s1881_s17 + $0xf0] ss:$8 sps:$4 sm:$0xff]   ;;  %v1494_v21 = vld [vmem:[%s1881_s17 + $0xe4] ss:$8 sps:$4 sm:$0xff]  }
  0x6c   : > { %883 = vmatprep.subr.bf16.mxu0 %v1467_v60  ;;  %v1517_v22 = vld [vmem:[%s1881_s17 + $0x110] ss:$8 sps:$4 sm:$0xff]   ;;  %v1521_v23 = vld [vmem:[%s1881_s17 + $0x104] ss:$8 sps:$4 sm:$0xff]   ;;  %v1496_v25 = vld [vmem:[%s1881_s17 + $0xe0] ss:$8 sps:$4 sm:$0xff]  }
  0x6d   : > { %925 = vmatpush1.bf16.msra.mxu1 %v1493_v6  ;;  %v1533_v24 = vld [vmem:[%s1879_s19 + $0x4] ss:$12 sps:$4 sm:$0xff]   ;;  %v1527_v30 = vld [vmem:[%s1879_s19 + $0x8] ss:$12 sps:$4 sm:$0xff]   ;;  %v1531_v40 = vld [vmem:[%s1879_s19] ss:$12 sps:$4 sm:$0xff]  }
  0x6e   : > { %926 = vmatprep.subr.bf16.mxu1 %v1497_v7  ;;  %v1500_v26 = vld [vmem:[%s1881_s17 + $0xd4] ss:$8 sps:$4 sm:$0xff]   ;;  %909 = vmatprep.mubr.bf16.mxu0 %v1533_v24  ;;  %v1523_v27 = vld [vmem:[%s1881_s17 + $0x100] ss:$8 sps:$4 sm:$0xff]   ;;  %v1502_v28 = vld [vmem:[%s1881_s17 + $0xd0] ss:$8 sps:$4 sm:$0xff]  }
  0x6f   : > { %884 = vmatpush1.bf16.msra.mxu0 %v1469_v63  ;;  %v1506_v29 = vld [vmem:[%s1881_s17 + $0xc4] ss:$8 sps:$4 sm:$0xff]   ;;  %v1508_v31 = vld [vmem:[%s1881_s17 + $0xc0] ss:$8 sps:$4 sm:$0xff]   ;;  %v1512_v32 = vld [vmem:[%s1881_s17 + $0xb4] ss:$8 sps:$4 sm:$0xff]  }
  0x70   : > { %885 = vmatprep.subr.bf16.mxu0 %v1470_v0  ;;  %v1514_v33 = vld [vmem:[%s1881_s17 + $0xb0] ss:$8 sps:$4 sm:$0xff]   ;;  %v1518_v34 = vld [vmem:[%s1881_s17 + $0xa4] ss:$8 sps:$4 sm:$0xff]   ;;  %v1520_v35 = vld [vmem:[%s1881_s17 + $0xa0] ss:$8 sps:$4 sm:$0xff]  }
  0x71   : > { %927 = vmatpush1.bf16.msra.mxu1 %v1499_v10  ;;  %v1524_v36 = vld [vmem:[%s1881_s17 + $0x94] ss:$8 sps:$4 sm:$0xff]   ;;  %v1526_v37 = vld [vmem:[%s1881_s17 + $0x90] ss:$8 sps:$4 sm:$0xff]   ;;  %v1528_v38 = vld [vmem:[%s1881_s17 + $0x84] ss:$8 sps:$4 sm:$0xff]  }
  0x72   : > { %928 = vmatprep.subr.bf16.mxu1 %v1503_v11  ;;  %v1530_v39 = vld [vmem:[%s1881_s17 + $0x80] ss:$8 sps:$4 sm:$0xff]   ;;  %v566_v47 = vld [vmem:[#allocation2] sm:$0xff]  ;;  %v568_v56 = vld [vmem:[#allocation2 + $0x8] sm:$0xff] }
  0x73   : > { %886 = vmatpush1.bf16.msra.mxu0 %v1472_v3  ;;  %v565_v43 = vld [vmem:[#allocation2 + $0x10] sm:$0xff]  ;;  %v567_v51 = vld [vmem:[#allocation2 + $0x18] sm:$0xff] }
  0x74   : > { %887 = vmatprep.subr.bf16.mxu0 %v1473_v5 }
  0x75   : > { %929 = vmatpush1.bf16.msra.mxu1 %v1505_v14 }
  0x76   : > { %930 = vmatprep.subr.bf16.mxu1 %v1509_v15 }
  0x77   : > { %888 = vmatpush1.bf16.msra.mxu0 %v1475_v8 }
  0x78   : > { %889 = vmatprep.subr.bf16.mxu0 %v1476_v9 }
  0x79   : > { %931 = vmatpush1.bf16.msra.mxu1 %v1511_v18 }
  0x7a   : > { %932 = vmatprep.subr.bf16.mxu1 %v1515_v19 }
  0x7b   : > { %890 = vmatpush1.bf16.msra.mxu0 %v1478_v12 }
  0x7c   : > { %891 = vmatprep.subr.bf16.mxu0 %v1482_v13 }
  0x7d   : > { %933 = vmatpush1.bf16.msra.mxu1 %v1517_v22 }
  0x7e   : > { %934 = vmatprep.subr.bf16.mxu1 %v1521_v23 }
  0x7f   : > { %892 = vmatpush1.bf16.msra.mxu0 %v1484_v16 }
  0x80   : > { %893 = vmatprep.subr.bf16.mxu0 %v1488_v17 }
  0x81   : > { %935 = vmatpush1.bf16.msra.mxu1 %v1523_v27 }
  0x83   : > { %894 = vmatpush2.bf16.msra.mxu0 %v1490_v20 }
  0x84   : > { %895 = vmatprep.subr.bf16.mxu0 %v1494_v21  ;;  %953 = vmatmul.mubr.bf16.vlgmr.msra.gmra.mxu1 %v1527_v30 }
  0x87   : > { %896 = vmatpush2.bf16.msra.mxu0 %v1496_v25 }
  0x88   : > { %897 = vmatprep.subr.bf16.mxu0 %v1500_v26 }
  0x8b   : > { %898 = vmatpush2.bf16.msra.mxu0 %v1502_v28 }
  0x8c   : > { %899 = vmatprep.subr.bf16.mxu0 %v1506_v29 }
  0x8f   : > { %900 = vmatpush2.bf16.msra.mxu0 %v1508_v31 }
  0x90   : > { %901 = vmatprep.subr.bf16.mxu0 %v1512_v32 }
  0x93   : > { %902 = vmatpush2.bf16.msra.mxu0 %v1514_v33 }
  0x94   : > { %903 = vmatprep.subr.bf16.mxu0 %v1518_v34 }
  0x97   : > { %904 = vmatpush2.bf16.msra.mxu0 %v1520_v35 }
  0x98   : > { %905 = vmatprep.subr.bf16.mxu0 %v1524_v36 }
  0x9b   : > { %906 = vmatpush2.bf16.msra.mxu0 %v1526_v37 }
  0x9c   : > { %907 = vmatprep.subr.bf16.mxu0 %v1528_v38 }
  0x9f   : > { %908 = vmatpush2.bf16.msra.mxu0 %v1530_v39 }
  0xa2   : > { %910 = vmatmul.mubr.bf16.vlgmr.msra.gmra.mxu0 %v1531_v40 }
 0x144   : > { %v954_v41 = vpop.f32.mrf.mxu1 }
 0x146   : > { %v956_v42 = vpop.f32.mrf.mxu1 }
 0x148   : > { %v958_v46 = vpop.f32.mrf.mxu1 }
 0x14a   : > { %v960_v55 = vpop.f32.mrf.mxu1 }
 0x162   : > { %v911_v44 = vpop.f32.mrf.mxu0 }
 0x163   : > { %v955_v45 = vadd.f32 %v954_v41, %v911_v44 }
 0x164   : > { %v913_v48 = vpop.f32.mrf.mxu0 }
 0x165   : > { %v963_v49 = vadd.f32 %v955_v45, %v565_v43  ;;  %v957_v50 = vadd.f32 %v956_v42, %v913_v48 }
 0x166   : > { %v915_v52 = vpop.f32.mrf.mxu0 }
 0x167   : > { %967 = vst [vmem:[#allocation2 + $0x10] sm:$0xff] %v963_v49  ;;  %v964_v53 = vadd.f32 %v957_v50, %v566_v47  ;;  %v959_v54 = vadd.f32 %v958_v46, %v915_v52 }
 0x168   : > { %v917_v57 = vpop.f32.mrf.mxu0 }
 0x169   : > { %968 = vst [vmem:[#allocation2] sm:$0xff] %v964_v53  ;;  %v965_v58 = vadd.f32 %v959_v54, %v567_v51  ;;  %v961_v59 = vadd.f32 %v960_v55, %v917_v57  ;;  %974 = sbr.rel (%p1351_p5) target bundleno = 390 (0x186), region = 100 }
 0x16b   : > { %969 = vst [vmem:[#allocation2 + $0x18] sm:$0xff] %v965_v58  ;;  %v966_v60 = vadd.f32 %v961_v59, %v568_v56 }
 0x16d   : > { %970 = vst [vmem:[#allocation2 + $0x8] sm:$0xff] %v966_v60 }
 0x16e   : > { %v975_v61 = vld [vmem:[#allocation2 + $0x10] sm:$0xff] }
 0x16f   : > { %v1007_v1 = vmul.f32 %v975_v61, %v975_v61 }
 0x170   : > { %v976_v63 = vld [vmem:[#allocation2] sm:$0xff] }
 0x171   : > { %v1361_v3 = vpack.c.bf16 %v976_v63, %v975_v61  ;;  %v1008_v5 = vmul.f32 %v976_v63, %v976_v63 }
 0x172   : > { %v977_v62 = vld [vmem:[#allocation2 + $0x18] sm:$0xff] }
 0x173   : > { %v993_v0 = vadd.f32 %v977_v62, %v975_v61  ;;  %v1009_v2 = vmul.f32 %v977_v62, %v977_v62  ;;  %991 = vst [vmem:[%s1883_s15] sm:$0xff] %v1361_v3 }
 0x174   : > { %v978_v4 = vld [vmem:[#allocation2 + $0x8] sm:$0xff] }
 0x175   : > { %v1362_v6 = vpack.c.bf16 %v978_v4, %v977_v62  ;;  %v1000_v7 = vadd.f32 %v978_v4, %v976_v63  ;;  %v1010_v8 = vmul.f32 %v978_v4, %v978_v4  ;;  %v994_v9 = vrot.slane %v993_v0, 4 }
 0x176   : > { %v1011_v10 = vadd.f32 %v1009_v2, %v1007_v1 }
 0x177   : > { %992 = vst [vmem:[%s1883_s15 + $0x8] sm:$0xff] %v1362_v6  ;;  %v1001_v11 = vrot.slane %v1000_v7, 4  ;;  %v1018_v12 = vadd.f32 %v1010_v8, %v1008_v5  ;;  %v995_v13 = vadd.f32 %v994_v9, %v993_v0 }
 0x178   : > { %v1012_v14 = vrot.slane %v1011_v10, 4 }
 0x179   : > { %v1002_v15 = vadd.f32 %v1001_v11, %v1000_v7  ;;  %v1019_v16 = vrot.slane %v1018_v12, 4  ;;  %v996_v17 = vrot.slane %v995_v13, 2 }
 0x17a   : > { %v1013_v18 = vadd.f32 %v1012_v14, %v1011_v10 }
 0x17b   : > { %v1003_v19 = vrot.slane %v1002_v15, 2  ;;  %v1020_v20 = vadd.f32 %v1019_v16, %v1018_v12  ;;  %v997_v21 = vadd.f32 %v996_v17, %v995_v13 }
 0x17c   : > { %v1014_v22 = vrot.slane %v1013_v18, 2 }
 0x17d   : > { %v1004_v23 = vadd.f32 %v1003_v19, %v1002_v15  ;;  %v1021_v24 = vrot.slane %v1020_v20, 2  ;;  %v998_v25 = vrot.slane %v997_v21, 1 }
 0x17e   : > { %v1015_v26 = vadd.f32 %v1014_v22, %v1013_v18 }
 0x17f   : > { %v1005_v27 = vrot.slane %v1004_v23, 1  ;;  %v1022_v28 = vadd.f32 %v1021_v24, %v1020_v20  ;;  %v999_v29 = vadd.f32 %v998_v25, %v997_v21 }
 0x180   : > { %v1016_v30 = vrot.slane %v1015_v26, 1 }
 0x181   : > { %v1006_v31 = vadd.f32 %v1005_v27, %v1004_v23  ;;  %v1023_v32 = vrot.slane %v1022_v28, 1  ;;  %1025 = vst [vmem:[%s1872_s8] sm:$0xff] %v999_v29 }
 0x182   : > { %v1017_v33 = vadd.f32 %v1016_v30, %v1015_v26 }
 0x183   : > { %1026 = vst [vmem:[%s1872_s8 + $0x8] sm:$0xff] %v1006_v31  ;;  %v1024_v34 = vadd.f32 %v1023_v32, %v1022_v28 }
 0x184   : > { %1027 = vst [vmem:[%s1877_s24] sm:$0xff] %v1017_v33 }
 0x185   : > { %1028 = vst [vmem:[%s1877_s24 + $0x8] sm:$0xff] %v1024_v34 }
 0x186 PF: > { %1053 = sbr.rel (!%p1743_p12) target bundleno = 395 (0x18b), region = 104  ;;  %s1363_s1 = sshll.u32 (%p1743_p12), %s1608_s22, 3  ;;  %v1090_v35 = vld [vmem:[%s1883_s15] sm:$0xff] (%p1743_p12)  ;;  %v1092_v36 = vld [vmem:[%s1883_s15 + $0x8] sm:$0xff] (%p1743_p12) }
 0x187   : > { %s1059_s28 = scalar_lea.vmem (%p1743_p12), %s1987_s2, %s1363_s1 }
 0x188   : > { %1091 = vst [vmem:[%s1059_s28] sm:$0xff] (%p1743_p12), %v1090_v35  ;;  %1093 = vst [vmem:[%s1059_s28 + $0x10] sm:$0xff] (%p1743_p12), %v1092_v36 }
 0x18b PF: > { %s15_s25 = sadd.s32 1, %s1620_s25   ;;  %s2003_s22 = sld [smem:[#allocation6_spill]] }
 0x18c   : > { %p12_p6 = scmp.ge.s32.totalorder %s15_s25, 14   ;;  %s2004_s24 = sld [smem:[#allocation7_spill]] }
 0x18d   : > { %s2005_s14 = sld [smem:[#allocation8_spill]]  ;;  %s2006_s15 = smov %s1584_s16 }
 0x18e   : > { %s2007_s16 = smov %s1741_s13  ;;  %s2008_s17 = smov %s1592_s18 }
 0x18f   : > { %s2009_s18 = smov %s1738_s12  ;;  %s2010_s19 = smov %s1600_s20 }
 0x190   : > { %s2011_s20 = smov %s1724_s7  ;;  %s2012_s21 = smov %s1612_s23 }
 0x191   :  { %14 = sbr.rel (!%p12_p6) target bundleno = 9 (0x9), region = 211 }
 0x192   : > { %s2013_s23 = smov %s2004_s24 }
 0x193   : > { %s2014_s24 = smov %s2005_s14 }

// kernel: forward.153
= control target key start
LH: loop header
LB: loop body
LE: loop exit
PB: predicated region body
PF: predicated region fallthrough
CT: control target
= control target key end

     0   :  { %v37_v0 = vlaneseq  ;;  %s314_s0 = inlined_call_operand.vmem [shape: bf16[16,512], index: 0, kind: input, shape index: {}]   ;;  %s315_s1 = inlined_call_operand.vmem [shape: f32[1,512], index: 1, kind: input, shape index: {}]   ;;  %s316_s2 = inlined_call_operand.vmem [shape: f32[1,512], index: 2, kind: input, shape index: {}]   ;;  %s317_s3 = inlined_call_operand.vmem [shape: bf16[16,512], index: 3, kind: input, shape index: {}]   ;;  %s318_s4 = inlined_call_operand.vmem [shape: f32[1,512], index: 4, kind: input, shape index: {}]   ;;  %s319_s5 = inlined_call_operand.vmem [shape: f32[1,512], index: 5, kind: input, shape index: {}]   ;;  %s320_s6 = inlined_call_operand.vmem [shape: bf16[16,512], index: 6, kind: output, shape index: {}]  }
   0x1   :  { %v23_v1 = vld [vmem:[%s314_s0] sm:$0xff]  ;;  %v24_v10 = vld [vmem:[%s314_s0 + $0x8] sm:$0xff]  ;;  %v25_v50 = vld [vmem:[%s314_s0 + $0x10] sm:$0xff] }
   0x2   :  { %v35_v2 = vld [vmem:[%s315_s1] sm:$0xf]  ;;  %v38_v3 = vshrl.u32 %v37_v0, 7  ;;  %v27_v5 = vunpack.c.l.bf16 %v23_v1  ;;  %v28_v6 = vunpack.c.h.bf16 %v23_v1  ;;  %v104_v11 = vld [vmem:[%s317_s3 + $0x8] sm:$0xff]  ;;  %v29_v16 = vunpack.c.l.bf16 %v24_v10  ;;  %v105_v55 = vld [vmem:[%s317_s3 + $0x10] sm:$0xff] }
   0x3   :  { %v103_v4 = vld [vmem:[%s317_s3] sm:$0xff]  ;;  %v30_v17 = vunpack.c.h.bf16 %v24_v10  ;;  %v109_v20 = vunpack.c.l.bf16 %v104_v11  ;;  %v110_v21 = vunpack.c.h.bf16 %v104_v11  ;;  %v31_v62 = vunpack.c.l.bf16 %v25_v50  ;;  %v26_v0 = vld [vmem:[%s314_s0 + $0x18] sm:$0xff] }
   0x4   :  { %v65_v7 = vld [vmem:[%s316_s2] sm:$0xf]  ;;  %v107_v8 = vunpack.c.l.bf16 %v103_v4  ;;  %v108_v9 = vunpack.c.h.bf16 %v103_v4  ;;  %v39_v12 = vsub.s32 0, %v38_v3  ;;  %v43_v13 = vsub.s32 1, %v38_v3 }
   0x5   :  { %v115_v14 = vld [vmem:[%s318_s4] sm:$0xf]  ;;  %v47_v18 = vsub.s32 2, %v38_v3  ;;  %v51_v19 = vsub.s32 3, %v38_v3  ;;  %v32_v63 = vunpack.c.h.bf16 %v25_v50  ;;  %v111_v3 = vunpack.c.l.bf16 %v105_v55 }
   0x6   :  { %v145_v15 = vld [vmem:[%s319_s5] sm:$0xf]  ;;  %v40_v22 = vrot.slane %v35_v2, %v39_v12  ;;  %v44_v23 = vrot.slane %v35_v2, %v43_v13  ;;  %v70_v24 = vrot.slane %v65_v7, %v39_v12  ;;  %v74_v25 = vrot.slane %v65_v7, %v43_v13 }
   0x7   :  { %v120_v26 = vrot.slane %v115_v14, %v39_v12  ;;  %v124_v27 = vrot.slane %v115_v14, %v43_v13  ;;  %v150_v28 = vrot.slane %v145_v15, %v39_v12  ;;  %v154_v29 = vrot.slane %v145_v15, %v43_v13  ;;  %v106_v13 = vld [vmem:[%s317_s3 + $0x18] sm:$0xff] }
   0x8   :  { %v57_v30 = vmul.f32 %v40_v22, %v27_v5  ;;  %v58_v31 = vmul.f32 %v44_v23, %v28_v6  ;;  %v48_v32 = vrot.slane %v35_v2, %v47_v18  ;;  %v52_v33 = vrot.slane %v35_v2, %v51_v19 }
   0x9   :  { %v137_v34 = vmul.f32 %v120_v26, %v107_v8  ;;  %v138_v35 = vmul.f32 %v124_v27, %v108_v9  ;;  %v78_v36 = vrot.slane %v65_v7, %v47_v18  ;;  %v82_v37 = vrot.slane %v65_v7, %v51_v19 }
   0xa   :  { %v87_v38 = vadd.f32 %v70_v24, %v57_v30  ;;  %v88_v39 = vadd.f32 %v74_v25, %v58_v31  ;;  %v59_v40 = vmul.f32 %v48_v32, %v29_v16  ;;  %v60_v41 = vmul.f32 %v52_v33, %v30_v17 }
   0xb   :  { %v167_v42 = vadd.f32 %v150_v28, %v137_v34  ;;  %v168_v43 = vadd.f32 %v154_v29, %v138_v35  ;;  %v128_v44 = vrot.slane %v115_v14, %v47_v18  ;;  %v132_v45 = vrot.slane %v115_v14, %v51_v19 }
   0xc   :  { %v95_v46 = vmax.f32 %v87_v38, 0.0  ;;  %v96_v47 = vmax.f32 %v88_v39, 0.0  ;;  %v89_v48 = vadd.f32 %v78_v36, %v59_v40  ;;  %v90_v49 = vadd.f32 %v82_v37, %v60_v41 }
   0xd   :  { %v139_v51 = vmul.f32 %v128_v44, %v109_v20  ;;  %v140_v52 = vmul.f32 %v132_v45, %v110_v21  ;;  %v158_v53 = vrot.slane %v145_v15, %v47_v18  ;;  %v162_v54 = vrot.slane %v145_v15, %v51_v19 }
   0xe   :  { %v175_v56 = vadd.f32 %v167_v42, %v95_v46  ;;  %v176_v57 = vadd.f32 %v168_v43, %v96_v47  ;;  %v97_v58 = vmax.f32 %v89_v48, 0.0  ;;  %v98_v59 = vmax.f32 %v90_v49, 0.0 }
   0xf   :  { %v169_v60 = vadd.f32 %v158_v53, %v139_v51  ;;  %v170_v61 = vadd.f32 %v162_v54, %v140_v52  ;;  %v112_v4 = vunpack.c.h.bf16 %v105_v55  ;;  %v61_v7 = vmul.f32 %v40_v22, %v31_v62 }
  0x10   :  { %v183_v1 = vmax.f32 %v175_v56, 0.0  ;;  %v184_v2 = vmax.f32 %v176_v57, 0.0  ;;  %v62_v8 = vmul.f32 %v44_v23, %v32_v63  ;;  %v141_v10 = vmul.f32 %v120_v26, %v111_v3 }
  0x11   :  { %v177_v5 = vadd.f32 %v169_v60, %v97_v58  ;;  %v178_v6 = vadd.f32 %v170_v61, %v98_v59  ;;  %v142_v11 = vmul.f32 %v124_v27, %v112_v4  ;;  %v33_v12 = vunpack.c.l.bf16 %v26_v0 }
  0x12   :  { %v227_v9 = vpack.c.bf16 %v184_v2, %v183_v1  ;;  %v91_v16 = vadd.f32 %v70_v24, %v61_v7  ;;  %v92_v17 = vadd.f32 %v74_v25, %v62_v8  ;;  %v171_v18 = vadd.f32 %v150_v28, %v141_v10 }
  0x13   :  { %v185_v14 = vmax.f32 %v177_v5, 0.0  ;;  %v186_v15 = vmax.f32 %v178_v6, 0.0  ;;  %v172_v19 = vadd.f32 %v154_v29, %v142_v11  ;;  %v34_v20 = vunpack.c.h.bf16 %v26_v0 }
  0x14   :  { %215 = vst [vmem:[%s320_s6] sm:$0xff] %v227_v9  ;;  %v63_v21 = vmul.f32 %v48_v32, %v33_v12  ;;  %v99_v23 = vmax.f32 %v91_v16, 0.0  ;;  %v100_v26 = vmax.f32 %v92_v17, 0.0  ;;  %v113_v27 = vunpack.c.l.bf16 %v106_v13 }
  0x15   :  { %v228_v22 = vpack.c.bf16 %v186_v15, %v185_v14  ;;  %v64_v30 = vmul.f32 %v52_v33, %v34_v20  ;;  %v114_v34 = vunpack.c.h.bf16 %v106_v13 }
  0x16   :  { %v93_v31 = vadd.f32 %v78_v36, %v63_v21  ;;  %v179_v24 = vadd.f32 %v171_v18, %v99_v23  ;;  %v180_v25 = vadd.f32 %v172_v19, %v100_v26  ;;  %v143_v35 = vmul.f32 %v128_v44, %v113_v27 }
  0x17   :  { %216 = vst [vmem:[%s320_s6 + $0x8] sm:$0xff] %v228_v22  ;;  %v94_v38 = vadd.f32 %v82_v37, %v64_v30  ;;  %v144_v28 = vmul.f32 %v132_v45, %v114_v34 }
  0x18   :  { %v101_v39 = vmax.f32 %v93_v31, 0.0  ;;  %v187_v29 = vmax.f32 %v179_v24, 0.0  ;;  %v188_v40 = vmax.f32 %v180_v25, 0.0  ;;  %v173_v32 = vadd.f32 %v158_v53, %v143_v35 }
  0x19   :  { %v102_v41 = vmax.f32 %v94_v38, 0.0  ;;  %v174_v42 = vadd.f32 %v162_v54, %v144_v28 }
  0x1a   :  { %v229_v43 = vpack.c.bf16 %v188_v40, %v187_v29  ;;  %v181_v46 = vadd.f32 %v173_v32, %v101_v39 }
  0x1b   :  { %v182_v33 = vadd.f32 %v174_v42, %v102_v41 }
  0x1c   :  { %217 = vst [vmem:[%s320_s6 + $0x10] sm:$0xff] %v229_v43  ;;  %v189_v36 = vmax.f32 %v181_v46, 0.0 }
  0x1d   :  { %v190_v47 = vmax.f32 %v182_v33, 0.0 }
  0x1f   :  { %v230_v48 = vpack.c.bf16 %v190_v47, %v189_v36 }
  0x21   :  { %218 = vst [vmem:[%s320_s6 + $0x18] sm:$0xff] %v230_v48 }

// kernel: forward.151
= control target key start
LH: loop header
LB: loop body
LE: loop exit
PB: predicated region body
PF: predicated region fallthrough
CT: control target
= control target key end

     0   :  { %s2222_s0 = inlined_call_operand.vmem [shape: bf16[16,4608], index: 0, kind: input, shape index: {}]   ;;  %s2223_s1 = inlined_call_operand.vmem [shape: bf16[4608,512], index: 1, kind: input, shape index: {}]   ;;  %s2224_s2 = inlined_call_operand.vmem [shape: bf16[16,512], index: 2, kind: output, shape index: {0}]   ;;  %s2225_s3 = inlined_call_operand.vmem [shape: f32[8,512], index: 3, kind: output, shape index: {1}]   ;;  %s2226_s4 = inlined_call_operand.vmem [shape: f32[8,512], index: 4, kind: output, shape index: {2}]  }
   0x1   :  { %2230 = sst [smem:[#allocation9_spill]] %s2222_s0 }
   0x2   :  { %2231 = sst [smem:[#allocation10_spill]] %s2223_s1 }
   0x3   :  { %s1837_s15 = smov 0   ;;  %s1839_s16 = smov 0  }
   0x4   :  { %s1841_s17 = smov 0   ;;  %s1843_s18 = smov 0  }
   0x5   :  { %s1845_s19 = smov 0   ;;  %s1847_s20 = smov 0  }
   0x6   :  { %s1849_s21 = smov 0   ;;  %s1851_s22 = smov 0  }
   0x7   :  { %s1853_s23 = smov 0   ;;  %s1855_s24 = smov 0  }
   0x8   :  { %s1857_s25 = smov 0  }
   0x9 LB: > { %2232 = sst [smem:[#allocation6_spill]] %s1805_s24  ;;  %s1430_s26 = sadd.s32 4294967295, %s1809_s25   ;;  %s1809_s25 = sphi %s1857_s25, %s15_s25   ;;  %s1805_s24 = sphi %s1855_s24, %s2251_s24   ;;  %s1801_s23 = sphi %s1853_s23, %s2250_s23   ;;  %s1797_s22 = sphi %s1851_s22, %s2240_s22   ;;  %s1793_s21 = sphi %s1849_s21, %s2249_s21   ;;  %s1789_s20 = sphi %s1847_s20, %s2248_s20   ;;  %s1785_s19 = sphi %s1845_s19, %s2247_s19   ;;  %s1781_s18 = sphi %s1843_s18, %s2246_s18   ;;  %s1777_s17 = sphi %s1841_s17, %s2245_s17   ;;  %s1773_s16 = sphi %s1839_s16, %s2244_s16   ;;  %s1769_s15 = sphi %s1837_s15, %s2243_s15  }
   0xa   : > { %s27_s27 = sadd.s32 1, %s1801_s23  ;;  %s30_s28 = sadd.s32 1, %s1805_s24 }
   0xb   : > { %p28_p0 = scmp.ge.s32.totalorder %s27_s27, 9  ;;  %s43_s29 = sadd.s32 1, %s1789_s20 }
   0xc   : > { %p50_p1 = scmp.ne.s32.totalorder %s1789_s20, %s1785_s19  ;;  %p51_p2 = scmp.eq.s32.totalorder %s1809_s25, 0 }
   0xd   : > { %s2253_s27 = smov (%p28_p0, %s27_s27), 0  ;;  %s2255_s28 = smov (!%p28_p0, %s30_s28), %s1805_s24 }
   0xe   : > { %2233 = sst [smem:[#allocation7_spill]] %s2253_s27  ;;  %s39_s30 = ssub.s32 %s1801_s23, %s2253_s27 }
   0xf   : > { %p32_p3 = scmp.ge.s32.totalorder %s2255_s28, 2  ;;  %p41_p4 = scmp.eq.s32.totalorder %s39_s30, 0 }
  0x10   : > { %p1904_p5 = por %p51_p2, %p50_p1  ;;  %s71_s6 = sadd.s32 1, %s1781_s18 }
  0x11   : > { %s2257_s28 = smov (%p32_p3, %s2255_s28), 0  ;;  %p78_p6 = scmp.ne.s32.totalorder %s1781_s18, %s1777_s17 }
  0x12   : > { %2235 = sst [smem:[#allocation8_spill]] %s2257_s28  ;;  %s67_s8 = ssub.s32 %s1805_s24, %s2257_s28 }
  0x13   : > { %s1912_s7 = scalar_select %p41_p4, %s1789_s20, %s43_s29  }
  0x14   : > { %s68_s9 = sor.u32 %s67_s8, %s39_s30  ;;  %p97_p7 = scmp.eq.s32.totalorder %s67_s8, 0 }
  0x15   : > { %p69_p8 = scmp.eq.s32.totalorder %s68_s9, 0  ;;  %p1918_p9 = por %p78_p6, %p51_p2 }
  0x16   : > { %s99_s11 = sadd.s32 1, %s1773_s16  ;;  %p109_p10 = scmp.ne.s32.totalorder %s1773_s16, %s1769_s15 }
  0x17   : > { %s1926_s12 = scalar_select %p69_p8, %s1781_s18, %s71_s6  }
  0x18   : > { %s1929_s13 = scalar_select %p97_p7, %s1773_s16, %s99_s11  }
  0x19   : > { %p110_p11 = scmp.eq.s32.totalorder %s1430_s26, 17  ;;  %p1433_p13 = scmp.ge.s32.totalorder %s1809_s25, 18 }
  0x1b   : > { %p1931_p12 = por %p110_p11, %p109_p10  ;;  %188 = sbr.rel (%p1433_p13) target bundleno = 86 (0x56), region = 16 }
  0x20   : > { %191 = sbr.rel (!%p1904_p5) target bundleno = 44 (0x2c), region = 20  ;;  %s193_s29 = sand.u32 (%p1904_p5), 1, %s1789_s20  }
  0x21   : > { %s1527_s30 = sshll.u32 (%p1904_p5), %s1801_s23, 4  ;;  %s1434_s8 = sshll.u32 (%p1904_p5), %s193_s29, 5 }
  0x22   : > { %s2238_s0 = sld [smem:[#allocation9_spill]] (%p1904_p5)  ;;  %s195_s26 = scalar_lea.vmem (%p1904_p5), [#allocation3], %s1434_s8 }
  0x28   : > { %s201_s11 = scalar_lea.vmem %s2238_s0, %s1527_s30 }
  0x29   : > { %v214_v0 = vld [vmem:[%s201_s11] sm:$0xff]  ;;  %v216_v1 = vld [vmem:[%s201_s11 + $0x8] sm:$0xff]  ;;  %v218_v2 = vld [vmem:[%s201_s11 + $0x90] sm:$0xff] }
  0x2a   : > { %215 = vst [vmem:[%s195_s26] sm:$0xff] %v214_v0  ;;  %217 = vst [vmem:[%s195_s26 + $0x8] sm:$0xff] %v216_v1  ;;  %v220_v3 = vld [vmem:[%s201_s11 + $0x98] sm:$0xff] }
  0x2b   : > { %219 = vst [vmem:[%s195_s26 + $0x10] sm:$0xff] %v218_v2  ;;  %221 = vst [vmem:[%s195_s26 + $0x18] sm:$0xff] %v220_v3 }
  0x2c PF: > { %227 = sbr.rel (!%p1918_p9) target bundleno = 86 (0x56), region = 43  ;;  %s229_s5 = sand.u32 (%p1918_p9), 1, %s1781_s18  }
  0x2d   : > { %s1439_s29 = sshll.u32 (%p1918_p9), %s1805_s24, 1  ;;  %s1437_s6 = sshll.u32 (%p1918_p9), %s229_s5, 9 }
  0x2e   : > { %s1528_s30 = sshll.u32 (%p1918_p9), %s1801_s23, 8  ;;  %s2239_s1 = sld [smem:[#allocation10_spill]] (%p1918_p9) }
  0x2f   : > { %s235_s9 = sadd.s32 (%p1918_p9), %s1528_s30, %s1439_s29  ;;  %s1956_s10 = scalar_lea.vmem (%p1918_p9), [#allocation4], %s1437_s6 }
  0x30   : > { %s1441_s0 = sshll.u32 (%p1918_p9), %s235_s9, 2 }
  0x34   : > { %s1951_s27 = scalar_lea.vmem %s2239_s1, %s1441_s0 }
  0x35   : > { %v392_v4 = vld [vmem:[%s1951_s27] sm:$0xff]  ;;  %v394_v5 = vld [vmem:[%s1951_s27 + $0x10] sm:$0xff] }
  0x36   : > { %v396_v6 = vld [vmem:[%s1951_s27 + $0x20] sm:$0xff]  ;;  %393 = vst [vmem:[%s1956_s10] sm:$0xff] %v392_v4  ;;  %395 = vst [vmem:[%s1956_s10 + $0x8] sm:$0xff] %v394_v5  ;;  %v398_v7 = vld [vmem:[%s1951_s27 + $0x30] sm:$0xff] }
  0x37   : > { %397 = vst [vmem:[%s1956_s10 + $0x10] sm:$0xff] %v396_v6  ;;  %v400_v8 = vld [vmem:[%s1951_s27 + $0x40] sm:$0xff]  ;;  %v402_v9 = vld [vmem:[%s1951_s27 + $0x50] sm:$0xff]  ;;  %399 = vst [vmem:[%s1956_s10 + $0x18] sm:$0xff] %v398_v7 }
  0x38   : > { %401 = vst [vmem:[%s1956_s10 + $0x20] sm:$0xff] %v400_v8  ;;  %403 = vst [vmem:[%s1956_s10 + $0x28] sm:$0xff] %v402_v9  ;;  %v404_v10 = vld [vmem:[%s1951_s27 + $0x60] sm:$0xff]  ;;  %v406_v11 = vld [vmem:[%s1951_s27 + $0x70] sm:$0xff] }
  0x39   : > { %v408_v12 = vld [vmem:[%s1951_s27 + $0x80] sm:$0xff]  ;;  %405 = vst [vmem:[%s1956_s10 + $0x30] sm:$0xff] %v404_v10  ;;  %407 = vst [vmem:[%s1956_s10 + $0x38] sm:$0xff] %v406_v11  ;;  %v410_v13 = vld [vmem:[%s1951_s27 + $0x90] sm:$0xff] }
  0x3a   : > { %409 = vst [vmem:[%s1956_s10 + $0x40] sm:$0xff] %v408_v12  ;;  %v412_v14 = vld [vmem:[%s1951_s27 + $0xa0] sm:$0xff]  ;;  %v414_v15 = vld [vmem:[%s1951_s27 + $0xb0] sm:$0xff]  ;;  %411 = vst [vmem:[%s1956_s10 + $0x48] sm:$0xff] %v410_v13 }
  0x3b   : > { %413 = vst [vmem:[%s1956_s10 + $0x50] sm:$0xff] %v412_v14  ;;  %415 = vst [vmem:[%s1956_s10 + $0x58] sm:$0xff] %v414_v15  ;;  %v416_v16 = vld [vmem:[%s1951_s27 + $0xc0] sm:$0xff]  ;;  %v418_v17 = vld [vmem:[%s1951_s27 + $0xd0] sm:$0xff] }
  0x3c   : > { %v420_v18 = vld [vmem:[%s1951_s27 + $0xe0] sm:$0xff]  ;;  %417 = vst [vmem:[%s1956_s10 + $0x60] sm:$0xff] %v416_v16  ;;  %419 = vst [vmem:[%s1956_s10 + $0x68] sm:$0xff] %v418_v17  ;;  %v422_v19 = vld [vmem:[%s1951_s27 + $0xf0] sm:$0xff] }
  0x3d   : > { %421 = vst [vmem:[%s1956_s10 + $0x70] sm:$0xff] %v420_v18  ;;  %v424_v20 = vld [vmem:[%s1951_s27 + $0x100] sm:$0xff]  ;;  %v426_v21 = vld [vmem:[%s1951_s27 + $0x110] sm:$0xff]  ;;  %423 = vst [vmem:[%s1956_s10 + $0x78] sm:$0xff] %v422_v19 }
  0x3e   : > { %425 = vst [vmem:[%s1956_s10 + $0x80] sm:$0xff] %v424_v20  ;;  %427 = vst [vmem:[%s1956_s10 + $0x88] sm:$0xff] %v426_v21  ;;  %v428_v22 = vld [vmem:[%s1951_s27 + $0x120] sm:$0xff]  ;;  %v430_v23 = vld [vmem:[%s1951_s27 + $0x130] sm:$0xff] }
  0x3f   : > { %v432_v24 = vld [vmem:[%s1951_s27 + $0x140] sm:$0xff]  ;;  %429 = vst [vmem:[%s1956_s10 + $0x90] sm:$0xff] %v428_v22  ;;  %431 = vst [vmem:[%s1956_s10 + $0x98] sm:$0xff] %v430_v23  ;;  %v434_v25 = vld [vmem:[%s1951_s27 + $0x150] sm:$0xff] }
  0x40   : > { %433 = vst [vmem:[%s1956_s10 + $0xa0] sm:$0xff] %v432_v24  ;;  %v436_v26 = vld [vmem:[%s1951_s27 + $0x160] sm:$0xff]  ;;  %v438_v27 = vld [vmem:[%s1951_s27 + $0x170] sm:$0xff]  ;;  %435 = vst [vmem:[%s1956_s10 + $0xa8] sm:$0xff] %v434_v25 }
  0x41   : > { %437 = vst [vmem:[%s1956_s10 + $0xb0] sm:$0xff] %v436_v26  ;;  %439 = vst [vmem:[%s1956_s10 + $0xb8] sm:$0xff] %v438_v27  ;;  %v440_v28 = vld [vmem:[%s1951_s27 + $0x180] sm:$0xff]  ;;  %v442_v29 = vld [vmem:[%s1951_s27 + $0x190] sm:$0xff] }
  0x42   : > { %v444_v30 = vld [vmem:[%s1951_s27 + $0x1a0] sm:$0xff]  ;;  %441 = vst [vmem:[%s1956_s10 + $0xc0] sm:$0xff] %v440_v28  ;;  %443 = vst [vmem:[%s1956_s10 + $0xc8] sm:$0xff] %v442_v29  ;;  %v446_v31 = vld [vmem:[%s1951_s27 + $0x1b0] sm:$0xff] }
  0x43   : > { %445 = vst [vmem:[%s1956_s10 + $0xd0] sm:$0xff] %v444_v30  ;;  %v448_v32 = vld [vmem:[%s1951_s27 + $0x1c0] sm:$0xff]  ;;  %v450_v33 = vld [vmem:[%s1951_s27 + $0x1d0] sm:$0xff]  ;;  %447 = vst [vmem:[%s1956_s10 + $0xd8] sm:$0xff] %v446_v31 }
  0x44   : > { %449 = vst [vmem:[%s1956_s10 + $0xe0] sm:$0xff] %v448_v32  ;;  %451 = vst [vmem:[%s1956_s10 + $0xe8] sm:$0xff] %v450_v33  ;;  %v452_v34 = vld [vmem:[%s1951_s27 + $0x1e0] sm:$0xff]  ;;  %v454_v35 = vld [vmem:[%s1951_s27 + $0x1f0] sm:$0xff] }
  0x45   : > { %v456_v36 = vld [vmem:[%s1951_s27 + $0x200] sm:$0xff]  ;;  %453 = vst [vmem:[%s1956_s10 + $0xf0] sm:$0xff] %v452_v34  ;;  %455 = vst [vmem:[%s1956_s10 + $0xf8] sm:$0xff] %v454_v35  ;;  %v458_v37 = vld [vmem:[%s1951_s27 + $0x210] sm:$0xff] }
  0x46   : > { %457 = vst [vmem:[%s1956_s10 + $0x100] sm:$0xff] %v456_v36  ;;  %v460_v38 = vld [vmem:[%s1951_s27 + $0x220] sm:$0xff]  ;;  %v462_v39 = vld [vmem:[%s1951_s27 + $0x230] sm:$0xff]  ;;  %459 = vst [vmem:[%s1956_s10 + $0x108] sm:$0xff] %v458_v37 }
  0x47   : > { %461 = vst [vmem:[%s1956_s10 + $0x110] sm:$0xff] %v460_v38  ;;  %463 = vst [vmem:[%s1956_s10 + $0x118] sm:$0xff] %v462_v39  ;;  %v464_v40 = vld [vmem:[%s1951_s27 + $0x240] sm:$0xff]  ;;  %v466_v41 = vld [vmem:[%s1951_s27 + $0x250] sm:$0xff] }
  0x48   : > { %v468_v42 = vld [vmem:[%s1951_s27 + $0x260] sm:$0xff]  ;;  %465 = vst [vmem:[%s1956_s10 + $0x120] sm:$0xff] %v464_v40  ;;  %467 = vst [vmem:[%s1956_s10 + $0x128] sm:$0xff] %v466_v41  ;;  %v470_v43 = vld [vmem:[%s1951_s27 + $0x270] sm:$0xff] }
  0x49   : > { %469 = vst [vmem:[%s1956_s10 + $0x130] sm:$0xff] %v468_v42  ;;  %v472_v44 = vld [vmem:[%s1951_s27 + $0x280] sm:$0xff]  ;;  %v474_v45 = vld [vmem:[%s1951_s27 + $0x290] sm:$0xff]  ;;  %471 = vst [vmem:[%s1956_s10 + $0x138] sm:$0xff] %v470_v43 }
  0x4a   : > { %473 = vst [vmem:[%s1956_s10 + $0x140] sm:$0xff] %v472_v44  ;;  %475 = vst [vmem:[%s1956_s10 + $0x148] sm:$0xff] %v474_v45  ;;  %v476_v46 = vld [vmem:[%s1951_s27 + $0x2a0] sm:$0xff]  ;;  %v478_v47 = vld [vmem:[%s1951_s27 + $0x2b0] sm:$0xff] }
  0x4b   : > { %v480_v48 = vld [vmem:[%s1951_s27 + $0x2c0] sm:$0xff]  ;;  %477 = vst [vmem:[%s1956_s10 + $0x150] sm:$0xff] %v476_v46  ;;  %479 = vst [vmem:[%s1956_s10 + $0x158] sm:$0xff] %v478_v47  ;;  %v482_v49 = vld [vmem:[%s1951_s27 + $0x2d0] sm:$0xff] }
  0x4c   : > { %481 = vst [vmem:[%s1956_s10 + $0x160] sm:$0xff] %v480_v48  ;;  %v484_v50 = vld [vmem:[%s1951_s27 + $0x2e0] sm:$0xff]  ;;  %v486_v51 = vld [vmem:[%s1951_s27 + $0x2f0] sm:$0xff]  ;;  %483 = vst [vmem:[%s1956_s10 + $0x168] sm:$0xff] %v482_v49 }
  0x4d   : > { %485 = vst [vmem:[%s1956_s10 + $0x170] sm:$0xff] %v484_v50  ;;  %487 = vst [vmem:[%s1956_s10 + $0x178] sm:$0xff] %v486_v51  ;;  %v488_v52 = vld [vmem:[%s1951_s27 + $0x300] sm:$0xff]  ;;  %v490_v53 = vld [vmem:[%s1951_s27 + $0x310] sm:$0xff] }
  0x4e   : > { %v492_v54 = vld [vmem:[%s1951_s27 + $0x320] sm:$0xff]  ;;  %489 = vst [vmem:[%s1956_s10 + $0x180] sm:$0xff] %v488_v52  ;;  %491 = vst [vmem:[%s1956_s10 + $0x188] sm:$0xff] %v490_v53  ;;  %v494_v55 = vld [vmem:[%s1951_s27 + $0x330] sm:$0xff] }
  0x4f   : > { %493 = vst [vmem:[%s1956_s10 + $0x190] sm:$0xff] %v492_v54  ;;  %v496_v56 = vld [vmem:[%s1951_s27 + $0x340] sm:$0xff]  ;;  %v498_v57 = vld [vmem:[%s1951_s27 + $0x350] sm:$0xff]  ;;  %495 = vst [vmem:[%s1956_s10 + $0x198] sm:$0xff] %v494_v55 }
  0x50   : > { %497 = vst [vmem:[%s1956_s10 + $0x1a0] sm:$0xff] %v496_v56  ;;  %499 = vst [vmem:[%s1956_s10 + $0x1a8] sm:$0xff] %v498_v57  ;;  %v500_v58 = vld [vmem:[%s1951_s27 + $0x360] sm:$0xff]  ;;  %v502_v59 = vld [vmem:[%s1951_s27 + $0x370] sm:$0xff] }
  0x51   : > { %v504_v60 = vld [vmem:[%s1951_s27 + $0x380] sm:$0xff]  ;;  %501 = vst [vmem:[%s1956_s10 + $0x1b0] sm:$0xff] %v500_v58  ;;  %503 = vst [vmem:[%s1956_s10 + $0x1b8] sm:$0xff] %v502_v59  ;;  %v506_v61 = vld [vmem:[%s1951_s27 + $0x390] sm:$0xff] }
  0x52   : > { %505 = vst [vmem:[%s1956_s10 + $0x1c0] sm:$0xff] %v504_v60  ;;  %v508_v62 = vld [vmem:[%s1951_s27 + $0x3a0] sm:$0xff]  ;;  %v510_v63 = vld [vmem:[%s1951_s27 + $0x3b0] sm:$0xff]  ;;  %507 = vst [vmem:[%s1956_s10 + $0x1c8] sm:$0xff] %v506_v61 }
  0x53   : > { %509 = vst [vmem:[%s1956_s10 + $0x1d0] sm:$0xff] %v508_v62  ;;  %511 = vst [vmem:[%s1956_s10 + $0x1d8] sm:$0xff] %v510_v63  ;;  %v512_v0 = vld [vmem:[%s1951_s27 + $0x3c0] sm:$0xff]  ;;  %v514_v1 = vld [vmem:[%s1951_s27 + $0x3d0] sm:$0xff] }
  0x54   : > { %v516_v2 = vld [vmem:[%s1951_s27 + $0x3e0] sm:$0xff]  ;;  %513 = vst [vmem:[%s1956_s10 + $0x1e0] sm:$0xff] %v512_v0  ;;  %515 = vst [vmem:[%s1956_s10 + $0x1e8] sm:$0xff] %v514_v1  ;;  %v518_v3 = vld [vmem:[%s1951_s27 + $0x3f0] sm:$0xff] }
  0x55   : > { %517 = vst [vmem:[%s1956_s10 + $0x1f0] sm:$0xff] %v516_v2  ;;  %519 = vst [vmem:[%s1956_s10 + $0x1f8] sm:$0xff] %v518_v3 }
  0x56 PF: > { %p1442_p0 = scmp.ge.s32.totalorder %s1809_s25, 1  ;;  %p524_p1 = scmp.lt.s32.totalorder %s1809_s25, 19 }
  0x58   : > { %p525_p2 = pnand %p1442_p0, %p524_p1 }
  0x59   : > { %s531_s0 = sand.u32 (!%p525_p2), 1, %s1785_s19   ;;  %s538_s28 = sand.u32 (!%p525_p2), 1, %s1777_s17  }
  0x5a   : > { %528 = sbr.rel (%p525_p2) target bundleno = 405 (0x195), region = 81  ;;  %s1443_s11 = sshll.u32 (!%p525_p2), %s531_s0, 5 }
  0x5b   : > { %s1444_s26 = sshll.u32 (!%p525_p2), %s538_s28, 9  ;;  %s559_s5 = sand.u32 (!%p525_p2), 1, %s1769_s15  }
  0x5c   : > { %s1446_s29 = sshll.u32 (!%p525_p2), %s1797_s22, 1  ;;  %s1445_s27 = sshll.u32 (!%p525_p2), %s559_s5, 4 }
  0x5d   : > { %p593_p3 = scmp.lt.s32.totalorder (!%p525_p2), %s1446_s29, 3  ;;  %s2099_s19 = scalar_lea.vmem (!%p525_p2), [#allocation3], %s1443_s11 }
  0x5e   : > { %s2101_s17 = scalar_lea.vmem (!%p525_p2), [#allocation4], %s1444_s26  ;;  %s2103_s15 = scalar_lea.vmem (!%p525_p2), [#allocation5], %s1445_s27 }
  0x5f   : > { %s2259_s29 = smov (!%p593_p3, %s1446_s29), 3  ;;  %p1450_p4 = scmp.ne.s32.totalorder %s1793_s21, 0 }
  0x60   : > { %s1447_s6 = sshll.u32 %s2259_s29, 3 }
  0x61   : > { %s2092_s8 = scalar_lea.vmem %s2225_s3, %s1447_s6  ;;  %s2097_s24 = scalar_lea.vmem %s2226_s4, %s1447_s6 }
  0x62   : > { %613 = sbr.rel (%p1450_p4) target bundleno = 106 (0x6a), region = 93 }
  0x67   : > { %v1811_v4 = vmov 0.0  }
  0x68   : > { %614 = vst [vmem:[#allocation2 + $0x10] sm:$0xff] %v1811_v4  ;;  %615 = vst [vmem:[#allocation2] sm:$0xff] %v1811_v4 }
  0x69   : > { %616 = vst [vmem:[#allocation2 + $0x18] sm:$0xff] %v1811_v4  ;;  %617 = vst [vmem:[#allocation2 + $0x8] sm:$0xff] %v1811_v4 }
  0x6a PF: > { %v1621_v5 = vld [vmem:[%s2101_s17 + $0x74] ss:$8 sps:$4 sm:$0xff]   ;;  %v1625_v7 = vld [vmem:[%s2101_s17 + $0x70] ss:$8 sps:$4 sm:$0xff]   ;;  %v1627_v9 = vld [vmem:[%s2101_s17 + $0x64] ss:$8 sps:$4 sm:$0xff]  }
  0x6b   : > { %v1623_v6 = vld [vmem:[%s2101_s17 + $0x174] ss:$8 sps:$4 sm:$0xff]   ;;  %1030 = vmatprep.subr.bf16.mxu0 %v1621_v5  ;;  %v1626_v8 = vld [vmem:[%s2101_s17 + $0x170] ss:$8 sps:$4 sm:$0xff]   ;;  %v1629_v10 = vld [vmem:[%s2101_s17 + $0x164] ss:$8 sps:$4 sm:$0xff]  }
  0x6c   : > { %1073 = vmatprep.subr.bf16.mxu1 %v1623_v6  ;;  %1031 = vmatpush1.bf16.msra.mxu0 %v1625_v7  ;;  %v1631_v11 = vld [vmem:[%s2101_s17 + $0x60] ss:$8 sps:$4 sm:$0xff]   ;;  %v1633_v13 = vld [vmem:[%s2101_s17 + $0x54] ss:$8 sps:$4 sm:$0xff]   ;;  %v1637_v15 = vld [vmem:[%s2101_s17 + $0x50] ss:$8 sps:$4 sm:$0xff]  }
  0x6d   : > { %1074 = vmatpush1.bf16.msra.mxu1 %v1626_v8  ;;  %1032 = vmatprep.subr.bf16.mxu0 %v1627_v9  ;;  %v1632_v12 = vld [vmem:[%s2101_s17 + $0x160] ss:$8 sps:$4 sm:$0xff]   ;;  %v1635_v14 = vld [vmem:[%s2101_s17 + $0x154] ss:$8 sps:$4 sm:$0xff]   ;;  %v1638_v16 = vld [vmem:[%s2101_s17 + $0x150] ss:$8 sps:$4 sm:$0xff]  }
  0x6e   : > { %1075 = vmatprep.subr.bf16.mxu1 %v1629_v10  ;;  %v1639_v17 = vld [vmem:[%s2101_s17 + $0x44] ss:$8 sps:$4 sm:$0xff]   ;;  %v1643_v19 = vld [vmem:[%s2101_s17 + $0x40] ss:$8 sps:$4 sm:$0xff]   ;;  %v1645_v21 = vld [vmem:[%s2101_s17 + $0x34] ss:$8 sps:$4 sm:$0xff]  }
  0x6f   : > { %v1641_v18 = vld [vmem:[%s2101_s17 + $0x144] ss:$8 sps:$4 sm:$0xff]   ;;  %v1644_v20 = vld [vmem:[%s2101_s17 + $0x140] ss:$8 sps:$4 sm:$0xff]   ;;  %v1647_v22 = vld [vmem:[%s2101_s17 + $0x134] ss:$8 sps:$4 sm:$0xff]  }
  0x70   : > { %1033 = vmatpush1.bf16.msra.mxu0 %v1631_v11  ;;  %v1649_v23 = vld [vmem:[%s2101_s17 + $0x30] ss:$8 sps:$4 sm:$0xff]   ;;  %v1651_v25 = vld [vmem:[%s2101_s17 + $0x24] ss:$8 sps:$4 sm:$0xff]   ;;  %v1655_v27 = vld [vmem:[%s2101_s17 + $0x20] ss:$8 sps:$4 sm:$0xff]  }
  0x71   : > { %1076 = vmatpush1.bf16.msra.mxu1 %v1632_v12  ;;  %1034 = vmatprep.subr.bf16.mxu0 %v1633_v13  ;;  %v1650_v24 = vld [vmem:[%s2101_s17 + $0x130] ss:$8 sps:$4 sm:$0xff]   ;;  %v1653_v26 = vld [vmem:[%s2101_s17 + $0x124] ss:$8 sps:$4 sm:$0xff]   ;;  %v1656_v28 = vld [vmem:[%s2101_s17 + $0x120] ss:$8 sps:$4 sm:$0xff]  }
  0x72   : > { %1077 = vmatprep.subr.bf16.mxu1 %v1635_v14  ;;  %v1657_v29 = vld [vmem:[%s2101_s17 + $0x14] ss:$8 sps:$4 sm:$0xff]   ;;  %v1661_v31 = vld [vmem:[%s2101_s17 + $0x10] ss:$8 sps:$4 sm:$0xff]   ;;  %v1663_v33 = vld [vmem:[%s2101_s17 + $0x4] ss:$8 sps:$4 sm:$0xff]  }
  0x73   : > { %v1659_v30 = vld [vmem:[%s2101_s17 + $0x114] ss:$8 sps:$4 sm:$0xff]   ;;  %v1662_v32 = vld [vmem:[%s2101_s17 + $0x110] ss:$8 sps:$4 sm:$0xff]   ;;  %v1665_v34 = vld [vmem:[%s2101_s17 + $0x104] ss:$8 sps:$4 sm:$0xff]  }
  0x74   : > { %1035 = vmatpush1.bf16.msra.mxu0 %v1637_v15  ;;  %v1667_v35 = vld [vmem:[%s2101_s17] ss:$8 sps:$4 sm:$0xff]   ;;  %v1669_v37 = vld [vmem:[%s2101_s17 + $0xf4] ss:$8 sps:$4 sm:$0xff]   ;;  %v1673_v39 = vld [vmem:[%s2101_s17 + $0xf0] ss:$8 sps:$4 sm:$0xff]  }
  0x75   : > { %1078 = vmatpush1.bf16.msra.mxu1 %v1638_v16  ;;  %1036 = vmatprep.subr.bf16.mxu0 %v1639_v17  ;;  %v1668_v36 = vld [vmem:[%s2101_s17 + $0x100] ss:$8 sps:$4 sm:$0xff]   ;;  %v1671_v38 = vld [vmem:[%s2101_s17 + $0x1f4] ss:$8 sps:$4 sm:$0xff]   ;;  %v1674_v40 = vld [vmem:[%s2101_s17 + $0x1f0] ss:$8 sps:$4 sm:$0xff]  }
  0x76   : > { %1079 = vmatprep.subr.bf16.mxu1 %v1641_v18  ;;  %v1675_v41 = vld [vmem:[%s2101_s17 + $0xe4] ss:$8 sps:$4 sm:$0xff]   ;;  %v1679_v43 = vld [vmem:[%s2101_s17 + $0xe0] ss:$8 sps:$4 sm:$0xff]   ;;  %v1681_v45 = vld [vmem:[%s2101_s17 + $0xd4] ss:$8 sps:$4 sm:$0xff]  }
  0x77   : > { %v1677_v42 = vld [vmem:[%s2101_s17 + $0x1e4] ss:$8 sps:$4 sm:$0xff]   ;;  %v1680_v44 = vld [vmem:[%s2101_s17 + $0x1e0] ss:$8 sps:$4 sm:$0xff]   ;;  %v1683_v46 = vld [vmem:[%s2101_s17 + $0x1d4] ss:$8 sps:$4 sm:$0xff]  }
  0x78   : > { %1037 = vmatpush1.bf16.msra.mxu0 %v1643_v19  ;;  %v1685_v47 = vld [vmem:[%s2101_s17 + $0xd0] ss:$8 sps:$4 sm:$0xff]   ;;  %v1687_v49 = vld [vmem:[%s2101_s17 + $0xc4] ss:$8 sps:$4 sm:$0xff]   ;;  %v1691_v51 = vld [vmem:[%s2101_s17 + $0xc0] ss:$8 sps:$4 sm:$0xff]  }
  0x79   : > { %1080 = vmatpush1.bf16.msra.mxu1 %v1644_v20  ;;  %1038 = vmatprep.subr.bf16.mxu0 %v1645_v21  ;;  %v1686_v48 = vld [vmem:[%s2101_s17 + $0x1d0] ss:$8 sps:$4 sm:$0xff]   ;;  %v1689_v50 = vld [vmem:[%s2101_s17 + $0x1c4] ss:$8 sps:$4 sm:$0xff]   ;;  %v1692_v53 = vld [vmem:[%s2101_s17 + $0x1c0] ss:$8 sps:$4 sm:$0xff]  }
  0x7a   : > { %1081 = vmatprep.subr.bf16.mxu1 %v1647_v22  ;;  %v1719_v52 = vld [vmem:[%s2099_s19 + $0x4] ss:$16 sps:$4 sm:$0xff]   ;;  %v1722_v56 = vld [vmem:[%s2099_s19 + $0xc] ss:$16 sps:$4 sm:$0xff]   ;;  %v1697_v57 = vld [vmem:[%s2101_s17 + $0xb0] ss:$8 sps:$4 sm:$0xff]  }
  0x7b   : > { %v1693_v54 = vld [vmem:[%s2101_s17 + $0xb4] ss:$8 sps:$4 sm:$0xff]   ;;  %1062 = vmatprep.mubr.bf16.mxu0 %v1719_v52  ;;  %1105 = vmatprep.mubr.bf16.mxu1 %v1722_v56  ;;  %v1698_v58 = vld [vmem:[%s2101_s17 + $0x1b0] ss:$8 sps:$4 sm:$0xff]   ;;  %v1699_v59 = vld [vmem:[%s2101_s17 + $0xa4] ss:$8 sps:$4 sm:$0xff]  }
  0x7c   : > { %1039 = vmatpush1.bf16.msra.mxu0 %v1649_v23  ;;  %v1695_v55 = vld [vmem:[%s2101_s17 + $0x1b4] ss:$8 sps:$4 sm:$0xff]   ;;  %v1701_v60 = vld [vmem:[%s2101_s17 + $0x1a4] ss:$8 sps:$4 sm:$0xff]   ;;  %v1703_v61 = vld [vmem:[%s2101_s17 + $0xa0] ss:$8 sps:$4 sm:$0xff]  }
  0x7d   : > { %1082 = vmatpush1.bf16.msra.mxu1 %v1650_v24  ;;  %1040 = vmatprep.subr.bf16.mxu0 %v1651_v25  ;;  %v1704_v62 = vld [vmem:[%s2101_s17 + $0x1a0] ss:$8 sps:$4 sm:$0xff]   ;;  %v1705_v63 = vld [vmem:[%s2101_s17 + $0x94] ss:$8 sps:$4 sm:$0xff]   ;;  %v1709_v1 = vld [vmem:[%s2101_s17 + $0x90] ss:$8 sps:$4 sm:$0xff]  }
  0x7e   : > { %1083 = vmatprep.subr.bf16.mxu1 %v1653_v26  ;;  %v1707_v0 = vld [vmem:[%s2101_s17 + $0x194] ss:$8 sps:$4 sm:$0xff]   ;;  %v1710_v2 = vld [vmem:[%s2101_s17 + $0x190] ss:$8 sps:$4 sm:$0xff]   ;;  %v1711_v3 = vld [vmem:[%s2101_s17 + $0x84] ss:$8 sps:$4 sm:$0xff]  }
  0x7f   : > { %v1713_v4 = vld [vmem:[%s2101_s17 + $0x184] ss:$8 sps:$4 sm:$0xff]   ;;  %v1715_v5 = vld [vmem:[%s2101_s17 + $0x80] ss:$8 sps:$4 sm:$0xff]   ;;  %v618_v10 = vld [vmem:[#allocation2 + $0x10] sm:$0xff]  ;;  %p1519_p5 = scmp.ne.s32.totalorder %s1793_s21, 8 }
  0x80   : > { %1041 = vmatpush1.bf16.msra.mxu0 %v1655_v27  ;;  %v1716_v6 = vld [vmem:[%s2101_s17 + $0x180] ss:$8 sps:$4 sm:$0xff]   ;;  %v620_v19 = vld [vmem:[#allocation2 + $0x18] sm:$0xff] }
  0x81   : > { %1084 = vmatpush1.bf16.msra.mxu1 %v1656_v28  ;;  %1042 = vmatprep.subr.bf16.mxu0 %v1657_v29  ;;  %v1717_v7 = vld [vmem:[%s2099_s19] ss:$16 sps:$4 sm:$0xff]   ;;  %v1720_v8 = vld [vmem:[%s2099_s19 + $0x8] ss:$16 sps:$4 sm:$0xff]  }
  0x82   : > { %1085 = vmatprep.subr.bf16.mxu1 %v1659_v30  ;;  %v619_v14 = vld [vmem:[#allocation2] sm:$0xff]  ;;  %v621_v24 = vld [vmem:[#allocation2 + $0x8] sm:$0xff] }
  0x84   : > { %1043 = vmatpush1.bf16.msra.mxu0 %v1661_v31 }
  0x85   : > { %1086 = vmatpush1.bf16.msra.mxu1 %v1662_v32  ;;  %1044 = vmatprep.subr.bf16.mxu0 %v1663_v33 }
  0x86   : > { %1087 = vmatprep.subr.bf16.mxu1 %v1665_v34 }
  0x88   : > { %1045 = vmatpush1.bf16.msra.mxu0 %v1667_v35 }
  0x89   : > { %1088 = vmatpush1.bf16.msra.mxu1 %v1668_v36  ;;  %1046 = vmatprep.subr.bf16.mxu0 %v1669_v37 }
  0x8a   : > { %1089 = vmatprep.subr.bf16.mxu1 %v1671_v38 }
  0x8c   : > { %1047 = vmatpush2.bf16.msra.mxu0 %v1673_v39 }
  0x8d   : > { %1090 = vmatpush2.bf16.msra.mxu1 %v1674_v40  ;;  %1048 = vmatprep.subr.bf16.mxu0 %v1675_v41 }
  0x8e   : > { %1091 = vmatprep.subr.bf16.mxu1 %v1677_v42 }
  0x90   : > { %1049 = vmatpush2.bf16.msra.mxu0 %v1679_v43 }
  0x91   : > { %1092 = vmatpush2.bf16.msra.mxu1 %v1680_v44  ;;  %1050 = vmatprep.subr.bf16.mxu0 %v1681_v45 }
  0x92   : > { %1093 = vmatprep.subr.bf16.mxu1 %v1683_v46 }
  0x94   : > { %1051 = vmatpush2.bf16.msra.mxu0 %v1685_v47 }
  0x95   : > { %1094 = vmatpush2.bf16.msra.mxu1 %v1686_v48  ;;  %1052 = vmatprep.subr.bf16.mxu0 %v1687_v49 }
  0x96   : > { %1095 = vmatprep.subr.bf16.mxu1 %v1689_v50 }
  0x98   : > { %1053 = vmatpush2.bf16.msra.mxu0 %v1691_v51 }
  0x99   : > { %1096 = vmatpush2.bf16.msra.mxu1 %v1692_v53  ;;  %1054 = vmatprep.subr.bf16.mxu0 %v1693_v54 }
  0x9a   : > { %1097 = vmatprep.subr.bf16.mxu1 %v1695_v55 }
  0x9c   : > { %1055 = vmatpush2.bf16.msra.mxu0 %v1697_v57 }
  0x9d   : > { %1098 = vmatpush2.bf16.msra.mxu1 %v1698_v58  ;;  %1056 = vmatprep.subr.bf16.mxu0 %v1699_v59 }
  0x9e   : > { %1099 = vmatprep.subr.bf16.mxu1 %v1701_v60 }
  0xa0   : > { %1057 = vmatpush2.bf16.msra.mxu0 %v1703_v61 }
  0xa1   : > { %1100 = vmatpush2.bf16.msra.mxu1 %v1704_v62  ;;  %1058 = vmatprep.subr.bf16.mxu0 %v1705_v63 }
  0xa2   : > { %1101 = vmatprep.subr.bf16.mxu1 %v1707_v0 }
  0xa4   : > { %1059 = vmatpush2.bf16.msra.mxu0 %v1709_v1 }
  0xa5   : > { %1102 = vmatpush2.bf16.msra.mxu1 %v1710_v2  ;;  %1060 = vmatprep.subr.bf16.mxu0 %v1711_v3 }
  0xa6   : > { %1103 = vmatprep.subr.bf16.mxu1 %v1713_v4 }
  0xa8   : > { %1061 = vmatpush2.bf16.msra.mxu0 %v1715_v5 }
  0xa9   : > { %1104 = vmatpush2.bf16.msra.mxu1 %v1716_v6 }
  0xab   : > { %1063 = vmatmul.mubr.bf16.vlgmr.msra.gmra.mxu0 %v1717_v7 }
  0xac   : > { %1106 = vmatmul.mubr.bf16.vlgmr.msra.gmra.mxu1 %v1720_v8 }
 0x16b   : > { %v1064_v9 = vpop.f32.mrf.mxu0 }
 0x16c   : > { %v1107_v11 = vpop.f32.mrf.mxu1 }
 0x16d   : > { %v1108_v12 = vadd.f32 %v1107_v11, %v1064_v9  ;;  %v1066_v13 = vpop.f32.mrf.mxu0 }
 0x16e   : > { %v1109_v15 = vpop.f32.mrf.mxu1 }
 0x16f   : > { %v1116_v16 = vadd.f32 %v1108_v12, %v618_v10  ;;  %v1110_v17 = vadd.f32 %v1109_v15, %v1066_v13  ;;  %v1068_v18 = vpop.f32.mrf.mxu0 }
 0x170   : > { %v1111_v20 = vpop.f32.mrf.mxu1 }
 0x171   : > { %1120 = vst [vmem:[#allocation2 + $0x10] sm:$0xff] %v1116_v16  ;;  %v1117_v21 = vadd.f32 %v1110_v17, %v619_v14  ;;  %v1112_v22 = vadd.f32 %v1111_v20, %v1068_v18  ;;  %v1070_v23 = vpop.f32.mrf.mxu0 }
 0x172   : > { %v1113_v25 = vpop.f32.mrf.mxu1 }
 0x173   : > { %1121 = vst [vmem:[#allocation2] sm:$0xff] %v1117_v21  ;;  %v1118_v26 = vadd.f32 %v1112_v22, %v620_v19  ;;  %v1114_v27 = vadd.f32 %v1113_v25, %v1070_v23  ;;  %1127 = sbr.rel (%p1519_p5) target bundleno = 400 (0x190), region = 97 }
 0x175   : > { %1122 = vst [vmem:[#allocation2 + $0x18] sm:$0xff] %v1118_v26  ;;  %v1119_v28 = vadd.f32 %v1114_v27, %v621_v24 }
 0x177   : > { %1123 = vst [vmem:[#allocation2 + $0x8] sm:$0xff] %v1119_v28 }
 0x178   : > { %v1128_v29 = vld [vmem:[#allocation2 + $0x10] sm:$0xff] }
 0x179   : > { %v1160_v33 = vmul.f32 %v1128_v29, %v1128_v29 }
 0x17a   : > { %v1129_v31 = vld [vmem:[#allocation2] sm:$0xff] }
 0x17b   : > { %v1529_v35 = vpack.c.bf16 %v1129_v31, %v1128_v29  ;;  %v1161_v37 = vmul.f32 %v1129_v31, %v1129_v31 }
 0x17c   : > { %v1130_v30 = vld [vmem:[#allocation2 + $0x18] sm:$0xff] }
 0x17d   : > { %v1146_v32 = vadd.f32 %v1130_v30, %v1128_v29  ;;  %v1162_v34 = vmul.f32 %v1130_v30, %v1130_v30  ;;  %1144 = vst [vmem:[%s2103_s15] sm:$0xff] %v1529_v35 }
 0x17e   : > { %v1131_v36 = vld [vmem:[#allocation2 + $0x8] sm:$0xff] }
 0x17f   : > { %v1530_v38 = vpack.c.bf16 %v1131_v36, %v1130_v30  ;;  %v1153_v39 = vadd.f32 %v1131_v36, %v1129_v31  ;;  %v1163_v40 = vmul.f32 %v1131_v36, %v1131_v36  ;;  %v1147_v41 = vrot.slane %v1146_v32, 4 }
 0x180   : > { %v1164_v42 = vadd.f32 %v1162_v34, %v1160_v33 }
 0x181   : > { %1145 = vst [vmem:[%s2103_s15 + $0x8] sm:$0xff] %v1530_v38  ;;  %v1154_v43 = vrot.slane %v1153_v39, 4  ;;  %v1171_v44 = vadd.f32 %v1163_v40, %v1161_v37  ;;  %v1148_v45 = vadd.f32 %v1147_v41, %v1146_v32 }
 0x182   : > { %v1165_v46 = vrot.slane %v1164_v42, 4 }
 0x183   : > { %v1155_v47 = vadd.f32 %v1154_v43, %v1153_v39  ;;  %v1172_v48 = vrot.slane %v1171_v44, 4  ;;  %v1149_v49 = vrot.slane %v1148_v45, 2 }
 0x184   : > { %v1166_v50 = vadd.f32 %v1165_v46, %v1164_v42 }
 0x185   : > { %v1156_v51 = vrot.slane %v1155_v47, 2  ;;  %v1173_v52 = vadd.f32 %v1172_v48, %v1171_v44  ;;  %v1150_v53 = vadd.f32 %v1149_v49, %v1148_v45 }
 0x186   : > { %v1167_v54 = vrot.slane %v1166_v50, 2 }
 0x187   : > { %v1157_v55 = vadd.f32 %v1156_v51, %v1155_v47  ;;  %v1174_v56 = vrot.slane %v1173_v52, 2  ;;  %v1151_v57 = vrot.slane %v1150_v53, 1 }
 0x188   : > { %v1168_v58 = vadd.f32 %v1167_v54, %v1166_v50 }
 0x189   : > { %v1158_v59 = vrot.slane %v1157_v55, 1  ;;  %v1175_v60 = vadd.f32 %v1174_v56, %v1173_v52  ;;  %v1152_v61 = vadd.f32 %v1151_v57, %v1150_v53 }
 0x18a   : > { %v1169_v62 = vrot.slane %v1168_v58, 1 }
 0x18b   : > { %v1159_v63 = vadd.f32 %v1158_v59, %v1157_v55  ;;  %v1176_v0 = vrot.slane %v1175_v60, 1  ;;  %1178 = vst [vmem:[%s2092_s8] sm:$0xff] %v1152_v61 }
 0x18c   : > { %v1170_v1 = vadd.f32 %v1169_v62, %v1168_v58 }
 0x18d   : > { %1179 = vst [vmem:[%s2092_s8 + $0x8] sm:$0xff] %v1159_v63  ;;  %v1177_v2 = vadd.f32 %v1176_v0, %v1175_v60 }
 0x18e   : > { %1180 = vst [vmem:[%s2097_s24] sm:$0xff] %v1170_v1 }
 0x18f   : > { %1181 = vst [vmem:[%s2097_s24 + $0x8] sm:$0xff] %v1177_v2 }
 0x190 PF: > { %1206 = sbr.rel (!%p1931_p12) target bundleno = 405 (0x195), region = 101  ;;  %s1531_s1 = sshll.u32 (%p1931_p12), %s1797_s22, 3  ;;  %v1243_v3 = vld [vmem:[%s2103_s15] sm:$0xff] (%p1931_p12)  ;;  %v1245_v4 = vld [vmem:[%s2103_s15 + $0x8] sm:$0xff] (%p1931_p12) }
 0x191   : > { %s1212_s28 = scalar_lea.vmem (%p1931_p12), %s2224_s2, %s1531_s1 }
 0x192   : > { %1244 = vst [vmem:[%s1212_s28] sm:$0xff] (%p1931_p12), %v1243_v3  ;;  %1246 = vst [vmem:[%s1212_s28 + $0x10] sm:$0xff] (%p1931_p12), %v1245_v4 }
 0x195 PF: > { %s15_s25 = sadd.s32 1, %s1809_s25   ;;  %s2240_s22 = sld [smem:[#allocation6_spill]] }
 0x196   : > { %p12_p6 = scmp.ge.s32.totalorder %s15_s25, 20   ;;  %s2241_s24 = sld [smem:[#allocation7_spill]] }
 0x197   : > { %s2242_s14 = sld [smem:[#allocation8_spill]]  ;;  %s2243_s15 = smov %s1773_s16 }
 0x198   : > { %s2244_s16 = smov %s1929_s13  ;;  %s2245_s17 = smov %s1781_s18 }
 0x199   : > { %s2246_s18 = smov %s1926_s12  ;;  %s2247_s19 = smov %s1789_s20 }
 0x19a   : > { %s2248_s20 = smov %s1912_s7  ;;  %s2249_s21 = smov %s1801_s23 }
 0x19b   :  { %14 = sbr.rel (!%p12_p6) target bundleno = 9 (0x9), region = 202 }
 0x19c   : > { %s2250_s23 = smov %s2241_s24 }
 0x19d   : > { %s2251_s24 = smov %s2242_s14 }

// kernel: forward.157
= control target key start
LH: loop header
LB: loop body
LE: loop exit
PB: predicated region body
PF: predicated region fallthrough
CT: control target
= control target key end

     0   :  { %s1715_s15 = smov 0   ;;  %s1717_s16 = smov 0   ;;  %s2014_s0 = inlined_call_operand.vmem [shape: bf16[16,512], index: 0, kind: input, shape index: {}]   ;;  %s2015_s1 = inlined_call_operand.vmem [shape: bf16[512,512], index: 1, kind: input, shape index: {}]   ;;  %s2016_s2 = inlined_call_operand.vmem [shape: bf16[16,512], index: 2, kind: output, shape index: {0}]   ;;  %s2017_s3 = inlined_call_operand.vmem [shape: f32[8,512], index: 3, kind: output, shape index: {1}]   ;;  %s2018_s4 = inlined_call_operand.vmem [shape: f32[8,512], index: 4, kind: output, shape index: {2}]  }
   0x1   :  { %s1719_s17 = smov 0   ;;  %s1721_s18 = smov 0  }
   0x2   :  { %s1723_s19 = smov 0  }
   0x3 LB: > { %s30_s20 = sadd.s32 1, %s1684_s18  ;;  %s1414_s21 = sadd.s32 4294967295, %s1688_s19   ;;  %s1688_s19 = sphi %s1723_s19, %s15_s19   ;;  %s1684_s18 = sphi %s1721_s18, %s2023_s18   ;;  %s1680_s17 = sphi %s1719_s17, %s2022_s17   ;;  %s1676_s16 = sphi %s1717_s16, %s2021_s16   ;;  %s1672_s15 = sphi %s1715_s15, %s2020_s15  }
   0x4   : > { %p32_p0 = scmp.ge.s32.totalorder %s30_s20, 2  ;;  %p78_p1 = scmp.ne.s32.totalorder %s1676_s16, %s1672_s15 }
   0x5   : > { %p79_p2 = scmp.eq.s32.totalorder %s1688_s19, 0  ;;  %p110_p4 = scmp.eq.s32.totalorder %s1414_s21, 1 }
   0x6   : > { %s2025_s20 = smov (%p32_p0, %s30_s20), 0  ;;  %s71_s23 = sadd.s32 1, %s1676_s16 }
   0x7   : > { %p80_p3 = por %p79_p2, %p78_p1  ;;  %s67_s22 = ssub.s32 %s1684_s18, %s2025_s20 }
   0x8   : > { %p69_p5 = scmp.eq.s32.totalorder %s67_s22, 0  ;;  %p1750_p6 = por %p110_p4, %p78_p1 }
   0x9   : > { %p1418_p7 = scmp.ge.s32.totalorder %s1688_s19, 2 }
   0xa   : > { %s1755_s25 = scalar_select %p69_p5, %s1676_s16, %s71_s23  }
   0xb   : > { %203 = sbr.rel (%p1418_p7) target bundleno = 52 (0x34), region = 20 }
  0x10   : > { %206 = sbr.rel (!%p80_p3) target bundleno = 52 (0x34), region = 24  ;;  %s208_s26 = sand.u32 (%p80_p3), 1, %s1676_s16  }
  0x11   : > { %s1504_s27 = sshll.u32 (%p80_p3), %s1684_s18, 3  ;;  %s1419_s28 = sshll.u32 (%p80_p3), %s208_s26, 9 }
  0x12   : > { %s1763_s5 = scalar_lea.vmem (%p80_p3), %s2015_s1, %s1504_s27  ;;  %s1768_s6 = scalar_lea.vmem (%p80_p3), [#allocation3], %s1419_s28 }
  0x13   : > { %v371_v0 = vld [vmem:[%s1763_s5] sm:$0xff] (%p80_p3)  ;;  %v373_v1 = vld [vmem:[%s1763_s5 + $0x10] sm:$0xff] (%p80_p3) }
  0x14   : > { %v375_v2 = vld [vmem:[%s1763_s5 + $0x20] sm:$0xff] (%p80_p3)  ;;  %372 = vst [vmem:[%s1768_s6] sm:$0xff] (%p80_p3), %v371_v0  ;;  %374 = vst [vmem:[%s1768_s6 + $0x8] sm:$0xff] (%p80_p3), %v373_v1  ;;  %v377_v3 = vld [vmem:[%s1763_s5 + $0x30] sm:$0xff] (%p80_p3) }
  0x15   : > { %376 = vst [vmem:[%s1768_s6 + $0x10] sm:$0xff] %v375_v2  ;;  %v379_v4 = vld [vmem:[%s1763_s5 + $0x40] sm:$0xff]  ;;  %v381_v5 = vld [vmem:[%s1763_s5 + $0x50] sm:$0xff]  ;;  %378 = vst [vmem:[%s1768_s6 + $0x18] sm:$0xff] %v377_v3 }
  0x16   : > { %380 = vst [vmem:[%s1768_s6 + $0x20] sm:$0xff] %v379_v4  ;;  %382 = vst [vmem:[%s1768_s6 + $0x28] sm:$0xff] %v381_v5  ;;  %v383_v6 = vld [vmem:[%s1763_s5 + $0x60] sm:$0xff]  ;;  %v385_v7 = vld [vmem:[%s1763_s5 + $0x70] sm:$0xff] }
  0x17   : > { %v387_v8 = vld [vmem:[%s1763_s5 + $0x80] sm:$0xff]  ;;  %384 = vst [vmem:[%s1768_s6 + $0x30] sm:$0xff] %v383_v6  ;;  %386 = vst [vmem:[%s1768_s6 + $0x38] sm:$0xff] %v385_v7  ;;  %v389_v9 = vld [vmem:[%s1763_s5 + $0x90] sm:$0xff] }
  0x18   : > { %388 = vst [vmem:[%s1768_s6 + $0x40] sm:$0xff] %v387_v8  ;;  %v391_v10 = vld [vmem:[%s1763_s5 + $0xa0] sm:$0xff]  ;;  %v393_v11 = vld [vmem:[%s1763_s5 + $0xb0] sm:$0xff]  ;;  %390 = vst [vmem:[%s1768_s6 + $0x48] sm:$0xff] %v389_v9 }
  0x19   : > { %392 = vst [vmem:[%s1768_s6 + $0x50] sm:$0xff] %v391_v10  ;;  %394 = vst [vmem:[%s1768_s6 + $0x58] sm:$0xff] %v393_v11  ;;  %v395_v12 = vld [vmem:[%s1763_s5 + $0xc0] sm:$0xff]  ;;  %v397_v13 = vld [vmem:[%s1763_s5 + $0xd0] sm:$0xff] }
  0x1a   : > { %v399_v14 = vld [vmem:[%s1763_s5 + $0xe0] sm:$0xff]  ;;  %396 = vst [vmem:[%s1768_s6 + $0x60] sm:$0xff] %v395_v12  ;;  %398 = vst [vmem:[%s1768_s6 + $0x68] sm:$0xff] %v397_v13  ;;  %v401_v15 = vld [vmem:[%s1763_s5 + $0xf0] sm:$0xff] }
  0x1b   : > { %400 = vst [vmem:[%s1768_s6 + $0x70] sm:$0xff] %v399_v14  ;;  %v403_v16 = vld [vmem:[%s1763_s5 + $0x100] sm:$0xff]  ;;  %v405_v17 = vld [vmem:[%s1763_s5 + $0x110] sm:$0xff]  ;;  %402 = vst [vmem:[%s1768_s6 + $0x78] sm:$0xff] %v401_v15 }
  0x1c   : > { %404 = vst [vmem:[%s1768_s6 + $0x80] sm:$0xff] %v403_v16  ;;  %406 = vst [vmem:[%s1768_s6 + $0x88] sm:$0xff] %v405_v17  ;;  %v407_v18 = vld [vmem:[%s1763_s5 + $0x120] sm:$0xff]  ;;  %v409_v19 = vld [vmem:[%s1763_s5 + $0x130] sm:$0xff] }
  0x1d   : > { %v411_v20 = vld [vmem:[%s1763_s5 + $0x140] sm:$0xff]  ;;  %408 = vst [vmem:[%s1768_s6 + $0x90] sm:$0xff] %v407_v18  ;;  %410 = vst [vmem:[%s1768_s6 + $0x98] sm:$0xff] %v409_v19  ;;  %v413_v21 = vld [vmem:[%s1763_s5 + $0x150] sm:$0xff] }
  0x1e   : > { %412 = vst [vmem:[%s1768_s6 + $0xa0] sm:$0xff] %v411_v20  ;;  %v415_v22 = vld [vmem:[%s1763_s5 + $0x160] sm:$0xff]  ;;  %v417_v23 = vld [vmem:[%s1763_s5 + $0x170] sm:$0xff]  ;;  %414 = vst [vmem:[%s1768_s6 + $0xa8] sm:$0xff] %v413_v21 }
  0x1f   : > { %416 = vst [vmem:[%s1768_s6 + $0xb0] sm:$0xff] %v415_v22  ;;  %418 = vst [vmem:[%s1768_s6 + $0xb8] sm:$0xff] %v417_v23  ;;  %v419_v24 = vld [vmem:[%s1763_s5 + $0x180] sm:$0xff]  ;;  %v421_v25 = vld [vmem:[%s1763_s5 + $0x190] sm:$0xff] }
  0x20   : > { %v423_v26 = vld [vmem:[%s1763_s5 + $0x1a0] sm:$0xff]  ;;  %420 = vst [vmem:[%s1768_s6 + $0xc0] sm:$0xff] %v419_v24  ;;  %422 = vst [vmem:[%s1768_s6 + $0xc8] sm:$0xff] %v421_v25  ;;  %v425_v27 = vld [vmem:[%s1763_s5 + $0x1b0] sm:$0xff] }
  0x21   : > { %424 = vst [vmem:[%s1768_s6 + $0xd0] sm:$0xff] %v423_v26  ;;  %v427_v28 = vld [vmem:[%s1763_s5 + $0x1c0] sm:$0xff]  ;;  %v429_v29 = vld [vmem:[%s1763_s5 + $0x1d0] sm:$0xff]  ;;  %426 = vst [vmem:[%s1768_s6 + $0xd8] sm:$0xff] %v425_v27 }
  0x22   : > { %428 = vst [vmem:[%s1768_s6 + $0xe0] sm:$0xff] %v427_v28  ;;  %430 = vst [vmem:[%s1768_s6 + $0xe8] sm:$0xff] %v429_v29  ;;  %v431_v30 = vld [vmem:[%s1763_s5 + $0x1e0] sm:$0xff]  ;;  %v433_v31 = vld [vmem:[%s1763_s5 + $0x1f0] sm:$0xff] }
  0x23   : > { %v435_v32 = vld [vmem:[%s1763_s5 + $0x200] sm:$0xff]  ;;  %432 = vst [vmem:[%s1768_s6 + $0xf0] sm:$0xff] %v431_v30  ;;  %434 = vst [vmem:[%s1768_s6 + $0xf8] sm:$0xff] %v433_v31  ;;  %v437_v33 = vld [vmem:[%s1763_s5 + $0x210] sm:$0xff] }
  0x24   : > { %436 = vst [vmem:[%s1768_s6 + $0x100] sm:$0xff] %v435_v32  ;;  %v439_v34 = vld [vmem:[%s1763_s5 + $0x220] sm:$0xff]  ;;  %v441_v35 = vld [vmem:[%s1763_s5 + $0x230] sm:$0xff]  ;;  %438 = vst [vmem:[%s1768_s6 + $0x108] sm:$0xff] %v437_v33 }
  0x25   : > { %440 = vst [vmem:[%s1768_s6 + $0x110] sm:$0xff] %v439_v34  ;;  %442 = vst [vmem:[%s1768_s6 + $0x118] sm:$0xff] %v441_v35  ;;  %v443_v36 = vld [vmem:[%s1763_s5 + $0x240] sm:$0xff]  ;;  %v445_v37 = vld [vmem:[%s1763_s5 + $0x250] sm:$0xff] }
  0x26   : > { %v447_v38 = vld [vmem:[%s1763_s5 + $0x260] sm:$0xff]  ;;  %444 = vst [vmem:[%s1768_s6 + $0x120] sm:$0xff] %v443_v36  ;;  %446 = vst [vmem:[%s1768_s6 + $0x128] sm:$0xff] %v445_v37  ;;  %v449_v39 = vld [vmem:[%s1763_s5 + $0x270] sm:$0xff] }
  0x27   : > { %448 = vst [vmem:[%s1768_s6 + $0x130] sm:$0xff] %v447_v38  ;;  %v451_v40 = vld [vmem:[%s1763_s5 + $0x280] sm:$0xff]  ;;  %v453_v41 = vld [vmem:[%s1763_s5 + $0x290] sm:$0xff]  ;;  %450 = vst [vmem:[%s1768_s6 + $0x138] sm:$0xff] %v449_v39 }
  0x28   : > { %452 = vst [vmem:[%s1768_s6 + $0x140] sm:$0xff] %v451_v40  ;;  %454 = vst [vmem:[%s1768_s6 + $0x148] sm:$0xff] %v453_v41  ;;  %v455_v42 = vld [vmem:[%s1763_s5 + $0x2a0] sm:$0xff]  ;;  %v457_v43 = vld [vmem:[%s1763_s5 + $0x2b0] sm:$0xff] }
  0x29   : > { %v459_v44 = vld [vmem:[%s1763_s5 + $0x2c0] sm:$0xff]  ;;  %456 = vst [vmem:[%s1768_s6 + $0x150] sm:$0xff] %v455_v42  ;;  %458 = vst [vmem:[%s1768_s6 + $0x158] sm:$0xff] %v457_v43  ;;  %v461_v45 = vld [vmem:[%s1763_s5 + $0x2d0] sm:$0xff] }
  0x2a   : > { %460 = vst [vmem:[%s1768_s6 + $0x160] sm:$0xff] %v459_v44  ;;  %v463_v46 = vld [vmem:[%s1763_s5 + $0x2e0] sm:$0xff]  ;;  %v465_v47 = vld [vmem:[%s1763_s5 + $0x2f0] sm:$0xff]  ;;  %462 = vst [vmem:[%s1768_s6 + $0x168] sm:$0xff] %v461_v45 }
  0x2b   : > { %464 = vst [vmem:[%s1768_s6 + $0x170] sm:$0xff] %v463_v46  ;;  %466 = vst [vmem:[%s1768_s6 + $0x178] sm:$0xff] %v465_v47  ;;  %v467_v48 = vld [vmem:[%s1763_s5 + $0x300] sm:$0xff]  ;;  %v469_v49 = vld [vmem:[%s1763_s5 + $0x310] sm:$0xff] }
  0x2c   : > { %v471_v50 = vld [vmem:[%s1763_s5 + $0x320] sm:$0xff]  ;;  %468 = vst [vmem:[%s1768_s6 + $0x180] sm:$0xff] %v467_v48  ;;  %470 = vst [vmem:[%s1768_s6 + $0x188] sm:$0xff] %v469_v49  ;;  %v473_v51 = vld [vmem:[%s1763_s5 + $0x330] sm:$0xff] }
  0x2d   : > { %472 = vst [vmem:[%s1768_s6 + $0x190] sm:$0xff] %v471_v50  ;;  %v475_v52 = vld [vmem:[%s1763_s5 + $0x340] sm:$0xff]  ;;  %v477_v53 = vld [vmem:[%s1763_s5 + $0x350] sm:$0xff]  ;;  %474 = vst [vmem:[%s1768_s6 + $0x198] sm:$0xff] %v473_v51 }
  0x2e   : > { %476 = vst [vmem:[%s1768_s6 + $0x1a0] sm:$0xff] %v475_v52  ;;  %478 = vst [vmem:[%s1768_s6 + $0x1a8] sm:$0xff] %v477_v53  ;;  %v479_v54 = vld [vmem:[%s1763_s5 + $0x360] sm:$0xff]  ;;  %v481_v55 = vld [vmem:[%s1763_s5 + $0x370] sm:$0xff] }
  0x2f   : > { %v483_v56 = vld [vmem:[%s1763_s5 + $0x380] sm:$0xff]  ;;  %480 = vst [vmem:[%s1768_s6 + $0x1b0] sm:$0xff] %v479_v54  ;;  %482 = vst [vmem:[%s1768_s6 + $0x1b8] sm:$0xff] %v481_v55  ;;  %v485_v57 = vld [vmem:[%s1763_s5 + $0x390] sm:$0xff] }
  0x30   : > { %484 = vst [vmem:[%s1768_s6 + $0x1c0] sm:$0xff] %v483_v56  ;;  %v487_v58 = vld [vmem:[%s1763_s5 + $0x3a0] sm:$0xff]  ;;  %v489_v59 = vld [vmem:[%s1763_s5 + $0x3b0] sm:$0xff]  ;;  %486 = vst [vmem:[%s1768_s6 + $0x1c8] sm:$0xff] %v485_v57 }
  0x31   : > { %488 = vst [vmem:[%s1768_s6 + $0x1d0] sm:$0xff] %v487_v58  ;;  %490 = vst [vmem:[%s1768_s6 + $0x1d8] sm:$0xff] %v489_v59  ;;  %v491_v60 = vld [vmem:[%s1763_s5 + $0x3c0] sm:$0xff]  ;;  %v493_v61 = vld [vmem:[%s1763_s5 + $0x3d0] sm:$0xff] }
  0x32   : > { %v495_v62 = vld [vmem:[%s1763_s5 + $0x3e0] sm:$0xff]  ;;  %492 = vst [vmem:[%s1768_s6 + $0x1e0] sm:$0xff] %v491_v60  ;;  %494 = vst [vmem:[%s1768_s6 + $0x1e8] sm:$0xff] %v493_v61  ;;  %v497_v63 = vld [vmem:[%s1763_s5 + $0x3f0] sm:$0xff] }
  0x33   : > { %496 = vst [vmem:[%s1768_s6 + $0x1f0] sm:$0xff] %v495_v62  ;;  %498 = vst [vmem:[%s1768_s6 + $0x1f8] sm:$0xff] %v497_v63 }
  0x34 PF: > { %p1422_p8 = scmp.ge.s32.totalorder %s1688_s19, 1  ;;  %p503_p9 = scmp.lt.s32.totalorder %s1688_s19, 3 }
  0x36   : > { %p504_p10 = pnand %p1422_p8, %p503_p9 }
  0x37   : > { %s510_s7 = sand.u32 (!%p504_p10), 1, %s1672_s15   ;;  %s1425_s27 = sshll.u32 (!%p504_p10), %s1680_s17, 1 }
  0x38   : > { %507 = sbr.rel (%p504_p10) target bundleno = 347 (0x15b), region = 62  ;;  %s1423_s8 = sshll.u32 (!%p504_p10), %s510_s7, 9 }
  0x39   : > { %s1906_s13 = scalar_lea.vmem (!%p504_p10), [#allocation3], %s1423_s8  ;;  %s1424_s26 = sshll.u32 (!%p504_p10), %s510_s7, 4 }
  0x3a   : > { %s1981_s28 = scalar_lea.vmem (!%p504_p10), [#allocation4], %s1424_s26  ;;  %p581_p11 = scmp.lt.s32.totalorder (!%p504_p10), %s1425_s27, 3 }
  0x3d   : > { %v1646_v0 = vld [vmem:[%s2014_s0 + $0x4] ss:$16 sps:$4 sm:$0xff]   ;;  %v1649_v1 = vld [vmem:[%s2014_s0 + $0xc] ss:$16 sps:$4 sm:$0xff]   ;;  %v1552_v4 = vld [vmem:[%s1906_s13 + $0x70] ss:$8 sps:$4 sm:$0xff]  }
  0x3e   : > { %v1548_v2 = vld [vmem:[%s1906_s13 + $0x74] ss:$8 sps:$4 sm:$0xff]   ;;  %1050 = vmatprep.mubr.bf16.mxu0 %v1646_v0  ;;  %1093 = vmatprep.mubr.bf16.mxu1 %v1649_v1  ;;  %v1553_v5 = vld [vmem:[%s1906_s13 + $0x170] ss:$8 sps:$4 sm:$0xff]   ;;  %v1554_v6 = vld [vmem:[%s1906_s13 + $0x64] ss:$8 sps:$4 sm:$0xff]  }
  0x3f   : > { %v1550_v3 = vld [vmem:[%s1906_s13 + $0x174] ss:$8 sps:$4 sm:$0xff]   ;;  %1018 = vmatprep.subr.bf16.mxu0 %v1548_v2  ;;  %v1556_v7 = vld [vmem:[%s1906_s13 + $0x164] ss:$8 sps:$4 sm:$0xff]   ;;  %v1558_v8 = vld [vmem:[%s1906_s13 + $0x60] ss:$8 sps:$4 sm:$0xff]  }
  0x40   : > { %1061 = vmatprep.subr.bf16.mxu1 %v1550_v3  ;;  %1019 = vmatpush1.bf16.msra.mxu0 %v1552_v4  ;;  %v1559_v9 = vld [vmem:[%s1906_s13 + $0x160] ss:$8 sps:$4 sm:$0xff]   ;;  %v1560_v10 = vld [vmem:[%s1906_s13 + $0x54] ss:$8 sps:$4 sm:$0xff]   ;;  %v1564_v12 = vld [vmem:[%s1906_s13 + $0x50] ss:$8 sps:$4 sm:$0xff]  }
  0x41   : > { %1062 = vmatpush1.bf16.msra.mxu1 %v1553_v5  ;;  %1020 = vmatprep.subr.bf16.mxu0 %v1554_v6  ;;  %v1562_v11 = vld [vmem:[%s1906_s13 + $0x154] ss:$8 sps:$4 sm:$0xff]   ;;  %v1565_v13 = vld [vmem:[%s1906_s13 + $0x150] ss:$8 sps:$4 sm:$0xff]   ;;  %v1566_v14 = vld [vmem:[%s1906_s13 + $0x44] ss:$8 sps:$4 sm:$0xff]  }
  0x42   : > { %1063 = vmatprep.subr.bf16.mxu1 %v1556_v7  ;;  %v1568_v15 = vld [vmem:[%s1906_s13 + $0x144] ss:$8 sps:$4 sm:$0xff]   ;;  %v1570_v16 = vld [vmem:[%s1906_s13 + $0x40] ss:$8 sps:$4 sm:$0xff]   ;;  %v1572_v18 = vld [vmem:[%s1906_s13 + $0x34] ss:$8 sps:$4 sm:$0xff]  }
  0x43   : > { %v1571_v17 = vld [vmem:[%s1906_s13 + $0x140] ss:$8 sps:$4 sm:$0xff]   ;;  %v1574_v19 = vld [vmem:[%s1906_s13 + $0x134] ss:$8 sps:$4 sm:$0xff]   ;;  %v1576_v20 = vld [vmem:[%s1906_s13 + $0x30] ss:$8 sps:$4 sm:$0xff]  }
  0x44   : > { %1021 = vmatpush1.bf16.msra.mxu0 %v1558_v8  ;;  %v1577_v21 = vld [vmem:[%s1906_s13 + $0x130] ss:$8 sps:$4 sm:$0xff]   ;;  %v1578_v22 = vld [vmem:[%s1906_s13 + $0x24] ss:$8 sps:$4 sm:$0xff]   ;;  %v1582_v24 = vld [vmem:[%s1906_s13 + $0x20] ss:$8 sps:$4 sm:$0xff]  }
  0x45   : > { %1064 = vmatpush1.bf16.msra.mxu1 %v1559_v9  ;;  %1022 = vmatprep.subr.bf16.mxu0 %v1560_v10  ;;  %v1580_v23 = vld [vmem:[%s1906_s13 + $0x124] ss:$8 sps:$4 sm:$0xff]   ;;  %v1583_v25 = vld [vmem:[%s1906_s13 + $0x120] ss:$8 sps:$4 sm:$0xff]   ;;  %v1584_v26 = vld [vmem:[%s1906_s13 + $0x14] ss:$8 sps:$4 sm:$0xff]  }
  0x46   : > { %1065 = vmatprep.subr.bf16.mxu1 %v1562_v11  ;;  %v1586_v27 = vld [vmem:[%s1906_s13 + $0x114] ss:$8 sps:$4 sm:$0xff]   ;;  %v1588_v28 = vld [vmem:[%s1906_s13 + $0x10] ss:$8 sps:$4 sm:$0xff]   ;;  %v1590_v30 = vld [vmem:[%s1906_s13 + $0x4] ss:$8 sps:$4 sm:$0xff]  }
  0x47   : > { %v1589_v29 = vld [vmem:[%s1906_s13 + $0x110] ss:$8 sps:$4 sm:$0xff]   ;;  %v1592_v31 = vld [vmem:[%s1906_s13 + $0x104] ss:$8 sps:$4 sm:$0xff]   ;;  %v1594_v32 = vld [vmem:[%s1906_s13] ss:$8 sps:$4 sm:$0xff]  }
  0x48   : > { %1023 = vmatpush1.bf16.msra.mxu0 %v1564_v12  ;;  %v1595_v33 = vld [vmem:[%s1906_s13 + $0x100] ss:$8 sps:$4 sm:$0xff]   ;;  %v1596_v34 = vld [vmem:[%s1906_s13 + $0xf4] ss:$8 sps:$4 sm:$0xff]   ;;  %v1600_v36 = vld [vmem:[%s1906_s13 + $0xf0] ss:$8 sps:$4 sm:$0xff]  }
  0x49   : > { %1066 = vmatpush1.bf16.msra.mxu1 %v1565_v13  ;;  %1024 = vmatprep.subr.bf16.mxu0 %v1566_v14  ;;  %v1598_v35 = vld [vmem:[%s1906_s13 + $0x1f4] ss:$8 sps:$4 sm:$0xff]   ;;  %v1601_v37 = vld [vmem:[%s1906_s13 + $0x1f0] ss:$8 sps:$4 sm:$0xff]   ;;  %v1602_v38 = vld [vmem:[%s1906_s13 + $0xe4] ss:$8 sps:$4 sm:$0xff]  }
  0x4a   : > { %1067 = vmatprep.subr.bf16.mxu1 %v1568_v15  ;;  %v1604_v39 = vld [vmem:[%s1906_s13 + $0x1e4] ss:$8 sps:$4 sm:$0xff]   ;;  %v1606_v40 = vld [vmem:[%s1906_s13 + $0xe0] ss:$8 sps:$4 sm:$0xff]   ;;  %v1608_v42 = vld [vmem:[%s1906_s13 + $0xd4] ss:$8 sps:$4 sm:$0xff]  }
  0x4b   : > { %v1607_v41 = vld [vmem:[%s1906_s13 + $0x1e0] ss:$8 sps:$4 sm:$0xff]   ;;  %v1610_v43 = vld [vmem:[%s1906_s13 + $0x1d4] ss:$8 sps:$4 sm:$0xff]   ;;  %v1612_v44 = vld [vmem:[%s1906_s13 + $0xd0] ss:$8 sps:$4 sm:$0xff]  }
  0x4c   : > { %1025 = vmatpush1.bf16.msra.mxu0 %v1570_v16  ;;  %v1613_v45 = vld [vmem:[%s1906_s13 + $0x1d0] ss:$8 sps:$4 sm:$0xff]   ;;  %v1614_v46 = vld [vmem:[%s1906_s13 + $0xc4] ss:$8 sps:$4 sm:$0xff]   ;;  %v1618_v48 = vld [vmem:[%s1906_s13 + $0xc0] ss:$8 sps:$4 sm:$0xff]  }
  0x4d   : > { %1068 = vmatpush1.bf16.msra.mxu1 %v1571_v17  ;;  %1026 = vmatprep.subr.bf16.mxu0 %v1572_v18  ;;  %v1616_v47 = vld [vmem:[%s1906_s13 + $0x1c4] ss:$8 sps:$4 sm:$0xff]   ;;  %v1619_v49 = vld [vmem:[%s1906_s13 + $0x1c0] ss:$8 sps:$4 sm:$0xff]   ;;  %v1620_v50 = vld [vmem:[%s1906_s13 + $0xb4] ss:$8 sps:$4 sm:$0xff]  }
  0x4e   : > { %1069 = vmatprep.subr.bf16.mxu1 %v1574_v19  ;;  %v1622_v51 = vld [vmem:[%s1906_s13 + $0x1b4] ss:$8 sps:$4 sm:$0xff]   ;;  %v1624_v52 = vld [vmem:[%s1906_s13 + $0xb0] ss:$8 sps:$4 sm:$0xff]   ;;  %v1626_v54 = vld [vmem:[%s1906_s13 + $0xa4] ss:$8 sps:$4 sm:$0xff]  }
  0x4f   : > { %v1625_v53 = vld [vmem:[%s1906_s13 + $0x1b0] ss:$8 sps:$4 sm:$0xff]   ;;  %v1628_v55 = vld [vmem:[%s1906_s13 + $0x1a4] ss:$8 sps:$4 sm:$0xff]   ;;  %v1630_v56 = vld [vmem:[%s1906_s13 + $0xa0] ss:$8 sps:$4 sm:$0xff]  }
  0x50   : > { %1027 = vmatpush1.bf16.msra.mxu0 %v1576_v20  ;;  %v1631_v57 = vld [vmem:[%s1906_s13 + $0x1a0] ss:$8 sps:$4 sm:$0xff]   ;;  %v1632_v58 = vld [vmem:[%s1906_s13 + $0x94] ss:$8 sps:$4 sm:$0xff]   ;;  %v1636_v60 = vld [vmem:[%s1906_s13 + $0x90] ss:$8 sps:$4 sm:$0xff]  }
  0x51   : > { %1070 = vmatpush1.bf16.msra.mxu1 %v1577_v21  ;;  %1028 = vmatprep.subr.bf16.mxu0 %v1578_v22  ;;  %v1634_v59 = vld [vmem:[%s1906_s13 + $0x194] ss:$8 sps:$4 sm:$0xff]   ;;  %v1637_v61 = vld [vmem:[%s1906_s13 + $0x190] ss:$8 sps:$4 sm:$0xff]   ;;  %v1638_v62 = vld [vmem:[%s1906_s13 + $0x84] ss:$8 sps:$4 sm:$0xff]  }
  0x52   : > { %1071 = vmatprep.subr.bf16.mxu1 %v1580_v23  ;;  %v1640_v63 = vld [vmem:[%s1906_s13 + $0x184] ss:$8 sps:$4 sm:$0xff]   ;;  %v1642_v0 = vld [vmem:[%s1906_s13 + $0x80] ss:$8 sps:$4 sm:$0xff]   ;;  %s2027_s27 = smov (!%p581_p11, %s1425_s27), 3  ;;  %s1507_s9 = sshll.u32 (%p1750_p6), %s1680_s17, 3 }
  0x53   : > { %v1643_v1 = vld [vmem:[%s1906_s13 + $0x180] ss:$8 sps:$4 sm:$0xff]   ;;  %s1426_s15 = sshll.u32 %s2027_s27, 3  ;;  %s1199_s12 = scalar_lea.vmem (%p1750_p6), %s2016_s2, %s1507_s9 }
  0x54   : > { %1029 = vmatpush1.bf16.msra.mxu0 %v1582_v24  ;;  %v1644_v2 = vld [vmem:[%s2014_s0] ss:$16 sps:$4 sm:$0xff]   ;;  %v1647_v3 = vld [vmem:[%s2014_s0 + $0x8] ss:$16 sps:$4 sm:$0xff]   ;;  %s586_s5 = scalar_lea.vmem %s2017_s3, %s1426_s15  ;;  %s596_s8 = scalar_lea.vmem %s2018_s4, %s1426_s15 }
  0x55   : > { %1072 = vmatpush1.bf16.msra.mxu1 %v1583_v25  ;;  %1030 = vmatprep.subr.bf16.mxu0 %v1584_v26 }
  0x56   : > { %1073 = vmatprep.subr.bf16.mxu1 %v1586_v27 }
  0x58   : > { %1031 = vmatpush1.bf16.msra.mxu0 %v1588_v28 }
  0x59   : > { %1074 = vmatpush1.bf16.msra.mxu1 %v1589_v29  ;;  %1032 = vmatprep.subr.bf16.mxu0 %v1590_v30 }
  0x5a   : > { %1075 = vmatprep.subr.bf16.mxu1 %v1592_v31 }
  0x5c   : > { %1033 = vmatpush1.bf16.msra.mxu0 %v1594_v32 }
  0x5d   : > { %1076 = vmatpush1.bf16.msra.mxu1 %v1595_v33  ;;  %1034 = vmatprep.subr.bf16.mxu0 %v1596_v34 }
  0x5e   : > { %1077 = vmatprep.subr.bf16.mxu1 %v1598_v35 }
  0x60   : > { %1035 = vmatpush2.bf16.msra.mxu0 %v1600_v36 }
  0x61   : > { %1078 = vmatpush2.bf16.msra.mxu1 %v1601_v37  ;;  %1036 = vmatprep.subr.bf16.mxu0 %v1602_v38 }
  0x62   : > { %1079 = vmatprep.subr.bf16.mxu1 %v1604_v39 }
  0x64   : > { %1037 = vmatpush2.bf16.msra.mxu0 %v1606_v40 }
  0x65   : > { %1080 = vmatpush2.bf16.msra.mxu1 %v1607_v41  ;;  %1038 = vmatprep.subr.bf16.mxu0 %v1608_v42 }
  0x66   : > { %1081 = vmatprep.subr.bf16.mxu1 %v1610_v43 }
  0x68   : > { %1039 = vmatpush2.bf16.msra.mxu0 %v1612_v44 }
  0x69   : > { %1082 = vmatpush2.bf16.msra.mxu1 %v1613_v45  ;;  %1040 = vmatprep.subr.bf16.mxu0 %v1614_v46 }
  0x6a   : > { %1083 = vmatprep.subr.bf16.mxu1 %v1616_v47 }
  0x6c   : > { %1041 = vmatpush2.bf16.msra.mxu0 %v1618_v48 }
  0x6d   : > { %1084 = vmatpush2.bf16.msra.mxu1 %v1619_v49  ;;  %1042 = vmatprep.subr.bf16.mxu0 %v1620_v50 }
  0x6e   : > { %1085 = vmatprep.subr.bf16.mxu1 %v1622_v51 }
  0x70   : > { %1043 = vmatpush2.bf16.msra.mxu0 %v1624_v52 }
  0x71   : > { %1086 = vmatpush2.bf16.msra.mxu1 %v1625_v53  ;;  %1044 = vmatprep.subr.bf16.mxu0 %v1626_v54 }
  0x72   : > { %1087 = vmatprep.subr.bf16.mxu1 %v1628_v55 }
  0x74   : > { %1045 = vmatpush2.bf16.msra.mxu0 %v1630_v56 }
  0x75   : > { %1088 = vmatpush2.bf16.msra.mxu1 %v1631_v57  ;;  %1046 = vmatprep.subr.bf16.mxu0 %v1632_v58 }
  0x76   : > { %1089 = vmatprep.subr.bf16.mxu1 %v1634_v59 }
  0x78   : > { %1047 = vmatpush2.bf16.msra.mxu0 %v1636_v60 }
  0x79   : > { %1090 = vmatpush2.bf16.msra.mxu1 %v1637_v61  ;;  %1048 = vmatprep.subr.bf16.mxu0 %v1638_v62 }
  0x7a   : > { %1091 = vmatprep.subr.bf16.mxu1 %v1640_v63 }
  0x7c   : > { %1049 = vmatpush2.bf16.msra.mxu0 %v1642_v0 }
  0x7d   : > { %1092 = vmatpush2.bf16.msra.mxu1 %v1643_v1 }
  0x7f   : > { %1051 = vmatmul.mubr.bf16.vlgmr.msra.gmra.mxu0 %v1644_v2 }
  0x80   : > { %1094 = vmatmul.mubr.bf16.vlgmr.msra.gmra.mxu1 %v1647_v3 }
 0x13f   : > { %v1052_v4 = vpop.f32.mrf.mxu0 }
 0x140   : > { %v1095_v5 = vpop.f32.mrf.mxu1 }
 0x141   : > { %v1054_v6 = vpop.f32.mrf.mxu0  ;;  %v1096_v8 = vadd.f32 %v1095_v5, %v1052_v4 }
 0x142   : > { %v1097_v7 = vpop.f32.mrf.mxu1 }
 0x143   : > { %v1098_v9 = vadd.f32 %v1097_v7, %v1054_v6  ;;  %v1056_v10 = vpop.f32.mrf.mxu0  ;;  %v1147_v16 = vmul.f32 %v1096_v8, %v1096_v8 }
 0x144   : > { %v1099_v11 = vpop.f32.mrf.mxu1 }
 0x145   : > { %v1505_v12 = vpack.c.bf16 %v1098_v9, %v1096_v8  ;;  %v1100_v13 = vadd.f32 %v1099_v11, %v1056_v10  ;;  %v1058_v14 = vpop.f32.mrf.mxu0  ;;  %v1148_v24 = vmul.f32 %v1098_v9, %v1098_v9 }
 0x146   : > { %v1101_v15 = vpop.f32.mrf.mxu1 }
 0x147   : > { %1131 = vst [vmem:[%s1981_s28] sm:$0xff] %v1505_v12  ;;  %v1133_v17 = vadd.f32 %v1100_v13, %v1096_v8  ;;  %v1149_v18 = vmul.f32 %v1100_v13, %v1100_v13  ;;  %v1102_v19 = vadd.f32 %v1101_v15, %v1058_v14 }
 0x149   : > { %v1134_v20 = vrot.slane %v1133_v17, 4  ;;  %v1151_v21 = vadd.f32 %v1149_v18, %v1147_v16  ;;  %v1506_v22 = vpack.c.bf16 %v1102_v19, %v1100_v13  ;;  %v1140_v23 = vadd.f32 %v1102_v19, %v1098_v9 }
 0x14a   : > { %v1150_v25 = vmul.f32 %v1102_v19, %v1102_v19 }
 0x14b   : > { %v1135_v26 = vadd.f32 %v1134_v20, %v1133_v17  ;;  %v1152_v27 = vrot.slane %v1151_v21, 4  ;;  %1132 = vst [vmem:[%s1981_s28 + $0x8] sm:$0xff] %v1506_v22  ;;  %v1141_v28 = vrot.slane %v1140_v23, 4 }
 0x14c   : > { %v1158_v29 = vadd.f32 %v1150_v25, %v1148_v24 }
 0x14d   : > { %v1136_v30 = vrot.slane %v1135_v26, 2  ;;  %v1153_v31 = vadd.f32 %v1152_v27, %v1151_v21  ;;  %v1142_v32 = vadd.f32 %v1141_v28, %v1140_v23 }
 0x14e   : > { %v1159_v33 = vrot.slane %v1158_v29, 4  ;;  %v1230_v50 = vld [vmem:[%s1981_s28] sm:$0xff] (%p1750_p6) }
 0x14f   : > { %v1137_v34 = vadd.f32 %v1136_v30, %v1135_v26  ;;  %v1154_v35 = vrot.slane %v1153_v31, 2  ;;  %v1143_v36 = vrot.slane %v1142_v32, 2  ;;  %1231 = vst [vmem:[%s1199_s12] sm:$0xff] (%p1750_p6), %v1230_v50 }
 0x150   : > { %v1160_v37 = vadd.f32 %v1159_v33, %v1158_v29 }
 0x151   : > { %v1138_v38 = vrot.slane %v1137_v34, 1  ;;  %v1155_v39 = vadd.f32 %v1154_v35, %v1153_v31  ;;  %v1144_v40 = vadd.f32 %v1143_v36, %v1142_v32 }
 0x152   : > { %v1161_v41 = vrot.slane %v1160_v37, 2  ;;  %v1232_v51 = vld [vmem:[%s1981_s28 + $0x8] sm:$0xff] (%p1750_p6) }
 0x153   : > { %v1139_v42 = vadd.f32 %v1138_v38, %v1137_v34  ;;  %v1156_v43 = vrot.slane %v1155_v39, 1  ;;  %v1145_v44 = vrot.slane %v1144_v40, 1  ;;  %1233 = vst [vmem:[%s1199_s12 + $0x10] sm:$0xff] (%p1750_p6), %v1232_v51 }
 0x154   : > { %v1162_v45 = vadd.f32 %v1161_v41, %v1160_v37 }
 0x155   : > { %v1157_v46 = vadd.f32 %v1156_v43, %v1155_v39  ;;  %1165 = vst [vmem:[%s586_s5] sm:$0xff] %v1139_v42  ;;  %v1146_v47 = vadd.f32 %v1145_v44, %v1144_v40 }
 0x156   : > { %v1163_v48 = vrot.slane %v1162_v45, 1  ;;  %1193 = sbr.rel (!%p1750_p6) target bundleno = 347 (0x15b), region = 78 }
 0x157   : > { %1167 = vst [vmem:[%s596_s8] sm:$0xff] %v1157_v46  ;;  %1166 = vst [vmem:[%s586_s5 + $0x8] sm:$0xff] %v1146_v47 }
 0x158   : > { %v1164_v49 = vadd.f32 %v1163_v48, %v1162_v45 }
 0x15a   : > { %1168 = vst [vmem:[%s596_s8 + $0x8] sm:$0xff] %v1164_v49 }
 0x15b PF: > { %s15_s19 = sadd.s32 1, %s1688_s19   ;;  %s2020_s15 = smov %s1676_s16 }
 0x15c   : > { %p12_p12 = scmp.ge.s32.totalorder %s15_s19, 4   ;;  %s2021_s16 = smov %s1755_s25 }
 0x15d   : > { %s2022_s17 = smov %s1684_s18  ;;  %s2023_s18 = smov %s2025_s20 }
 0x15e   :  { %14 = sbr.rel (!%p12_p12) target bundleno = 3 (0x3), region = 174 }

</bundles_post_ra>
